<compile_context>
chip_gen: v7x
topology: tpu7x:2x2x1
jax: 0.10.0
libtpu: 0.0.40
codegen_flags: <defaults>
</compile_context>

<pallas_src>
import functools

import jax
import jax.numpy as jnp
from jax import lax
from jax.experimental import pallas as pl
from jax.experimental.pallas import tpu as pltpu

LN_EPS = 1e-5  # torch.nn.LayerNorm default


# ----------------------------------------------------------------------------
# Fused interaction kernel (one grid step == one graph of the batch)
# ----------------------------------------------------------------------------

def _make_interaction_kernel(n_lin: int, matmul_dtype):
    """n_lin = number of Linear layers per MLP (= nmlp_layers + 1)."""
    m = 2 * n_lin + 3  # w0a, w0b, b0, (w, b) * (n_lin - 1), gamma, beta
    # Full-f32 MXU passes only when the caller asked for the exact path.
    prec = lax.Precision.HIGHEST if matmul_dtype == jnp.float32 else None

    def kernel(*refs):
        x_ref, e_ref, inc_ref = refs[:3]
        edge_refs = refs[3:3 + m]
        node_refs = refs[3 + m:3 + 2 * m]
        node_out_ref = refs[3 + 2 * m]
        edge_out_ref = refs[3 + 2 * m + 1]
        md = matmul_dtype

        def mlp_layernorm(a, b, p):
            # First Linear as a split-K matmul == cat([a, b], -1) @ W0.
            h = (jnp.dot(a.astype(md), p[0][...].astype(md),
                         preferred_element_type=jnp.float32, precision=prec)
                 + jnp.dot(b.astype(md), p[1][...].astype(md),
                           preferred_element_type=jnp.float32, precision=prec)
                 + p[2][...])
            if n_lin > 1:
                h = jnp.maximum(h, 0.0)               # ReLU (hidden activation)
            for i in range(1, n_lin):
                w = p[1 + 2 * i][...].astype(md)
                bias = p[2 + 2 * i][...]
                h = jnp.dot(h.astype(md), w,
                            preferred_element_type=jnp.float32,
                            precision=prec) + bias
                if i < n_lin - 1:                     # output activation = Identity
                    h = jnp.maximum(h, 0.0)
            gamma = p[2 * n_lin + 1][...]
            beta = p[2 * n_lin + 2][...]
            # LayerNorm over the (lane-dense) feature axis, all f32; rsqrt on EUP.
            d = h - jnp.mean(h, axis=-1, keepdims=True)
            var = jnp.mean(d * d, axis=-1, keepdims=True)
            return d * lax.rsqrt(var + LN_EPS) * gamma + beta

        x = x_ref[...].astype(jnp.float32)      # (N, F) f32: residual + LN input
        ef = e_ref[...].astype(jnp.float32)     # (E, F)
        inc = inc_ref[...].astype(md)           # (N, E) one-hot incidence H

        # hg.v2e(x, 'sum') == H^T @ x, contracting over the node axis of the
        # SINGLE resident incidence copy (no H^T operand shipped).
        agg_e = lax.dot_general(inc, x.astype(md),
                                dimension_numbers=(((0,), (0,)), ((), ())),
                                preferred_element_type=jnp.float32,
                                precision=prec)
        upd_e = mlp_layernorm(agg_e, ef, edge_refs)

        # hg.e2v(updated_edge_features, 'sum') == H @ updated_edge_features
        agg_n = jnp.dot(inc, upd_e.astype(md),
                        preferred_element_type=jnp.float32, precision=prec)
        upd_n = mlp_layernorm(agg_n, x, node_refs)

        # Residual adds fused into the (lane-dense, unmasked) stores.
        node_out_ref[...] = (upd_n + x).astype(node_out_ref.dtype)
        edge_out_ref[...] = (upd_e + ef).astype(edge_out_ref.dtype)

    return kernel


def _mlp_operands(p):
    ops = [p["w0a"], p["w0b"], p["b0"]]
    for w, b in zip(p["w"], p["b"]):
        ops += [w, b]
    ops += [p["gamma"], p["beta"]]
    return ops


def _mlp_sizes(p):
    sizes = [p["w0a"].shape[0] + p["w0b"].shape[0], p["w0a"].shape[1]]
    for w in p["w"]:
        sizes.append(w.shape[1])
    return sizes


def _nbytes(a):
    return int(a.size) * a.dtype.itemsize


def hypergraph_interaction(params, x, edge_features, incidence, *, use_bf16=True):
    """Fused forward of HyperGraphInteractionNetwork over a batch of graphs.

    x:             (B, N, nnode_in)
    edge_features: (B, E, nedge_in)
    incidence:     (B, N, E) one-hot H per graph, H[v, e] = multiplicity of v in e
                   (built ONCE with the hypergraph structure, not per call).
    """
    batch, n, nnode_in = x.shape
    b2, e, nedge_in = edge_features.shape
    b3, n2, e2 = incidence.shape
    assert batch == b2 == b3 and n == n2 and e == e2, "inconsistent batch/graph sizes"
    nnode_out = params["node_fn"]["gamma"].shape[-1]
    nedge_out = params["edge_fn"]["gamma"].shape[-1]
    # Residual adds in the module require matching widths; fail loudly otherwise.
    assert nnode_out == nnode_in, "residual add requires nnode_out == nnode_in"
    assert nedge_out == nedge_in, "residual add requires nedge_out == nedge_in"
    n_lin = 1 + len(params["edge_fn"]["w"])

    matmul_dtype = jnp.bfloat16 if use_bf16 else jnp.float32
    # 0/1/2 incidence values are exactly representable in bf16; halves its DMA/VMEM.
    inc = incidence.astype(jnp.bfloat16) if use_bf16 else incidence

    edge_ops = _mlp_operands(params["edge_fn"])
    node_ops = _mlp_operands(params["node_fn"])
    operands = [x, edge_features, inc] + edge_ops + node_ops

    # Per-graph blocks (batch dim squeezed) iterate with the grid; MLP weights
    # use a constant index_map so they stay VMEM-resident across all steps.
    per_graph_specs = [
        pl.BlockSpec((None, n, nnode_in), lambda i: (i, 0, 0)),
        pl.BlockSpec((None, e, nedge_in), lambda i: (i, 0, 0)),
        pl.BlockSpec((None, n, e), lambda i: (i, 0, 0)),
    ]
    weight_specs = [pl.BlockSpec(op.shape, lambda i, _nd=op.ndim: (0,) * _nd)
                    for op in edge_ops + node_ops]
    in_specs = per_graph_specs + weight_specs

    out_shape = (jax.ShapeDtypeStruct((batch, n, nnode_out), x.dtype),
                 jax.ShapeDtypeStruct((batch, e, nedge_out), edge_features.dtype))
    out_specs = (pl.BlockSpec((None, n, nnode_out), lambda i: (i, 0, 0)),
                 pl.BlockSpec((None, e, nedge_out), lambda i: (i, 0, 0)))

    # Advisory cost estimate for XLA's scheduler around the custom call.
    def mlp_flops(rows, sizes):
        return 2 * rows * sum(si * so for si, so in zip(sizes[:-1], sizes[1:]))

    flops = batch * (2 * e * n * nnode_in
                     + mlp_flops(e, _mlp_sizes(params["edge_fn"]))
                     + 2 * n * e * nedge_out
                     + mlp_flops(n, _mlp_sizes(params["node_fn"])))
    out_bytes = batch * (n * nnode_out * x.dtype.itemsize
                         + e * nedge_out * edge_features.dtype.itemsize)
    bytes_accessed = sum(_nbytes(op) for op in operands) + out_bytes
    cost = pl.CostEstimate(flops=int(flops),
                           transcendentals=int(batch * (n + e)),  # rsqrt per LN row
                           bytes_accessed=int(bytes_accessed))

    # Explicit VMEM budget: double-buffered per-step blocks + resident weights
    # + headroom for f32 intermediates, clamped to v7x's 64 MiB physical VMEM.
    weight_bytes = sum(_nbytes(op) for op in edge_ops + node_ops)
    per_step_bytes = (_nbytes(x) // batch + _nbytes(edge_features) // batch
                      + _nbytes(inc) // batch + out_bytes // batch + weight_bytes)
    vmem_limit = int(min(max(2 * per_step_bytes + (8 << 20), 16 << 20), 64 << 20))

    return pl.pallas_call(
        _make_interaction_kernel(n_lin, matmul_dtype),
        out_shape=out_shape,
        grid=(batch,),
        in_specs=in_specs,
        out_specs=out_specs,
        compiler_params=pltpu.CompilerParams(
            dimension_semantics=("parallel",),   # shards graphs across v7x's 2 TCs
            vmem_limit_bytes=vmem_limit),
        cost_estimate=cost,
    )(*operands)


# ----------------------------------------------------------------------------
# Parameter construction (deterministic, synthetic, matches torch defaults)
# ----------------------------------------------------------------------------

def init_mlp_ln_params(key, d_split, d_rest, hidden, dout, nmlp_layers):
    """build_mlp(d_split + d_rest, [hidden]*nmlp_layers, dout) + LayerNorm(dout).

    The first Linear weight is stored pre-split at row d_split so the kernel
    can avoid materializing the feature concatenation (split-K matmul).
    """
    sizes = [d_split + d_rest] + [hidden] * nmlp_layers + [dout]
    ws, bs = [], []
    for i in range(len(sizes) - 1):
        key, kw, kb = jax.random.split(key, 3)
        bound = float(sizes[i]) ** -0.5          # torch.nn.Linear default init
        ws.append(jax.random.uniform(kw, (sizes[i], sizes[i + 1]),
                                     jnp.float32, -bound, bound))
        bs.append(jax.random.uniform(kb, (1, sizes[i + 1]),
                                     jnp.float32, -bound, bound))
    return {
        "w0a": ws[0][:d_split],
        "w0b": ws[0][d_split:],
        "b0": bs[0],
        "w": ws[1:],
        "b": bs[1:],
        "gamma": jnp.ones((1, dout), jnp.float32),
        "beta": jnp.zeros((1, dout), jnp.float32),
    }


def init_interaction_params(key, nnode_in, nnode_out, nedge_in, nedge_out,
                            nmlp_layers, hidden):
    k_edge, k_node = jax.random.split(key)
    return {
        # edge_fn input = cat([v2e(x) (nnode_in), edge_features (nedge_in)])
        "edge_fn": init_mlp_ln_params(k_edge, nnode_in, nedge_in, hidden,
                                      nedge_out, nmlp_layers),
        # node_fn input = cat([e2v(updated_edges) (nedge_out), x (nnode_in)])
        "node_fn": init_mlp_ln_params(k_node, nedge_out, nnode_in, hidden,
                                      nnode_out, nmlp_layers),
    }


# ----------------------------------------------------------------------------
# Pure-JAX reference (gather + segment_sum + concat), mirrors the PyTorch module
# ----------------------------------------------------------------------------

def reference_forward(params, x, edge_features, vertices, hyperedges, num_edges):
    def mlp_ln_ref(inp, p):
        ws = [jnp.concatenate([p["w0a"], p["w0b"]], axis=0)] + list(p["w"])
        bs = [p["b0"]] + list(p["b"])
        h = inp
        for i, (w, b) in enumerate(zip(ws, bs)):
            h = jnp.dot(h, w, precision=lax.Precision.HIGHEST) + b
            if i < len(ws) - 1:
                h = jnp.maximum(h, 0.0)
        mean = jnp.mean(h, axis=-1, keepdims=True)
        var = jnp.mean(jnp.square(h - mean), axis=-1, keepdims=True)
        return (h - mean) * lax.rsqrt(var + LN_EPS) * p["gamma"] + p["beta"]

    def one_graph(xg, eg, vg):
        agg_e = jax.ops.segment_sum(xg[vg], hyperedges, num_segments=num_edges)
        upd_e = mlp_ln_ref(jnp.concatenate([agg_e, eg], axis=-1), params["edge_fn"])
        agg_n = jax.ops.segment_sum(upd_e[hyperedges], vg, num_segments=xg.shape[0])
        upd_n = mlp_ln_ref(jnp.concatenate([agg_n, xg], axis=-1), params["node_fn"])
        return upd_n + xg, upd_e + eg

    return jax.vmap(one_graph)(x, edge_features, vertices)


# ----------------------------------------------------------------------------
# Example
# ----------------------------------------------------------------------------

if __name__ == "__main__":
    F = 128       # nnode_in = nnode_out = nedge_in = nedge_out (lane-dense last dim)
    HIDDEN = 128  # mlp_hidden_dim (multiple of 128 -> dense vregs / MXU columns)
    NMLP = 2      # nmlp_layers -> 3 Linear layers per MLP
    B = 4         # batch of graphs = real ("parallel") grid axis
    N = 128       # nodes per graph
    E = 64        # hyperedges per graph
    CARD = 3      # vertices per hyperedge

    key = jax.random.PRNGKey(0)
    key, kp, kx, ke = jax.random.split(key, 4)
    params = init_interaction_params(kp, F, F, F, F, NMLP, HIDDEN)

    # Hypergraph structure per graph (built ONCE, analogous to dhg.Hypergraph).
    j = jnp.arange(E, dtype=jnp.int32)
    hyperedges = jnp.repeat(j, CARD)
    verts, incs = [], []
    for g in range(B):
        vg = jnp.stack([(3 * j + g) % N,
                        (3 * j + 7 + 2 * g) % N,
                        (3 * j + 19 + 5 * g) % N], axis=1).reshape(-1)
        verts.append(vg)
        incs.append(jnp.zeros((N, E), jnp.float32).at[vg, hyperedges].add(1.0))
    vertices = jnp.stack(verts)      # (B, E*CARD)
    incidence = jnp.stack(incs)      # (B, N, E) dense one-hot H per graph

    x = jax.random.normal(kx, (B, N, F), jnp.float32)
    edge_features = jax.random.normal(ke, (B, E, F), jnp.float32)

    node_ref, edge_ref = reference_forward(params, x, edge_features,
                                           vertices, hyperedges, E)

    def rel_err(a, b):
        a = a.astype(jnp.float32)
        b = b.astype(jnp.float32)
        return float(jnp.linalg.norm(a - b) / (jnp.linalg.norm(b) + 1e-12))

    # Exact path (f32 MXU inputs): tight tolerance.
    fwd_f32 = jax.jit(functools.partial(hypergraph_interaction, params,
                                        use_bf16=False))
    node_f32, edge_f32 = fwd_f32(x, edge_features, incidence)
    jax.block_until_ready((node_f32, edge_f32))
    assert node_f32.shape == (B, N, F) and edge_f32.shape == (B, E, F)
    assert bool(jnp.all(jnp.isfinite(node_f32)))
    assert bool(jnp.all(jnp.isfinite(edge_f32)))
    assert rel_err(node_f32, node_ref) < 1e-4, rel_err(node_f32, node_ref)
    assert rel_err(edge_f32, edge_ref) < 1e-4, rel_err(edge_f32, edge_ref)

    # Fast path (bf16 MXU inputs, f32 accumulation & elementwise): looser tol.
    fwd_bf16 = jax.jit(functools.partial(hypergraph_interaction, params,
                                         use_bf16=True))
    node_bf, edge_bf = fwd_bf16(x, edge_features, incidence)
    jax.block_until_ready((node_bf, edge_bf))
    assert node_bf.shape == (B, N, F) and edge_bf.shape == (B, E, F)
    assert bool(jnp.all(jnp.isfinite(node_bf)))
    assert bool(jnp.all(jnp.isfinite(edge_bf)))
    assert rel_err(node_bf, node_ref) < 3e-2, rel_err(node_bf, node_ref)
    assert rel_err(edge_bf, edge_ref) < 3e-2, rel_err(edge_bf, edge_ref)

    print("KERNEL_OK")
</pallas_src>

<mosaic_0001>
module attributes {stable_mosaic.version = 11 : i64} {
  func.func @kernel(%arg0: i32, %arg1: memref<1x128x128xf32, #tpu.memory_space<vmem>>, %arg2: memref<1x64x128xf32, #tpu.memory_space<vmem>>, %arg3: memref<1x128x64xf32, #tpu.memory_space<vmem>>, %arg4: memref<128x128xf32, #tpu.memory_space<vmem>>, %arg5: memref<128x128xf32, #tpu.memory_space<vmem>>, %arg6: memref<1x128xf32, #tpu.memory_space<vmem>>, %arg7: memref<128x128xf32, #tpu.memory_space<vmem>>, %arg8: memref<1x128xf32, #tpu.memory_space<vmem>>, %arg9: memref<128x128xf32, #tpu.memory_space<vmem>>, %arg10: memref<1x128xf32, #tpu.memory_space<vmem>>, %arg11: memref<1x128xf32, #tpu.memory_space<vmem>>, %arg12: memref<1x128xf32, #tpu.memory_space<vmem>>, %arg13: memref<128x128xf32, #tpu.memory_space<vmem>>, %arg14: memref<128x128xf32, #tpu.memory_space<vmem>>, %arg15: memref<1x128xf32, #tpu.memory_space<vmem>>, %arg16: memref<128x128xf32, #tpu.memory_space<vmem>>, %arg17: memref<1x128xf32, #tpu.memory_space<vmem>>, %arg18: memref<128x128xf32, #tpu.memory_space<vmem>>, %arg19: memref<1x128xf32, #tpu.memory_space<vmem>>, %arg20: memref<1x128xf32, #tpu.memory_space<vmem>>, %arg21: memref<1x128xf32, #tpu.memory_space<vmem>>, %arg22: memref<1x128x128xf32, #tpu.memory_space<vmem>>, %arg23: memref<1x64x128xf32, #tpu.memory_space<vmem>>) attributes {dimension_semantics = [#tpu.dimension_semantics<parallel>], iteration_bounds = array<i64: 4>, scalar_prefetch = 0 : i64, scratch_operands = 0 : i64, tpu.core_type = #tpu.core_type<tc>, window_params = [{transform_indices = @transform_0, window_bounds = array<i64: 1, 128, 128>}, {transform_indices = @transform_1, window_bounds = array<i64: 1, 64, 128>}, {transform_indices = @transform_2, window_bounds = array<i64: 1, 128, 64>}, {pipeline_mode = #tpu.pipeline_mode<synchronous>, transform_indices = @transform_3, window_bounds = array<i64: 128, 128>}, {pipeline_mode = #tpu.pipeline_mode<synchronous>, transform_indices = @transform_4, window_bounds = array<i64: 128, 128>}, {pipeline_mode = #tpu.pipeline_mode<synchronous>, transform_indices = @transform_5, window_bounds = array<i64: 1, 128>}, {pipeline_mode = #tpu.pipeline_mode<synchronous>, transform_indices = @transform_6, window_bounds = array<i64: 128, 128>}, {pipeline_mode = #tpu.pipeline_mode<synchronous>, transform_indices = @transform_7, window_bounds = array<i64: 1, 128>}, {pipeline_mode = #tpu.pipeline_mode<synchronous>, transform_indices = @transform_8, window_bounds = array<i64: 128, 128>}, {pipeline_mode = #tpu.pipeline_mode<synchronous>, transform_indices = @transform_9, window_bounds = array<i64: 1, 128>}, {pipeline_mode = #tpu.pipeline_mode<synchronous>, transform_indices = @transform_10, window_bounds = array<i64: 1, 128>}, {pipeline_mode = #tpu.pipeline_mode<synchronous>, transform_indices = @transform_11, window_bounds = array<i64: 1, 128>}, {pipeline_mode = #tpu.pipeline_mode<synchronous>, transform_indices = @transform_12, window_bounds = array<i64: 128, 128>}, {pipeline_mode = #tpu.pipeline_mode<synchronous>, transform_indices = @transform_13, window_bounds = array<i64: 128, 128>}, {pipeline_mode = #tpu.pipeline_mode<synchronous>, transform_indices = @transform_14, window_bounds = array<i64: 1, 128>}, {pipeline_mode = #tpu.pipeline_mode<synchronous>, transform_indices = @transform_15, window_bounds = array<i64: 128, 128>}, {pipeline_mode = #tpu.pipeline_mode<synchronous>, transform_indices = @transform_16, window_bounds = array<i64: 1, 128>}, {pipeline_mode = #tpu.pipeline_mode<synchronous>, transform_indices = @transform_17, window_bounds = array<i64: 128, 128>}, {pipeline_mode = #tpu.pipeline_mode<synchronous>, transform_indices = @transform_18, window_bounds = array<i64: 1, 128>}, {pipeline_mode = #tpu.pipeline_mode<synchronous>, transform_indices = @transform_19, window_bounds = array<i64: 1, 128>}, {pipeline_mode = #tpu.pipeline_mode<synchronous>, transform_indices = @transform_20, window_bounds = array<i64: 1, 128>}, {transform_indices = @transform_21, window_bounds = array<i64: 1, 128, 128>}, {transform_indices = @transform_22, window_bounds = array<i64: 1, 64, 128>}]} {
    %c0 = arith.constant 0 : index
    %c0_0 = arith.constant 0 : index
    %c0_1 = arith.constant 0 : index
    %0 = vector.load %arg1[%c0, %c0_0, %c0_1] : memref<1x128x128xf32, #tpu.memory_space<vmem>>, vector<1x128x128xf32>
    %1 = vector.shape_cast %0 : vector<1x128x128xf32> to vector<128x128xf32>
    %c0_2 = arith.constant 0 : index
    %c0_3 = arith.constant 0 : index
    %c0_4 = arith.constant 0 : index
    %2 = vector.load %arg2[%c0_2, %c0_3, %c0_4] : memref<1x64x128xf32, #tpu.memory_space<vmem>>, vector<1x64x128xf32>
    %3 = vector.shape_cast %2 : vector<1x64x128xf32> to vector<64x128xf32>
    %c0_5 = arith.constant 0 : index
    %c0_6 = arith.constant 0 : index
    %c0_7 = arith.constant 0 : index
    %4 = vector.load %arg3[%c0_5, %c0_6, %c0_7] : memref<1x128x64xf32, #tpu.memory_space<vmem>>, vector<1x128x64xf32>
    %5 = vector.shape_cast %4 : vector<1x128x64xf32> to vector<128x64xf32>
    %cst = arith.constant dense<0.000000e+00> : vector<64x128xf32>
    %6 = tpu.matmul %5, %1, %cst {dimension_numbers = #tpu.dot_dimension_numbers<[0], [0], [1], [1], [0, 1, 1, 1], [], []>, precision = #tpu.contract_precision<fp32>} : vector<128x64xf32>, vector<128x128xf32>, vector<64x128xf32> -> vector<64x128xf32>
    %c0_8 = arith.constant 0 : index
    %c0_9 = arith.constant 0 : index
    %7 = vector.load %arg4[%c0_8, %c0_9] : memref<128x128xf32, #tpu.memory_space<vmem>>, vector<128x128xf32>
    %cst_10 = arith.constant dense<0.000000e+00> : vector<64x128xf32>
    %8 = tpu.matmul %6, %7, %cst_10 {dimension_numbers = #tpu.dot_dimension_numbers<[1], [0], [0], [1], [0, 0, 1, 1], [], []>, precision = #tpu.contract_precision<fp32>} : vector<64x128xf32>, vector<128x128xf32>, vector<64x128xf32> -> vector<64x128xf32>
    %c0_11 = arith.constant 0 : index
    %c0_12 = arith.constant 0 : index
    %9 = vector.load %arg5[%c0_11, %c0_12] : memref<128x128xf32, #tpu.memory_space<vmem>>, vector<128x128xf32>
    %cst_13 = arith.constant dense<0.000000e+00> : vector<64x128xf32>
    %10 = tpu.matmul %3, %9, %cst_13 {dimension_numbers = #tpu.dot_dimension_numbers<[1], [0], [0], [1], [0, 0, 1, 1], [], []>, precision = #tpu.contract_precision<fp32>} : vector<64x128xf32>, vector<128x128xf32>, vector<64x128xf32> -> vector<64x128xf32>
    %11 = arith.addf %8, %10 : vector<64x128xf32>
    %c0_14 = arith.constant 0 : index
    %c0_15 = arith.constant 0 : index
    %12 = vector.load %arg6[%c0_14, %c0_15] : memref<1x128xf32, #tpu.memory_space<vmem>>, vector<1x128xf32>
    %13 = vector.broadcast %12 : vector<1x128xf32> to vector<64x128xf32>
    %14 = arith.addf %11, %13 : vector<64x128xf32>
    %cst_16 = arith.constant 0.000000e+00 : f32
    %15 = vector.broadcast %cst_16 : f32 to vector<64x128xf32>
    %16 = arith.maximumf %14, %15 : vector<64x128xf32>
    %c0_17 = arith.constant 0 : index
    %c0_18 = arith.constant 0 : index
    %17 = vector.load %arg7[%c0_17, %c0_18] : memref<128x128xf32, #tpu.memory_space<vmem>>, vector<128x128xf32>
    %c0_19 = arith.constant 0 : index
    %c0_20 = arith.constant 0 : index
    %18 = vector.load %arg8[%c0_19, %c0_20] : memref<1x128xf32, #tpu.memory_space<vmem>>, vector<1x128xf32>
    %cst_21 = arith.constant dense<0.000000e+00> : vector<64x128xf32>
    %19 = tpu.matmul %16, %17, %cst_21 {dimension_numbers = #tpu.dot_dimension_numbers<[1], [0], [0], [1], [0, 0, 1, 1], [], []>, precision = #tpu.contract_precision<fp32>} : vector<64x128xf32>, vector<128x128xf32>, vector<64x128xf32> -> vector<64x128xf32>
    %20 = vector.broadcast %18 : vector<1x128xf32> to vector<64x128xf32>
    %21 = arith.addf %19, %20 : vector<64x128xf32>
    %cst_22 = arith.constant 0.000000e+00 : f32
    %22 = vector.broadcast %cst_22 : f32 to vector<64x128xf32>
    %23 = arith.maximumf %21, %22 : vector<64x128xf32>
    %c0_23 = arith.constant 0 : index
    %c0_24 = arith.constant 0 : index
    %24 = vector.load %arg9[%c0_23, %c0_24] : memref<128x128xf32, #tpu.memory_space<vmem>>, vector<128x128xf32>
    %c0_25 = arith.constant 0 : index
    %c0_26 = arith.constant 0 : index
    %25 = vector.load %arg10[%c0_25, %c0_26] : memref<1x128xf32, #tpu.memory_space<vmem>>, vector<1x128xf32>
    %cst_27 = arith.constant dense<0.000000e+00> : vector<64x128xf32>
    %26 = tpu.matmul %23, %24, %cst_27 {dimension_numbers = #tpu.dot_dimension_numbers<[1], [0], [0], [1], [0, 0, 1, 1], [], []>, precision = #tpu.contract_precision<fp32>} : vector<64x128xf32>, vector<128x128xf32>, vector<64x128xf32> -> vector<64x128xf32>
    %27 = vector.broadcast %25 : vector<1x128xf32> to vector<64x128xf32>
    %28 = arith.addf %26, %27 : vector<64x128xf32>
    %c0_28 = arith.constant 0 : index
    %c0_29 = arith.constant 0 : index
    %29 = vector.load %arg11[%c0_28, %c0_29] : memref<1x128xf32, #tpu.memory_space<vmem>>, vector<1x128xf32>
    %c0_30 = arith.constant 0 : index
    %c0_31 = arith.constant 0 : index
    %30 = vector.load %arg12[%c0_30, %c0_31] : memref<1x128xf32, #tpu.memory_space<vmem>>, vector<1x128xf32>
    %cst_32 = arith.constant dense<0.000000e+00> : vector<64xf32>
    %31 = vector.multi_reduction <add>, %28, %cst_32 [1] : vector<64x128xf32> to vector<64xf32>
    %32 = vector.shape_cast %31 : vector<64xf32> to vector<64x1xf32>
    %cst_33 = arith.constant 1.280000e+02 : f32
    %33 = vector.broadcast %cst_33 : f32 to vector<64x1xf32>
    %34 = arith.divf %32, %33 : vector<64x1xf32>
    %35 = vector.broadcast %34 : vector<64x1xf32> to vector<64x128xf32>
    %36 = arith.subf %28, %35 : vector<64x128xf32>
    %37 = arith.mulf %36, %36 : vector<64x128xf32>
    %cst_34 = arith.constant dense<0.000000e+00> : vector<64xf32>
    %38 = vector.multi_reduction <add>, %37, %cst_34 [1] : vector<64x128xf32> to vector<64xf32>
    %39 = vector.shape_cast %38 : vector<64xf32> to vector<64x1xf32>
    %cst_35 = arith.constant 1.280000e+02 : f32
    %40 = vector.broadcast %cst_35 : f32 to vector<64x1xf32>
    %41 = arith.divf %39, %40 : vector<64x1xf32>
    %cst_36 = arith.constant 9.99999974E-6 : f32
    %42 = vector.broadcast %cst_36 : f32 to vector<64x1xf32>
    %43 = arith.addf %41, %42 : vector<64x1xf32>
    %44 = math.rsqrt %43 : vector<64x1xf32>
    %45 = vector.broadcast %44 : vector<64x1xf32> to vector<64x128xf32>
    %46 = arith.mulf %36, %45 : vector<64x128xf32>
    %47 = vector.broadcast %29 : vector<1x128xf32> to vector<64x128xf32>
    %48 = arith.mulf %46, %47 : vector<64x128xf32>
    %49 = vector.broadcast %30 : vector<1x128xf32> to vector<64x128xf32>
    %50 = arith.addf %48, %49 : vector<64x128xf32>
    %cst_37 = arith.constant dense<0.000000e+00> : vector<128x128xf32>
    %51 = tpu.matmul %5, %50, %cst_37 {dimension_numbers = #tpu.dot_dimension_numbers<[1], [0], [0], [1], [0, 0, 1, 1], [], []>, precision = #tpu.contract_precision<fp32>} : vector<128x64xf32>, vector<64x128xf32>, vector<128x128xf32> -> vector<128x128xf32>
    %c0_38 = arith.constant 0 : index
    %c0_39 = arith.constant 0 : index
    %52 = vector.load %arg13[%c0_38, %c0_39] : memref<128x128xf32, #tpu.memory_space<vmem>>, vector<128x128xf32>
    %cst_40 = arith.constant dense<0.000000e+00> : vector<128x128xf32>
    %53 = tpu.matmul %51, %52, %cst_40 {dimension_numbers = #tpu.dot_dimension_numbers<[1], [0], [0], [1], [0, 0, 1, 1], [], []>, precision = #tpu.contract_precision<fp32>} : vector<128x128xf32>, vector<128x128xf32>, vector<128x128xf32> -> vector<128x128xf32>
    %c0_41 = arith.constant 0 : index
    %c0_42 = arith.constant 0 : index
    %54 = vector.load %arg14[%c0_41, %c0_42] : memref<128x128xf32, #tpu.memory_space<vmem>>, vector<128x128xf32>
    %cst_43 = arith.constant dense<0.000000e+00> : vector<128x128xf32>
    %55 = tpu.matmul %1, %54, %cst_43 {dimension_numbers = #tpu.dot_dimension_numbers<[1], [0], [0], [1], [0, 0, 1, 1], [], []>, precision = #tpu.contract_precision<fp32>} : vector<128x128xf32>, vector<128x128xf32>, vector<128x128xf32> -> vector<128x128xf32>
    %56 = arith.addf %53, %55 : vector<128x128xf32>
    %c0_44 = arith.constant 0 : index
    %c0_45 = arith.constant 0 : index
    %57 = vector.load %arg15[%c0_44, %c0_45] : memref<1x128xf32, #tpu.memory_space<vmem>>, vector<1x128xf32>
    %58 = vector.broadcast %57 : vector<1x128xf32> to vector<128x128xf32>
    %59 = arith.addf %56, %58 : vector<128x128xf32>
    %cst_46 = arith.constant 0.000000e+00 : f32
    %60 = vector.broadcast %cst_46 : f32 to vector<128x128xf32>
    %61 = arith.maximumf %59, %60 : vector<128x128xf32>
    %c0_47 = arith.constant 0 : index
    %c0_48 = arith.constant 0 : index
    %62 = vector.load %arg16[%c0_47, %c0_48] : memref<128x128xf32, #tpu.memory_space<vmem>>, vector<128x128xf32>
    %c0_49 = arith.constant 0 : index
    %c0_50 = arith.constant 0 : index
    %63 = vector.load %arg17[%c0_49, %c0_50] : memref<1x128xf32, #tpu.memory_space<vmem>>, vector<1x128xf32>
    %cst_51 = arith.constant dense<0.000000e+00> : vector<128x128xf32>
    %64 = tpu.matmul %61, %62, %cst_51 {dimension_numbers = #tpu.dot_dimension_numbers<[1], [0], [0], [1], [0, 0, 1, 1], [], []>, precision = #tpu.contract_precision<fp32>} : vector<128x128xf32>, vector<128x128xf32>, vector<128x128xf32> -> vector<128x128xf32>
    %65 = vector.broadcast %63 : vector<1x128xf32> to vector<128x128xf32>
    %66 = arith.addf %64, %65 : vector<128x128xf32>
    %cst_52 = arith.constant 0.000000e+00 : f32
    %67 = vector.broadcast %cst_52 : f32 to vector<128x128xf32>
    %68 = arith.maximumf %66, %67 : vector<128x128xf32>
    %c0_53 = arith.constant 0 : index
    %c0_54 = arith.constant 0 : index
    %69 = vector.load %arg18[%c0_53, %c0_54] : memref<128x128xf32, #tpu.memory_space<vmem>>, vector<128x128xf32>
    %c0_55 = arith.constant 0 : index
    %c0_56 = arith.constant 0 : index
    %70 = vector.load %arg19[%c0_55, %c0_56] : memref<1x128xf32, #tpu.memory_space<vmem>>, vector<1x128xf32>
    %cst_57 = arith.constant dense<0.000000e+00> : vector<128x128xf32>
    %71 = tpu.matmul %68, %69, %cst_57 {dimension_numbers = #tpu.dot_dimension_numbers<[1], [0], [0], [1], [0, 0, 1, 1], [], []>, precision = #tpu.contract_precision<fp32>} : vector<128x128xf32>, vector<128x128xf32>, vector<128x128xf32> -> vector<128x128xf32>
    %72 = vector.broadcast %70 : vector<1x128xf32> to vector<128x128xf32>
    %73 = arith.addf %71, %72 : vector<128x128xf32>
    %c0_58 = arith.constant 0 : index
    %c0_59 = arith.constant 0 : index
    %74 = vector.load %arg20[%c0_58, %c0_59] : memref<1x128xf32, #tpu.memory_space<vmem>>, vector<1x128xf32>
    %c0_60 = arith.constant 0 : index
    %c0_61 = arith.constant 0 : index
    %75 = vector.load %arg21[%c0_60, %c0_61] : memref<1x128xf32, #tpu.memory_space<vmem>>, vector<1x128xf32>
    %cst_62 = arith.constant dense<0.000000e+00> : vector<128xf32>
    %76 = vector.multi_reduction <add>, %73, %cst_62 [1] : vector<128x128xf32> to vector<128xf32>
    %77 = vector.shape_cast %76 : vector<128xf32> to vector<128x1xf32>
    %cst_63 = arith.constant 1.280000e+02 : f32
    %78 = vector.broadcast %cst_63 : f32 to vector<128x1xf32>
    %79 = arith.divf %77, %78 : vector<128x1xf32>
    %80 = vector.broadcast %79 : vector<128x1xf32> to vector<128x128xf32>
    %81 = arith.subf %73, %80 : vector<128x128xf32>
    %82 = arith.mulf %81, %81 : vector<128x128xf32>
    %cst_64 = arith.constant dense<0.000000e+00> : vector<128xf32>
    %83 = vector.multi_reduction <add>, %82, %cst_64 [1] : vector<128x128xf32> to vector<128xf32>
    %84 = vector.shape_cast %83 : vector<128xf32> to vector<128x1xf32>
    %cst_65 = arith.constant 1.280000e+02 : f32
    %85 = vector.broadcast %cst_65 : f32 to vector<128x1xf32>
    %86 = arith.divf %84, %85 : vector<128x1xf32>
    %cst_66 = arith.constant 9.99999974E-6 : f32
    %87 = vector.broadcast %cst_66 : f32 to vector<128x1xf32>
    %88 = arith.addf %86, %87 : vector<128x1xf32>
    %89 = math.rsqrt %88 : vector<128x1xf32>
    %90 = vector.broadcast %89 : vector<128x1xf32> to vector<128x128xf32>
    %91 = arith.mulf %81, %90 : vector<128x128xf32>
    %92 = vector.broadcast %74 : vector<1x128xf32> to vector<128x128xf32>
    %93 = arith.mulf %91, %92 : vector<128x128xf32>
    %94 = vector.broadcast %75 : vector<1x128xf32> to vector<128x128xf32>
    %95 = arith.addf %93, %94 : vector<128x128xf32>
    %96 = arith.addf %95, %1 : vector<128x128xf32>
    %c0_67 = arith.constant 0 : index
    %c0_68 = arith.constant 0 : index
    %c0_69 = arith.constant 0 : index
    %97 = vector.load %arg22[%c0_67, %c0_68, %c0_69] : memref<1x128x128xf32, #tpu.memory_space<vmem>>, vector<1x128x128xf32>
    %98 = vector.shape_cast %97 : vector<1x128x128xf32> to vector<128x128xf32>
    %99 = vector.shape_cast %96 : vector<128x128xf32> to vector<1x128x128xf32>
    tpu.vector_store %arg22[%c0_67, %c0_68, %c0_69], %99 {strides = array<i32>} : memref<1x128x128xf32, #tpu.memory_space<vmem>>, vector<1x128x128xf32>,
    %100 = arith.addf %50, %3 : vector<64x128xf32>
    %c0_70 = arith.constant 0 : index
    %c0_71 = arith.constant 0 : index
    %c0_72 = arith.constant 0 : index
    %101 = vector.load %arg23[%c0_70, %c0_71, %c0_72] : memref<1x64x128xf32, #tpu.memory_space<vmem>>, vector<1x64x128xf32>
    %102 = vector.shape_cast %101 : vector<1x64x128xf32> to vector<64x128xf32>
    %103 = vector.shape_cast %100 : vector<64x128xf32> to vector<1x64x128xf32>
    tpu.vector_store %arg23[%c0_70, %c0_71, %c0_72], %103 {strides = array<i32>} : memref<1x64x128xf32, #tpu.memory_space<vmem>>, vector<1x64x128xf32>,
    return
  }
  func.func @transform_0(%arg0: i32) -> (i32, i32, i32) {
    %c0_i32 = arith.constant 0 : i32
    %c0_i32_0 = arith.constant 0 : i32
    %c0_i32_1 = arith.constant 0 : i32
    return %arg0, %c0_i32, %c0_i32_0 : i32, i32, i32
  }
  func.func @transform_1(%arg0: i32) -> (i32, i32, i32) {
    %c0_i32 = arith.constant 0 : i32
    %c0_i32_0 = arith.constant 0 : i32
    %c0_i32_1 = arith.constant 0 : i32
    return %arg0, %c0_i32, %c0_i32_0 : i32, i32, i32
  }
  func.func @transform_2(%arg0: i32) -> (i32, i32, i32) {
    %c0_i32 = arith.constant 0 : i32
    %c0_i32_0 = arith.constant 0 : i32
    %c0_i32_1 = arith.constant 0 : i32
    return %arg0, %c0_i32, %c0_i32_0 : i32, i32, i32
  }
  func.func @transform_3(%arg0: i32) -> (i32, i32) {
    %c0_i32 = arith.constant 0 : i32
    %c0_i32_0 = arith.constant 0 : i32
    %c0_i32_1 = arith.constant 0 : i32
    return %c0_i32, %c0_i32_0 : i32, i32
  }
  func.func @transform_4(%arg0: i32) -> (i32, i32) {
    %c0_i32 = arith.constant 0 : i32
    %c0_i32_0 = arith.constant 0 : i32
    %c0_i32_1 = arith.constant 0 : i32
    return %c0_i32, %c0_i32_0 : i32, i32
  }
  func.func @transform_5(%arg0: i32) -> (i32, i32) {
    %c0_i32 = arith.constant 0 : i32
    %c0_i32_0 = arith.constant 0 : i32
    %c0_i32_1 = arith.constant 0 : i32
    return %c0_i32, %c0_i32_0 : i32, i32
  }
  func.func @transform_6(%arg0: i32) -> (i32, i32) {
    %c0_i32 = arith.constant 0 : i32
    %c0_i32_0 = arith.constant 0 : i32
    %c0_i32_1 = arith.constant 0 : i32
    return %c0_i32, %c0_i32_0 : i32, i32
  }
  func.func @transform_7(%arg0: i32) -> (i32, i32) {
    %c0_i32 = arith.constant 0 : i32
    %c0_i32_0 = arith.constant 0 : i32
    %c0_i32_1 = arith.constant 0 : i32
    return %c0_i32, %c0_i32_0 : i32, i32
  }
  func.func @transform_8(%arg0: i32) -> (i32, i32) {
    %c0_i32 = arith.constant 0 : i32
    %c0_i32_0 = arith.constant 0 : i32
    %c0_i32_1 = arith.constant 0 : i32
    return %c0_i32, %c0_i32_0 : i32, i32
  }
  func.func @transform_9(%arg0: i32) -> (i32, i32) {
    %c0_i32 = arith.constant 0 : i32
    %c0_i32_0 = arith.constant 0 : i32
    %c0_i32_1 = arith.constant 0 : i32
    return %c0_i32, %c0_i32_0 : i32, i32
  }
  func.func @transform_10(%arg0: i32) -> (i32, i32) {
    %c0_i32 = arith.constant 0 : i32
    %c0_i32_0 = arith.constant 0 : i32
    %c0_i32_1 = arith.constant 0 : i32
    return %c0_i32, %c0_i32_0 : i32, i32
  }
  func.func @transform_11(%arg0: i32) -> (i32, i32) {
    %c0_i32 = arith.constant 0 : i32
    %c0_i32_0 = arith.constant 0 : i32
    %c0_i32_1 = arith.constant 0 : i32
    return %c0_i32, %c0_i32_0 : i32, i32
  }
  func.func @transform_12(%arg0: i32) -> (i32, i32) {
    %c0_i32 = arith.constant 0 : i32
    %c0_i32_0 = arith.constant 0 : i32
    %c0_i32_1 = arith.constant 0 : i32
    return %c0_i32, %c0_i32_0 : i32, i32
  }
  func.func @transform_13(%arg0: i32) -> (i32, i32) {
    %c0_i32 = arith.constant 0 : i32
    %c0_i32_0 = arith.constant 0 : i32
    %c0_i32_1 = arith.constant 0 : i32
    return %c0_i32, %c0_i32_0 : i32, i32
  }
  func.func @transform_14(%arg0: i32) -> (i32, i32) {
    %c0_i32 = arith.constant 0 : i32
    %c0_i32_0 = arith.constant 0 : i32
    %c0_i32_1 = arith.constant 0 : i32
    return %c0_i32, %c0_i32_0 : i32, i32
  }
  func.func @transform_15(%arg0: i32) -> (i32, i32) {
    %c0_i32 = arith.constant 0 : i32
    %c0_i32_0 = arith.constant 0 : i32
    %c0_i32_1 = arith.constant 0 : i32
    return %c0_i32, %c0_i32_0 : i32, i32
  }
  func.func @transform_16(%arg0: i32) -> (i32, i32) {
    %c0_i32 = arith.constant 0 : i32
    %c0_i32_0 = arith.constant 0 : i32
    %c0_i32_1 = arith.constant 0 : i32
    return %c0_i32, %c0_i32_0 : i32, i32
  }
  func.func @transform_17(%arg0: i32) -> (i32, i32) {
    %c0_i32 = arith.constant 0 : i32
    %c0_i32_0 = arith.constant 0 : i32
    %c0_i32_1 = arith.constant 0 : i32
    return %c0_i32, %c0_i32_0 : i32, i32
  }
  func.func @transform_18(%arg0: i32) -> (i32, i32) {
    %c0_i32 = arith.constant 0 : i32
    %c0_i32_0 = arith.constant 0 : i32
    %c0_i32_1 = arith.constant 0 : i32
    return %c0_i32, %c0_i32_0 : i32, i32
  }
  func.func @transform_19(%arg0: i32) -> (i32, i32) {
    %c0_i32 = arith.constant 0 : i32
    %c0_i32_0 = arith.constant 0 : i32
    %c0_i32_1 = arith.constant 0 : i32
    return %c0_i32, %c0_i32_0 : i32, i32
  }
  func.func @transform_20(%arg0: i32) -> (i32, i32) {
    %c0_i32 = arith.constant 0 : i32
    %c0_i32_0 = arith.constant 0 : i32
    %c0_i32_1 = arith.constant 0 : i32
    return %c0_i32, %c0_i32_0 : i32, i32
  }
  func.func @transform_21(%arg0: i32) -> (i32, i32, i32) {
    %c0_i32 = arith.constant 0 : i32
    %c0_i32_0 = arith.constant 0 : i32
    %c0_i32_1 = arith.constant 0 : i32
    return %arg0, %c0_i32, %c0_i32_0 : i32, i32, i32
  }
  func.func @transform_22(%arg0: i32) -> (i32, i32, i32) {
    %c0_i32 = arith.constant 0 : i32
    %c0_i32_0 = arith.constant 0 : i32
    %c0_i32_1 = arith.constant 0 : i32
    return %arg0, %c0_i32, %c0_i32_0 : i32, i32, i32
  }
}

</mosaic_0001>

<bundles_post_ra>
// kernel: hypergraph_interaction.1
= control target key start
LH: loop header
LB: loop body
LE: loop exit
PB: predicated region body
PF: predicated region fallthrough
CT: control target
= control target key end

     0   :  { %s26044_s0 = inlined_call_operand.vmem [shape: f32[4,128,128], index: 0, kind: input, shape index: {}]   ;;  %s26045_s1 = inlined_call_operand.vmem [shape: f32[4,64,128], index: 1, kind: input, shape index: {}]   ;;  %s26046_s2 = inlined_call_operand.vmem [shape: f32[4,128,64], index: 2, kind: input, shape index: {}]   ;;  %s26047_s3 = inlined_call_operand.hbm [shape: f32[128,128], index: 3, kind: input, shape index: {}]   ;;  %s26048_s4 = inlined_call_operand.hbm [shape: f32[128,128], index: 4, kind: input, shape index: {}]   ;;  %s26049_s5 = inlined_call_operand.vmem [shape: f32[1,128], index: 5, kind: input, shape index: {}]   ;;  %s26050_s6 = inlined_call_operand.hbm [shape: f32[128,128], index: 6, kind: input, shape index: {}]   ;;  %s26051_s7 = inlined_call_operand.vmem [shape: f32[1,128], index: 7, kind: input, shape index: {}]   ;;  %s26052_s8 = inlined_call_operand.hbm [shape: f32[128,128], index: 8, kind: input, shape index: {}]   ;;  %s26053_s9 = inlined_call_operand.vmem [shape: f32[1,128], index: 9, kind: input, shape index: {}]   ;;  %s26054_s10 = inlined_call_operand.vmem [shape: f32[1,128], index: 10, kind: input, shape index: {}, may-alias: {10,19}]   ;;  %s26055_s11 = inlined_call_operand.vmem [shape: f32[1,128], index: 11, kind: input, shape index: {}, may-alias: {11,20}]   ;;  %s26056_s12 = inlined_call_operand.hbm [shape: f32[128,128], index: 12, kind: input, shape index: {}]   ;;  %s26057_s13 = inlined_call_operand.hbm [shape: f32[128,128], index: 13, kind: input, shape index: {}]   ;;  %s26058_s14 = inlined_call_operand.vmem [shape: f32[1,128], index: 14, kind: input, shape index: {}]   ;;  %s26059_s15 = inlined_call_operand.hbm [shape: f32[128,128], index: 15, kind: input, shape index: {}]   ;;  %s26060_s16 = inlined_call_operand.vmem [shape: f32[1,128], index: 16, kind: input, shape index: {}]   ;;  %s26061_s17 = inlined_call_operand.hbm [shape: f32[128,128], index: 17, kind: input, shape index: {}]   ;;  %s26062_s18 = inlined_call_operand.vmem [shape: f32[1,128], index: 18, kind: input, shape index: {}]   ;;  %s26063_s19 = inlined_call_operand.vmem [shape: f32[1,128], index: 19, kind: input, shape index: {}, may-alias: {10,19}]   ;;  %s26064_s20 = inlined_call_operand.vmem [shape: f32[1,128], index: 20, kind: input, shape index: {}, may-alias: {11,20}]   ;;  %s26065_s21 = inlined_call_operand.hbm [shape: f32[4,128,128], index: 21, kind: output, shape index: {0}]   ;;  %s26066_s22 = inlined_call_operand.hbm [shape: f32[4,64,128], index: 22, kind: output, shape index: {1}]  }
   0x1   :  { %26528 = sst [smem:[#allocation144_spill]] %s26044_s0 }
   0x2   :  { %26529 = sst [smem:[#allocation145_spill]] %s26045_s1 }
   0x3   :  { %26530 = sst [smem:[#allocation146_spill]] %s26046_s2 }
   0x4   :  { %26531 = sst [smem:[#allocation147_spill]] %s26047_s3 }
   0x5   :  { %26532 = sst [smem:[#allocation148_spill]] %s26048_s4 }
   0x6   :  { %26533 = sst [smem:[#allocation149_spill]] %s26049_s5 }
   0x7   :  { %26534 = sst [smem:[#allocation150_spill]] %s26050_s6 }
   0x8   :  { %26535 = sst [smem:[#allocation151_spill]] %s26052_s8 }
   0x9   :  { %26536 = sst [smem:[#allocation152_spill]] %s26057_s13 }
   0xa   :  { %26537 = sst [smem:[#allocation153_spill]] %s26062_s18 }
   0xb   :  { %26538 = sst [smem:[#allocation154_spill]] %s26063_s19 }
   0xc   :  { %26539 = sst [smem:[#allocation155_spill]] %s26064_s20 }
   0xd   :  { %26540 = sst [smem:[#allocation156_spill]] %s26065_s21 }
   0xe   :  { %26541 = sst [smem:[#allocation157_spill]] %s26066_s22 }
   0xf   :  { %28 = vsyncpa [#allocation3], 0 }
  0x10   :  { %29 = vsyncpa [#allocation6], 0 }
  0x11   :  { %30 = vsyncpa [#allocation9], 0 }
  0x12   :  { %31 = vsyncpa [#allocation12], 0 }
  0x13   :  { %32 = vsyncpa [#allocation15], 0 }
  0x14   :  { %33 = vsyncpa [#allocation4], 0 }
  0x15   :  { %35 = vsyncpa [#allocation4 + $0x1], 0 }
  0x16   :  { %36 = vsyncpa [#allocation18], 0 }
  0x17   :  { %38 = vsyncpa [#allocation18 + $0x1], 0  ;;  %s20640_s3 = smov 0   ;;  %s20642_s28 = smov 0  }
  0x18   :  { %s20644_s29 = smov 0   ;;  %s20646_s30 = smov 0  }
  0x19 LB: > { %26542 = sst [smem:[#allocation26_spill]] %s20497_s3  ;;  %s20661_s4 = sadd.s32 4294967295, %s20509_s30   ;;  %s20509_s30 = sphi %s20646_s30, %s27180_s30   ;;  %s20505_s29 = sphi %s20644_s29, %s27182_s29   ;;  %s20501_s28 = sphi %s20642_s28, %s27184_s28   ;;  %s20497_s3 = sphi %s20640_s3, %s27183_s3  }
  0x1a   : > { %26543 = sst [smem:[#allocation27_spill]] %s20505_s29  ;;  %s12870_s0 = sadd.s32 4294967294, %s20509_s30  }
  0x1b   : > { %26544 = sst [smem:[#allocation28_spill]] %s20509_s30  ;;  %s20665_s23 = sadd.s32 1, %s20509_s30  }
  0x1c   : > { %26545 = sst [smem:[#allocation29_spill]] %s20665_s23  ;;  %s507_s1 = sadd.s32 1, %s20505_s29 }
  0x1d   : > { %s504_s5 = ssub.s32 %s20509_s30, %s20665_s23  ;;  %p517_p0 = scmp.ne.s32.totalorder %s20505_s29, %s20501_s28 }
  0x1e   : > { %p505_p1 = scmp.eq.s32.totalorder %s504_s5, 0  ;;  %p518_p2 = scmp.eq.s32.totalorder %s20661_s4, 3 }
  0x1f   : > { %p523_p3 = scmp.ne.s32.totalorder %s20501_s28, %s20497_s3  ;;  %p524_p4 = scmp.eq.s32.totalorder %s12870_s0, 3 }
  0x20   : > { %s20676_s24 = scalar_select %p505_p1, %s20505_s29, %s507_s1  }
  0x21   : > { %p20678_p5 = por %p518_p2, %p517_p0  ;;  %p20682_p6 = por %p524_p4, %p523_p3 }
  0x22   : > { %26546 = sst [smem:[#allocation30_spill]] %s20676_s24  ;;  %p12871_p7 = scmp.ge.s32.totalorder %s20509_s30, 1 }
  0x23   : > { %s26547_s6 = scalar_select %p20678_p5, 1, 0 }
  0x24   : > { %s26549_s25 = scalar_select %p20682_p6, 1, 0 }
  0x25   : > { %26548 = sst [smem:[#allocation31_spill]] %s26547_s6  ;;  %p557_p8 = scmp.lt.s32.totalorder %s20509_s30, 5 }
  0x26   : > { %26550 = sst [smem:[#allocation32_spill]] %s26549_s25  ;;  %p26077_p9 = scmp.eq.s32.totalorder %s20661_s4, 0 }
  0x27   : > { %p20689_p10 = pnand %p12871_p7, %p557_p8  ;;  %s20511_s2 = smov [#allocation5]  }
  0x28   : > { %s582_s27 = sshll.u32 %s20511_s2, 4  ;;  %s20512_s1 = smov [#allocation8]   ;;  %s20695_s27 = int_to_ptr.vmem [resolvable:$true] %s582_s27 }
  0x29   : > { %s26551_s26 = scalar_select %p20689_p10, 1, 0 }
  0x2a   : > { %p20005_p11 = pneg %p20689_p10  ;;  %s614_s5 = sshll.u32 %s20512_s1, 4  ;;  %s20703_s5 = int_to_ptr.vmem [resolvable:$true] %s614_s5 }
  0x2b   : > { %s20513_s24 = smov [#allocation11]   ;;  %s26553_s3 = sld [smem:[#allocation148_spill]] }
  0x2c   : > { %p20699_p12 = pnand %p26077_p9, %p20005_p11  ;;  %s20705_s29 = sshll.u32 %s20513_s24, 4  ;;  %s650_s29 = int_to_ptr.vmem [resolvable:$true] %s20705_s29 }
  0x2e   : > { %p20715_p0 = pneg %p20699_p12 }
  0x31   : > { %s26554_s21 = smov %s26553_s3  ;;  %s20171_s30 = scalar_lea.hbm %s26553_s3, 2048 }
  0x32   : > { %p20172_p13 = scmp.ne.s32.totalorder %s26554_s21, %s20171_s30  ;;  %p20178_p3 = scmp.lt.u32.totalorder %s20171_s30, %s26554_s21 }
  0x34   : > { %p20174_p1 = pnand %p20715_p0, %p20172_p13 }
  0x36   : > { %p20175_p2 = pneg %p20174_p1 }
  0x38   : > { %p20180_p4 = pnand %p20178_p3, %p20175_p2 }
  0x3a   : > { %20183 = shalt.err (!%p20180_p4)
}
  0x3b   : > { %s20184_s20 = scalar_lea.vmem %s20695_s27, 2048  ;;  %p20192_p9 = scmp.lt.s32.totalorder %s20695_s27, %s20695_s27 }
  0x3c   : > { %p20185_p7 = scmp.ne.s32.totalorder %s20695_s27, %s20184_s20  ;;  %p20193_p6 = scmp.lt.s32.totalorder %s20184_s20, %s20184_s20 }
  0x3e   : > { %p20187_p8 = pnand %p20185_p7, %p20715_p0  ;;  %p20194_p13 = por %p20193_p6, %p20192_p9 }
  0x40   : > { %p20188_p11 = pneg %p20187_p8 }
  0x42   : > { %p20195_p1 = pnand %p20194_p13, %p20188_p11 }
  0x44   : > { %20198 = shalt.err (!%p20195_p1)
}
  0x45   : > { %s20514_s3 = smov 128   ;;  %s20515_s30 = smov 8  }
  0x46   : > { %20011 = dma.hbm_to_vmem [thread:$0]  (!%p20699_p12), %s26554_s21, 2048, %s20695_s27, [#allocation6], %s20514_s3, %s20514_s3, %s20515_s30  }
  0x47   : > { %s26556_s8 = sld [smem:[#allocation151_spill]] }
  0x4d   : > { %s20199_s24 = scalar_lea.hbm %s26556_s8, 2048 }
  0x4e   : > { %p20200_p6 = scmp.ne.s32.totalorder %s26556_s8, %s20199_s24  ;;  %p20206_p3 = scmp.lt.u32.totalorder %s20199_s24, %s26556_s8 }
  0x50   : > { %p20202_p9 = pnand %p20200_p6, %p20715_p0 }
  0x52   : > { %p20203_p2 = pneg %p20202_p9 }
  0x54   : > { %p20208_p4 = pnand %p20206_p3, %p20203_p2 }
  0x56   : > { %20211 = shalt.err (!%p20208_p4)
}
  0x57   : > { %s20212_s27 = scalar_lea.vmem %s20703_s5, 2048  ;;  %p20220_p13 = scmp.lt.s32.totalorder %s20703_s5, %s20703_s5 }
  0x58   : > { %p20213_p7 = scmp.ne.s32.totalorder %s20703_s5, %s20212_s27  ;;  %p20221_p1 = scmp.lt.s32.totalorder %s20212_s27, %s20212_s27 }
  0x5a   : > { %p20215_p8 = pnand %p20213_p7, %p20715_p0  ;;  %p20222_p6 = por %p20221_p1, %p20220_p13 }
  0x5c   : > { %p20216_p11 = pneg %p20215_p8 }
  0x5e   : > { %p20223_p9 = pnand %p20222_p6, %p20216_p11 }
  0x60   : > { %20226 = shalt.err (!%p20223_p9)
}
  0x61   : > { %20017 = dma.hbm_to_vmem [thread:$0]  (!%p20699_p12), %s26556_s8, 2048, %s20703_s5, [#allocation9], %s20514_s3, %s20514_s3, %s20515_s30  }
  0x62   : > { %s26557_s13 = sld [smem:[#allocation152_spill]] }
  0x68   : > { %s20227_s25 = scalar_lea.hbm %s26557_s13, 2048 }
  0x69   : > { %p20228_p2 = scmp.ne.s32.totalorder %s26557_s13, %s20227_s25  ;;  %p20234_p7 = scmp.lt.u32.totalorder %s20227_s25, %s26557_s13 }
  0x6b   : > { %p20230_p3 = pnand %p20228_p2, %p20715_p0 }
  0x6d   : > { %p20231_p4 = pneg %p20230_p3 }
  0x6f   : > { %p20236_p8 = pnand %p20234_p7, %p20231_p4 }
  0x71   : > { %20239 = shalt.err (!%p20236_p8)
}
  0x72   : > { %s20240_s27 = scalar_lea.vmem %s650_s29, 2048  ;;  %p20248_p6 = scmp.lt.s32.totalorder %s650_s29, %s650_s29 }
  0x73   : > { %p20241_p11 = scmp.ne.s32.totalorder %s650_s29, %s20240_s27  ;;  %p20249_p9 = scmp.lt.s32.totalorder %s20240_s27, %s20240_s27 }
  0x75   : > { %p20243_p13 = pnand %p20241_p11, %p20715_p0  ;;  %p20250_p5 = por %p20249_p9, %p20248_p6 }
  0x77   : > { %p20244_p1 = pneg %p20243_p13 }
  0x79   : > { %p20251_p10 = pnand %p20250_p5, %p20244_p1 }
  0x7b   : > { %20254 = shalt.err (!%p20251_p10)
}
  0x7c   : > { %20023 = dma.hbm_to_vmem [thread:$0]  (!%p20699_p12), %s26557_s13, 2048, %s650_s29, [#allocation12], %s20514_s3, %s20514_s3, %s20515_s30  }
  0x7d   : > { %s20516_s22 = smov [#allocation2]   ;;  %s20517_s23 = smov [#allocation7]  }
  0x7e   : > { %s569_s6 = sshll.u32 %s20516_s22, 4  ;;  %s598_s25 = sshll.u32 %s20517_s23, 4  ;;  %s570_s6 = int_to_ptr.vmem [resolvable:$true] %s569_s6  ;;  %s599_s25 = int_to_ptr.vmem [resolvable:$true] %s598_s25 }
  0x7f   : > { %s26558_s24 = sld [smem:[#allocation147_spill]] }
  0x85   : > { %s20255_s20 = scalar_lea.hbm %s26558_s24, 2048 }
  0x86   : > { %p20256_p5 = scmp.ne.s32.totalorder %s26558_s24, %s20255_s20  ;;  %p20262_p3 = scmp.lt.u32.totalorder %s20255_s20, %s26558_s24 }
  0x88   : > { %p20258_p10 = pnand %p20256_p5, %p20715_p0 }
  0x8a   : > { %p20259_p2 = pneg %p20258_p10 }
  0x8c   : > { %p20264_p4 = pnand %p20262_p3, %p20259_p2 }
  0x8e   : > { %20267 = shalt.err (!%p20264_p4)
}
  0x8f   : > { %s20268_s29 = scalar_lea.vmem %s570_s6, 2048  ;;  %p20276_p13 = scmp.lt.s32.totalorder %s570_s6, %s570_s6 }
  0x90   : > { %p20269_p7 = scmp.ne.s32.totalorder %s570_s6, %s20268_s29  ;;  %p20277_p1 = scmp.lt.s32.totalorder %s20268_s29, %s20268_s29 }
  0x92   : > { %p20271_p8 = pnand %p20269_p7, %p20715_p0  ;;  %p20278_p6 = por %p20277_p1, %p20276_p13 }
  0x94   : > { %p20272_p11 = pneg %p20271_p8 }
  0x96   : > { %p20279_p9 = pnand %p20278_p6, %p20272_p11 }
  0x98   : > { %20282 = shalt.err (!%p20279_p9)
}
  0x99   : > { %20008 = dma.hbm_to_vmem [thread:$0]  (!%p20699_p12), %s26558_s24, 2048, %s570_s6, [#allocation3], %s20514_s3, %s20514_s3, %s20515_s30  }
  0x9a   : > { %s26559_s23 = sld [smem:[#allocation150_spill]] }
  0xa0   : > { %s20283_s2 = scalar_lea.hbm %s26559_s23, 2048 }
  0xa1   : > { %p20284_p5 = scmp.ne.s32.totalorder %s26559_s23, %s20283_s2  ;;  %p20290_p3 = scmp.lt.u32.totalorder %s20283_s2, %s26559_s23 }
  0xa3   : > { %p20286_p10 = pnand %p20284_p5, %p20715_p0 }
  0xa5   : > { %p20287_p2 = pneg %p20286_p10 }
  0xa7   : > { %p20292_p4 = pnand %p20290_p3, %p20287_p2 }
  0xa9   : > { %20295 = shalt.err (!%p20292_p4)
}
  0xaa   : > { %s20296_s29 = scalar_lea.vmem %s599_s25, 2048  ;;  %p20304_p13 = scmp.lt.s32.totalorder %s599_s25, %s599_s25 }
  0xab   : > { %p20297_p7 = scmp.ne.s32.totalorder %s599_s25, %s20296_s29  ;;  %p20305_p1 = scmp.lt.s32.totalorder %s20296_s29, %s20296_s29 }
  0xad   : > { %p20299_p8 = pnand %p20297_p7, %p20715_p0  ;;  %p20306_p6 = por %p20305_p1, %p20304_p13 }
  0xaf   : > { %p20300_p11 = pneg %p20299_p8 }
  0xb1   : > { %p20307_p9 = pnand %p20306_p6, %p20300_p11 }
  0xb3   : > { %20310 = shalt.err (!%p20307_p9)
}
  0xb4   : > { %20014 = dma.hbm_to_vmem [thread:$0]  (!%p20699_p12), %s26559_s23, 2048, %s599_s25, [#allocation6], %s20514_s3, %s20514_s3, %s20515_s30  }
  0xb5   : > { %s20518_s21 = smov [#allocation10]   ;;  %s20519_s22 = smov [#allocation13]  }
  0xb6   : > { %s636_s18 = sshll.u32 %s20518_s21, 4  ;;  %s665_s2 = sshll.u32 %s20519_s22, 4  ;;  %s637_s18 = int_to_ptr.vmem [resolvable:$true] %s636_s18  ;;  %s666_s2 = int_to_ptr.vmem [resolvable:$true] %s665_s2 }
  0xb7   : > { %s20311_s27 = scalar_lea.hbm %s26056_s12, 2048 }
  0xb8   : > { %p20312_p5 = scmp.ne.s32.totalorder %s26056_s12, %s20311_s27  ;;  %p20318_p3 = scmp.lt.u32.totalorder %s20311_s27, %s26056_s12 }
  0xba   : > { %p20314_p10 = pnand %p20312_p5, %p20715_p0 }
  0xbc   : > { %p20315_p2 = pneg %p20314_p10 }
  0xbe   : > { %p20320_p4 = pnand %p20318_p3, %p20315_p2 }
  0xc0   : > { %20323 = shalt.err (!%p20320_p4)
}
  0xc1   : > { %s20324_s25 = scalar_lea.vmem %s637_s18, 2048  ;;  %p20332_p13 = scmp.lt.s32.totalorder %s637_s18, %s637_s18 }
  0xc2   : > { %p20325_p7 = scmp.ne.s32.totalorder %s637_s18, %s20324_s25  ;;  %p20333_p1 = scmp.lt.s32.totalorder %s20324_s25, %s20324_s25 }
  0xc4   : > { %p20327_p8 = pnand %p20325_p7, %p20715_p0  ;;  %p20334_p6 = por %p20333_p1, %p20332_p13 }
  0xc6   : > { %p20328_p11 = pneg %p20327_p8 }
  0xc8   : > { %p20335_p9 = pnand %p20334_p6, %p20328_p11 }
  0xca   : > { %20338 = shalt.err (!%p20335_p9)
}
  0xcb   : > { %20020 = dma.hbm_to_vmem [thread:$0]  (!%p20699_p12), %s26056_s12, 2048, %s637_s18, [#allocation9], %s20514_s3, %s20514_s3, %s20515_s30  }
  0xcc   : > { %s20339_s1 = scalar_lea.hbm %s26059_s15, 2048 }
  0xcd   : > { %p20340_p5 = scmp.ne.s32.totalorder %s26059_s15, %s20339_s1  ;;  %p20346_p3 = scmp.lt.u32.totalorder %s20339_s1, %s26059_s15 }
  0xcf   : > { %p20342_p10 = pnand %p20340_p5, %p20715_p0 }
  0xd1   : > { %p20343_p2 = pneg %p20342_p10 }
  0xd3   : > { %p20348_p4 = pnand %p20346_p3, %p20343_p2 }
  0xd5   : > { %20351 = shalt.err (!%p20348_p4)
}
  0xd6   : > { %s20352_s6 = scalar_lea.vmem %s666_s2, 2048  ;;  %p20360_p13 = scmp.lt.s32.totalorder %s666_s2, %s666_s2 }
  0xd7   : > { %p20353_p7 = scmp.ne.s32.totalorder %s666_s2, %s20352_s6  ;;  %p20361_p1 = scmp.lt.s32.totalorder %s20352_s6, %s20352_s6 }
  0xd9   : > { %p20355_p8 = pnand %p20353_p7, %p20715_p0  ;;  %p20362_p6 = por %p20361_p1, %p20360_p13 }
  0xdb   : > { %p20356_p11 = pneg %p20355_p8 }
  0xdd   : > { %p20363_p9 = pnand %p20362_p6, %p20356_p11 }
  0xdf   : > { %20366 = shalt.err (!%p20363_p9)
}
  0xe0   : > { %20026 = dma.hbm_to_vmem [thread:$0]  (!%p20699_p12), %s26059_s15, 2048, %s666_s2, [#allocation12], %s20514_s3, %s20514_s3, %s20515_s30  }
  0xe1   : > { %s20520_s13 = smov [#allocation14]   ;;  %s20367_s1 = scalar_lea.hbm %s26061_s17, 2048 }
  0xe2   : > { %s681_s8 = sshll.u32 %s20520_s13, 4  ;;  %p20368_p5 = scmp.ne.s32.totalorder %s26061_s17, %s20367_s1  ;;  %s682_s8 = int_to_ptr.vmem [resolvable:$true] %s681_s8 }
  0xe3   : > { %p20374_p3 = scmp.lt.u32.totalorder %s20367_s1, %s26061_s17 }
  0xe4   : > { %p20370_p10 = pnand %p20368_p5, %p20715_p0 }
  0xe6   : > { %p20371_p2 = pneg %p20370_p10 }
  0xe8   : > { %p20376_p4 = pnand %p20374_p3, %p20371_p2 }
  0xea   : > { %20379 = shalt.err (!%p20376_p4)
}
  0xeb   : > { %s20380_s2 = scalar_lea.vmem %s682_s8, 2048  ;;  %p20388_p13 = scmp.lt.s32.totalorder %s682_s8, %s682_s8 }
  0xec   : > { %p20381_p7 = scmp.ne.s32.totalorder %s682_s8, %s20380_s2  ;;  %p20389_p1 = scmp.lt.s32.totalorder %s20380_s2, %s20380_s2 }
  0xee   : > { %p20383_p8 = pnand %p20381_p7, %p20715_p0  ;;  %p20390_p6 = por %p20389_p1, %p20388_p13 }
  0xf0   : > { %p20384_p11 = pneg %p20383_p8 }
  0xf2   : > { %p20391_p9 = pnand %p20390_p6, %p20384_p11 }
  0xf4   : > { %20394 = shalt.err (!%p20391_p9)
}
  0xf5   : > { %20029 = dma.hbm_to_vmem [thread:$0]  (!%p20699_p12), %s26061_s17, 2048, %s682_s8, [#allocation15], %s20514_s3, %s20514_s3, %s20515_s30  }
  0xf6   : > { %p26560_p5 = scmp.ne.s32.totalorder %s26551_s26, 0 }
  0xf8   : > { %730 = sbr.rel (%p26560_p5) target bundleno = 4207 (0x106f), region = 104 }
  0xff   : > { %p26561_p0 = scmp.eq.s32.totalorder %s20661_s4, 0 }
 0x101   : > { %20468 = dma.done.wait (%p26561_p0), [#allocation3], 2048   ;;  %p26562_p10 = pmov %p26561_p0 }
 0x102   : > { %p26563_p2 = pmov %p26561_p0 }
 0x103   : > { %20470 = vsyncadd (%p26562_p10), [#allocation3], 4294965248 }
 0x104   : > { %20472 = dma.done.wait (%p26563_p2), [#allocation6], 4096   ;;  %p26564_p3 = pmov %p26561_p0 }
 0x105   : > { %p26565_p4 = pmov %p26561_p0 }
 0x106   : > { %20474 = vsyncadd (%p26564_p3), [#allocation6], 4294963200 }
 0x107   : > { %20476 = dma.done.wait (%p26565_p4), [#allocation9], 4096   ;;  %p26566_p12 = pmov %p26561_p0 }
 0x108   : > { %p26567_p7 = pmov %p26561_p0 }
 0x109   : > { %20478 = vsyncadd (%p26566_p12), [#allocation9], 4294963200 }
 0x10a   : > { %20480 = dma.done.wait (%p26567_p7), [#allocation12], 4096   ;;  %p26568_p8 = pmov %p26561_p0 }
 0x10b   : > { %p26569_p11 = pmov %p26561_p0 }
 0x10c   : > { %20482 = vsyncadd (%p26568_p8), [#allocation12], 4294963200 }
 0x10d   : > { %20484 = dma.done.wait (%p26569_p11), [#allocation15], 2048   ;;  %p26570_p13 = pmov %p26561_p0 }
 0x10e   : > { %p835_p1 = scmp.lt.s32.totalorder %s20661_s4, 3  ;;  %s26571_s30 = sld [smem:[#allocation146_spill]]  ;;  %vm5860_vm0 = vcmask 523264  }
 0x10f   : > { %20486 = vsyncadd (%p26570_p13), [#allocation15], 4294965248  ;;  %s26580_s21 = sld [smem:[#allocation144_spill]]  ;;  %s26668_s5 = sld [smem:[#allocation145_spill]] }
 0x110   : > { %s20916_s19 = scalar_select %p835_p1, %s20661_s4, 3 }
 0x111   : > { %s26823_s18 = sld [smem:[#allocation149_spill]]  ;;  %s12920_s0 = sshll.u32 %s20661_s4, 10 }
 0x112   : > { %s12916_s26 = sshll.u32 %s20916_s19, 7  ;;  %s12917_s1 = sshll.u32 %s20916_s19, 6 }
 0x113   : > { %s27169_s19 = sld [smem:[#allocation153_spill]]  ;;  %s27171_s13 = sld [smem:[#allocation157_spill]] }
 0x114   : > { %s20922_s25 = scalar_lea.vmem %s26571_s30, %s12916_s26  ;;  %s23337_s30 = sand.u32 1, %s20501_s28  }
 0x115   : > { %v874_v0 = vld [vmem:[%s20922_s25] sm:$0xff]  ;;  %v875_v1 = vld [vmem:[%s20922_s25 + $0x8] sm:$0xff]  ;;  %v876_v2 = vld [vmem:[%s20922_s25 + $0x10] sm:$0xff]  ;;  %s20969_s22 = scalar_lea.vmem %s26580_s21, %s12916_s26  ;;  %s21526_s29 = scalar_lea.vmem %s26668_s5, %s12917_s1 }
 0x116   : > { %890 = vxpose.xlu0.b32.start [1/16] (narrow) %v874_v0, 64  ;;  %v20928_v3 = vsel %vm5860_vm0, %v875_v1, 0  ;;  %v20931_v4 = vsel %vm5860_vm0, %v876_v2, 0  ;;  %v877_v5 = vld [vmem:[%s20922_s25 + $0x18] sm:$0xff]  ;;  %v878_v7 = vld [vmem:[%s20922_s25 + $0x20] sm:$0xff]  ;;  %v879_v8 = vld [vmem:[%s20922_s25 + $0x28] sm:$0xff] }
 0x117   : > { %26572 = vst [vmem:[#allocation33_spill] sm:$0xff] %v20928_v3  ;;  %26573 = vst [vmem:[#allocation34_spill] sm:$0xff] %v20931_v4  ;;  %v20935_v6 = vsel %vm5860_vm0, %v877_v5, 0  ;;  %v880_v9 = vld [vmem:[%s20922_s25 + $0x30] sm:$0xff]  ;;  %v20941_v10 = vsel %vm5860_vm0, %v878_v7, 0  ;;  %v20944_v11 = vsel %vm5860_vm0, %v879_v8, 0 }
 0x118   : > { %26574 = vst [vmem:[#allocation35_spill] sm:$0xff] %v20935_v6  ;;  %26575 = vst [vmem:[#allocation36_spill] sm:$0xff] %v20941_v10  ;;  %v20947_v12 = vsel %vm5860_vm0, %v880_v9, 0  ;;  %v20950_v13 = vld [vmem:[%s20922_s25 + $0x38] sm:$0xff]  ;;  %v20957_v15 = vld [vmem:[%s20922_s25 + $0x40] sm:$0xff]  ;;  %s12891_s1 = sshll.u32 %s23337_s30, 6 }
 0x119   : > { %26576 = vst [vmem:[#allocation37_spill] sm:$0xff] %v20944_v11  ;;  %26577 = vst [vmem:[#allocation38_spill] sm:$0xff] %v20947_v12  ;;  %v20954_v14 = vsel %vm5860_vm0, %v20950_v13, 0  ;;  %v20961_v16 = vsel %vm5860_vm0, %v20957_v15, 0  ;;  %v20964_v17 = vld [vmem:[%s20922_s25 + $0x48] sm:$0xff]  ;;  %v20976_v19 = vld [vmem:[%s20922_s25 + $0x50] sm:$0xff]  ;;  %s25866_s8 = scalar_lea.hbm %s27171_s13, %s12920_s0 }
 0x11a   : > { %891 = vxpose.xlu0.b32.cont [2/16] (narrow) %v875_v1, 64  ;;  %26578 = vst [vmem:[#allocation39_spill] sm:$0xff] %v20954_v14  ;;  %26579 = vst [vmem:[#allocation40_spill] sm:$0xff] %v20961_v16  ;;  %v20973_v18 = vsel %vm5860_vm0, %v20964_v17, 0  ;;  %v20980_v20 = vsel %vm5860_vm0, %v20976_v19, 0  ;;  %v20983_v21 = vld [vmem:[%s20922_s25 + $0x58] sm:$0xff] }
 0x11b   : > { %26581 = vst [vmem:[#allocation41_spill] sm:$0xff] %v20973_v18  ;;  %26582 = vst [vmem:[#allocation42_spill] sm:$0xff] %v20980_v20  ;;  %v20986_v22 = vld [vmem:[%s20922_s25 + $0x60] sm:$0xff]  ;;  %v20990_v23 = vsel %vm5860_vm0, %v20983_v21, 0  ;;  %v20997_v25 = vld [vmem:[%s20922_s25 + $0x68] sm:$0xff]  ;;  %s23356_s20 = scalar_lea.vmem [#allocation17], %s12891_s1 }
 0x11c   : > { %26583 = vst [vmem:[#allocation43_spill] sm:$0xff] %v20990_v23  ;;  %v20994_v24 = vsel %vm5860_vm0, %v20986_v22, 0  ;;  %v21000_v26 = vld [vmem:[%s20922_s25 + $0x70] sm:$0xff]  ;;  %v21003_v27 = vld [vmem:[%s20922_s25 + $0x78] sm:$0xff]  ;;  %v850_v28 = vld [vmem:[%s20969_s22] sm:$0xff]  ;;  %v21012_v31 = vsel %vm5860_vm0, %v20997_v25, 0 }
 0x11d   : > { %26584 = vst [vmem:[#allocation44_spill] sm:$0xff] %v20994_v24  ;;  %v851_v29 = vld [vmem:[%s20969_s22 + $0x8] sm:$0xff]  ;;  %v21008_v30 = vld [vmem:[%s20969_s22 + $0x10] sm:$0xff]  ;;  %26585 = vst [vmem:[#allocation45_spill] sm:$0xff] %v21012_v31  ;;  %v21016_v32 = vsel %vm5860_vm0, %v21000_v26, 0  ;;  %v21020_v33 = vsel %vm5860_vm0, %v21003_v27, 0 }
 0x11e   : > { %892 = vxpose.xlu0.b32.cont [3/16] (narrow) %v876_v2, 64  ;;  %26586 = vst [vmem:[#allocation46_spill] sm:$0xff] %v21016_v32  ;;  %26587 = vst [vmem:[#allocation47_spill] sm:$0xff] %v21020_v33  ;;  %v21023_v34 = vld [vmem:[%s20969_s22 + $0x18] sm:$0xff]  ;;  %v21026_v35 = vld [vmem:[%s20969_s22 + $0x20] sm:$0xff]  ;;  %v21031_v37 = vand.u32 4294901760, %v850_v28 }
 0x11f   : > { %v21029_v36 = vld [vmem:[%s20969_s22 + $0x28] sm:$0xff]  ;;  %v21033_v38 = vand.u32 4294901760, %v851_v29  ;;  %v21036_v39 = vand.u32 4294901760, %v21008_v30  ;;  %v21039_v40 = vand.u32 4294901760, %v21023_v34  ;;  %v21046_v42 = vand.u32 4294901760, %v21026_v35  ;;  %v21056_v45 = vld [vmem:[%s20969_s22 + $0x30] sm:$0xff] }
 0x120   : > { %26588 = vst [vmem:[#allocation48_spill] sm:$0xff] %v21031_v37  ;;  %v21049_v43 = vand.u32 4294901760, %v21029_v36  ;;  %v21059_v46 = vld [vmem:[%s20969_s22 + $0x38] sm:$0xff]  ;;  %v21069_v48 = vand.u32 4294901760, %v21056_v45  ;;  %v21075_v50 = vld [vmem:[%s20969_s22 + $0x40] sm:$0xff]  ;;  %v21078_v51 = vld [vmem:[%s20969_s22 + $0x48] sm:$0xff]  ;;  %v21114_v61 = vsub.f32 %v850_v28, %v21031_v37 }
 0x121   : > { %26589 = vst [vmem:[#allocation49_spill] sm:$0xff] %v21033_v38  ;;  %26590 = vst [vmem:[#allocation50_spill] sm:$0xff] %v21036_v39  ;;  %v21043_v41 = vpack.c.bf16 %v21033_v38, %v21031_v37  ;;  %v21053_v44 = vpack.c.bf16 %v21039_v40, %v21036_v39  ;;  %v21072_v49 = vand.u32 4294901760, %v21059_v46  ;;  %v21087_v53 = vand.u32 4294901760, %v21075_v50  ;;  %v21093_v55 = vld [vmem:[%s20969_s22 + $0x50] sm:$0xff]  ;;  %v21096_v56 = vld [vmem:[%s20969_s22 + $0x58] sm:$0xff] }
 0x122   : > { %893 = vxpose.xlu0.b32.cont [4/16] (narrow) %v877_v5, 64  ;;  %26591 = vst [vmem:[#allocation51_spill] sm:$0xff] %v21039_v40  ;;  %26593 = vst [vmem:[#allocation53_spill] sm:$0xff] %v21046_v42  ;;  %v21066_v47 = vpack.c.bf16 %v21049_v43, %v21046_v42  ;;  %v21090_v54 = vand.u32 4294901760, %v21078_v51  ;;  %v21100_v57 = vand.u32 4294901760, %v21093_v55  ;;  %v21108_v59 = vand.u32 4294901760, %v21096_v56 }
 0x123   : > { %26592 = vst [vmem:[#allocation52_spill] sm:$0xff] %v21043_v41  ;;  %26594 = vst [vmem:[#allocation54_spill] sm:$0xff] %v21049_v43  ;;  %17458 = vmatprep.subr.bf16.mxu0 %v21043_v41  ;;  %v21084_v52 = vpack.c.bf16 %v21072_v49, %v21069_v48  ;;  %v21111_v60 = vld [vmem:[%s20969_s22 + $0x60] sm:$0xff]  ;;  %v21117_v62 = vsub.f32 %v851_v29, %v21033_v38  ;;  %v21120_v63 = vld [vmem:[%s20969_s22 + $0x68] sm:$0xff]  ;;  %v21257_v20 = vsub.f32 %v21075_v50, %v21087_v53  ;;  %s27170_s26 = sld [smem:[#allocation31_spill]]  ;;  %s12673_s21 = sshll.u32 %s23356_s20, 4  ;;  %s25869_s21 = int_to_ptr.vmem [resolvable:$true] %s12673_s21 }
 0x124   : > { %26595 = vst [vmem:[#allocation55_spill] sm:$0xff] %v21053_v44  ;;  %17460 = vmatpush3.bf16.msra.mxu0 %v21043_v41  ;;  %26596 = vst [vmem:[#allocation56_spill] sm:$0xff] %v21066_v47  ;;  %v21105_v58 = vpack.c.bf16 %v21090_v54, %v21087_v53  ;;  %v21125_v0 = vand.u32 4294901760, %v21111_v60  ;;  %v21130_v1 = vpack.c.bf16 %v21108_v59, %v21100_v57  ;;  %v21133_v2 = vand.u32 4294901760, %v21120_v63  ;;  %v21136_v5 = vld [vmem:[%s20969_s22 + $0x70] sm:$0xff]  ;;  %s12644_s1 = scalar_lea.sflag [#allocation18], %s23337_s30 }
 0x125   : > { %17462 = vmatprep.subr.bf16.mxu0 %v21053_v44  ;;  %26597 = vst [vmem:[#allocation57_spill] sm:$0xff] %v21069_v48  ;;  %26598 = vst [vmem:[#allocation58_spill] sm:$0xff] %v21072_v49  ;;  %v21274_v50 = vsub.f32 %v21093_v55, %v21100_v57  ;;  %v21287_v11 = vand.u32 4294901760, %v21257_v20  ;;  %s20395_s27 = scalar_lea.vmem %s25869_s21, 1024  ;;  %s20521_s5 = smov [#allocation17]  }
 0x126   : > { %894 = vxpose.xlu0.b32.cont [5/16] (narrow) %v878_v7, 64  ;;  %26599 = vst [vmem:[#allocation59_spill] sm:$0xff] %v21087_v53  ;;  %26600 = vst [vmem:[#allocation60_spill] sm:$0xff] %v21090_v54  ;;  %v21139_v7 = vand.u32 4294901760, %v21114_v61  ;;  %v21155_v28 = vpack.c.bf16 %v21133_v2, %v21125_v0  ;;  %p20396_p6 = scmp.ne.s32.totalorder %s25869_s21, %s20395_s27 }
 0x127   : > { %26601 = vst [vmem:[#allocation61_spill] sm:$0xff] %v21100_v57  ;;  %26602 = vst [vmem:[#allocation62_spill] sm:$0xff] %v21108_v59  ;;  %v21306_v6 = vand.u32 4294901760, %v21274_v50 }
 0x128   : > { %17464 = vmatpush3.bf16.msra.mxu0 %v21053_v44  ;;  %26603 = vst [vmem:[#allocation63_spill] sm:$0xff] %v21114_v61  ;;  %26604 = vst [vmem:[#allocation64_spill] sm:$0xff] %v21117_v62  ;;  %v1087_v38 = vsub.f32 %v21114_v61, %v21139_v7 }
 0x129   : > { %17466 = vmatprep.subr.bf16.mxu0 %v21066_v47  ;;  %26605 = vst [vmem:[#allocation65_spill] sm:$0xff] %v21125_v0  ;;  %26606 = vst [vmem:[#allocation66_spill] sm:$0xff] %v21133_v2  ;;  %p27172_p9 = scmp.ne.s32.totalorder %s27170_s26, 0 }
 0x12a   : > { %895 = vxpose.xlu0.b32.cont [6/16] (narrow) %v879_v8, 64  ;;  %26607 = vst [vmem:[#allocation67_spill] sm:$0xff] %v21139_v7  ;;  %v21142_v8 = vand.u32 4294901760, %v21117_v62  ;;  %v21171_v33 = vand.u32 4294901760, %v1087_v38  ;;  %v21195_v38 = vsub.f32 %v21023_v34, %v21039_v40  ;;  %v21219_v34 = vsub.f32 %v21059_v46, %v21072_v49  ;;  %26628 = vst [vmem:[#allocation88_spill] sm:$0xff] %v21257_v20 }
 0x12b   : > { %26632 = vst [vmem:[#allocation92_spill] sm:$0xff] %v21274_v50  ;;  %26635 = vst [vmem:[#allocation95_spill] sm:$0xff] %v21287_v11  ;;  %p20397_p5 = pnand %p20396_p6, %p27172_p9 }
 0x12c   : > { %17468 = vmatpush3.bf16.msra.mxu0 %v21066_v47  ;;  %26608 = vst [vmem:[#allocation68_spill] sm:$0xff] %v21142_v8  ;;  %26611 = vst [vmem:[#allocation71_spill] sm:$0xff] %v21171_v33  ;;  %v21241_v49 = vand.u32 4294901760, %v21219_v34 }
 0x12d   : > { %17470 = vmatprep.subr.bf16.mxu0 %v21084_v52  ;;  %26614 = vst [vmem:[#allocation74_spill] sm:$0xff] %v21195_v38  ;;  %26621 = vst [vmem:[#allocation81_spill] sm:$0xff] %v21219_v34  ;;  %p20398_p0 = pneg %p20397_p5 }
 0x12e   : > { %896 = vxpose.xlu0.b32.cont [7/16] (narrow) %v880_v9, 64  ;;  %v21145_v9 = vld [vmem:[%s20969_s22 + $0x78] sm:$0xff]  ;;  %26626 = vst [vmem:[#allocation86_spill] sm:$0xff] %v21241_v49  ;;  %v1136_v12 = vsub.f32 %v21219_v34, %v21241_v49  ;;  %26641 = vst [vmem:[#allocation101_spill] sm:$0xff] %v21306_v6 }
 0x12f   : > { %v21158_v29 = vand.u32 4294901760, %v21145_v9 }
 0x130   : > { %17472 = vmatpush3.bf16.msra.mxu0 %v21084_v52  ;;  %v21303_v57 = vand.u32 4294901760, %v1136_v12 }
 0x131   : > { %17474 = vmatprep.subr.bf16.mxu0 %v21105_v58  ;;  %26610 = vst [vmem:[#allocation70_spill] sm:$0xff] %v21158_v29 }
 0x132   : > { %897 = vxpose.xlu0.b32.cont [8/16] (narrow) %v20950_v13, 64  ;;  %v21150_v13 = vand.u32 4294901760, %v21136_v5  ;;  %26640 = vst [vmem:[#allocation100_spill] sm:$0xff] %v21303_v57 }
 0x134   : > { %17476 = vmatpush3.bf16.msra.mxu0 %v21105_v58  ;;  %26609 = vst [vmem:[#allocation69_spill] sm:$0xff] %v21150_v13  ;;  %v21169_v37 = vpack.c.bf16 %v21158_v29, %v21150_v13 }
 0x135   : > { %17478 = vmatprep.subr.bf16.mxu0 %v21130_v1 }
 0x136   : > { %898 = vxpose.xlu0.b32.cont [9/16] (narrow) %v20957_v15, 64  ;;  %v1094_v15 = vsub.f32 %v21117_v62, %v21142_v8 }
 0x138   : > { %17480 = vmatpush3.bf16.msra.mxu0 %v21130_v1  ;;  %v21173_v32 = vand.u32 4294901760, %v1094_v15 }
 0x139   : > { %17482 = vmatprep.subr.bf16.mxu0 %v21155_v28 }
 0x13a   : > { %899 = vxpose.xlu0.b32.cont [10/16] (narrow) %v20964_v17, 64  ;;  %26612 = vst [vmem:[#allocation72_spill] sm:$0xff] %v21173_v32  ;;  %v21180_v17 = vpack.c.bf16 %v21173_v32, %v21171_v33 }
 0x13c   : > { %17484 = vmatpush3.bf16.msra.mxu0 %v21155_v28 }
 0x13d   : > { %17486 = vmatprep.subr.bf16.mxu0 %v21169_v37 }
 0x13e   : > { %900 = vxpose.xlu0.b32.cont [11/16] (narrow) %v20976_v19, 64  ;;  %v21191_v19 = vsub.f32 %v21008_v30, %v21036_v39  ;;  %v21215_v30 = vsub.f32 %v21056_v45, %v21069_v48 }
 0x140   : > { %17488 = vmatpush3.bf16.msra.mxu0 %v21169_v37  ;;  %26613 = vst [vmem:[#allocation73_spill] sm:$0xff] %v21191_v19  ;;  %26620 = vst [vmem:[#allocation80_spill] sm:$0xff] %v21215_v30 }
 0x141   : > { %17490 = vmatprep.subr.bf16.mxu0 %v21180_v17 }
 0x142   : > { %901 = vxpose.xlu0.b32.cont [12/16] (narrow) %v20983_v21, 64  ;;  %v21199_v21 = vsub.f32 %v21026_v35, %v21046_v42 }
 0x144   : > { %26615 = vst [vmem:[#allocation75_spill] sm:$0xff] %v21199_v21  ;;  %v21225_v42 = vand.u32 4294901760, %v21199_v21 }
 0x146   : > { %902 = vxpose.xlu0.b32.cont [13/16] (narrow) %v20986_v22, 64  ;;  %v21202_v22 = vand.u32 4294901760, %v21191_v19  ;;  %26622 = vst [vmem:[#allocation82_spill] sm:$0xff] %v21225_v42  ;;  %v1115_v33 = vsub.f32 %v21199_v21, %v21225_v42 }
 0x148   : > { %26616 = vst [vmem:[#allocation76_spill] sm:$0xff] %v21202_v22 }
 0x14a   : > { %903 = vxpose.xlu0.b32.cont [14/16] (narrow) %v20997_v25, 64  ;;  %v21206_v25 = vsub.f32 %v21029_v36, %v21049_v43  ;;  %v1101_v43 = vsub.f32 %v21191_v19, %v21202_v22 }
 0x14c   : > { %26617 = vst [vmem:[#allocation77_spill] sm:$0xff] %v21206_v25  ;;  %v21230_v40 = vand.u32 4294901760, %v21206_v25  ;;  %v21251_v24 = vand.u32 4294901760, %v1101_v43 }
 0x14e   : > { %904 = vxpose.xlu0.b32.cont [15/16] (narrow) %v21000_v26, 64  ;;  %26623 = vst [vmem:[#allocation83_spill] sm:$0xff] %v21230_v40  ;;  %26627 = vst [vmem:[#allocation87_spill] sm:$0xff] %v21251_v24  ;;  %v1122_v23 = vsub.f32 %v21206_v25, %v21230_v40 }
 0x150   : > { %v21284_v53 = vand.u32 4294901760, %v1122_v23 }
 0x152   : > { %905 = vxpose.xlu0.b32.end [16/16] (narrow) %v21003_v27, 64  ;;  %v21211_v27 = vand.u32 4294901760, %v21195_v38  ;;  %26634 = vst [vmem:[#allocation94_spill] sm:$0xff] %v21284_v53 }
 0x154   : > { %26619 = vst [vmem:[#allocation79_spill] sm:$0xff] %v21211_v27  ;;  %v1108_v46 = vsub.f32 %v21195_v38, %v21211_v27 }
 0x156   : > { %v21266_v14 = vand.u32 4294901760, %v1108_v46  ;;  %v21282_v46 = vand.u32 4294901760, %v1115_v33 }
 0x158   : > { %26631 = vst [vmem:[#allocation91_spill] sm:$0xff] %v21266_v14  ;;  %26633 = vst [vmem:[#allocation93_spill] sm:$0xff] %v21282_v46  ;;  %v17493_v33 = vpack.c.bf16 %v21266_v14, %v21251_v24 }
 0x196   : > { %v906_v15 = vpop.trf.xlu0 }
 0x197   : > { %v21208_v26 = vand.u32 4294901760, %v906_v15 }
 0x199   : > { %26618 = vst [vmem:[#allocation78_spill] sm:$0xff] %v21208_v26  ;;  %v21222_v35 = vsub.f32 %v906_v15, %v21208_v26  ;;  %v21238_v15 = vand.u32 4294901760, %v21215_v30 }
 0x19a   : > { %v907_v36 = vpop.trf.xlu0 }
 0x19b   : > { %v21232_v39 = vand.u32 4294901760, %v907_v36  ;;  %v26109_v45 = vand.u32 4294901760, %v21222_v35  ;;  %26625 = vst [vmem:[#allocation85_spill] sm:$0xff] %v21238_v15  ;;  %v1129_v43 = vsub.f32 %v21215_v30, %v21238_v15 }
 0x19d   : > { %26624 = vst [vmem:[#allocation84_spill] sm:$0xff] %v21232_v39  ;;  %v21244_v48 = vsub.f32 %v907_v36, %v21232_v39  ;;  %v1006_v32 = vsub.f32 %v21222_v35, %v26109_v45  ;;  %v21261_v36 = vsub.f32 %v21078_v51, %v21090_v54  ;;  %v21301_v23 = vand.u32 4294901760, %v1129_v43 }
 0x19e   : > { %v908_v31 = vpop.trf.xlu0  ;;  %v21320_v43 = vsub.f32 %v21120_v63, %v21133_v2  ;;  %v17497_v63 = vpack.c.bf16 %v21284_v53, %v21282_v46  ;;  %v1157_v2 = vsub.f32 %v21274_v50, %v21306_v6 }
 0x19f   : > { %26629 = vst [vmem:[#allocation89_spill] sm:$0xff] %v21261_v36  ;;  %v26119_v18 = vand.u32 4294901760, %v21244_v48  ;;  %v21264_v45 = vand.u32 4294901760, %v908_v31  ;;  %v1007_v16 = vand.u32 4294901760, %v1006_v32  ;;  %v21290_v10 = vand.u32 4294901760, %v21261_v36  ;;  %26639 = vst [vmem:[#allocation99_spill] sm:$0xff] %v21301_v23 }
 0x1a0   : > { %26643 = vst [vmem:[#allocation103_spill] sm:$0xff] %v21320_v43 }
 0x1a1   : > { %26630 = vst [vmem:[#allocation90_spill] sm:$0xff] %v21264_v45  ;;  %v21277_v51 = vsub.f32 %v908_v31, %v21264_v45  ;;  %14585 = vmatprep.mubr.f32.mxu0 %v1007_v16  ;;  %v1016_v32 = vsub.f32 %v21244_v48, %v26119_v18  ;;  %26636 = vst [vmem:[#allocation96_spill] sm:$0xff] %v21290_v10  ;;  %v21294_v31 = vsub.f32 %v21096_v56, %v21108_v59 }
 0x1a2   : > { %v909_v54 = vpop.trf.xlu0 }
 0x1a3   : > { %26637 = vst [vmem:[#allocation97_spill] sm:$0xff] %v21294_v31  ;;  %v26126_v16 = vand.u32 4294901760, %v21277_v51  ;;  %v21297_v55 = vand.u32 4294901760, %v909_v54  ;;  %v1017_v18 = vand.u32 4294901760, %v1016_v32  ;;  %v21316_v32 = vsub.f32 %v21111_v60, %v21125_v0 }
 0x1a4   : > { %v21328_v59 = vand.u32 4294901760, %v21294_v31 }
 0x1a5   : > { %26638 = vst [vmem:[#allocation98_spill] sm:$0xff] %v21297_v55  ;;  %v21309_v4 = vsub.f32 %v909_v54, %v21297_v55  ;;  %14586 = vmatmul.mubr.f32.vlgmr.msra.gmra.mrb[0].mxu0 %v1017_v18  ;;  %v1026_v56 = vsub.f32 %v21277_v51, %v26126_v16  ;;  %26642 = vst [vmem:[#allocation102_spill] sm:$0xff] %v21316_v32  ;;  %v1143_v54 = vsub.f32 %v21257_v20, %v21287_v11 }
 0x1a6   : > { %17492 = vmatpush3.bf16.msra.mxu0 %v21180_v17  ;;  %v910_v12 = vpop.trf.xlu0  ;;  %v1150_v18 = vsub.f32 %v21261_v36, %v21290_v10  ;;  %26644 = vst [vmem:[#allocation104_spill] sm:$0xff] %v21328_v59  ;;  %v17501_v17 = vpack.c.bf16 %v21303_v57, %v21301_v23  ;;  %v21346_v3 = vand.u32 4294901760, %v21316_v32 }
 0x1a7   : > { %v26137_v16 = vand.u32 4294901760, %v21309_v4  ;;  %v21331_v60 = vand.u32 4294901760, %v910_v12  ;;  %17494 = vmatprep.subr.bf16.mxu0 %v17493_v33  ;;  %v1027_v0 = vand.u32 4294901760, %v1026_v56  ;;  %v21349_v56 = vand.u32 4294901760, %v21320_v43 }
 0x1a8   : > { %26646 = vst [vmem:[#allocation106_spill] sm:$0xff] %v21346_v3  ;;  %v21351_v57 = vand.u32 4294901760, %v1143_v54  ;;  %v21353_v23 = vand.u32 4294901760, %v1150_v18 }
 0x1a9   : > { %26645 = vst [vmem:[#allocation105_spill] sm:$0xff] %v21331_v60  ;;  %v21340_v14 = vsub.f32 %v910_v12, %v21331_v60  ;;  %14588 = vmatprep.mubr.f32.mxu0 %v1027_v0  ;;  %v1036_v24 = vsub.f32 %v21309_v4, %v26137_v16  ;;  %26647 = vst [vmem:[#allocation107_spill] sm:$0xff] %v21349_v56  ;;  %v1164_v12 = vsub.f32 %v21294_v31, %v21328_v59 }
 0x1aa   : > { %17496 = vmatpush3.bf16.msra.mxu0 %v17493_v33  ;;  %v911_v53 = vpop.trf.xlu0  ;;  %26648 = vst [vmem:[#allocation108_spill] sm:$0xff] %v21351_v57  ;;  %26649 = vst [vmem:[#allocation109_spill] sm:$0xff] %v21353_v23  ;;  %v21359_v0 = vsub.f32 %v21136_v5, %v21150_v13  ;;  %v21366_v33 = vsub.f32 %v21145_v9, %v21158_v29  ;;  %v21374_v5 = vand.u32 4294901760, %v1157_v2 }
 0x1ab   : > { %v26145_v16 = vand.u32 4294901760, %v21340_v14  ;;  %v21362_v46 = vand.u32 4294901760, %v911_v53  ;;  %17498 = vmatprep.subr.bf16.mxu0 %v17497_v63  ;;  %v1037_v6 = vand.u32 4294901760, %v1036_v24  ;;  %v1171_v13 = vsub.f32 %v21316_v32, %v21346_v3 }
 0x1ac   : > { %26650 = vst [vmem:[#allocation110_spill] sm:$0xff] %v21359_v0  ;;  %26652 = vst [vmem:[#allocation112_spill] sm:$0xff] %v21366_v33  ;;  %v17505_v24 = vpack.c.bf16 %v21353_v23, %v21351_v57  ;;  %v21380_v9 = vand.u32 4294901760, %v1164_v12 }
 0x1ad   : > { %26651 = vst [vmem:[#allocation111_spill] sm:$0xff] %v21362_v46  ;;  %v21369_v54 = vsub.f32 %v911_v53, %v21362_v46  ;;  %14589 = vmatmul.mubr.f32.gmra.mrb[2].mxu0 %v1037_v6  ;;  %v1046_v18 = vsub.f32 %v21340_v14, %v26145_v16  ;;  %26653 = vst [vmem:[#allocation113_spill] sm:$0xff] %v21374_v5  ;;  %v1178_v53 = vsub.f32 %v21320_v43, %v21349_v56 }
 0x1ae   : > { %17500 = vmatpush3.bf16.msra.mxu0 %v17497_v63  ;;  %v912_v59 = vpop.trf.xlu0  ;;  %26654 = vst [vmem:[#allocation114_spill] sm:$0xff] %v21380_v9  ;;  %v21385_v6 = vand.u32 4294901760, %v21359_v0  ;;  %v21391_v63 = vand.u32 4294901760, %v21366_v33  ;;  %v17509_v57 = vpack.c.bf16 %v21380_v9, %v21374_v5  ;;  %v21401_v56 = vand.u32 4294901760, %v1171_v13 }
 0x1af   : > { %v26158_v16 = vand.u32 4294901760, %v21369_v54  ;;  %v21388_v2 = vand.u32 4294901760, %v912_v59  ;;  %17502 = vmatprep.subr.bf16.mxu0 %v17501_v17  ;;  %v1047_v29 = vand.u32 4294901760, %v1046_v18  ;;  %v21403_v10 = vand.u32 4294901760, %v1178_v53 }
 0x1b0   : > { %26655 = vst [vmem:[#allocation115_spill] sm:$0xff] %v21385_v6  ;;  %26657 = vst [vmem:[#allocation117_spill] sm:$0xff] %v21391_v63  ;;  %v1185_v18 = vsub.f32 %v21359_v0, %v21385_v6 }
 0x1b1   : > { %26656 = vst [vmem:[#allocation116_spill] sm:$0xff] %v21388_v2  ;;  %v21394_v3 = vsub.f32 %v912_v59, %v21388_v2  ;;  %14591 = vmatprep.mubr.f32.mxu0 %v1047_v29  ;;  %v1056_v12 = vsub.f32 %v21369_v54, %v26158_v16  ;;  %26658 = vst [vmem:[#allocation118_spill] sm:$0xff] %v21401_v56  ;;  %v17513_v53 = vpack.c.bf16 %v21403_v10, %v21401_v56 }
 0x1b2   : > { %17504 = vmatpush3.bf16.msra.mxu0 %v17501_v17  ;;  %v913_v23 = vpop.trf.xlu0  ;;  %26659 = vst [vmem:[#allocation119_spill] sm:$0xff] %v21403_v10  ;;  %v1192_v17 = vsub.f32 %v21366_v33, %v21391_v63 }
 0x1b3   : > { %v26163_v59 = vand.u32 4294901760, %v21394_v3  ;;  %v21408_v11 = vand.u32 4294901760, %v913_v23  ;;  %17506 = vmatprep.subr.bf16.mxu0 %v17505_v24  ;;  %v1057_v29 = vand.u32 4294901760, %v1056_v12  ;;  %v21421_v12 = vand.u32 4294901760, %v1185_v18 }
 0x1b4   : > { %v21423_v6 = vand.u32 4294901760, %v1192_v17  ;;  %v17521_v18 = vpack.c.bf16 %v21117_v62, %v21114_v61  ;;  %v1880_v17 = vld [vmem:[#allocation5] sm:$0xff]  ;;  %v21455_v61 = vld [vmem:[#allocation5 + $0x28] sm:$0xff] }
 0x1b5   : > { %26660 = vst [vmem:[#allocation120_spill] sm:$0xff] %v21408_v11  ;;  %v21413_v16 = vsub.f32 %v913_v23, %v21408_v11  ;;  %14592 = vmatmul.mubr.f32.gmra.mrb[4].mxu0 %v1057_v29  ;;  %v1066_v13 = vsub.f32 %v21394_v3, %v26163_v59  ;;  %26661 = vst [vmem:[#allocation121_spill] sm:$0xff] %v21421_v12 }
 0x1b6   : > { %17508 = vmatpush3.bf16.msra.mxu0 %v17505_v24  ;;  %26662 = vst [vmem:[#allocation122_spill] sm:$0xff] %v21423_v6  ;;  %v17517_v24 = vpack.c.bf16 %v21423_v6, %v21421_v12  ;;  %v26175_v12 = vand.u32 4294901760, %v21455_v61 }
 0x1b7   : > { %v26164_v9 = vand.u32 4294901760, %v21413_v16  ;;  %17510 = vmatprep.subr.bf16.mxu0 %v17509_v57  ;;  %v1067_v5 = vand.u32 4294901760, %v1066_v13  ;;  %v1897_v13 = vand.u32 4294901760, %v1880_v17 }
 0x1b9   : > { %14594 = vmatprep.mubr.f32.mxu0 %v1067_v5  ;;  %v1076_v23 = vsub.f32 %v21413_v16, %v26164_v9  ;;  %v1881_v5 = vld [vmem:[#allocation5 + $0x8] sm:$0xff] }
 0x1ba   : > { %17512 = vmatpush3.bf16.msra.mxu0 %v17509_v57  ;;  %v1900_v59 = vand.u32 4294901760, %v1881_v5  ;;  %v17525_v57 = vpack.c.bf16 %v21195_v38, %v21191_v19  ;;  %v17529_v38 = vpack.c.bf16 %v21206_v25, %v21199_v21  ;;  %v21453_v19 = vld [vmem:[#allocation5 + $0x20] sm:$0xff]  ;;  %v21471_v25 = vld [vmem:[#allocation5 + $0x30] sm:$0xff]  ;;  %v21473_v21 = vld [vmem:[#allocation5 + $0x38] sm:$0xff] }
 0x1bb   : > { %17514 = vmatprep.subr.bf16.mxu0 %v17513_v53  ;;  %v1077_v29 = vand.u32 4294901760, %v1076_v23  ;;  %v21437_v23 = vld [vmem:[#allocation5 + $0x10] sm:$0xff]  ;;  %v26176_v6 = vand.u32 4294901760, %v21453_v19  ;;  %v26181_v10 = vand.u32 4294901760, %v21471_v25 }
 0x1bc   : > { %v21433_v9 = vpack.c.bf16 %v1900_v59, %v1897_v13 }
 0x1bd   : > { %14595 = vmatmul.mubr.f32.gmra.mrb[6].mxu0 %v1077_v29  ;;  %v1903_v29 = vand.u32 4294901760, %v21437_v23 }
 0x1be   : > { %17516 = vmatpush3.bf16.msra.mxu0 %v17513_v53  ;;  %14629 = vmatprep.mubr.f32.mxu0 %v21208_v26  ;;  %26663 = vst [vmem:[#allocation123_spill] sm:$0xff] %v21433_v9  ;;  %v21439_v53 = vld [vmem:[#allocation5 + $0x18] sm:$0xff] }
 0x1bf   : > { %17518 = vmatprep.subr.bf16.mxu0 %v17517_v24  ;;  %17650 = vmatprep.subr.bf16.mxu1 %v21433_v9  ;;  %v26171_v62 = vand.u32 4294901760, %v21439_v53 }
 0x1c0   : > { %17652 = vmatpush3.bf16.msra.mxu1 %v21433_v9 }
 0x1c2   : > { %17520 = vmatpush3.bf16.msra.mxu0 %v17517_v24  ;;  %v21449_v24 = vpack.c.bf16 %v26171_v62, %v1903_v29  ;;  %v17533_v62 = vpack.c.bf16 %v21219_v34, %v21215_v30  ;;  %v21489_v34 = vld [vmem:[#allocation5 + $0x40] sm:$0xff]  ;;  %v21491_v30 = vld [vmem:[#allocation5 + $0x48] sm:$0xff] }
 0x1c3   : > { %17522 = vmatprep.subr.bf16.mxu0 %v17521_v18  ;;  %v26195_v56 = vand.u32 4294901760, %v21489_v34 }
 0x1c4   : > { %26664 = vst [vmem:[#allocation124_spill] sm:$0xff] %v21449_v24  ;;  %17654 = vmatprep.subr.bf16.mxu1 %v21449_v24 }
 0x1c5   : > { %14630 = vmatmul.mubr.f32.vlgmr.msra.gmra.mrb[0].mxu0 %v21232_v39  ;;  %17656 = vmatpush3.bf16.msra.mxu1 %v21449_v24 }
 0x1c6   : > { %14632 = vmatprep.mubr.f32.mxu0 %v21264_v45  ;;  %17524 = vmatpush3.bf16.msra.mxu0 %v17521_v18  ;;  %v21467_v18 = vpack.c.bf16 %v26175_v12, %v26176_v6  ;;  %v17537_v6 = vpack.c.bf16 %v21261_v36, %v21257_v20  ;;  %v21505_v36 = vsub.f32 %v1880_v17, %v1897_v13  ;;  %v21521_v13 = vld [vmem:[#allocation5 + $0x70] sm:$0xff]  ;;  %v867_v17 = vld [vmem:[%s21526_s29 + $0x8] sm:$0xff] }
 0x1c7   : > { %17526 = vmatprep.subr.bf16.mxu0 %v17525_v57  ;;  %v21507_v20 = vsub.f32 %v1881_v5, %v1900_v59  ;;  %v21531_v5 = vld [vmem:[#allocation5 + $0x78] sm:$0xff] }
 0x1c8   : > { %26665 = vst [vmem:[#allocation125_spill] sm:$0xff] %v21467_v18  ;;  %17658 = vmatprep.subr.bf16.mxu1 %v21467_v18 }
 0x1c9   : > { %14633 = vmatmul.mubr.f32.gmra.mrb[2].mxu0 %v21297_v55  ;;  %17660 = vmatpush3.bf16.msra.mxu1 %v21467_v18  ;;  %v21518_v18 = vld [vmem:[#allocation5 + $0x68] sm:$0xff] }
 0x1ca   : > { %14635 = vmatprep.mubr.f32.mxu0 %v21331_v60  ;;  %17528 = vmatpush3.bf16.msra.mxu0 %v17525_v57  ;;  %v26180_v57 = vand.u32 4294901760, %v21473_v21 }
 0x1cb   : > { %17530 = vmatprep.subr.bf16.mxu0 %v17529_v38 }
 0x1cc   : > { %v21485_v12 = vpack.c.bf16 %v26180_v57, %v26181_v10  ;;  %v21498_v57 = vld [vmem:[#allocation5 + $0x50] sm:$0xff]  ;;  %v21500_v10 = vld [vmem:[#allocation5 + $0x58] sm:$0xff] }
 0x1cd   : > { %14636 = vmatmul.mubr.f32.gmra.mrb[4].mxu0 %v21362_v46  ;;  %v21537_v46 = vsub.f32 %v21437_v23, %v1903_v29  ;;  %v26669_v60 = vand.u32 4294901760, %v21500_v10  ;;  %v26672_v29 = vand.u32 4294901760, %v21518_v18 }
 0x1ce   : > { %14638 = vmatprep.mubr.f32.mxu0 %v21388_v2  ;;  %17532 = vmatpush3.bf16.msra.mxu0 %v17529_v38  ;;  %26666 = vst [vmem:[#allocation126_spill] sm:$0xff] %v21485_v12  ;;  %v26194_v38 = vand.u32 4294901760, %v21491_v30  ;;  %v21502_v2 = vld [vmem:[#allocation5 + $0x60] sm:$0xff] }
 0x1cf   : > { %17534 = vmatprep.subr.bf16.mxu0 %v17533_v62  ;;  %17662 = vmatprep.subr.bf16.mxu1 %v21485_v12  ;;  %v26671_v23 = vand.u32 4294901760, %v21502_v2 }
 0x1d0   : > { %17664 = vmatpush3.bf16.msra.mxu1 %v21485_v12  ;;  %v26204_v12 = vand.u32 4294901760, %v21498_v57 }
 0x1d1   : > { %14639 = vmatmul.mubr.f32.gmra.mrb[6].mxu0 %v21408_v11  ;;  %v21514_v11 = vpack.c.bf16 %v26194_v38, %v26195_v56  ;;  %v866_v38 = vld [vmem:[%s21526_s29] sm:$0xff]  ;;  %v17545_v56 = vpack.c.bf16 %v21320_v43, %v21316_v32  ;;  %v21558_v24 = vpack.c.bf16 %v26672_v29, %v26671_v23  ;;  %v17549_v29 = vpack.c.bf16 %v21366_v33, %v21359_v0 }
 0x1d2   : > { %17536 = vmatpush3.bf16.msra.mxu0 %v17533_v62  ;;  %14673 = vmatprep.mubr.f32.mxu0 %v21222_v35  ;;  %v17541_v62 = vpack.c.bf16 %v21294_v31, %v21274_v50  ;;  %v21544_v55 = vpack.c.bf16 %v26669_v60, %v26204_v12  ;;  %v21546_v31 = vand.u32 4294901760, %v866_v38  ;;  %v21549_v50 = vand.u32 4294901760, %v867_v17 }
 0x1d3   : > { %26667 = vst [vmem:[#allocation127_spill] sm:$0xff] %v21514_v11  ;;  %17538 = vmatprep.subr.bf16.mxu0 %v17537_v6  ;;  %17666 = vmatprep.subr.bf16.mxu1 %v21514_v11  ;;  %26673 = vst [vmem:[#allocation129_spill] sm:$0xff] %v21558_v24  ;;  %v26674_v12 = vand.u32 4294901760, %v21505_v36  ;;  %v26680_v33 = vand.u32 4294901760, %v21455_v61 }
 0x1d4   : > { %26670 = vst [vmem:[#allocation128_spill] sm:$0xff] %v21544_v55  ;;  %17668 = vmatpush3.bf16.msra.mxu1 %v21514_v11  ;;  %v21567_v32 = vsub.f32 %v866_v38, %v21546_v31  ;;  %v26676_v11 = vand.u32 4294901760, %v21507_v20  ;;  %v21573_v23 = vsub.f32 %v867_v17, %v21549_v50  ;;  %v26679_v38 = vand.u32 4294901760, %v21453_v19 }
 0x1d5   : > { %v2061_v59 = vsub.f32 %v21505_v36, %v26674_v12  ;;  %17670 = vmatprep.subr.bf16.mxu1 %v21544_v55  ;;  %v26678_v12 = vand.u32 4294901760, %v21439_v53 }
 0x1d6   : > { %17540 = vmatpush3.bf16.msra.mxu0 %v17537_v6  ;;  %26675 = vst [vmem:[#allocation130_spill] sm:$0xff] %v21567_v32  ;;  %v2068_v45 = vsub.f32 %v21507_v20, %v26676_v11  ;;  %26677 = vst [vmem:[#allocation131_spill] sm:$0xff] %v21573_v23  ;;  %v21586_v60 = vsub.f32 %v21453_v19, %v26679_v38  ;;  %v868_v11 = vld [vmem:[%s21526_s29 + $0x10] sm:$0xff]  ;;  %v26217_v17 = vand.u32 4294901760, %v21567_v32  ;;  %v26681_v19 = vand.u32 4294901760, %v21471_v25 }
 0x1d7   : > { %17542 = vmatprep.subr.bf16.mxu0 %v17541_v62  ;;  %v21581_v43 = vsub.f32 %v21439_v53, %v26678_v12  ;;  %v2062_v39 = vand.u32 4294901760, %v2061_v59  ;;  %v21594_v6 = vsub.f32 %v21455_v61, %v26680_v33  ;;  %v26682_v59 = vand.u32 4294901760, %v21521_v13 }
 0x1d8   : > { %17672 = vmatpush3.bf16.msra.mxu1 %v21544_v55  ;;  %v2069_v53 = vand.u32 4294901760, %v2068_v45  ;;  %v21602_v38 = vsub.f32 %v21471_v25, %v26681_v19  ;;  %v26683_v61 = vand.u32 4294901760, %v21531_v5  ;;  %v1980_v45 = vsub.f32 %v21567_v32, %v26217_v17 }
 0x1d9   : > { %v26224_v12 = vand.u32 4294901760, %v21581_v43  ;;  %17674 = vmatprep.subr.bf16.mxu1 %v21558_v24  ;;  %v21615_v9 = vand.u32 4294901760, %v868_v11  ;;  %v26686_v25 = vand.u32 4294901760, %v21537_v46  ;;  %v26688_v55 = vand.u32 4294901760, %v21573_v23 }
 0x1da   : > { %17544 = vmatpush3.bf16.msra.mxu0 %v17541_v62  ;;  %v21609_v33 = vpack.c.bf16 %v26683_v61, %v26682_v59  ;;  %v26687_v61 = vand.u32 4294901760, %v21473_v21  ;;  %v1981_v0 = vand.u32 4294901760, %v1980_v45  ;;  %v26689_v32 = vand.u32 4294901760, %v21489_v34 }
 0x1db   : > { %26685 = vst [vmem:[#allocation133_spill] sm:$0xff] %v21615_v9  ;;  %17546 = vmatprep.subr.bf16.mxu0 %v17545_v56  ;;  %v2075_v62 = vsub.f32 %v21537_v46, %v26686_v25  ;;  %v2082_v19 = vsub.f32 %v21581_v43, %v26224_v12  ;;  %v1990_v63 = vsub.f32 %v21573_v23, %v26688_v55  ;;  %v26690_v59 = vand.u32 4294901760, %v21586_v60  ;;  %v870_v23 = vld [vmem:[%s21526_s29 + $0x20] sm:$0xff] }
 0x1dc   : > { %26684 = vst [vmem:[#allocation132_spill] sm:$0xff] %v21609_v33  ;;  %v21627_v17 = vsub.f32 %v21473_v21, %v26687_v61  ;;  %v21635_v25 = vsub.f32 %v21489_v34, %v26689_v32  ;;  %17676 = vmatpush3.bf16.msra.mxu1 %v21558_v24  ;;  %v17681_v12 = vpack.c.bf16 %v2069_v53, %v2062_v39  ;;  %v26691_v55 = vand.u32 4294901760, %v21594_v6  ;;  %v869_v53 = vld [vmem:[%s21526_s29 + $0x18] sm:$0xff] }
 0x1dd   : > { %v2089_v26 = vsub.f32 %v21586_v60, %v26690_v59  ;;  %17678 = vmatprep.subr.bf16.mxu1 %v21609_v33  ;;  %v26692_v34 = vand.u32 4294901760, %v21491_v30  ;;  %v21652_v39 = vsub.f32 %v868_v11, %v21615_v9  ;;  %14849 = vmatprep.mubr.f32.mxu1 %v1981_v0  ;;  %v2076_v59 = vand.u32 4294901760, %v2075_v62 }
 0x1de   : > { %17548 = vmatpush3.bf16.msra.mxu0 %v17545_v56  ;;  %v2096_v45 = vsub.f32 %v21594_v6, %v26691_v55  ;;  %v2083_v61 = vand.u32 4294901760, %v2082_v19  ;;  %v26694_v56 = vand.u32 4294901760, %v21602_v38  ;;  %v26695_v24 = vand.u32 4294901760, %v21498_v57 }
 0x1df   : > { %v21649_v32 = vsub.f32 %v21491_v30, %v26692_v34  ;;  %26693 = vst [vmem:[#allocation134_spill] sm:$0xff] %v21652_v39  ;;  %17550 = vmatprep.subr.bf16.mxu0 %v17549_v29  ;;  %v1991_v30 = vand.u32 4294901760, %v1990_v63  ;;  %v26696_v34 = vand.u32 4294901760, %v21627_v17  ;;  %v26237_v0 = vand.u32 4294901760, %v21652_v39 }
 0x1e0   : > { %v2103_v21 = vsub.f32 %v21602_v38, %v26694_v56  ;;  %v21661_v55 = vsub.f32 %v21498_v57, %v26695_v24  ;;  %17680 = vmatpush3.bf16.msra.mxu1 %v21609_v33  ;;  %v26697_v24 = vand.u32 4294901760, %v21500_v10  ;;  %v21677_v63 = vand.u32 4294901760, %v869_v53 }
 0x1e1   : > { %v2110_v11 = vsub.f32 %v21627_v17, %v26696_v34  ;;  %17682 = vmatprep.subr.bf16.mxu1 %v17681_v12  ;;  %v2090_v56 = vand.u32 4294901760, %v2089_v26  ;;  %v2097_v34 = vand.u32 4294901760, %v2096_v45  ;;  %v2000_v49 = vsub.f32 %v21652_v39, %v26237_v0 }
 0x1e2   : > { %v21675_v57 = vsub.f32 %v21500_v10, %v26697_v24  ;;  %26698 = vst [vmem:[#allocation135_spill] sm:$0xff] %v21677_v63  ;;  %17552 = vmatpush3.bf16.msra.mxu0 %v17549_v29  ;;  %v21682_v33 = vand.u32 4294901760, %v870_v23  ;;  %v17685_v19 = vpack.c.bf16 %v2083_v61, %v2076_v59  ;;  %v2104_v62 = vand.u32 4294901760, %v2103_v21  ;;  %v871_v29 = vld [vmem:[%s21526_s29 + $0x28] sm:$0xff]  ;;  %v872_v21 = vld [vmem:[%s21526_s29 + $0x30] sm:$0xff] }
 0x1e3   : > { %17554 = vmatprep.subr.bf16.mxu0 %v21043_v41  ;;  %v21687_v24 = vsub.f32 %v869_v53, %v21677_v63  ;;  %14850 = vmatmul.mubr.f32.vlgmr.msra.gmra.mrb[0].mxu1 %v1991_v30  ;;  %v26701_v26 = vand.u32 4294901760, %v21635_v25  ;;  %v2001_v15 = vand.u32 4294901760, %v2000_v49  ;;  %v26703_v39 = vand.u32 4294901760, %v21502_v2 }
 0x1e4   : > { %26699 = vst [vmem:[#allocation136_spill] sm:$0xff] %v21682_v33  ;;  %v26244_v10 = vand.u32 4294901760, %v21675_v57  ;;  %v21694_v0 = vsub.f32 %v870_v23, %v21682_v33  ;;  %17684 = vmatpush3.bf16.msra.mxu1 %v17681_v12  ;;  %v2111_v53 = vand.u32 4294901760, %v2110_v11  ;;  %v26704_v61 = vand.u32 4294901760, %v21649_v32 }
 0x1e5   : > { %26700 = vst [vmem:[#allocation137_spill] sm:$0xff] %v21687_v24  ;;  %v2117_v45 = vsub.f32 %v21635_v25, %v26701_v26  ;;  %v21699_v59 = vsub.f32 %v21502_v2, %v26703_v39  ;;  %14674 = vmatmul.mubr.f32.vlgmr.msra.gmra.mrb[0].mxu0 %v21244_v48  ;;  %v26705_v26 = vand.u32 4294901760, %v21661_v55  ;;  %v26249_v23 = vand.u32 4294901760, %v21687_v24  ;;  %17686 = vmatprep.subr.bf16.mxu1 %v17685_v19 }
 0x1e6   : > { %26702 = vst [vmem:[#allocation138_spill] sm:$0xff] %v21694_v0  ;;  %v2124_v30 = vsub.f32 %v21649_v32, %v26704_v61  ;;  %14676 = vmatprep.mubr.f32.mxu0 %v21277_v51  ;;  %17556 = vmatpush3.bf16.msra.mxu0 %v21043_v41  ;;  %v2138_v2 = vsub.f32 %v21675_v57, %v26244_v10  ;;  %v26706_v39 = vand.u32 4294901760, %v21518_v18  ;;  %v21721_v61 = vand.u32 4294901760, %v871_v29 }
 0x1e7   : > { %v2131_v49 = vsub.f32 %v21661_v55, %v26705_v26  ;;  %17558 = vmatprep.subr.bf16.mxu0 %v21053_v44  ;;  %v17689_v26 = vpack.c.bf16 %v2097_v34, %v2090_v56  ;;  %v2010_v41 = vsub.f32 %v21687_v24, %v26249_v23  ;;  %v21728_v10 = vand.u32 4294901760, %v872_v21  ;;  %14852 = vmatprep.mubr.f32.mxu1 %v2001_v15  ;;  %v873_v34 = vld [vmem:[%s21526_s29 + $0x38] sm:$0xff] }
 0x1e8   : > { %v21719_v11 = vsub.f32 %v21518_v18, %v26706_v39  ;;  %v2118_v12 = vand.u32 4294901760, %v2117_v45  ;;  %v26707_v63 = vand.u32 4294901760, %v21694_v0  ;;  %v21734_v39 = vsub.f32 %v871_v29, %v21721_v61  ;;  %17688 = vmatpush3.bf16.msra.mxu1 %v17685_v19 }
 0x1e9   : > { %v26709_v9 = vand.u32 4294901760, %v21521_v13  ;;  %14677 = vmatmul.mubr.f32.gmra.mrb[2].mxu0 %v21309_v4  ;;  %v17693_v23 = vpack.c.bf16 %v2111_v53, %v2104_v62  ;;  %v2125_v33 = vand.u32 4294901760, %v2124_v30  ;;  %v2011_v45 = vand.u32 4294901760, %v2010_v41  ;;  %17690 = vmatprep.subr.bf16.mxu1 %v17689_v26 }
 0x1ea   : > { %v2020_v18 = vsub.f32 %v21694_v0, %v26707_v63  ;;  %26708 = vst [vmem:[#allocation139_spill] sm:$0xff] %v21734_v39  ;;  %v21744_v15 = vsub.f32 %v872_v21, %v21728_v10  ;;  %14679 = vmatprep.mubr.f32.mxu0 %v21340_v14  ;;  %17560 = vmatpush3.bf16.msra.mxu0 %v21053_v44  ;;  %v2132_v63 = vand.u32 4294901760, %v2131_v49  ;;  %v2139_v29 = vand.u32 4294901760, %v2138_v2 }
 0x1eb   : > { %v21739_v56 = vsub.f32 %v21521_v13, %v26709_v9  ;;  %v2151_v0 = vand.u32 4294901760, %v21719_v11  ;;  %v26252_v9 = vand.u32 4294901760, %v21734_v39  ;;  %17562 = vmatprep.subr.bf16.mxu0 %v21066_v47  ;;  %v26711_v13 = vand.u32 4294901760, %v21699_v59  ;;  %14853 = vmatmul.mubr.f32.gmra.mrb[2].mxu1 %v2011_v45 }
 0x1ec   : > { %26710 = vst [vmem:[#allocation140_spill] sm:$0xff] %v21744_v15  ;;  %v26255_v62 = vand.u32 4294901760, %v21744_v15  ;;  %v26712_v19 = vand.u32 4294901760, %v21531_v5  ;;  %v21760_v53 = vand.u32 4294901760, %v873_v34  ;;  %v2021_v30 = vand.u32 4294901760, %v2020_v18  ;;  %17692 = vmatpush3.bf16.msra.mxu1 %v17689_v26 }
 0x1ed   : > { %v2145_v41 = vsub.f32 %v21699_v59, %v26711_v13  ;;  %v2030_v49 = vsub.f32 %v21734_v39, %v26252_v9  ;;  %v2158_v2 = vand.u32 4294901760, %v21739_v56  ;;  %14680 = vmatmul.mubr.f32.gmra.mrb[4].mxu0 %v21369_v54  ;;  %v2152_v18 = vsub.f32 %v21719_v11, %v2151_v0  ;;  %17694 = vmatprep.subr.bf16.mxu1 %v17693_v23 }
 0x1ee   : > { %v21758_v21 = vsub.f32 %v21531_v5, %v26712_v19  ;;  %v2040_v13 = vsub.f32 %v21744_v15, %v26255_v62  ;;  %v21772_v19 = vsub.f32 %v873_v34, %v21760_v53  ;;  %14682 = vmatprep.mubr.f32.mxu0 %v21394_v3  ;;  %17564 = vmatpush3.bf16.msra.mxu0 %v21066_v47  ;;  %v26713_v24 = vand.u32 4294901760, %v21505_v36 }
 0x1ef   : > { %17566 = vmatprep.subr.bf16.mxu0 %v21084_v52  ;;  %v17697_v45 = vpack.c.bf16 %v2125_v33, %v2118_v12  ;;  %v17701_v26 = vpack.c.bf16 %v2139_v29, %v2132_v63  ;;  %v2146_v9 = vand.u32 4294901760, %v2145_v41  ;;  %14855 = vmatprep.mubr.f32.mxu1 %v2021_v30  ;;  %v2031_v62 = vand.u32 4294901760, %v2030_v49 }
 0x1f0   : > { %v2165_v5 = vand.u32 4294901760, %v21758_v21  ;;  %v26264_v39 = vand.u32 4294901760, %v21772_v19  ;;  %v2159_v15 = vsub.f32 %v21739_v56, %v2158_v2  ;;  %v26714_v47 = vand.u32 4294901760, %v21507_v20  ;;  %17696 = vmatpush3.bf16.msra.mxu1 %v17693_v23 }
 0x1f1   : > { %14683 = vmatmul.mubr.f32.gmra.mrb[6].mxu0 %v21413_v16  ;;  %v2041_v33 = vand.u32 4294901760, %v2040_v13  ;;  %v26716_v63 = vand.u32 4294901760, %v21537_v46  ;;  %v26717_v29 = vand.u32 4294901760, %v21581_v43  ;;  %v26719_v30 = vand.u32 4294901760, %v21586_v60  ;;  %17698 = vmatprep.subr.bf16.mxu1 %v17697_v45 }
 0x1f2   : > { %v2166_v34 = vsub.f32 %v21758_v21, %v2165_v5  ;;  %v21785_v44 = vpack.c.bf16 %v26714_v47, %v26713_v24  ;;  %v2050_v12 = vsub.f32 %v21772_v19, %v26264_v39  ;;  %v26720_v49 = vand.u32 4294901760, %v21594_v6  ;;  %17568 = vmatpush3.bf16.msra.mxu0 %v21084_v52  ;;  %14856 = vmatmul.mubr.f32.gmra.mrb[4].mxu1 %v2031_v62 }
 0x1f3   : > { %v21795_v41 = vpack.c.bf16 %v26717_v29, %v26716_v63  ;;  %v26722_v24 = vand.u32 4294901760, %v21222_v35  ;;  %v2153_v23 = vand.u32 4294901760, %v2152_v18  ;;  %v26723_v13 = vand.u32 4294901760, %v21602_v38  ;;  %17570 = vmatprep.subr.bf16.mxu0 %v21105_v58  ;;  %14858 = vmatprep.mubr.f32.mxu1 %v2041_v33 }
 0x1f4   : > { %26715 = vst [vmem:[#allocation141_spill] sm:$0xff] %v21785_v44  ;;  %v21801_v47 = vpack.c.bf16 %v26720_v49, %v26719_v30  ;;  %v26724_v39 = vand.u32 4294901760, %v21627_v17  ;;  %v26725_v63 = vand.u32 4294901760, %v21635_v25  ;;  %v26726_v29 = vand.u32 4294901760, %v21649_v32  ;;  %17700 = vmatpush3.bf16.msra.mxu1 %v17697_v45 }
 0x1f5   : > { %26718 = vst [vmem:[#allocation142_spill] sm:$0xff] %v21795_v41  ;;  %14717 = vmatprep.mubr.f32.mxu0 %v26722_v24  ;;  %v26727_v30 = vand.u32 4294901760, %v21661_v55  ;;  %v26728_v49 = vand.u32 4294901760, %v21675_v57  ;;  %v26729_v35 = vand.u32 4294901760, %v21699_v59  ;;  %v2051_v24 = vand.u32 4294901760, %v2050_v12  ;;  %17702 = vmatprep.subr.bf16.mxu1 %v17701_v26  ;;  %v26737_v12 = vld [vmem:[#allocation135_spill] sm:$0xff] }
 0x1f6   : > { %26721 = vst [vmem:[#allocation143_spill] sm:$0xff] %v21801_v47  ;;  %v21810_v44 = vpack.c.bf16 %v26724_v39, %v26723_v13  ;;  %v21816_v41 = vpack.c.bf16 %v26726_v29, %v26725_v63  ;;  %v21829_v39 = vpack.c.bf16 %v2165_v5, %v2158_v2  ;;  %17572 = vmatpush3.bf16.msra.mxu0 %v21105_v58  ;;  %v2160_v63 = vand.u32 4294901760, %v2159_v15 }
 0x1f7   : > { %v21822_v47 = vpack.c.bf16 %v26728_v49, %v26727_v30  ;;  %v21827_v18 = vpack.c.bf16 %v2151_v0, %v26729_v35  ;;  %v17705_v13 = vpack.c.bf16 %v2153_v23, %v2146_v9  ;;  %v2167_v29 = vand.u32 4294901760, %v2166_v34  ;;  %17574 = vmatprep.subr.bf16.mxu0 %v21130_v1  ;;  %14859 = vmatmul.mubr.f32.gmra.mrb[6].mxu1 %v2051_v24  ;;  %v26742_v49 = vld [vmem:[#allocation136_spill] sm:$0xff] }
 0x1f8   : > { %17704 = vmatpush3.bf16.msra.mxu1 %v17701_v26  ;;  %14893 = vmatprep.mubr.f32.mxu1 %v21546_v31  ;;  %v17713_v15 = vpack.c.bf16 %v21507_v20, %v21505_v36  ;;  %v17585_v9 = vpack.c.bf16 %v21142_v8, %v21139_v7  ;;  %v17589_v62 = vpack.c.bf16 %v21211_v27, %v21202_v22  ;;  %v26730_v20 = vand.u32 4294901760, %v21244_v48  ;;  %v26732_v26 = vld [vmem:[#allocation133_spill] sm:$0xff]  ;;  %v26746_v35 = vld [vmem:[#allocation104_spill] sm:$0xff] }
 0x1f9   : > { %17706 = vmatprep.subr.bf16.mxu1 %v17705_v13  ;;  %v17709_v0 = vpack.c.bf16 %v2167_v29, %v2160_v63  ;;  %v17717_v2 = vpack.c.bf16 %v21581_v43, %v21537_v46  ;;  %v26731_v36 = vand.u32 4294901760, %v21277_v51  ;;  %v17593_v5 = vpack.c.bf16 %v21230_v40, %v21225_v42  ;;  %v26735_v51 = vld [vmem:[#allocation85_spill] sm:$0xff]  ;;  %v26736_v43 = vld [vmem:[#allocation86_spill] sm:$0xff]  ;;  %v26750_v63 = vld [vmem:[#allocation115_spill] sm:$0xff] }
 0x1fa   : > { %17576 = vmatpush3.bf16.msra.mxu0 %v21130_v1  ;;  %v17721_v45 = vpack.c.bf16 %v21594_v6, %v21586_v60  ;;  %v26733_v46 = vand.u32 4294901760, %v21309_v4  ;;  %v26734_v48 = vand.u32 4294901760, %v21340_v14  ;;  %v17597_v34 = vpack.c.bf16 %v26736_v43, %v26735_v51  ;;  %v26740_v14 = vld [vmem:[#allocation95_spill] sm:$0xff]  ;;  %v26741_v6 = vld [vmem:[#allocation96_spill] sm:$0xff]  ;;  %v26751_v29 = vld [vmem:[#allocation117_spill] sm:$0xff] }
 0x1fb   : > { %17578 = vmatprep.subr.bf16.mxu0 %v21155_v28  ;;  %v17725_v33 = vpack.c.bf16 %v21627_v17, %v21602_v38  ;;  %v26738_v60 = vand.u32 4294901760, %v21369_v54  ;;  %v26739_v4 = vand.u32 4294901760, %v21394_v3  ;;  %v17601_v23 = vpack.c.bf16 %v26741_v6, %v26740_v14  ;;  %v26744_v54 = vld [vmem:[#allocation78_spill] sm:$0xff]  ;;  %v26745_v38 = vld [vmem:[#allocation101_spill] sm:$0xff] }
 0x1fc   : > { %17708 = vmatpush3.bf16.msra.mxu1 %v17705_v13  ;;  %v17729_v30 = vpack.c.bf16 %v21649_v32, %v21635_v25  ;;  %v26743_v17 = vand.u32 4294901760, %v21413_v16  ;;  %v17733_v3 = vpack.c.bf16 %v21675_v57, %v21661_v55  ;;  %v17605_v24 = vpack.c.bf16 %v26746_v35, %v26745_v38  ;;  %v26747_v25 = vld [vmem:[#allocation106_spill] sm:$0xff]  ;;  %v26748_v32 = vld [vmem:[#allocation107_spill] sm:$0xff] }
 0x1fd   : > { %17710 = vmatprep.subr.bf16.mxu1 %v17709_v0  ;;  %v17737_v16 = vpack.c.bf16 %v21719_v11, %v21699_v59  ;;  %v17609_v13 = vpack.c.bf16 %v26748_v32, %v26747_v25  ;;  %v26749_v55 = vld [vmem:[#allocation130_spill] sm:$0xff]  ;;  %v17741_v57 = vpack.c.bf16 %v21758_v21, %v21739_v56  ;;  %v26752_v59 = vld [vmem:[#allocation123_spill] sm:$0xff]  ;;  %v26753_v11 = vld [vmem:[#allocation52_spill] sm:$0xff] }
 0x1fe   : > { %17580 = vmatpush3.bf16.msra.mxu0 %v21155_v28  ;;  %v26756_v56 = vld [vmem:[#allocation90_spill] sm:$0xff]  ;;  %v26757_v21 = vld [vmem:[#allocation55_spill] sm:$0xff] }
 0x1ff   : > { %17582 = vmatprep.subr.bf16.mxu0 %v21169_v37 }
 0x200   : > { %17712 = vmatpush3.bf16.msra.mxu1 %v17709_v0  ;;  %v17613_v0 = vpack.c.bf16 %v26751_v29, %v26750_v63 }
 0x201   : > { %17714 = vmatprep.subr.bf16.mxu1 %v17713_v15 }
 0x202   : > { %17584 = vmatpush3.bf16.msra.mxu0 %v21169_v37 }
 0x203   : > { %17586 = vmatprep.subr.bf16.mxu0 %v17585_v9  ;;  %14894 = vmatmul.mubr.f32.vlgmr.msra.gmra.mrb[0].mxu1 %v21549_v50 }
 0x204   : > { %17716 = vmatpush3.bf16.msra.mxu1 %v17713_v15  ;;  %14896 = vmatprep.mubr.f32.mxu1 %v26732_v26  ;;  %v26754_v15 = vld [vmem:[#allocation131_spill] sm:$0xff] }
 0x205   : > { %14718 = vmatmul.mubr.f32.vlgmr.msra.gmra.mrb[0].mxu0 %v26730_v20  ;;  %17718 = vmatprep.subr.bf16.mxu1 %v17717_v2  ;;  %v26760_v20 = vld [vmem:[#allocation98_spill] sm:$0xff] }
 0x206   : > { %14720 = vmatprep.mubr.f32.mxu0 %v26731_v36  ;;  %17588 = vmatpush3.bf16.msra.mxu0 %v17585_v9  ;;  %v26755_v9 = vld [vmem:[#allocation84_spill] sm:$0xff]  ;;  %v26761_v36 = vld [vmem:[#allocation105_spill] sm:$0xff] }
 0x207   : > { %17590 = vmatprep.subr.bf16.mxu0 %v17589_v62  ;;  %14897 = vmatmul.mubr.f32.gmra.mrb[2].mxu1 %v26737_v12 }
 0x208   : > { %17720 = vmatpush3.bf16.msra.mxu1 %v17717_v2  ;;  %14899 = vmatprep.mubr.f32.mxu1 %v26742_v49  ;;  %v26759_v2 = vld [vmem:[#allocation134_spill] sm:$0xff] }
 0x209   : > { %14721 = vmatmul.mubr.f32.gmra.mrb[2].mxu0 %v26733_v46  ;;  %17722 = vmatprep.subr.bf16.mxu1 %v17721_v45  ;;  %v26764_v46 = vld [vmem:[#allocation137_spill] sm:$0xff] }
 0x20a   : > { %14723 = vmatprep.mubr.f32.mxu0 %v26734_v48  ;;  %17592 = vmatpush3.bf16.msra.mxu0 %v17589_v62  ;;  %v26758_v62 = vld [vmem:[#allocation124_spill] sm:$0xff]  ;;  %v26765_v48 = vld [vmem:[#allocation111_spill] sm:$0xff] }
 0x20b   : > { %17594 = vmatprep.subr.bf16.mxu0 %v17593_v5  ;;  %14900 = vmatmul.mubr.f32.gmra.mrb[4].mxu1 %v21721_v61 }
 0x20c   : > { %17724 = vmatpush3.bf16.msra.mxu1 %v17721_v45  ;;  %14902 = vmatprep.mubr.f32.mxu1 %v21728_v10  ;;  %v26763_v45 = vld [vmem:[#allocation125_spill] sm:$0xff] }
 0x20d   : > { %14724 = vmatmul.mubr.f32.gmra.mrb[4].mxu0 %v26738_v60  ;;  %17726 = vmatprep.subr.bf16.mxu1 %v17725_v33  ;;  %v26768_v60 = vld [vmem:[#allocation138_spill] sm:$0xff] }
 0x20e   : > { %14726 = vmatprep.mubr.f32.mxu0 %v26739_v4  ;;  %17596 = vmatpush3.bf16.msra.mxu0 %v17593_v5  ;;  %v26762_v5 = vld [vmem:[#allocation56_spill] sm:$0xff] }
 0x20f   : > { %17598 = vmatprep.subr.bf16.mxu0 %v17597_v34  ;;  %14903 = vmatmul.mubr.f32.gmra.mrb[6].mxu1 %v21760_v53  ;;  %v26769_v4 = vld [vmem:[#allocation120_spill] sm:$0xff] }
 0x210   : > { %17728 = vmatpush3.bf16.msra.mxu1 %v17725_v33  ;;  %14937 = vmatprep.mubr.f32.mxu1 %v26749_v55  ;;  %v26767_v33 = vld [vmem:[#allocation126_spill] sm:$0xff] }
 0x211   : > { %14727 = vmatmul.mubr.f32.gmra.mrb[6].mxu0 %v26743_v17  ;;  %17730 = vmatprep.subr.bf16.mxu1 %v17729_v30  ;;  %v26772_v17 = vld [vmem:[#allocation140_spill] sm:$0xff] }
 0x212   : > { %17600 = vmatpush3.bf16.msra.mxu0 %v17597_v34  ;;  %14761 = vmatprep.mubr.f32.mxu0 %v26744_v54  ;;  %v26766_v34 = vld [vmem:[#allocation116_spill] sm:$0xff] }
 0x213   : > { %17602 = vmatprep.subr.bf16.mxu0 %v17601_v23 }
 0x214   : > { %17732 = vmatpush3.bf16.msra.mxu1 %v17729_v30  ;;  %v26771_v30 = vld [vmem:[#allocation139_spill] sm:$0xff] }
 0x215   : > { %17734 = vmatprep.subr.bf16.mxu1 %v17733_v3 }
 0x216   : > { %17604 = vmatpush3.bf16.msra.mxu0 %v17601_v23  ;;  %v26770_v23 = vld [vmem:[#allocation127_spill] sm:$0xff] }
 0x217   : > { %17606 = vmatprep.subr.bf16.mxu0 %v17605_v24 }
 0x218   : > { %17736 = vmatpush3.bf16.msra.mxu1 %v17733_v3  ;;  %v26773_v3 = vld [vmem:[#allocation128_spill] sm:$0xff] }
 0x219   : > { %17738 = vmatprep.subr.bf16.mxu1 %v17737_v16 }
 0x21a   : > { %17608 = vmatpush3.bf16.msra.mxu0 %v17605_v24  ;;  %v26777_v24 = vld [vmem:[#allocation141_spill] sm:$0xff] }
 0x21b   : > { %17610 = vmatprep.subr.bf16.mxu0 %v17609_v13 }
 0x21c   : > { %17740 = vmatpush3.bf16.msra.mxu1 %v17737_v16  ;;  %v26780_v16 = vand.u32 4294901760, %v26759_v2 }
 0x21d   : > { %17742 = vmatprep.subr.bf16.mxu1 %v17741_v57 }
 0x21e   : > { %17612 = vmatpush3.bf16.msra.mxu0 %v17609_v13  ;;  %v26781_v13 = vand.u32 4294901760, %v26764_v46 }
 0x21f   : > { %17614 = vmatprep.subr.bf16.mxu0 %v17613_v0 }
 0x220   : > { %17744 = vmatpush3.bf16.msra.mxu1 %v17741_v57  ;;  %v26784_v57 = vand.u32 4294901760, %v26771_v30 }
 0x221   : > { %17746 = vmatprep.subr.bf16.mxu1 %v26752_v59 }
 0x222   : > { %17616 = vmatpush3.bf16.msra.mxu0 %v17613_v0  ;;  %v26785_v0 = vand.u32 4294901760, %v26772_v17 }
 0x223   : > { %17618 = vmatprep.subr.bf16.mxu0 %v26753_v11  ;;  %14938 = vmatmul.mubr.f32.vlgmr.msra.gmra.mrb[0].mxu1 %v26754_v15 }
 0x224   : > { %17748 = vmatpush3.bf16.msra.mxu1 %v26752_v59  ;;  %14940 = vmatprep.mubr.f32.mxu1 %v26759_v2 }
 0x225   : > { %14762 = vmatmul.mubr.f32.vlgmr.msra.gmra.mrb[0].mxu0 %v26755_v9  ;;  %17750 = vmatprep.subr.bf16.mxu1 %v26758_v62 }
 0x226   : > { %14764 = vmatprep.mubr.f32.mxu0 %v26756_v56  ;;  %17620 = vmatpush3.bf16.msra.mxu0 %v26753_v11  ;;  %v26786_v11 = vand.u32 4294901760, %v21772_v19 }
 0x227   : > { %17622 = vmatprep.subr.bf16.mxu0 %v26757_v21  ;;  %14941 = vmatmul.mubr.f32.gmra.mrb[2].mxu1 %v26764_v46 }
 0x228   : > { %17752 = vmatpush3.bf16.msra.mxu1 %v26758_v62  ;;  %14943 = vmatprep.mubr.f32.mxu1 %v26768_v60 }
 0x229   : > { %14765 = vmatmul.mubr.f32.gmra.mrb[2].mxu0 %v26760_v20  ;;  %17754 = vmatprep.subr.bf16.mxu1 %v26763_v45 }
 0x22a   : > { %14767 = vmatprep.mubr.f32.mxu0 %v26761_v36  ;;  %17624 = vmatpush3.bf16.msra.mxu0 %v26757_v21 }
 0x22b   : > { %17626 = vmatprep.subr.bf16.mxu0 %v26762_v5  ;;  %14944 = vmatmul.mubr.f32.gmra.mrb[4].mxu1 %v26771_v30  ;;  %v1877_v30 = vld [vmem:[#allocation2 + $0x68] sm:$0xff] }
 0x22c   : > { %17756 = vmatpush3.bf16.msra.mxu1 %v26763_v45  ;;  %14946 = vmatprep.mubr.f32.mxu1 %v26772_v17 }
 0x22d   : > { %14768 = vmatmul.mubr.f32.gmra.mrb[4].mxu0 %v26765_v48  ;;  %17758 = vmatprep.subr.bf16.mxu1 %v26767_v33 }
 0x22e   : > { %14770 = vmatprep.mubr.f32.mxu0 %v26766_v34  ;;  %17628 = vmatpush3.bf16.msra.mxu0 %v26762_v5 }
 0x22f   : > { %17630 = vmatprep.subr.bf16.mxu0 %v21084_v52  ;;  %14947 = vmatmul.mubr.f32.gmra.mrb[6].mxu1 %v21772_v19  ;;  %v1865_v19 = vld [vmem:[#allocation2 + $0x8] sm:$0xff] }
 0x230   : > { %17760 = vmatpush3.bf16.msra.mxu1 %v26767_v33 }
 0x231   : > { %14771 = vmatmul.mubr.f32.gmra.mrb[6].mxu0 %v26769_v4  ;;  %17762 = vmatprep.subr.bf16.mxu1 %v26770_v23 }
 0x232   : > { %17632 = vmatpush3.bf16.msra.mxu0 %v21084_v52  ;;  %14805 = vmatprep.mubr.f32.mxu0 %v26744_v54  ;;  %v26774_v52 = vand.u32 4294901760, %v26749_v55  ;;  %v26775_v54 = vld [vmem:[#allocation129_spill] sm:$0xff]  ;;  %v26783_v55 = vand.u32 4294901760, %v26768_v60 }
 0x233   : > { %17634 = vmatprep.subr.bf16.mxu0 %v21105_v58 }
 0x234   : > { %17764 = vmatpush3.bf16.msra.mxu1 %v26770_v23  ;;  %14981 = vmatprep.mubr.f32.mxu1 %v26774_v52 }
 0x235   : > { %17766 = vmatprep.subr.bf16.mxu1 %v26773_v3 }
 0x236   : > { %17636 = vmatpush3.bf16.msra.mxu0 %v21105_v58  ;;  %v26776_v58 = vld [vmem:[#allocation132_spill] sm:$0xff] }
 0x237   : > { %17638 = vmatprep.subr.bf16.mxu0 %v21130_v1 }
 0x238   : > { %17768 = vmatpush3.bf16.msra.mxu1 %v26773_v3 }
 0x239   : > { %17770 = vmatprep.subr.bf16.mxu1 %v26775_v54 }
 0x23a   : > { %17640 = vmatpush3.bf16.msra.mxu0 %v21130_v1  ;;  %v26778_v1 = vand.u32 4294901760, %v26754_v15 }
 0x23b   : > { %17642 = vmatprep.subr.bf16.mxu0 %v21155_v28 }
 0x23c   : > { %17772 = vmatpush3.bf16.msra.mxu1 %v26775_v54 }
 0x23d   : > { %17774 = vmatprep.subr.bf16.mxu1 %v26776_v58 }
 0x23e   : > { %17644 = vmatpush3.bf16.msra.mxu0 %v21155_v28  ;;  %v26779_v28 = vld [vmem:[#allocation142_spill] sm:$0xff] }
 0x23f   : > { %17646 = vmatprep.subr.bf16.mxu0 %v21169_v37 }
 0x240   : > { %17776 = vmatpush3.bf16.msra.mxu1 %v26776_v58 }
 0x241   : > { %17778 = vmatprep.subr.bf16.mxu1 %v26777_v24 }
 0x242   : > { %17648 = vmatpush3.bf16.msra.mxu0 %v21169_v37  ;;  %v26782_v37 = vld [vmem:[#allocation143_spill] sm:$0xff] }
 0x243   : > { %14982 = vmatmul.mubr.f32.vlgmr.msra.gmra.mrb[0].mxu1 %v26778_v1 }
 0x244   : > { %17780 = vmatpush3.bf16.msra.mxu1 %v26777_v24  ;;  %14984 = vmatprep.mubr.f32.mxu1 %v26780_v16  ;;  %v1879_v24 = vld [vmem:[#allocation2 + $0x78] sm:$0xff] }
 0x245   : > { %14806 = vmatmul.mubr.f32.vlgmr.msra.gmra.mrb[0].mxu0 %v26755_v9  ;;  %17782 = vmatprep.subr.bf16.mxu1 %v26779_v28  ;;  %v22012_v9 = vld [vmem:[#allocation2 + $0x20] sm:$0xff] }
 0x246   : > { %14808 = vmatprep.mubr.f32.mxu0 %v26756_v56  ;;  %v22014_v56 = vld [vmem:[#allocation2 + $0x28] sm:$0xff] }
 0x247   : > { %14985 = vmatmul.mubr.f32.gmra.mrb[2].mxu1 %v26781_v13  ;;  %v2854_v2 = vand.u32 4294901760, %v22014_v56 }
 0x248   : > { %17784 = vmatpush3.bf16.msra.mxu1 %v26779_v28  ;;  %14987 = vmatprep.mubr.f32.mxu1 %v26783_v55  ;;  %v2884_v28 = vand.u32 4294901760, %v1879_v24 }
 0x249   : > { %14809 = vmatmul.mubr.f32.gmra.mrb[2].mxu0 %v26760_v20  ;;  %17786 = vmatprep.subr.bf16.mxu1 %v26782_v37  ;;  %v22026_v20 = vld [vmem:[#allocation2 + $0x30] sm:$0xff] }
 0x24a   : > { %14811 = vmatprep.mubr.f32.mxu0 %v26761_v36  ;;  %v22028_v36 = vld [vmem:[#allocation2 + $0x38] sm:$0xff] }
 0x24b   : > { %14988 = vmatmul.mubr.f32.gmra.mrb[4].mxu1 %v26784_v57  ;;  %v2860_v46 = vand.u32 4294901760, %v22028_v36 }
 0x24c   : > { %17788 = vmatpush3.bf16.msra.mxu1 %v26782_v37  ;;  %14990 = vmatprep.mubr.f32.mxu1 %v26785_v0 }
 0x24d   : > { %14812 = vmatmul.mubr.f32.gmra.mrb[4].mxu0 %v26765_v48  ;;  %17790 = vmatprep.subr.bf16.mxu1 %v21810_v44  ;;  %v22042_v48 = vld [vmem:[#allocation2 + $0x40] sm:$0xff] }
 0x24e   : > { %14814 = vmatprep.mubr.f32.mxu0 %v26766_v34  ;;  %v22044_v34 = vld [vmem:[#allocation2 + $0x48] sm:$0xff]  ;;  %v26789_v32 = vand.u32 4294901760, %v22042_v48 }
 0x24f   : > { %14991 = vmatmul.mubr.f32.gmra.mrb[6].mxu1 %v26786_v11 }
 0x250   : > { %17792 = vmatpush3.bf16.msra.mxu1 %v21810_v44  ;;  %15025 = vmatprep.mubr.f32.mxu1 %v21546_v31  ;;  %v1864_v44 = vld [vmem:[#allocation2] sm:$0xff] }
 0x251   : > { %14815 = vmatmul.mubr.f32.gmra.mrb[6].mxu0 %v26769_v4  ;;  %17794 = vmatprep.subr.bf16.mxu1 %v21816_v41 }
 0x254   : > { %17796 = vmatpush3.bf16.msra.mxu1 %v21816_v41  ;;  %v2839_v41 = vand.u32 4294901760, %v1864_v44 }
 0x255   : > { %17798 = vmatprep.subr.bf16.mxu1 %v21822_v47 }
 0x256   : > { %v22078_v52 = vsub.f32 %v1864_v44, %v2839_v41 }
 0x258   : > { %17800 = vmatpush3.bf16.msra.mxu1 %v21822_v47  ;;  %v2842_v47 = vand.u32 4294901760, %v1865_v19  ;;  %v26268_v16 = vand.u32 4294901760, %v22078_v52 }
 0x259   : > { %17802 = vmatprep.subr.bf16.mxu1 %v21827_v18 }
 0x25a   : > { %v3003_v55 = vsub.f32 %v22078_v52, %v26268_v16 }
 0x25c   : > { %17804 = vmatpush3.bf16.msra.mxu1 %v21827_v18  ;;  %v22002_v18 = vld [vmem:[#allocation2 + $0x10] sm:$0xff]  ;;  %v3004_v0 = vand.u32 4294901760, %v3003_v55 }
 0x25d   : > { %17806 = vmatprep.subr.bf16.mxu1 %v21829_v39 }
 0x260   : > { %17808 = vmatpush3.bf16.msra.mxu1 %v21829_v39  ;;  %v22004_v39 = vld [vmem:[#allocation2 + $0x18] sm:$0xff] }
 0x261   : > { %17810 = vmatprep.subr.bf16.mxu1 %v26752_v59  ;;  %v2848_v15 = vand.u32 4294901760, %v22004_v39 }
 0x263   : > { %15026 = vmatmul.mubr.f32.vlgmr.msra.gmra.mrb[0].mxu1 %v21549_v50 }
 0x264   : > { %17812 = vmatpush3.bf16.msra.mxu1 %v26752_v59  ;;  %15028 = vmatprep.mubr.f32.mxu1 %v26732_v26  ;;  %v2845_v59 = vand.u32 4294901760, %v22002_v18 }
 0x265   : > { %17814 = vmatprep.subr.bf16.mxu1 %v26758_v62 }
 0x266   : > { %v22022_v21 = vpack.c.bf16 %v2848_v15, %v2845_v59 }
 0x267   : > { %15029 = vmatmul.mubr.f32.gmra.mrb[2].mxu1 %v26737_v12 }
 0x268   : > { %17816 = vmatpush3.bf16.msra.mxu1 %v26758_v62  ;;  %15031 = vmatprep.mubr.f32.mxu1 %v26742_v49  ;;  %v2851_v62 = vand.u32 4294901760, %v22012_v9 }
 0x269   : > { %17818 = vmatprep.subr.bf16.mxu1 %v26763_v45 }
 0x26a   : > { %v22038_v5 = vpack.c.bf16 %v2854_v2, %v2851_v62 }
 0x26b   : > { %15032 = vmatmul.mubr.f32.gmra.mrb[4].mxu1 %v21721_v61 }
 0x26c   : > { %17820 = vmatpush3.bf16.msra.mxu1 %v26763_v45  ;;  %15034 = vmatprep.mubr.f32.mxu1 %v21728_v10  ;;  %v2857_v45 = vand.u32 4294901760, %v22026_v20 }
 0x26d   : > { %17822 = vmatprep.subr.bf16.mxu1 %v26767_v33 }
 0x26f   : > { %15035 = vmatmul.mubr.f32.gmra.mrb[6].mxu1 %v21760_v53 }
 0x270   : > { %17824 = vmatpush3.bf16.msra.mxu1 %v26767_v33  ;;  %15069 = vmatprep.mubr.f32.mxu1 %v21546_v31  ;;  %v22008_v31 = vpack.c.bf16 %v2842_v47, %v2839_v41  ;;  %v26271_v33 = vand.u32 4294901760, %v22044_v34 }
 0x271   : > { %17826 = vmatprep.subr.bf16.mxu1 %v26770_v23 }
 0x274   : > { %17828 = vmatpush3.bf16.msra.mxu1 %v26770_v23  ;;  %v1876_v23 = vld [vmem:[#allocation2 + $0x60] sm:$0xff] }
 0x275   : > { %17830 = vmatprep.subr.bf16.mxu1 %v26773_v3  ;;  %v2875_v17 = vand.u32 4294901760, %v1876_v23 }
 0x278   : > { %17832 = vmatpush3.bf16.msra.mxu1 %v26773_v3  ;;  %v2878_v3 = vand.u32 4294901760, %v1877_v30 }
 0x279   : > { %17834 = vmatprep.subr.bf16.mxu1 %v26775_v54 }
 0x27c   : > { %17836 = vmatpush3.bf16.msra.mxu1 %v26775_v54  ;;  %v22080_v54 = vsub.f32 %v1865_v19, %v2842_v47 }
 0x27d   : > { %17838 = vmatprep.subr.bf16.mxu1 %v26776_v58 }
 0x27e   : > { %v26269_v13 = vand.u32 4294901760, %v22080_v54 }
 0x280   : > { %17840 = vmatpush3.bf16.msra.mxu1 %v26776_v58  ;;  %v1878_v58 = vld [vmem:[#allocation2 + $0x70] sm:$0xff]  ;;  %v3010_v57 = vsub.f32 %v22080_v54, %v26269_v13 }
 0x281   : > { %17842 = vmatprep.subr.bf16.mxu1 %v22008_v31  ;;  %v2881_v1 = vand.u32 4294901760, %v1878_v58 }
 0x282   : > { %v3011_v11 = vand.u32 4294901760, %v3010_v57  ;;  %v22111_v57 = vsub.f32 %v1876_v23, %v2875_v17 }
 0x283   : > { %15070 = vmatmul.mubr.f32.vlgmr.msra.gmra.mrb[0].mxu1 %v21549_v50  ;;  %v22054_v50 = vpack.c.bf16 %v2860_v46, %v2857_v45  ;;  %v22086_v37 = vpack.c.bf16 %v2884_v28, %v2881_v1 }
 0x284   : > { %17844 = vmatpush3.bf16.msra.mxu1 %v22008_v31  ;;  %15072 = vmatprep.mubr.f32.mxu1 %v26732_v26  ;;  %v26272_v26 = vand.u32 4294901760, %v22042_v48  ;;  %v22096_v44 = vpack.c.bf16 %v3011_v11, %v3004_v0  ;;  %v22113_v0 = vsub.f32 %v1877_v30, %v2878_v3 }
 0x285   : > { %17846 = vmatprep.subr.bf16.mxu1 %v22022_v21 }
 0x287   : > { %15073 = vmatmul.mubr.f32.gmra.mrb[2].mxu1 %v26737_v12  ;;  %v22066_v12 = vpack.c.bf16 %v26271_v33, %v26272_v26  ;;  %v22122_v33 = vsub.f32 %v1878_v58, %v2881_v1  ;;  %v22124_v26 = vsub.f32 %v1879_v24, %v2884_v28 }
 0x288   : > { %17848 = vmatpush3.bf16.msra.mxu1 %v22022_v21  ;;  %15075 = vmatprep.mubr.f32.mxu1 %v26742_v49  ;;  %v1874_v49 = vld [vmem:[#allocation2 + $0x50] sm:$0xff] }
 0x289   : > { %17850 = vmatprep.subr.bf16.mxu1 %v22038_v5  ;;  %v2869_v60 = vand.u32 4294901760, %v1874_v49  ;;  %26787 = vst [vmem:[#allocation133_spill] sm:$0xff] %v22124_v26 }
 0x28b   : > { %15076 = vmatmul.mubr.f32.gmra.mrb[4].mxu1 %v21721_v61  ;;  %v1875_v61 = vld [vmem:[#allocation2 + $0x58] sm:$0xff]  ;;  %v22099_v19 = vsub.f32 %v1874_v49, %v2869_v60 }
 0x28c   : > { %17852 = vmatpush3.bf16.msra.mxu1 %v22038_v5  ;;  %15078 = vmatprep.mubr.f32.mxu1 %v21728_v10  ;;  %v2872_v4 = vand.u32 4294901760, %v1875_v61 }
 0x28d   : > { %17854 = vmatprep.subr.bf16.mxu1 %v22054_v50  ;;  %v26270_v47 = vand.u32 4294901760, %v22099_v19 }
 0x28e   : > { %v22072_v10 = vpack.c.bf16 %v2872_v4, %v2869_v60  ;;  %v22101_v41 = vsub.f32 %v1875_v61, %v2872_v4  ;;  %v26276_v61 = vand.u32 4294901760, %v22111_v57  ;;  %v26275_v4 = vand.u32 4294901760, %v22113_v0 }
 0x28f   : > { %15079 = vmatmul.mubr.f32.gmra.mrb[6].mxu1 %v21760_v53  ;;  %v22076_v53 = vpack.c.bf16 %v2878_v3, %v2875_v17  ;;  %v3073_v13 = vsub.f32 %v22099_v19, %v26270_v47  ;;  %v26274_v17 = vand.u32 4294901760, %v22122_v33  ;;  %v26273_v3 = vand.u32 4294901760, %v22124_v26 }
 0x290   : > { %17856 = vmatpush3.bf16.msra.mxu1 %v22054_v50  ;;  %v26277_v16 = vand.u32 4294901760, %v22101_v41  ;;  %v3087_v47 = vsub.f32 %v22111_v57, %v26276_v61  ;;  %v3094_v23 = vsub.f32 %v22113_v0, %v26275_v4 }
 0x291   : > { %17858 = vmatprep.subr.bf16.mxu1 %v22066_v12  ;;  %v3074_v49 = vand.u32 4294901760, %v3073_v13  ;;  %v3108_v58 = vsub.f32 %v22124_v26, %v26273_v3  ;;  %v22177_v3 = vsub.f32 %v22014_v56, %v2854_v2  ;;  %v22192_v56 = vsub.f32 %v22026_v20, %v2857_v45 }
 0x292   : > { %v3080_v55 = vsub.f32 %v22101_v41, %v26277_v16  ;;  %v3088_v30 = vand.u32 4294901760, %v3087_v47  ;;  %v3095_v13 = vand.u32 4294901760, %v3094_v23  ;;  %v22143_v47 = vpack.c.bf16 %v22080_v54, %v22078_v52 }
 0x293   : > { %v3109_v28 = vand.u32 4294901760, %v3108_v58  ;;  %v22151_v23 = vpack.c.bf16 %v22113_v0, %v22111_v57  ;;  %v22197_v2 = vsub.f32 %v22028_v36, %v2860_v46  ;;  %v26788_v45 = vand.u32 4294901760, %v22177_v3 }
 0x294   : > { %17860 = vmatpush3.bf16.msra.mxu1 %v22066_v12  ;;  %v3081_v60 = vand.u32 4294901760, %v3080_v55  ;;  %v3101_v55 = vsub.f32 %v22122_v33, %v26274_v17  ;;  %v22137_v24 = vpack.c.bf16 %v3095_v13, %v3088_v30  ;;  %v22155_v30 = vpack.c.bf16 %v22124_v26, %v22122_v33 }
 0x295   : > { %17862 = vmatprep.subr.bf16.mxu1 %v22072_v10  ;;  %v22160_v13 = vsub.f32 %v22002_v18, %v2845_v59  ;;  %v3038_v36 = vsub.f32 %v22177_v3, %v26788_v45 }
 0x296   : > { %v22117_v11 = vpack.c.bf16 %v3081_v60, %v3074_v49  ;;  %v3102_v1 = vand.u32 4294901760, %v3101_v55  ;;  %v22147_v60 = vpack.c.bf16 %v22101_v41, %v22099_v19  ;;  %v22165_v55 = vsub.f32 %v22004_v39, %v2848_v15 }
 0x297   : > { %v26279_v58 = vand.u32 4294901760, %v22160_v13  ;;  %v3039_v14 = vand.u32 4294901760, %v3038_v36 }
 0x298   : > { %17864 = vmatpush3.bf16.msra.mxu1 %v22072_v10  ;;  %v22139_v49 = vpack.c.bf16 %v3109_v28, %v3102_v1  ;;  %v26278_v1 = vand.u32 4294901760, %v22165_v55  ;;  %v22172_v28 = vsub.f32 %v22012_v9, %v2851_v62 }
 0x299   : > { %17866 = vmatprep.subr.bf16.mxu1 %v22076_v53  ;;  %v3017_v18 = vsub.f32 %v22160_v13, %v26279_v58 }
 0x29a   : > { %v3024_v39 = vsub.f32 %v22165_v55, %v26278_v1  ;;  %v26280_v15 = vand.u32 4294901760, %v22172_v28 }
 0x29b   : > { %v3018_v16 = vand.u32 4294901760, %v3017_v18  ;;  %v26790_v18 = vand.u32 4294901760, %v22044_v34 }
 0x29c   : > { %17868 = vmatpush3.bf16.msra.mxu1 %v22076_v53  ;;  %v3025_v1 = vand.u32 4294901760, %v3024_v39  ;;  %v3031_v20 = vsub.f32 %v22172_v28, %v26280_v15  ;;  %v22224_v15 = vsub.f32 %v22042_v48, %v26789_v32 }
 0x29d   : > { %17870 = vmatprep.subr.bf16.mxu1 %v22086_v37  ;;  %v22235_v39 = vsub.f32 %v22044_v34, %v26790_v18  ;;  %v26793_v18 = vand.u32 4294901760, %v22197_v2 }
 0x29e   : > { %v17877_v35 = vpack.c.bf16 %v3025_v1, %v3018_v16  ;;  %v3032_v6 = vand.u32 4294901760, %v3031_v20  ;;  %v26792_v1 = vand.u32 4294901760, %v22192_v56 }
 0x2a0   : > { %17872 = vmatpush3.bf16.msra.mxu1 %v22086_v37  ;;  %v3045_v34 = vsub.f32 %v22192_v56, %v26792_v1  ;;  %v17881_v20 = vpack.c.bf16 %v3039_v14, %v3032_v6 }
 0x2a1   : > { %17874 = vmatprep.subr.bf16.mxu1 %v22096_v44 }
 0x2a2   : > { %v3046_v8 = vand.u32 4294901760, %v3045_v34 }
 0x318   : > { %v14807_v59 = vpop.f32.mrb[0].mxu0 }
 0x319   : > { %v22187_v9 = vand.u32 4294901760, %v14807_v59  ;;  %v1818_v62 = vpop.f32.mrb[1].mxu0 }
 0x31a   : > { %v22199_v4 = vand.u32 4294901760, %v1818_v62 }
 0x31b   : > { %v22202_v61 = vsub.f32 %v14807_v59, %v22187_v9 }
 0x31c   : > { %v22205_v58 = vsub.f32 %v1818_v62, %v22199_v4  ;;  %v14810_v17 = vpop.f32.mrb[2].mxu0 }
 0x31d   : > { %v26281_v46 = vand.u32 4294901760, %v22202_v61  ;;  %v22214_v29 = vand.u32 4294901760, %v14810_v17  ;;  %v1830_v59 = vpop.f32.mrb[3].mxu0 }
 0x31e   : > { %v22219_v63 = vand.u32 4294901760, %v1830_v59  ;;  %v26791_v32 = vand.u32 4294901760, %v22205_v58 }
 0x31f   : > { %v2932_v45 = vsub.f32 %v22202_v61, %v26281_v46  ;;  %v22230_v25 = vsub.f32 %v14810_v17, %v22214_v29 }
 0x320   : > { %v22238_v62 = vsub.f32 %v1830_v59, %v22219_v63  ;;  %v14813_v38 = vpop.f32.mrb[4].mxu0  ;;  %v2922_v48 = vsub.f32 %v22205_v58, %v26791_v32  ;;  %v3052_v59 = vsub.f32 %v22197_v2, %v26793_v18 }
 0x321   : > { %v22244_v17 = vand.u32 4294901760, %v14813_v38  ;;  %v1842_v16 = vpop.f32.mrb[5].mxu0  ;;  %v2933_v36 = vand.u32 4294901760, %v2932_v45  ;;  %v26794_v40 = vand.u32 4294901760, %v22230_v25 }
 0x322   : > { %v26288_v43 = vand.u32 4294901760, %v22238_v62  ;;  %v22253_v51 = vand.u32 4294901760, %v1842_v16  ;;  %v2923_v32 = vand.u32 4294901760, %v2922_v48 }
 0x323   : > { %v22257_v46 = vsub.f32 %v14813_v38, %v22244_v17  ;;  %v2952_v42 = vsub.f32 %v22230_v25, %v26794_v40  ;;  %v3053_v40 = vand.u32 4294901760, %v3052_v59  ;;  %v26796_v59 = vand.u32 4294901760, %v22235_v39 }
 0x324   : > { %v22264_v27 = vsub.f32 %v1842_v16, %v22253_v51  ;;  %v14816_v18 = vpop.f32.mrb[6].mxu0  ;;  %15113 = vmatprep.mubr.f32.mxu1 %v2923_v32  ;;  %v2942_v48 = vsub.f32 %v22238_v62, %v26288_v43  ;;  %v26795_v32 = vand.u32 4294901760, %v22224_v15 }
 0x325   : > { %v26289_v45 = vand.u32 4294901760, %v22257_v46  ;;  %v22270_v38 = vand.u32 4294901760, %v14816_v18  ;;  %v1854_v22 = vpop.f32.mrb[7].mxu0  ;;  %15114 = vmatmul.mubr.f32.vlgmr.msra.gmra.mrb[0].mxu1 %v2933_v36  ;;  %v2953_v6 = vand.u32 4294901760, %v2952_v42  ;;  %v3066_v36 = vsub.f32 %v22235_v39, %v26796_v59 }
 0x326   : > { %v26291_v1 = vand.u32 4294901760, %v22264_v27  ;;  %v22273_v7 = vand.u32 4294901760, %v1854_v22  ;;  %17876 = vmatpush3.bf16.msra.mxu1 %v22096_v44  ;;  %v2943_v16 = vand.u32 4294901760, %v2942_v48  ;;  %v3059_v43 = vsub.f32 %v22224_v15, %v26795_v32 }
 0x327   : > { %v22280_v14 = vsub.f32 %v14816_v18, %v22270_v38  ;;  %17878 = vmatprep.subr.bf16.mxu1 %v17877_v35  ;;  %v2972_v34 = vsub.f32 %v22257_v46, %v26289_v45  ;;  %v17885_v45 = vpack.c.bf16 %v3053_v40, %v3046_v8  ;;  %v17909_v8 = vpack.c.bf16 %v22165_v55, %v22160_v13 }
 0x328   : > { %v22289_v44 = vsub.f32 %v1854_v22, %v22273_v7  ;;  %15116 = vmatprep.mubr.f32.mxu1 %v2943_v16  ;;  %v2962_v48 = vsub.f32 %v22264_v27, %v26291_v1  ;;  %v3060_v59 = vand.u32 4294901760, %v3059_v43  ;;  %v3067_v16 = vand.u32 4294901760, %v3066_v36  ;;  %v22340_v36 = vld [vmem:[#allocation7 + $0x28] sm:$0xff] }
 0x329   : > { %v2991_v18 = vand.u32 4294901760, %v22280_v14  ;;  %15117 = vmatmul.mubr.f32.gmra.mrb[2].mxu1 %v2953_v6  ;;  %v2973_v26 = vand.u32 4294901760, %v2972_v34  ;;  %v17913_v43 = vpack.c.bf16 %v22177_v3, %v22172_v28  ;;  %v22338_v34 = vld [vmem:[#allocation7 + $0x20] sm:$0xff] }
 0x32a   : > { %v2981_v42 = vand.u32 4294901760, %v22289_v44  ;;  %17880 = vmatpush3.bf16.msra.mxu1 %v17877_v35  ;;  %v2963_v32 = vand.u32 4294901760, %v2962_v48  ;;  %v17889_v48 = vpack.c.bf16 %v3067_v16, %v3060_v59  ;;  %v26295_v59 = vand.u32 4294901760, %v22338_v34 }
 0x32b   : > { %17882 = vmatprep.subr.bf16.mxu1 %v17881_v20  ;;  %v2992_v22 = vsub.f32 %v22280_v14, %v2991_v18  ;;  %v26294_v16 = vand.u32 4294901760, %v22340_v36 }
 0x32c   : > { %15119 = vmatprep.mubr.f32.mxu1 %v2963_v32  ;;  %v2982_v1 = vsub.f32 %v22289_v44, %v2981_v42 }
 0x32d   : > { %15120 = vmatmul.mubr.f32.gmra.mrb[4].mxu1 %v2973_v26  ;;  %v2993_v35 = vand.u32 4294901760, %v2992_v22  ;;  %v17917_v26 = vpack.c.bf16 %v22197_v2, %v22192_v56 }
 0x32e   : > { %17884 = vmatpush3.bf16.msra.mxu1 %v17881_v20  ;;  %v2983_v6 = vand.u32 4294901760, %v2982_v1 }
 0x32f   : > { %17886 = vmatprep.subr.bf16.mxu1 %v17885_v45 }
 0x330   : > { %15122 = vmatprep.mubr.f32.mxu1 %v2983_v6 }
 0x331   : > { %15123 = vmatmul.mubr.f32.gmra.mrb[6].mxu1 %v2993_v35  ;;  %v22357_v35 = vld [vmem:[#allocation7 + $0x30] sm:$0xff] }
 0x332   : > { %17888 = vmatpush3.bf16.msra.mxu1 %v17885_v45  ;;  %15157 = vmatprep.mubr.f32.mxu1 %v22199_v4  ;;  %v22335_v45 = vld [vmem:[#allocation7 + $0x18] sm:$0xff] }
 0x333   : > { %17890 = vmatprep.subr.bf16.mxu1 %v17889_v48  ;;  %v3836_v32 = vand.u32 4294901760, %v22335_v45 }
 0x336   : > { %17892 = vmatpush3.bf16.msra.mxu1 %v17889_v48  ;;  %v22359_v48 = vld [vmem:[#allocation7 + $0x38] sm:$0xff] }
 0x337   : > { %17894 = vmatprep.subr.bf16.mxu1 %v22117_v11 }
 0x33a   : > { %17896 = vmatpush3.bf16.msra.mxu1 %v22117_v11  ;;  %v17921_v11 = vpack.c.bf16 %v22235_v39, %v22224_v15 }
 0x33b   : > { %17898 = vmatprep.subr.bf16.mxu1 %v22137_v24 }
 0x33e   : > { %17900 = vmatpush3.bf16.msra.mxu1 %v22137_v24  ;;  %v22326_v24 = vld [vmem:[#allocation7] sm:$0xff] }
 0x33f   : > { %17902 = vmatprep.subr.bf16.mxu1 %v22139_v49  ;;  %v3827_v20 = vand.u32 4294901760, %v22326_v24 }
 0x342   : > { %17904 = vmatpush3.bf16.msra.mxu1 %v22139_v49  ;;  %v22328_v49 = vld [vmem:[#allocation7 + $0x8] sm:$0xff] }
 0x343   : > { %17906 = vmatprep.subr.bf16.mxu1 %v22143_v47  ;;  %v3830_v1 = vand.u32 4294901760, %v22328_v49 }
 0x345   : > { %15158 = vmatmul.mubr.f32.vlgmr.msra.gmra.mrb[0].mxu1 %v22187_v9  ;;  %v22347_v22 = vpack.c.bf16 %v3830_v1, %v3827_v20 }
 0x346   : > { %15160 = vmatprep.mubr.f32.mxu1 %v22219_v63  ;;  %17908 = vmatpush3.bf16.msra.mxu1 %v22143_v47  ;;  %v22330_v47 = vld [vmem:[#allocation7 + $0x10] sm:$0xff] }
 0x347   : > { %17910 = vmatprep.subr.bf16.mxu1 %v17909_v8  ;;  %v3833_v40 = vand.u32 4294901760, %v22330_v47  ;;  %18034 = vmatprep.subr.bf16.mxu0 %v22347_v22 }
 0x348   : > { %18036 = vmatpush3.bf16.msra.mxu0 %v22347_v22 }
 0x349   : > { %15161 = vmatmul.mubr.f32.gmra.mrb[2].mxu1 %v22214_v29  ;;  %v22355_v6 = vpack.c.bf16 %v3836_v32, %v3833_v40 }
 0x34a   : > { %15163 = vmatprep.mubr.f32.mxu1 %v22253_v51  ;;  %17912 = vmatpush3.bf16.msra.mxu1 %v17909_v8  ;;  %v22369_v8 = vpack.c.bf16 %v26294_v16, %v26295_v59  ;;  %v26802_v16 = vand.u32 4294901760, %v22202_v61  ;;  %v26803_v59 = vand.u32 4294901760, %v22238_v62 }
 0x34b   : > { %17914 = vmatprep.subr.bf16.mxu1 %v17913_v43  ;;  %18038 = vmatprep.subr.bf16.mxu0 %v22355_v6 }
 0x34c   : > { %18040 = vmatpush3.bf16.msra.mxu0 %v22355_v6 }
 0x34d   : > { %15164 = vmatmul.mubr.f32.gmra.mrb[4].mxu1 %v22244_v17  ;;  %18042 = vmatprep.subr.bf16.mxu0 %v22369_v8 }
 0x34e   : > { %15166 = vmatprep.mubr.f32.mxu1 %v22273_v7  ;;  %17916 = vmatpush3.bf16.msra.mxu1 %v17913_v43  ;;  %v26293_v43 = vand.u32 4294901760, %v22357_v35 }
 0x34f   : > { %17918 = vmatprep.subr.bf16.mxu1 %v17917_v26 }
 0x350   : > { %18044 = vmatpush3.bf16.msra.mxu0 %v22369_v8 }
 0x351   : > { %15167 = vmatmul.mubr.f32.gmra.mrb[6].mxu1 %v22270_v38 }
 0x352   : > { %17920 = vmatpush3.bf16.msra.mxu1 %v17917_v26  ;;  %15201 = vmatprep.mubr.f32.mxu1 %v22205_v58  ;;  %v26292_v26 = vand.u32 4294901760, %v22359_v48 }
 0x353   : > { %17922 = vmatprep.subr.bf16.mxu1 %v17921_v11 }
 0x356   : > { %17924 = vmatpush3.bf16.msra.mxu1 %v17921_v11  ;;  %v22381_v11 = vpack.c.bf16 %v26292_v26, %v26293_v43  ;;  %v26801_v26 = vand.u32 4294901760, %v22165_v55  ;;  %v26809_v55 = vand.u32 4294901760, %v22197_v2 }
 0x357   : > { %17926 = vmatprep.subr.bf16.mxu1 %v22147_v60 }
 0x358   : > { %18046 = vmatprep.subr.bf16.mxu0 %v22381_v11 }
 0x359   : > { %18048 = vmatpush3.bf16.msra.mxu0 %v22381_v11 }
 0x35a   : > { %17928 = vmatpush3.bf16.msra.mxu1 %v22147_v60  ;;  %v26797_v60 = vand.u32 4294901760, %v22205_v58 }
 0x35b   : > { %17930 = vmatprep.subr.bf16.mxu1 %v22151_v23 }
 0x35e   : > { %17932 = vmatpush3.bf16.msra.mxu1 %v22151_v23  ;;  %v26798_v23 = vand.u32 4294901760, %v22078_v52  ;;  %v26804_v52 = vand.u32 4294901760, %v22172_v28  ;;  %v26813_v28 = vand.u32 4294901760, %v22099_v19 }
 0x35f   : > { %17934 = vmatprep.subr.bf16.mxu1 %v22155_v30 }
 0x362   : > { %17936 = vmatpush3.bf16.msra.mxu1 %v22155_v30  ;;  %v26799_v30 = vand.u32 4294901760, %v22080_v54  ;;  %v26805_v54 = vand.u32 4294901760, %v22177_v3 }
 0x363   : > { %17938 = vmatprep.subr.bf16.mxu1 %v22008_v31 }
 0x364   : > { %v17969_v58 = vpack.c.bf16 %v26799_v30, %v26798_v23  ;;  %v17977_v23 = vpack.c.bf16 %v26805_v54, %v26804_v52  ;;  %v26806_v30 = vand.u32 4294901760, %v22230_v25 }
 0x365   : > { %15202 = vmatmul.mubr.f32.vlgmr.msra.gmra.mrb[0].mxu1 %v22202_v61  ;;  %v26808_v61 = vand.u32 4294901760, %v22192_v56  ;;  %v26814_v56 = vand.u32 4294901760, %v22101_v41 }
 0x366   : > { %15204 = vmatprep.mubr.f32.mxu1 %v22238_v62  ;;  %17940 = vmatpush3.bf16.msra.mxu1 %v22008_v31 }
 0x367   : > { %17942 = vmatprep.subr.bf16.mxu1 %v22022_v21  ;;  %v17981_v62 = vpack.c.bf16 %v26809_v55, %v26808_v61  ;;  %v17989_v2 = vpack.c.bf16 %v26814_v56, %v26813_v28 }
 0x369   : > { %15205 = vmatmul.mubr.f32.gmra.mrb[2].mxu1 %v22230_v25  ;;  %v26811_v25 = vand.u32 4294901760, %v22224_v15  ;;  %v26816_v15 = vand.u32 4294901760, %v22113_v0  ;;  %v22510_v0 = vsub.f32 %v22328_v49, %v3830_v1 }
 0x36a   : > { %15207 = vmatprep.mubr.f32.mxu1 %v22264_v27  ;;  %17944 = vmatpush3.bf16.msra.mxu1 %v22022_v21 }
 0x36b   : > { %17946 = vmatprep.subr.bf16.mxu1 %v22038_v5 }
 0x36d   : > { %15208 = vmatmul.mubr.f32.gmra.mrb[4].mxu1 %v22257_v46 }
 0x36e   : > { %15210 = vmatprep.mubr.f32.mxu1 %v22289_v44  ;;  %17948 = vmatpush3.bf16.msra.mxu1 %v22038_v5  ;;  %v26818_v44 = vld [vmem:[#allocation133_spill] sm:$0xff] }
 0x36f   : > { %17950 = vmatprep.subr.bf16.mxu1 %v22054_v50 }
 0x371   : > { %15211 = vmatmul.mubr.f32.gmra.mrb[6].mxu1 %v22280_v14  ;;  %v26817_v14 = vand.u32 4294901760, %v22122_v33 }
 0x372   : > { %17952 = vmatpush3.bf16.msra.mxu1 %v22054_v50  ;;  %15245 = vmatprep.mubr.f32.mxu1 %v26797_v60  ;;  %v26800_v60 = vand.u32 4294901760, %v22160_v13  ;;  %v26807_v13 = vand.u32 4294901760, %v22264_v27  ;;  %v26812_v27 = vand.u32 4294901760, %v22235_v39 }
 0x373   : > { %17954 = vmatprep.subr.bf16.mxu1 %v22066_v12 }
 0x374   : > { %v17973_v43 = vpack.c.bf16 %v26801_v26, %v26800_v60  ;;  %v17985_v3 = vpack.c.bf16 %v26812_v27, %v26811_v25 }
 0x376   : > { %17956 = vmatpush3.bf16.msra.mxu1 %v22066_v12 }
 0x377   : > { %17958 = vmatprep.subr.bf16.mxu1 %v22072_v10 }
 0x37a   : > { %17960 = vmatpush3.bf16.msra.mxu1 %v22072_v10 }
 0x37b   : > { %17962 = vmatprep.subr.bf16.mxu1 %v22076_v53 }
 0x37e   : > { %17964 = vmatpush3.bf16.msra.mxu1 %v22076_v53 }
 0x37f   : > { %17966 = vmatprep.subr.bf16.mxu1 %v22086_v37 }
 0x382   : > { %17968 = vmatpush3.bf16.msra.mxu1 %v22086_v37 }
 0x383   : > { %17970 = vmatprep.subr.bf16.mxu1 %v17969_v58 }
 0x385   : > { %15246 = vmatmul.mubr.f32.vlgmr.msra.gmra.mrb[0].mxu1 %v26802_v16 }
 0x386   : > { %15248 = vmatprep.mubr.f32.mxu1 %v26803_v59  ;;  %17972 = vmatpush3.bf16.msra.mxu1 %v17969_v58  ;;  %v26810_v59 = vand.u32 4294901760, %v22257_v46  ;;  %v26815_v46 = vand.u32 4294901760, %v22111_v57  ;;  %v22505_v57 = vsub.f32 %v22326_v24, %v3827_v20 }
 0x387   : > { %17974 = vmatprep.subr.bf16.mxu1 %v17973_v43 }
 0x388   : > { %v17993_v39 = vpack.c.bf16 %v26816_v15, %v26815_v46  ;;  %v26310_v16 = vand.u32 4294901760, %v22505_v57 }
 0x389   : > { %15249 = vmatmul.mubr.f32.gmra.mrb[2].mxu1 %v26806_v30 }
 0x38a   : > { %15251 = vmatprep.mubr.f32.mxu1 %v26807_v13  ;;  %17976 = vmatpush3.bf16.msra.mxu1 %v17973_v43  ;;  %v26309_v43 = vand.u32 4294901760, %v22510_v0  ;;  %v3991_v24 = vsub.f32 %v22505_v57, %v26310_v16 }
 0x38b   : > { %17978 = vmatprep.subr.bf16.mxu1 %v17977_v23 }
 0x38c   : > { %v3998_v49 = vsub.f32 %v22510_v0, %v26309_v43  ;;  %v3992_v20 = vand.u32 4294901760, %v3991_v24 }
 0x38d   : > { %15252 = vmatmul.mubr.f32.gmra.mrb[4].mxu1 %v26810_v59 }
 0x38e   : > { %15254 = vmatprep.mubr.f32.mxu1 %v2981_v42  ;;  %17980 = vmatpush3.bf16.msra.mxu1 %v17977_v23  ;;  %v3999_v1 = vand.u32 4294901760, %v3998_v49 }
 0x38f   : > { %17982 = vmatprep.subr.bf16.mxu1 %v17981_v62 }
 0x390   : > { %v22526_v58 = vpack.c.bf16 %v3999_v1, %v3992_v20  ;;  %v22608_v20 = vsub.f32 %v22330_v47, %v3833_v40  ;;  %v22613_v1 = vsub.f32 %v22335_v45, %v3836_v32  ;;  %v26825_v47 = vand.u32 4294901760, %v22340_v36 }
 0x391   : > { %15255 = vmatmul.mubr.f32.gmra.mrb[6].mxu1 %v2991_v18  ;;  %v26819_v18 = vand.u32 4294901760, %v26818_v44 }
 0x392   : > { %17984 = vmatpush3.bf16.msra.mxu1 %v17981_v62  ;;  %15289 = vmatprep.mubr.f32.mxu1 %v22199_v4  ;;  %v22628_v40 = vsub.f32 %v22340_v36, %v26825_v47 }
 0x393   : > { %17986 = vmatprep.subr.bf16.mxu1 %v17985_v3  ;;  %v17997_v42 = vpack.c.bf16 %v26819_v18, %v26817_v14 }
 0x396   : > { %17988 = vmatpush3.bf16.msra.mxu1 %v17985_v3 }
 0x397   : > { %17990 = vmatprep.subr.bf16.mxu1 %v17989_v2 }
 0x39a   : > { %17992 = vmatpush3.bf16.msra.mxu1 %v17989_v2 }
 0x39b   : > { %17994 = vmatprep.subr.bf16.mxu1 %v17993_v39 }
 0x39e   : > { %17996 = vmatpush3.bf16.msra.mxu1 %v17993_v39 }
 0x39f   : > { %17998 = vmatprep.subr.bf16.mxu1 %v17997_v42 }
 0x3a2   : > { %18000 = vmatpush3.bf16.msra.mxu1 %v17997_v42 }
 0x3a3   : > { %18002 = vmatprep.subr.bf16.mxu1 %v22008_v31 }
 0x3a5   : > { %15290 = vmatmul.mubr.f32.vlgmr.msra.gmra.mrb[0].mxu1 %v22187_v9 }
 0x3a6   : > { %15292 = vmatprep.mubr.f32.mxu1 %v22219_v63  ;;  %18004 = vmatpush3.bf16.msra.mxu1 %v22008_v31  ;;  %v3811_v31 = vld [vmem:[#allocation7 + $0x40] sm:$0xff] }
 0x3a7   : > { %18006 = vmatprep.subr.bf16.mxu1 %v22022_v21 }
 0x3a9   : > { %15293 = vmatmul.mubr.f32.gmra.mrb[2].mxu1 %v22214_v29 }
 0x3aa   : > { %15295 = vmatprep.mubr.f32.mxu1 %v22253_v51  ;;  %18008 = vmatpush3.bf16.msra.mxu1 %v22022_v21  ;;  %v3812_v21 = vld [vmem:[#allocation7 + $0x48] sm:$0xff] }
 0x3ab   : > { %18010 = vmatprep.subr.bf16.mxu1 %v22038_v5 }
 0x3ad   : > { %15296 = vmatmul.mubr.f32.gmra.mrb[4].mxu1 %v22244_v17 }
 0x3ae   : > { %15298 = vmatprep.mubr.f32.mxu1 %v22273_v7  ;;  %18012 = vmatpush3.bf16.msra.mxu1 %v22038_v5  ;;  %v3851_v5 = vand.u32 4294901760, %v3811_v31 }
 0x3af   : > { %18014 = vmatprep.subr.bf16.mxu1 %v22054_v50 }
 0x3b0   : > { %v22529_v60 = vsub.f32 %v3811_v31, %v3851_v5 }
 0x3b1   : > { %15299 = vmatmul.mubr.f32.gmra.mrb[6].mxu1 %v22270_v38 }
 0x3b2   : > { %18016 = vmatpush3.bf16.msra.mxu1 %v22054_v50  ;;  %15333 = vmatprep.mubr.f32.mxu1 %v22199_v4  ;;  %v3854_v50 = vand.u32 4294901760, %v3812_v21  ;;  %v3817_v4 = vld [vmem:[#allocation7 + $0x70] sm:$0xff]  ;;  %v26303_v54 = vand.u32 4294901760, %v22529_v60 }
 0x3b3   : > { %18018 = vmatprep.subr.bf16.mxu1 %v22066_v12 }
 0x3b4   : > { %v22492_v33 = vpack.c.bf16 %v3854_v50, %v3851_v5  ;;  %v22531_v52 = vsub.f32 %v3812_v21, %v3854_v50  ;;  %v4047_v30 = vsub.f32 %v22529_v60, %v26303_v54 }
 0x3b6   : > { %18020 = vmatpush3.bf16.msra.mxu1 %v22066_v12  ;;  %v3813_v12 = vld [vmem:[#allocation7 + $0x50] sm:$0xff]  ;;  %18050 = vmatprep.subr.bf16.mxu0 %v22492_v33  ;;  %v26302_v23 = vand.u32 4294901760, %v22531_v52  ;;  %v4048_v62 = vand.u32 4294901760, %v4047_v30  ;;  %v26307_v30 = vand.u32 4294901760, %v22608_v20 }
 0x3b7   : > { %18022 = vmatprep.subr.bf16.mxu1 %v22072_v10  ;;  %18052 = vmatpush3.bf16.msra.mxu0 %v22492_v33 }
 0x3b8   : > { %v4054_v13 = vsub.f32 %v22531_v52, %v26302_v23  ;;  %v4005_v32 = vsub.f32 %v22608_v20, %v26307_v30 }
 0x3ba   : > { %18024 = vmatpush3.bf16.msra.mxu1 %v22072_v10  ;;  %v3814_v10 = vld [vmem:[#allocation7 + $0x58] sm:$0xff]  ;;  %v4055_v59 = vand.u32 4294901760, %v4054_v13  ;;  %v26306_v13 = vand.u32 4294901760, %v22613_v1 }
 0x3bb   : > { %18026 = vmatprep.subr.bf16.mxu1 %v22076_v53 }
 0x3bc   : > { %v22547_v3 = vpack.c.bf16 %v4055_v59, %v4048_v62  ;;  %v12898_v62 = vld [vmem:[%s26823_s18] ss:$0 sm:$0xff]  ;;  %v26824_v59 = vand.u32 4294901760, %v22338_v34 }
 0x3be   : > { %18028 = vmatpush3.bf16.msra.mxu1 %v22076_v53  ;;  %v3815_v53 = vld [vmem:[#allocation7 + $0x60] sm:$0xff] }
 0x3bf   : > { %18030 = vmatprep.subr.bf16.mxu1 %v22086_v37 }
 0x3c2   : > { %18032 = vmatpush3.bf16.msra.mxu1 %v22086_v37  ;;  %v3863_v37 = vand.u32 4294901760, %v3815_v53 }
 0x3c4   : > { %v22555_v2 = vsub.f32 %v3815_v53, %v3863_v37 }
 0x3c5   : > { %15334 = vmatmul.mubr.f32.vlgmr.msra.gmra.mrb[0].mxu1 %v22187_v9  ;;  %v3818_v9 = vld [vmem:[#allocation7 + $0x78] sm:$0xff] }
 0x3c6   : > { %15336 = vmatprep.mubr.f32.mxu1 %v22219_v63  ;;  %v3857_v63 = vand.u32 4294901760, %v3813_v12  ;;  %v26299_v14 = vand.u32 4294901760, %v22555_v2 }
 0x3c8   : > { %v22541_v61 = vsub.f32 %v3813_v12, %v3857_v63  ;;  %v4075_v42 = vsub.f32 %v22555_v2, %v26299_v14 }
 0x3c9   : > { %15337 = vmatmul.mubr.f32.gmra.mrb[2].mxu1 %v22214_v29  ;;  %v3860_v29 = vand.u32 4294901760, %v3814_v10 }
 0x3ca   : > { %15339 = vmatprep.mubr.f32.mxu1 %v22253_v51  ;;  %v26301_v25 = vand.u32 4294901760, %v22541_v61  ;;  %v4076_v50 = vand.u32 4294901760, %v4075_v42 }
 0x3cb   : > { %v22496_v51 = vpack.c.bf16 %v3860_v29, %v3857_v63  ;;  %v22543_v55 = vsub.f32 %v3814_v10, %v3860_v29 }
 0x3cc   : > { %v4061_v28 = vsub.f32 %v22541_v61, %v26301_v25 }
 0x3cd   : > { %15340 = vmatmul.mubr.f32.gmra.mrb[4].mxu1 %v22244_v17  ;;  %18054 = vmatprep.subr.bf16.mxu0 %v22496_v51  ;;  %v3869_v17 = vand.u32 4294901760, %v3817_v4  ;;  %v26300_v27 = vand.u32 4294901760, %v22543_v55 }
 0x3ce   : > { %15342 = vmatprep.mubr.f32.mxu1 %v22273_v7  ;;  %v3816_v7 = vld [vmem:[#allocation7 + $0x68] sm:$0xff]  ;;  %18056 = vmatpush3.bf16.msra.mxu0 %v22496_v51  ;;  %v4062_v15 = vand.u32 4294901760, %v4061_v28  ;;  %v22623_v28 = vsub.f32 %v22338_v34, %v26824_v59 }
 0x3cf   : > { %v3866_v19 = vand.u32 4294901760, %v3816_v7  ;;  %v4068_v56 = vsub.f32 %v22543_v55, %v26300_v27  ;;  %v22566_v31 = vsub.f32 %v3817_v4, %v3869_v17 }
 0x3d0   : > { %v26305_v34 = vand.u32 4294901760, %v22623_v28 }
 0x3d1   : > { %15343 = vmatmul.mubr.f32.gmra.mrb[6].mxu1 %v22270_v38  ;;  %v22500_v41 = vpack.c.bf16 %v3866_v19, %v3863_v37  ;;  %v3872_v38 = vand.u32 4294901760, %v3818_v9  ;;  %v22557_v46 = vsub.f32 %v3816_v7, %v3866_v19  ;;  %v4069_v39 = vand.u32 4294901760, %v4068_v56  ;;  %26821 = vst [vmem:[#allocation136_spill] sm:$0xff] %v22566_v31 }
 0x3d2   : > { %v26297_v12 = vand.u32 4294901760, %v22566_v31  ;;  %v4012_v56 = vsub.f32 %v22613_v1, %v26306_v13 }
 0x3d3   : > { %18058 = vmatprep.subr.bf16.mxu0 %v22500_v41  ;;  %v22516_v26 = vpack.c.bf16 %v3872_v38, %v3869_v17  ;;  %26820 = vst [vmem:[#allocation135_spill] sm:$0xff] %v22557_v46  ;;  %v26298_v44 = vand.u32 4294901760, %v22557_v46  ;;  %v22561_v18 = vpack.c.bf16 %v4069_v39, %v4062_v15  ;;  %v22568_v21 = vsub.f32 %v3818_v9, %v3872_v38 }
 0x3d4   : > { %18060 = vmatpush3.bf16.msra.mxu0 %v22500_v41  ;;  %v4089_v29 = vsub.f32 %v22566_v31, %v26297_v12  ;;  %v22587_v9 = vpack.c.bf16 %v22510_v0, %v22505_v57  ;;  %v22591_v17 = vpack.c.bf16 %v22531_v52, %v22529_v60  ;;  %v22595_v38 = vpack.c.bf16 %v22543_v55, %v22541_v61 }
 0x3d5   : > { %18062 = vmatprep.subr.bf16.mxu0 %v22516_v26  ;;  %26822 = vst [vmem:[#allocation78_spill] sm:$0xff] %v22568_v21  ;;  %v4082_v5 = vsub.f32 %v22557_v46, %v26298_v44  ;;  %v26296_v10 = vand.u32 4294901760, %v22568_v21  ;;  %v22599_v24 = vpack.c.bf16 %v22557_v46, %v22555_v2  ;;  %v22603_v49 = vpack.c.bf16 %v22568_v21, %v22566_v31 }
 0x3d6   : > { %v4090_v37 = vand.u32 4294901760, %v4089_v29  ;;  %v4006_v29 = vand.u32 4294901760, %v4005_v32  ;;  %v4019_v32 = vsub.f32 %v22623_v28, %v26305_v34 }
 0x3d7   : > { %v4083_v63 = vand.u32 4294901760, %v4082_v5  ;;  %v4096_v53 = vsub.f32 %v22568_v21, %v26296_v10 }
 0x3d8   : > { %18064 = vmatpush3.bf16.msra.mxu0 %v22516_v26 }
 0x3d9   : > { %18066 = vmatprep.subr.bf16.mxu0 %v22526_v58  ;;  %v22581_v7 = vpack.c.bf16 %v4083_v63, %v4076_v50  ;;  %v4097_v19 = vand.u32 4294901760, %v4096_v53  ;;  %v26304_v50 = vand.u32 4294901760, %v22628_v40  ;;  %v4013_v53 = vand.u32 4294901760, %v4012_v56 }
 0x3db   : > { %v22583_v4 = vpack.c.bf16 %v4097_v19, %v4090_v37  ;;  %v26826_v37 = vand.u32 4294901760, %v22357_v35  ;;  %v18069_v12 = vpack.c.bf16 %v4013_v53, %v4006_v29 }
 0x3dd   : > { %v22641_v19 = vsub.f32 %v22357_v35, %v26826_v37 }
 0x498   : > { %v15335_v45 = vpop.f32.mrb[0].mxu1 }
 0x499   : > { %v3788_v15 = vadd.f32 %v15335_v45, %v12898_v62  ;;  %v3734_v39 = vpop.f32.mrb[1].mxu1 }
 0x49a   : > { %v3787_v42 = vadd.f32 %v12898_v62, %v3734_v39  ;;  %v26827_v39 = vand.u32 4294901760, %v22359_v48 }
 0x49b   : > { %v3796_v5 = vmax.f32 %v3788_v15, 0.0 }
 0x49c   : > { %v3795_v63 = vmax.f32 %v3787_v42, 0.0  ;;  %v15338_v36 = vpop.f32.mrb[2].mxu1  ;;  %v22648_v10 = vsub.f32 %v22359_v48, %v26827_v39 }
 0x49d   : > { %v22643_v59 = vand.u32 4294901760, %v3796_v5  ;;  %v3790_v47 = vadd.f32 %v15338_v36, %v12898_v62  ;;  %v3746_v45 = vpop.f32.mrb[3].mxu1  ;;  %v4026_v36 = vsub.f32 %v22628_v40, %v26304_v50 }
 0x49e   : > { %v22650_v15 = vand.u32 4294901760, %v3795_v63  ;;  %v3789_v42 = vadd.f32 %v12898_v62, %v3746_v45  ;;  %v26313_v45 = vand.u32 4294901760, %v22641_v19 }
 0x49f   : > { %v22656_v56 = vsub.f32 %v3796_v5, %v22643_v59  ;;  %v3798_v35 = vmax.f32 %v3790_v47, 0.0  ;;  %v26316_v47 = vand.u32 4294901760, %v22648_v10  ;;  %v4027_v50 = vand.u32 4294901760, %v4026_v36 }
 0x4a0   : > { %v22662_v37 = vsub.f32 %v3795_v63, %v22650_v15  ;;  %v3797_v48 = vmax.f32 %v3789_v42, 0.0  ;;  %v15341_v39 = vpop.f32.mrb[4].mxu1  ;;  %v4020_v63 = vand.u32 4294901760, %v4019_v32  ;;  %v4033_v32 = vsub.f32 %v22641_v19, %v26313_v45 }
 0x4a1   : > { %v26308_v44 = vand.u32 4294901760, %v22656_v56  ;;  %v22666_v14 = vand.u32 4294901760, %v3798_v35  ;;  %v3792_v27 = vadd.f32 %v15341_v39, %v12898_v62  ;;  %v3758_v5 = vpop.f32.mrb[5].mxu1  ;;  %v4040_v36 = vsub.f32 %v22648_v10, %v26316_v47 }
 0x4a2   : > { %v22669_v25 = vand.u32 4294901760, %v3797_v48  ;;  %v3791_v23 = vadd.f32 %v12898_v62, %v3758_v5  ;;  %v26311_v54 = vand.u32 4294901760, %v22662_v37  ;;  %v4034_v47 = vand.u32 4294901760, %v4033_v32 }
 0x4a3   : > { %v3920_v29 = vsub.f32 %v22656_v56, %v26308_v44  ;;  %v22676_v53 = vsub.f32 %v3798_v35, %v22666_v14  ;;  %v3800_v42 = vmax.f32 %v3792_v27, 0.0 }
 0x4a4   : > { %v22679_v39 = vsub.f32 %v3797_v48, %v22669_v25  ;;  %v3799_v34 = vmax.f32 %v3791_v23, 0.0  ;;  %v15344_v13 = vpop.f32.mrb[6].mxu1  ;;  %v3910_v5 = vsub.f32 %v22662_v37, %v26311_v54 }
 0x4a5   : > { %v22687_v30 = vand.u32 4294901760, %v3800_v42  ;;  %v3794_v44 = vadd.f32 %v15344_v13, %v12898_v62  ;;  %v3770_v35 = vpop.f32.mrb[7].mxu1  ;;  %v26317_v27 = vand.u32 4294901760, %v22676_v53  ;;  %v3921_v54 = vand.u32 4294901760, %v3920_v29 }
 0x4a6   : > { %v22693_v23 = vand.u32 4294901760, %v3799_v34  ;;  %v3793_v48 = vadd.f32 %v12898_v62, %v3770_v35  ;;  %v3911_v43 = vand.u32 4294901760, %v3910_v5  ;;  %v3929_v16 = vand.u32 4294901760, %v22679_v39 }
 0x4a7   : > { %v22697_v21 = vsub.f32 %v3800_v42, %v22687_v30  ;;  %v3802_v45 = vmax.f32 %v3794_v44, 0.0  ;;  %v3940_v13 = vsub.f32 %v22676_v53, %v26317_v27  ;;  %v18073_v29 = vpack.c.bf16 %v4027_v50, %v4020_v63 }
 0x4a8   : > { %v22703_v31 = vsub.f32 %v3799_v34, %v22693_v23  ;;  %v3801_v46 = vmax.f32 %v3793_v48, 0.0  ;;  %15377 = vmatprep.mubr.f32.mxu0 %v3911_v43  ;;  %v3930_v62 = vsub.f32 %v22679_v39, %v3929_v16  ;;  %v4041_v50 = vand.u32 4294901760, %v4040_v36 }
 0x4a9   : > { %v22708_v5 = vand.u32 4294901760, %v3802_v45  ;;  %15378 = vmatmul.mubr.f32.vlgmr.msra.gmra.mrb[8].mxu0 %v3921_v54  ;;  %v3959_v42 = vand.u32 4294901760, %v22697_v21  ;;  %v3941_v48 = vand.u32 4294901760, %v3940_v13 }
 0x4aa   : > { %v22711_v44 = vand.u32 4294901760, %v3801_v46  ;;  %18068 = vmatpush3.bf16.msra.mxu0 %v22526_v58  ;;  %v3931_v35 = vand.u32 4294901760, %v3930_v62  ;;  %v3949_v34 = vand.u32 4294901760, %v22703_v31  ;;  %v18077_v27 = vpack.c.bf16 %v4041_v50, %v4034_v47 }
 0x4ab   : > { %v22716_v43 = vsub.f32 %v3802_v45, %v22708_v5  ;;  %18070 = vmatprep.subr.bf16.mxu0 %v18069_v12  ;;  %v3960_v54 = vsub.f32 %v22697_v21, %v3959_v42  ;;  %v18101_v47 = vpack.c.bf16 %v22613_v1, %v22608_v20 }
 0x4ac   : > { %v22722_v63 = vsub.f32 %v3801_v46, %v22711_v44  ;;  %15380 = vmatprep.mubr.f32.mxu0 %v3931_v35  ;;  %v3950_v58 = vsub.f32 %v22703_v31, %v3949_v34 }
 0x4ad   : > { %15381 = vmatmul.mubr.f32.gmra.mrb[10].mxu0 %v3941_v48  ;;  %v3979_v32 = vand.u32 4294901760, %v22716_v43  ;;  %v3961_v62 = vand.u32 4294901760, %v3960_v54  ;;  %v22871_v54 = vld [vmem:[#allocation8 + $0x20] sm:$0xff] }
 0x4ae   : > { %18072 = vmatpush3.bf16.msra.mxu0 %v18069_v12  ;;  %v3951_v45 = vand.u32 4294901760, %v3950_v58  ;;  %v3969_v13 = vand.u32 4294901760, %v22722_v63  ;;  %v4812_v50 = vand.u32 4294901760, %v22871_v54  ;;  %v22885_v58 = vld [vmem:[#allocation8 + $0x30] sm:$0xff] }
 0x4af   : > { %18074 = vmatprep.subr.bf16.mxu0 %v18073_v29  ;;  %v3980_v46 = vsub.f32 %v22716_v43, %v3979_v32 }
 0x4b0   : > { %15383 = vmatprep.mubr.f32.mxu0 %v3951_v45  ;;  %v3970_v36 = vsub.f32 %v22722_v63, %v3969_v13  ;;  %v4818_v45 = vand.u32 4294901760, %v22885_v58 }
 0x4b1   : > { %15384 = vmatmul.mubr.f32.gmra.mrb[12].mxu0 %v3961_v62  ;;  %v3981_v12 = vand.u32 4294901760, %v3980_v46 }
 0x4b2   : > { %18076 = vmatpush3.bf16.msra.mxu0 %v18073_v29  ;;  %v3971_v35 = vand.u32 4294901760, %v3970_v36  ;;  %v26836_v29 = vand.u32 4294901760, %v22676_v53  ;;  %v4786_v36 = vld [vmem:[#allocation8 + $0x50] sm:$0xff] }
 0x4b3   : > { %18078 = vmatprep.subr.bf16.mxu0 %v18077_v27 }
 0x4b4   : > { %15386 = vmatprep.mubr.f32.mxu0 %v3971_v35  ;;  %v4787_v35 = vld [vmem:[#allocation8 + $0x58] sm:$0xff] }
 0x4b5   : > { %15387 = vmatmul.mubr.f32.gmra.mrb[14].mxu0 %v3981_v12 }
 0x4b6   : > { %18080 = vmatpush3.bf16.msra.mxu0 %v18077_v27  ;;  %15421 = vmatprep.mubr.f32.mxu0 %v22650_v15 }
 0x4b7   : > { %18082 = vmatprep.subr.bf16.mxu0 %v22547_v3 }
 0x4ba   : > { %18084 = vmatpush3.bf16.msra.mxu0 %v22547_v3  ;;  %v18105_v3 = vpack.c.bf16 %v22628_v40, %v22623_v28 }
 0x4bb   : > { %18086 = vmatprep.subr.bf16.mxu0 %v22561_v18 }
 0x4be   : > { %18088 = vmatpush3.bf16.msra.mxu0 %v22561_v18  ;;  %v18109_v18 = vpack.c.bf16 %v22648_v10, %v22641_v19 }
 0x4bf   : > { %18090 = vmatprep.subr.bf16.mxu0 %v22581_v7 }
 0x4c2   : > { %18092 = vmatpush3.bf16.msra.mxu0 %v22581_v7  ;;  %v26828_v7 = vand.u32 4294901760, %v22662_v37 }
 0x4c3   : > { %18094 = vmatprep.subr.bf16.mxu0 %v22583_v4 }
 0x4c6   : > { %18096 = vmatpush3.bf16.msra.mxu0 %v22583_v4  ;;  %v26829_v4 = vand.u32 4294901760, %v22505_v57  ;;  %v26834_v57 = vand.u32 4294901760, %v22623_v28  ;;  %v26839_v28 = vand.u32 4294901760, %v22529_v60  ;;  %v26844_v60 = vld [vmem:[#allocation135_spill] sm:$0xff] }
 0x4c7   : > { %18098 = vmatprep.subr.bf16.mxu0 %v22587_v9 }
 0x4c9   : > { %15422 = vmatmul.mubr.f32.vlgmr.msra.gmra.mrb[8].mxu0 %v22643_v59 }
 0x4ca   : > { %15424 = vmatprep.mubr.f32.mxu0 %v22669_v25  ;;  %18100 = vmatpush3.bf16.msra.mxu0 %v22587_v9  ;;  %v26830_v9 = vand.u32 4294901760, %v22510_v0  ;;  %v26835_v0 = vand.u32 4294901760, %v22628_v40 }
 0x4cb   : > { %18102 = vmatprep.subr.bf16.mxu0 %v18101_v47 }
 0x4cc   : > { %v18169_v27 = vpack.c.bf16 %v26835_v0, %v26834_v57 }
 0x4cd   : > { %15425 = vmatmul.mubr.f32.gmra.mrb[10].mxu0 %v22666_v14 }
 0x4ce   : > { %15427 = vmatprep.mubr.f32.mxu0 %v22693_v23  ;;  %18104 = vmatpush3.bf16.msra.mxu0 %v18101_v47  ;;  %v4788_v47 = vld [vmem:[#allocation8 + $0x60] sm:$0xff] }
 0x4cf   : > { %18106 = vmatprep.subr.bf16.mxu0 %v18105_v3 }
 0x4d1   : > { %15428 = vmatmul.mubr.f32.gmra.mrb[12].mxu0 %v22687_v30 }
 0x4d2   : > { %15430 = vmatprep.mubr.f32.mxu0 %v22711_v44  ;;  %18108 = vmatpush3.bf16.msra.mxu0 %v18105_v3  ;;  %v4836_v3 = vand.u32 4294901760, %v4788_v47 }
 0x4d3   : > { %18110 = vmatprep.subr.bf16.mxu0 %v18109_v18 }
 0x4d5   : > { %15431 = vmatmul.mubr.f32.gmra.mrb[14].mxu0 %v22708_v5 }
 0x4d6   : > { %18112 = vmatpush3.bf16.msra.mxu0 %v18109_v18  ;;  %15465 = vmatprep.mubr.f32.mxu0 %v22662_v37  ;;  %v26833_v37 = vand.u32 4294901760, %v22656_v56 }
 0x4d7   : > { %18114 = vmatprep.subr.bf16.mxu0 %v22591_v17 }
 0x4da   : > { %18116 = vmatpush3.bf16.msra.mxu0 %v22591_v17  ;;  %v18161_v17 = vpack.c.bf16 %v26830_v9, %v26829_v4 }
 0x4db   : > { %18118 = vmatprep.subr.bf16.mxu0 %v22595_v38 }
 0x4de   : > { %18120 = vmatpush3.bf16.msra.mxu0 %v22595_v38  ;;  %v26831_v38 = vand.u32 4294901760, %v22608_v20  ;;  %v26837_v20 = vand.u32 4294901760, %v22641_v19 }
 0x4df   : > { %18122 = vmatprep.subr.bf16.mxu0 %v22599_v24 }
 0x4e2   : > { %18124 = vmatpush3.bf16.msra.mxu0 %v22599_v24  ;;  %v26832_v24 = vand.u32 4294901760, %v22613_v1  ;;  %v26838_v1 = vand.u32 4294901760, %v22648_v10  ;;  %v26842_v10 = vand.u32 4294901760, %v22543_v55  ;;  %v22861_v55 = vld [vmem:[#allocation8 + $0x10] sm:$0xff] }
 0x4e3   : > { %18126 = vmatprep.subr.bf16.mxu0 %v22603_v49 }
 0x4e6   : > { %18128 = vmatpush3.bf16.msra.mxu0 %v22603_v49  ;;  %v18165_v49 = vpack.c.bf16 %v26832_v24, %v26831_v38  ;;  %v4791_v38 = vld [vmem:[#allocation8 + $0x78] sm:$0xff] }
 0x4e7   : > { %18130 = vmatprep.subr.bf16.mxu0 %v22347_v22 }
 0x4e9   : > { %15466 = vmatmul.mubr.f32.vlgmr.msra.gmra.mrb[8].mxu0 %v22656_v56  ;;  %v26843_v56 = vand.u32 4294901760, %v22555_v2  ;;  %v22863_v2 = vld [vmem:[#allocation8 + $0x18] sm:$0xff] }
 0x4ea   : > { %15468 = vmatprep.mubr.f32.mxu0 %v22679_v39  ;;  %18132 = vmatpush3.bf16.msra.mxu0 %v22347_v22  ;;  %v26846_v39 = vld [vmem:[#allocation136_spill] sm:$0xff] }
 0x4eb   : > { %18134 = vmatprep.subr.bf16.mxu0 %v22355_v6 }
 0x4ed   : > { %15469 = vmatmul.mubr.f32.gmra.mrb[10].mxu0 %v22676_v53  ;;  %v26845_v53 = vand.u32 4294901760, %v26844_v60 }
 0x4ee   : > { %15471 = vmatprep.mubr.f32.mxu0 %v22703_v31  ;;  %18136 = vmatpush3.bf16.msra.mxu0 %v22355_v6  ;;  %v26840_v31 = vand.u32 4294901760, %v22531_v52 }
 0x4ef   : > { %18138 = vmatprep.subr.bf16.mxu0 %v22369_v8  ;;  %v18185_v52 = vpack.c.bf16 %v26845_v53, %v26843_v56 }
 0x4f0   : > { %v18177_v40 = vpack.c.bf16 %v26840_v31, %v26839_v28 }
 0x4f1   : > { %15472 = vmatmul.mubr.f32.gmra.mrb[12].mxu0 %v22697_v21  ;;  %v26841_v21 = vand.u32 4294901760, %v22541_v61 }
 0x4f2   : > { %15474 = vmatprep.mubr.f32.mxu0 %v22722_v63  ;;  %18140 = vmatpush3.bf16.msra.mxu0 %v22369_v8 }
 0x4f3   : > { %18142 = vmatprep.subr.bf16.mxu0 %v22381_v11  ;;  %v18181_v19 = vpack.c.bf16 %v26842_v10, %v26841_v21 }
 0x4f5   : > { %15475 = vmatmul.mubr.f32.gmra.mrb[14].mxu0 %v22716_v43 }
 0x4f6   : > { %18144 = vmatpush3.bf16.msra.mxu0 %v22381_v11  ;;  %15509 = vmatprep.mubr.f32.mxu0 %v26828_v7 }
 0x4f7   : > { %18146 = vmatprep.subr.bf16.mxu0 %v22492_v33 }
 0x4fa   : > { %18148 = vmatpush3.bf16.msra.mxu0 %v22492_v33 }
 0x4fb   : > { %18150 = vmatprep.subr.bf16.mxu0 %v22496_v51 }
 0x4fe   : > { %18152 = vmatpush3.bf16.msra.mxu0 %v22496_v51 }
 0x4ff   : > { %18154 = vmatprep.subr.bf16.mxu0 %v22500_v41 }
 0x502   : > { %18156 = vmatpush3.bf16.msra.mxu0 %v22500_v41 }
 0x503   : > { %18158 = vmatprep.subr.bf16.mxu0 %v22516_v26 }
 0x506   : > { %18160 = vmatpush3.bf16.msra.mxu0 %v22516_v26 }
 0x507   : > { %18162 = vmatprep.subr.bf16.mxu0 %v18161_v17 }
 0x509   : > { %15510 = vmatmul.mubr.f32.vlgmr.msra.gmra.mrb[8].mxu0 %v26833_v37 }
 0x50a   : > { %15512 = vmatprep.mubr.f32.mxu0 %v3929_v16  ;;  %18164 = vmatpush3.bf16.msra.mxu0 %v18161_v17  ;;  %v18173_v16 = vpack.c.bf16 %v26838_v1, %v26837_v20  ;;  %v4790_v17 = vld [vmem:[#allocation8 + $0x70] sm:$0xff] }
 0x50b   : > { %18166 = vmatprep.subr.bf16.mxu0 %v18165_v49  ;;  %v4842_v24 = vand.u32 4294901760, %v4790_v17 }
 0x50d   : > { %15513 = vmatmul.mubr.f32.gmra.mrb[10].mxu0 %v26836_v29 }
 0x50e   : > { %15515 = vmatprep.mubr.f32.mxu0 %v3949_v34  ;;  %18168 = vmatpush3.bf16.msra.mxu0 %v18165_v49  ;;  %v26848_v34 = vld [vmem:[#allocation78_spill] sm:$0xff]  ;;  %v4845_v49 = vand.u32 4294901760, %v4791_v38 }
 0x50f   : > { %18170 = vmatprep.subr.bf16.mxu0 %v18169_v27  ;;  %v26849_v43 = vand.u32 4294901760, %v26848_v34 }
 0x510   : > { %v22935_v0 = vpack.c.bf16 %v4845_v49, %v4842_v24 }
 0x511   : > { %15516 = vmatmul.mubr.f32.gmra.mrb[12].mxu0 %v3959_v42  ;;  %v26847_v42 = vand.u32 4294901760, %v26846_v39 }
 0x512   : > { %15518 = vmatprep.mubr.f32.mxu0 %v3969_v13  ;;  %18172 = vmatpush3.bf16.msra.mxu0 %v18169_v27 }
 0x513   : > { %18174 = vmatprep.subr.bf16.mxu0 %v18173_v16  ;;  %v18189_v48 = vpack.c.bf16 %v26849_v43, %v26847_v42 }
 0x515   : > { %15519 = vmatmul.mubr.f32.gmra.mrb[14].mxu0 %v3979_v32  ;;  %v22887_v32 = vld [vmem:[#allocation8 + $0x38] sm:$0xff] }
 0x516   : > { %18176 = vmatpush3.bf16.msra.mxu0 %v18173_v16  ;;  %15553 = vmatprep.mubr.f32.mxu0 %v22650_v15  ;;  %v4821_v13 = vand.u32 4294901760, %v22887_v32 }
 0x517   : > { %18178 = vmatprep.subr.bf16.mxu0 %v18177_v40 }
 0x51a   : > { %18180 = vmatpush3.bf16.msra.mxu0 %v18177_v40 }
 0x51b   : > { %18182 = vmatprep.subr.bf16.mxu0 %v18181_v19 }
 0x51e   : > { %18184 = vmatpush3.bf16.msra.mxu0 %v18181_v19 }
 0x51f   : > { %18186 = vmatprep.subr.bf16.mxu0 %v18185_v52 }
 0x522   : > { %18188 = vmatpush3.bf16.msra.mxu0 %v18185_v52 }
 0x523   : > { %18190 = vmatprep.subr.bf16.mxu0 %v18189_v48 }
 0x526   : > { %18192 = vmatpush3.bf16.msra.mxu0 %v18189_v48 }
 0x527   : > { %18194 = vmatprep.subr.bf16.mxu0 %v22347_v22 }
 0x529   : > { %15554 = vmatmul.mubr.f32.vlgmr.msra.gmra.mrb[8].mxu0 %v22643_v59 }
 0x52a   : > { %15556 = vmatprep.mubr.f32.mxu0 %v22669_v25  ;;  %18196 = vmatpush3.bf16.msra.mxu0 %v22347_v22  ;;  %v4776_v22 = vld [vmem:[#allocation8] sm:$0xff] }
 0x52b   : > { %18198 = vmatprep.subr.bf16.mxu0 %v22355_v6 }
 0x52d   : > { %15557 = vmatmul.mubr.f32.gmra.mrb[10].mxu0 %v22666_v14 }
 0x52e   : > { %15559 = vmatprep.mubr.f32.mxu0 %v22693_v23  ;;  %18200 = vmatpush3.bf16.msra.mxu0 %v22355_v6  ;;  %v4777_v6 = vld [vmem:[#allocation8 + $0x8] sm:$0xff] }
 0x52f   : > { %18202 = vmatprep.subr.bf16.mxu0 %v22369_v8  ;;  %v4803_v61 = vand.u32 4294901760, %v4777_v6 }
 0x531   : > { %15560 = vmatmul.mubr.f32.gmra.mrb[12].mxu0 %v22687_v30  ;;  %v22929_v9 = vsub.f32 %v4777_v6, %v4803_v61 }
 0x532   : > { %15562 = vmatprep.mubr.f32.mxu0 %v22711_v44  ;;  %18204 = vmatpush3.bf16.msra.mxu0 %v22369_v8  ;;  %v4800_v8 = vand.u32 4294901760, %v4776_v22 }
 0x533   : > { %18206 = vmatprep.subr.bf16.mxu0 %v22381_v11  ;;  %v26331_v57 = vand.u32 4294901760, %v22929_v9 }
 0x534   : > { %v22927_v4 = vsub.f32 %v4776_v22, %v4800_v8  ;;  %v22974_v22 = vsub.f32 %v4788_v47, %v4836_v3 }
 0x535   : > { %15563 = vmatmul.mubr.f32.gmra.mrb[14].mxu0 %v22708_v5  ;;  %v4971_v29 = vsub.f32 %v22929_v9, %v26331_v57 }
 0x536   : > { %18208 = vmatpush3.bf16.msra.mxu0 %v22381_v11  ;;  %15597 = vmatprep.mubr.f32.mxu0 %v22650_v15  ;;  %v22867_v11 = vpack.c.bf16 %v4803_v61, %v4800_v8  ;;  %v4809_v15 = vand.u32 4294901760, %v22863_v2  ;;  %v26332_v37 = vand.u32 4294901760, %v22927_v4 }
 0x537   : > { %18210 = vmatprep.subr.bf16.mxu0 %v22492_v33  ;;  %v4972_v1 = vand.u32 4294901760, %v4971_v29  ;;  %v23006_v29 = vpack.c.bf16 %v22929_v9, %v22927_v4 }
 0x538   : > { %v4964_v27 = vsub.f32 %v22927_v4, %v26332_v37 }
 0x53a   : > { %18212 = vmatpush3.bf16.msra.mxu0 %v22492_v33  ;;  %v4806_v33 = vand.u32 4294901760, %v22861_v55  ;;  %v4965_v20 = vand.u32 4294901760, %v4964_v27 }
 0x53b   : > { %18214 = vmatprep.subr.bf16.mxu0 %v22496_v51 }
 0x53c   : > { %v22945_v16 = vpack.c.bf16 %v4972_v1, %v4965_v20 }
 0x53e   : > { %18216 = vmatpush3.bf16.msra.mxu0 %v22496_v51  ;;  %v22873_v51 = vld [vmem:[#allocation8 + $0x28] sm:$0xff] }
 0x53f   : > { %18218 = vmatprep.subr.bf16.mxu0 %v22500_v41  ;;  %v4815_v63 = vand.u32 4294901760, %v22873_v51 }
 0x542   : > { %18220 = vmatpush3.bf16.msra.mxu0 %v22500_v41  ;;  %v22881_v41 = vpack.c.bf16 %v4809_v15, %v4806_v33 }
 0x543   : > { %18222 = vmatprep.subr.bf16.mxu0 %v22516_v26 }
 0x546   : > { %18224 = vmatpush3.bf16.msra.mxu0 %v22516_v26  ;;  %v22897_v26 = vpack.c.bf16 %v4815_v63, %v4812_v50 }
 0x547   : > { %18226 = vmatprep.subr.bf16.mxu0 %v22867_v11 }
 0x549   : > { %15598 = vmatmul.mubr.f32.vlgmr.msra.gmra.mrb[8].mxu0 %v22643_v59  ;;  %v4785_v59 = vld [vmem:[#allocation8 + $0x48] sm:$0xff] }
 0x54a   : > { %15600 = vmatprep.mubr.f32.mxu0 %v22669_v25  ;;  %18228 = vmatpush3.bf16.msra.mxu0 %v22867_v11  ;;  %v22909_v25 = vpack.c.bf16 %v4821_v13, %v4818_v45  ;;  %v4827_v62 = vand.u32 4294901760, %v4785_v59 }
 0x54b   : > { %18230 = vmatprep.subr.bf16.mxu0 %v22881_v41 }
 0x54c   : > { %v22950_v31 = vsub.f32 %v4785_v59, %v4827_v62 }
 0x54d   : > { %15601 = vmatmul.mubr.f32.gmra.mrb[10].mxu0 %v22666_v14  ;;  %v4784_v14 = vld [vmem:[#allocation8 + $0x40] sm:$0xff] }
 0x54e   : > { %15603 = vmatprep.mubr.f32.mxu0 %v22693_v23  ;;  %18232 = vmatpush3.bf16.msra.mxu0 %v22881_v41  ;;  %v4824_v23 = vand.u32 4294901760, %v4784_v14  ;;  %v26324_v21 = vand.u32 4294901760, %v22950_v31 }
 0x54f   : > { %18234 = vmatprep.subr.bf16.mxu0 %v22897_v26 }
 0x550   : > { %v22917_v46 = vpack.c.bf16 %v4827_v62, %v4824_v23  ;;  %v22948_v28 = vsub.f32 %v4784_v14, %v4824_v23  ;;  %v5027_v19 = vsub.f32 %v22950_v31, %v26324_v21  ;;  %v26321_v14 = vand.u32 4294901760, %v22974_v22 }
 0x551   : > { %15604 = vmatmul.mubr.f32.gmra.mrb[12].mxu0 %v22687_v30  ;;  %v4830_v30 = vand.u32 4294901760, %v4786_v36 }
 0x552   : > { %15606 = vmatprep.mubr.f32.mxu0 %v22711_v44  ;;  %18236 = vmatpush3.bf16.msra.mxu0 %v22897_v26  ;;  %v4833_v44 = vand.u32 4294901760, %v4787_v35  ;;  %v26325_v40 = vand.u32 4294901760, %v22948_v28  ;;  %v5028_v52 = vand.u32 4294901760, %v5027_v19  ;;  %v5048_v62 = vsub.f32 %v22974_v22, %v26321_v14 }
 0x553   : > { %18238 = vmatprep.subr.bf16.mxu0 %v22909_v25  ;;  %v22960_v56 = vsub.f32 %v4786_v36, %v4830_v30  ;;  %v22985_v36 = vsub.f32 %v4790_v17, %v4842_v24  ;;  %v23010_v20 = vpack.c.bf16 %v22950_v31, %v22948_v28 }
 0x554   : > { %v22921_v12 = vpack.c.bf16 %v4833_v44, %v4830_v30  ;;  %v5020_v10 = vsub.f32 %v22948_v28, %v26325_v40  ;;  %v22962_v60 = vsub.f32 %v4787_v35, %v4833_v44  ;;  %v22987_v35 = vsub.f32 %v4791_v38, %v4845_v49 }
 0x555   : > { %15607 = vmatmul.mubr.f32.gmra.mrb[14].mxu0 %v22708_v5  ;;  %v4789_v5 = vld [vmem:[#allocation8 + $0x68] sm:$0xff]  ;;  %v26323_v39 = vand.u32 4294901760, %v22960_v56  ;;  %26851 = vst [vmem:[#allocation123_spill] sm:$0xff] %v22985_v36  ;;  %v5049_v44 = vand.u32 4294901760, %v5048_v62  ;;  %v26319_v47 = vand.u32 4294901760, %v22985_v36 }
 0x556   : > { %18240 = vmatpush3.bf16.msra.mxu0 %v22909_v25  ;;  %v4839_v18 = vand.u32 4294901760, %v4789_v5  ;;  %v5021_v53 = vand.u32 4294901760, %v5020_v10  ;;  %v26322_v42 = vand.u32 4294901760, %v22962_v60  ;;  %26852 = vst [vmem:[#allocation52_spill] sm:$0xff] %v22987_v35  ;;  %v23014_v1 = vpack.c.bf16 %v22962_v60, %v22960_v56 }
 0x557   : > { %18242 = vmatprep.subr.bf16.mxu0 %v22917_v46  ;;  %v5034_v43 = vsub.f32 %v22960_v56, %v26323_v39  ;;  %v23022_v19 = vpack.c.bf16 %v22987_v35, %v22985_v36 }
 0x558   : > { %v22925_v7 = vpack.c.bf16 %v4839_v18, %v4836_v3  ;;  %v22966_v34 = vpack.c.bf16 %v5028_v52, %v5021_v53  ;;  %v5041_v48 = vsub.f32 %v22962_v60, %v26322_v42  ;;  %v22976_v6 = vsub.f32 %v4789_v5, %v4839_v18 }
 0x559   : > { %v5035_v8 = vand.u32 4294901760, %v5034_v43  ;;  %v26318_v5 = vand.u32 4294901760, %v22987_v35  ;;  %v5062_v18 = vsub.f32 %v22985_v36, %v26319_v47  ;;  %v23027_v53 = vsub.f32 %v22861_v55, %v4806_v33 }
 0x55a   : > { %18244 = vmatpush3.bf16.msra.mxu0 %v22917_v46  ;;  %26850 = vst [vmem:[#allocation130_spill] sm:$0xff] %v22976_v6  ;;  %v5042_v61 = vand.u32 4294901760, %v5041_v48  ;;  %v26320_v59 = vand.u32 4294901760, %v22976_v6  ;;  %v23018_v10 = vpack.c.bf16 %v22976_v6, %v22974_v22  ;;  %v23032_v52 = vsub.f32 %v22863_v2, %v4809_v15 }
 0x55b   : > { %18246 = vmatprep.subr.bf16.mxu0 %v22921_v12  ;;  %v5069_v17 = vsub.f32 %v22987_v35, %v26318_v5  ;;  %v5063_v24 = vand.u32 4294901760, %v5062_v18  ;;  %v26329_v43 = vand.u32 4294901760, %v23027_v53  ;;  %v23047_v55 = vsub.f32 %v22873_v51, %v4815_v63 }
 0x55c   : > { %v22980_v23 = vpack.c.bf16 %v5042_v61, %v5035_v8  ;;  %v5055_v30 = vsub.f32 %v22976_v6, %v26320_v59  ;;  %v26328_v48 = vand.u32 4294901760, %v23032_v52  ;;  %v12899_v8 = vld [vmem:[%s26051_s7] ss:$0 sm:$0xff]  ;;  %v23042_v61 = vsub.f32 %v22871_v54, %v4812_v50 }
 0x55d   : > { %v5070_v49 = vand.u32 4294901760, %v5069_v17  ;;  %v4978_v33 = vsub.f32 %v23027_v53, %v26329_v43 }
 0x55e   : > { %18248 = vmatpush3.bf16.msra.mxu0 %v22921_v12  ;;  %v5056_v3 = vand.u32 4294901760, %v5055_v30  ;;  %v4985_v15 = vsub.f32 %v23032_v52, %v26328_v48  ;;  %v26327_v54 = vand.u32 4294901760, %v23042_v61 }
 0x55f   : > { %18250 = vmatprep.subr.bf16.mxu0 %v22925_v7  ;;  %v23002_v27 = vpack.c.bf16 %v5070_v49, %v5063_v24  ;;  %v4979_v63 = vand.u32 4294901760, %v4978_v33  ;;  %v23060_v24 = vsub.f32 %v22885_v58, %v4818_v45 }
 0x560   : > { %v23000_v38 = vpack.c.bf16 %v5056_v3, %v5049_v44  ;;  %v26326_v3 = vand.u32 4294901760, %v23047_v55  ;;  %v4986_v17 = vand.u32 4294901760, %v4985_v15  ;;  %v4992_v33 = vsub.f32 %v23042_v61, %v26327_v54 }
 0x562   : > { %18252 = vmatpush3.bf16.msra.mxu0 %v22925_v7  ;;  %v4999_v45 = vsub.f32 %v23047_v55, %v26326_v3  ;;  %v18261_v47 = vpack.c.bf16 %v4986_v17, %v4979_v63 }
 0x563   : > { %18254 = vmatprep.subr.bf16.mxu0 %v22935_v0 }
 0x564   : > { %v5000_v3 = vand.u32 4294901760, %v4999_v45 }
 0x566   : > { %18256 = vmatpush3.bf16.msra.mxu0 %v22935_v0 }
 0x567   : > { %18258 = vmatprep.subr.bf16.mxu0 %v22945_v16 }
 0x61c   : > { %v15599_v2 = vpop.f32.mrb[8].mxu0 }
 0x61d   : > { %v19297_v62 = vadd.f32 %v15599_v2, %v12899_v8  ;;  %v4722_v30 = vpop.f32.mrb[9].mxu0 }
 0x61e   : > { %v19298_v44 = vadd.f32 %v12899_v8, %v4722_v30  ;;  %v23067_v30 = vsub.f32 %v22887_v32, %v4821_v13 }
 0x61f   : > { %v4769_v50 = vmax.f32 %v19297_v62, 0.0 }
 0x620   : > { %v4768_v18 = vmax.f32 %v19298_v44, 0.0  ;;  %v15602_v51 = vpop.f32.mrb[10].mxu0 }
 0x621   : > { %v23062_v49 = vand.u32 4294901760, %v4769_v50  ;;  %v19299_v5 = vadd.f32 %v15602_v51, %v12899_v8  ;;  %v4734_v2 = vpop.f32.mrb[11].mxu0 }
 0x622   : > { %v23069_v62 = vand.u32 4294901760, %v4768_v18  ;;  %v19300_v44 = vadd.f32 %v12899_v8, %v4734_v2  ;;  %v26335_v2 = vand.u32 4294901760, %v23060_v24 }
 0x623   : > { %v23075_v15 = vsub.f32 %v4769_v50, %v23062_v49  ;;  %v4771_v58 = vmax.f32 %v19299_v5, 0.0  ;;  %v26338_v5 = vand.u32 4294901760, %v23067_v30 }
 0x624   : > { %v23081_v51 = vsub.f32 %v4768_v18, %v23069_v62  ;;  %v4770_v32 = vmax.f32 %v19300_v44, 0.0  ;;  %v15605_v13 = vpop.f32.mrb[12].mxu0  ;;  %v4993_v18 = vand.u32 4294901760, %v4992_v33  ;;  %v5006_v33 = vsub.f32 %v23060_v24, %v26335_v2 }
 0x625   : > { %v26330_v59 = vand.u32 4294901760, %v23075_v15  ;;  %v23085_v14 = vand.u32 4294901760, %v4771_v58  ;;  %v19301_v42 = vadd.f32 %v15605_v13, %v12899_v8  ;;  %v4746_v50 = vpop.f32.mrb[13].mxu0  ;;  %v5013_v45 = vsub.f32 %v23067_v30, %v26338_v5 }
 0x626   : > { %v23088_v39 = vand.u32 4294901760, %v4770_v32  ;;  %v19302_v21 = vadd.f32 %v12899_v8, %v4746_v50  ;;  %v26333_v40 = vand.u32 4294901760, %v23081_v51  ;;  %v5007_v5 = vand.u32 4294901760, %v5006_v33 }
 0x627   : > { %v4893_v63 = vsub.f32 %v23075_v15, %v26330_v59  ;;  %v23095_v17 = vsub.f32 %v4771_v58, %v23085_v14  ;;  %v4773_v44 = vmax.f32 %v19301_v42, 0.0 }
 0x628   : > { %v23098_v13 = vsub.f32 %v4770_v32, %v23088_v39  ;;  %v4772_v54 = vmax.f32 %v19302_v21, 0.0  ;;  %v15608_v48 = vpop.f32.mrb[14].mxu0  ;;  %v4883_v50 = vsub.f32 %v23081_v51, %v26333_v40 }
 0x629   : > { %v23106_v43 = vand.u32 4294901760, %v4773_v44  ;;  %v19303_v59 = vadd.f32 %v15608_v48, %v12899_v8  ;;  %v4758_v58 = vpop.f32.mrb[15].mxu0  ;;  %v26339_v42 = vand.u32 4294901760, %v23095_v17  ;;  %v4894_v40 = vand.u32 4294901760, %v4893_v63 }
 0x62a   : > { %v23112_v21 = vand.u32 4294901760, %v4772_v54  ;;  %v19304_v32 = vadd.f32 %v12899_v8, %v4758_v58  ;;  %v4884_v57 = vand.u32 4294901760, %v4883_v50  ;;  %v4902_v37 = vand.u32 4294901760, %v23098_v13 }
 0x62b   : > { %v23116_v35 = vsub.f32 %v4773_v44, %v23106_v43  ;;  %v4775_v2 = vmax.f32 %v19303_v59, 0.0  ;;  %v4913_v48 = vsub.f32 %v23095_v17, %v26339_v42  ;;  %v18265_v63 = vpack.c.bf16 %v5000_v3, %v4993_v18 }
 0x62c   : > { %v23122_v36 = vsub.f32 %v4772_v54, %v23112_v21  ;;  %v4774_v6 = vmax.f32 %v19304_v32, 0.0  ;;  %15641 = vmatprep.mubr.f32.mxu0 %v4884_v57  ;;  %v4903_v8 = vsub.f32 %v23098_v13, %v4902_v37  ;;  %v5014_v3 = vand.u32 4294901760, %v5013_v45 }
 0x62d   : > { %v23127_v50 = vand.u32 4294901760, %v4775_v2  ;;  %15642 = vmatmul.mubr.f32.vlgmr.msra.gmra.mrb[16].mxu0 %v4894_v40  ;;  %v4932_v44 = vand.u32 4294901760, %v23116_v35  ;;  %v4914_v32 = vand.u32 4294901760, %v4913_v48 }
 0x62e   : > { %v23130_v59 = vand.u32 4294901760, %v4774_v6  ;;  %18260 = vmatpush3.bf16.msra.mxu0 %v22945_v16  ;;  %v4904_v58 = vand.u32 4294901760, %v4903_v8  ;;  %v4922_v54 = vand.u32 4294901760, %v23122_v36  ;;  %v18269_v42 = vpack.c.bf16 %v5014_v3, %v5007_v5 }
 0x62f   : > { %v23135_v57 = vsub.f32 %v4775_v2, %v23127_v50  ;;  %18262 = vmatprep.subr.bf16.mxu0 %v18261_v47  ;;  %v4933_v40 = vsub.f32 %v23116_v35, %v4932_v44  ;;  %v18293_v5 = vpack.c.bf16 %v23032_v52, %v23027_v53 }
 0x630   : > { %v23141_v18 = vsub.f32 %v4774_v6, %v23130_v59  ;;  %15644 = vmatprep.mubr.f32.mxu0 %v4904_v58  ;;  %v4923_v16 = vsub.f32 %v23122_v36, %v4922_v54 }
 0x631   : > { %15645 = vmatmul.mubr.f32.gmra.mrb[18].mxu0 %v4914_v32  ;;  %v4952_v33 = vand.u32 4294901760, %v23135_v57  ;;  %v4934_v8 = vand.u32 4294901760, %v4933_v40 }
 0x632   : > { %18264 = vmatpush3.bf16.msra.mxu0 %v18261_v47  ;;  %v4924_v2 = vand.u32 4294901760, %v4923_v16  ;;  %v4942_v48 = vand.u32 4294901760, %v23141_v18 }
 0x633   : > { %18266 = vmatprep.subr.bf16.mxu0 %v18265_v63  ;;  %v4953_v6 = vsub.f32 %v23135_v57, %v4952_v33 }
 0x634   : > { %15647 = vmatprep.mubr.f32.mxu0 %v4924_v2  ;;  %v4943_v45 = vsub.f32 %v23141_v18, %v4942_v48 }
 0x635   : > { %15648 = vmatmul.mubr.f32.gmra.mrb[20].mxu0 %v4934_v8  ;;  %v4954_v47 = vand.u32 4294901760, %v4953_v6 }
 0x636   : > { %18268 = vmatpush3.bf16.msra.mxu0 %v18265_v63  ;;  %v4944_v58 = vand.u32 4294901760, %v4943_v45  ;;  %v26861_v63 = vand.u32 4294901760, %v23095_v17 }
 0x637   : > { %18270 = vmatprep.subr.bf16.mxu0 %v18269_v42 }
 0x638   : > { %15650 = vmatprep.mubr.f32.mxu0 %v4944_v58 }
 0x639   : > { %15651 = vmatmul.mubr.f32.gmra.mrb[22].mxu0 %v4954_v47 }
 0x63a   : > { %18272 = vmatpush3.bf16.msra.mxu0 %v18269_v42  ;;  %15685 = vmatprep.mubr.f32.mxu0 %v23069_v62 }
 0x63b   : > { %18274 = vmatprep.subr.bf16.mxu0 %v22966_v34 }
 0x63e   : > { %18276 = vmatpush3.bf16.msra.mxu0 %v22966_v34  ;;  %v18297_v34 = vpack.c.bf16 %v23047_v55, %v23042_v61 }
 0x63f   : > { %18278 = vmatprep.subr.bf16.mxu0 %v22980_v23 }
 0x642   : > { %18280 = vmatpush3.bf16.msra.mxu0 %v22980_v23  ;;  %v18301_v23 = vpack.c.bf16 %v23067_v30, %v23060_v24 }
 0x643   : > { %18282 = vmatprep.subr.bf16.mxu0 %v23000_v38 }
 0x646   : > { %18284 = vmatpush3.bf16.msra.mxu0 %v23000_v38  ;;  %v26853_v38 = vand.u32 4294901760, %v23081_v51 }
 0x647   : > { %18286 = vmatprep.subr.bf16.mxu0 %v23002_v27 }
 0x64a   : > { %18288 = vmatpush3.bf16.msra.mxu0 %v23002_v27  ;;  %v26854_v27 = vand.u32 4294901760, %v22927_v4  ;;  %v26859_v4 = vand.u32 4294901760, %v23042_v61  ;;  %v26864_v61 = vand.u32 4294901760, %v22948_v28  ;;  %v26869_v28 = vld [vmem:[#allocation130_spill] sm:$0xff] }
 0x64b   : > { %18290 = vmatprep.subr.bf16.mxu0 %v23006_v29 }
 0x64d   : > { %15686 = vmatmul.mubr.f32.vlgmr.msra.gmra.mrb[16].mxu0 %v23062_v49 }
 0x64e   : > { %15688 = vmatprep.mubr.f32.mxu0 %v23088_v39  ;;  %18292 = vmatpush3.bf16.msra.mxu0 %v23006_v29  ;;  %v26855_v29 = vand.u32 4294901760, %v22929_v9  ;;  %v26860_v9 = vand.u32 4294901760, %v23047_v55 }
 0x64f   : > { %18294 = vmatprep.subr.bf16.mxu0 %v18293_v5 }
 0x650   : > { %v18361_v42 = vpack.c.bf16 %v26860_v9, %v26859_v4 }
 0x651   : > { %15689 = vmatmul.mubr.f32.gmra.mrb[18].mxu0 %v23085_v14 }
 0x652   : > { %15691 = vmatprep.mubr.f32.mxu0 %v23112_v21  ;;  %18296 = vmatpush3.bf16.msra.mxu0 %v18293_v5 }
 0x653   : > { %18298 = vmatprep.subr.bf16.mxu0 %v18297_v34 }
 0x655   : > { %15692 = vmatmul.mubr.f32.gmra.mrb[20].mxu0 %v23106_v43 }
 0x656   : > { %15694 = vmatprep.mubr.f32.mxu0 %v23130_v59  ;;  %18300 = vmatpush3.bf16.msra.mxu0 %v18297_v34 }
 0x657   : > { %18302 = vmatprep.subr.bf16.mxu0 %v18301_v23 }
 0x659   : > { %15695 = vmatmul.mubr.f32.gmra.mrb[22].mxu0 %v23127_v50 }
 0x65a   : > { %18304 = vmatpush3.bf16.msra.mxu0 %v18301_v23  ;;  %15729 = vmatprep.mubr.f32.mxu0 %v23081_v51  ;;  %v26858_v51 = vand.u32 4294901760, %v23075_v15 }
 0x65b   : > { %18306 = vmatprep.subr.bf16.mxu0 %v23010_v20 }
 0x65e   : > { %18308 = vmatpush3.bf16.msra.mxu0 %v23010_v20  ;;  %v18353_v20 = vpack.c.bf16 %v26855_v29, %v26854_v27 }
 0x65f   : > { %18310 = vmatprep.subr.bf16.mxu0 %v23014_v1 }
 0x662   : > { %18312 = vmatpush3.bf16.msra.mxu0 %v23014_v1  ;;  %v26856_v1 = vand.u32 4294901760, %v23027_v53  ;;  %v26862_v53 = vand.u32 4294901760, %v23060_v24  ;;  %v26867_v24 = vand.u32 4294901760, %v22962_v60 }
 0x663   : > { %18314 = vmatprep.subr.bf16.mxu0 %v23018_v10 }
 0x666   : > { %18316 = vmatpush3.bf16.msra.mxu0 %v23018_v10  ;;  %v26857_v10 = vand.u32 4294901760, %v23032_v52  ;;  %v26863_v52 = vand.u32 4294901760, %v23067_v30 }
 0x667   : > { %18318 = vmatprep.subr.bf16.mxu0 %v23022_v19 }
 0x66a   : > { %18320 = vmatpush3.bf16.msra.mxu0 %v23022_v19  ;;  %v18357_v19 = vpack.c.bf16 %v26857_v10, %v26856_v1 }
 0x66b   : > { %18322 = vmatprep.subr.bf16.mxu0 %v22867_v11 }
 0x66d   : > { %15730 = vmatmul.mubr.f32.vlgmr.msra.gmra.mrb[16].mxu0 %v23075_v15  ;;  %v26868_v15 = vand.u32 4294901760, %v22974_v22 }
 0x66e   : > { %15732 = vmatprep.mubr.f32.mxu0 %v23098_v13  ;;  %18324 = vmatpush3.bf16.msra.mxu0 %v22867_v11  ;;  %v26871_v13 = vld [vmem:[#allocation123_spill] sm:$0xff] }
 0x66f   : > { %18326 = vmatprep.subr.bf16.mxu0 %v22881_v41 }
 0x671   : > { %15733 = vmatmul.mubr.f32.gmra.mrb[18].mxu0 %v23095_v17  ;;  %v26870_v17 = vand.u32 4294901760, %v26869_v28 }
 0x672   : > { %15735 = vmatprep.mubr.f32.mxu0 %v23122_v36  ;;  %18328 = vmatpush3.bf16.msra.mxu0 %v22881_v41  ;;  %v26865_v36 = vand.u32 4294901760, %v22950_v31 }
 0x673   : > { %18330 = vmatprep.subr.bf16.mxu0 %v22897_v26  ;;  %v18377_v31 = vpack.c.bf16 %v26870_v17, %v26868_v15 }
 0x674   : > { %v18369_v55 = vpack.c.bf16 %v26865_v36, %v26864_v61  ;;  %v20146_v61 = vld [vmem:[%s20922_s25] sm:$0xff] }
 0x675   : > { %15736 = vmatmul.mubr.f32.gmra.mrb[20].mxu0 %v23116_v35  ;;  %v26866_v35 = vand.u32 4294901760, %v22960_v56  ;;  %v5862_v36 = vsel %vm5860_vm0, %v20146_v61, 0 }
 0x676   : > { %15738 = vmatprep.mubr.f32.mxu0 %v23141_v18  ;;  %18332 = vmatpush3.bf16.msra.mxu0 %v22897_v26 }
 0x677   : > { %18334 = vmatprep.subr.bf16.mxu0 %v22909_v25  ;;  %v18373_v30 = vpack.c.bf16 %v26867_v24, %v26866_v35 }
 0x679   : > { %15739 = vmatmul.mubr.f32.gmra.mrb[22].mxu0 %v23135_v57 }
 0x67a   : > { %18336 = vmatpush3.bf16.msra.mxu0 %v22909_v25  ;;  %15773 = vmatprep.mubr.f32.mxu0 %v26853_v38 }
 0x67b   : > { %18338 = vmatprep.subr.bf16.mxu0 %v22917_v46 }
 0x67e   : > { %18340 = vmatpush3.bf16.msra.mxu0 %v22917_v46 }
 0x67f   : > { %18342 = vmatprep.subr.bf16.mxu0 %v22921_v12 }
 0x682   : > { %18344 = vmatpush3.bf16.msra.mxu0 %v22921_v12 }
 0x683   : > { %18346 = vmatprep.subr.bf16.mxu0 %v22925_v7 }
 0x686   : > { %18348 = vmatpush3.bf16.msra.mxu0 %v22925_v7 }
 0x687   : > { %18350 = vmatprep.subr.bf16.mxu0 %v22935_v0 }
 0x68a   : > { %18352 = vmatpush3.bf16.msra.mxu0 %v22935_v0 }
 0x68b   : > { %18354 = vmatprep.subr.bf16.mxu0 %v18353_v20 }
 0x68d   : > { %15774 = vmatmul.mubr.f32.vlgmr.msra.gmra.mrb[16].mxu0 %v26858_v51 }
 0x68e   : > { %15776 = vmatprep.mubr.f32.mxu0 %v4902_v37  ;;  %18356 = vmatpush3.bf16.msra.mxu0 %v18353_v20  ;;  %v18365_v37 = vpack.c.bf16 %v26863_v52, %v26862_v53 }
 0x68f   : > { %18358 = vmatprep.subr.bf16.mxu0 %v18357_v19 }
 0x691   : > { %15777 = vmatmul.mubr.f32.gmra.mrb[18].mxu0 %v26861_v63 }
 0x692   : > { %15779 = vmatprep.mubr.f32.mxu0 %v4922_v54  ;;  %18360 = vmatpush3.bf16.msra.mxu0 %v18357_v19  ;;  %v26873_v54 = vld [vmem:[#allocation52_spill] sm:$0xff] }
 0x693   : > { %18362 = vmatprep.subr.bf16.mxu0 %v18361_v42  ;;  %v26874_v57 = vand.u32 4294901760, %v26873_v54 }
 0x695   : > { %15780 = vmatmul.mubr.f32.gmra.mrb[20].mxu0 %v4932_v44  ;;  %v26872_v44 = vand.u32 4294901760, %v26871_v13 }
 0x696   : > { %15782 = vmatprep.mubr.f32.mxu0 %v4942_v48  ;;  %18364 = vmatpush3.bf16.msra.mxu0 %v18361_v42 }
 0x697   : > { %18366 = vmatprep.subr.bf16.mxu0 %v18365_v37  ;;  %v18381_v32 = vpack.c.bf16 %v26874_v57, %v26872_v44 }
 0x699   : > { %15783 = vmatmul.mubr.f32.gmra.mrb[22].mxu0 %v4952_v33 }
 0x69a   : > { %18368 = vmatpush3.bf16.msra.mxu0 %v18365_v37  ;;  %15817 = vmatprep.mubr.f32.mxu0 %v23069_v62 }
 0x69b   : > { %18370 = vmatprep.subr.bf16.mxu0 %v18369_v55 }
 0x69e   : > { %18372 = vmatpush3.bf16.msra.mxu0 %v18369_v55  ;;  %v23327_v55 = vand.u32 4294901760, %v5862_v36 }
 0x69f   : > { %18374 = vmatprep.subr.bf16.mxu0 %v18373_v30 }
 0x6a0   : > { %v23330_v35 = vsub.f32 %v5862_v36, %v23327_v55 }
 0x6a2   : > { %18376 = vmatpush3.bf16.msra.mxu0 %v18373_v30  ;;  %v26346_v24 = vand.u32 4294901760, %v23330_v35 }
 0x6a3   : > { %18378 = vmatprep.subr.bf16.mxu0 %v18377_v31 }
 0x6a4   : > { %v5985_v30 = vsub.f32 %v23330_v35, %v26346_v24 }
 0x6a6   : > { %18380 = vmatpush3.bf16.msra.mxu0 %v18377_v31  ;;  %v5986_v15 = vand.u32 4294901760, %v5985_v30 }
 0x6a7   : > { %18382 = vmatprep.subr.bf16.mxu0 %v18381_v32 }
 0x6a8   : > { %15889 = vmatprep.mubr.f32.mxu1 %v5986_v15 }
 0x6aa   : > { %18384 = vmatpush3.bf16.msra.mxu0 %v18381_v32 }
 0x6ab   : > { %18386 = vmatprep.subr.bf16.mxu0 %v22867_v11 }
 0x6ad   : > { %15818 = vmatmul.mubr.f32.vlgmr.msra.gmra.mrb[16].mxu0 %v23062_v49 }
 0x6ae   : > { %15820 = vmatprep.mubr.f32.mxu0 %v23088_v39  ;;  %18388 = vmatpush3.bf16.msra.mxu0 %v22867_v11  ;;  %v12900_v11 = vld [vmem:[%s26053_s9] ss:$0 sm:$0xff] }
 0x6af   : > { %18390 = vmatprep.subr.bf16.mxu0 %v22881_v41 }
 0x6b1   : > { %15821 = vmatmul.mubr.f32.gmra.mrb[18].mxu0 %v23085_v14 }
 0x6b2   : > { %15823 = vmatprep.mubr.f32.mxu0 %v23112_v21  ;;  %18392 = vmatpush3.bf16.msra.mxu0 %v22881_v41 }
 0x6b3   : > { %18394 = vmatprep.subr.bf16.mxu0 %v22897_v26 }
 0x6b5   : > { %15824 = vmatmul.mubr.f32.gmra.mrb[20].mxu0 %v23106_v43 }
 0x6b6   : > { %15826 = vmatprep.mubr.f32.mxu0 %v23130_v59  ;;  %18396 = vmatpush3.bf16.msra.mxu0 %v22897_v26 }
 0x6b7   : > { %18398 = vmatprep.subr.bf16.mxu0 %v22909_v25 }
 0x6b9   : > { %15827 = vmatmul.mubr.f32.gmra.mrb[22].mxu0 %v23127_v50 }
 0x6ba   : > { %18400 = vmatpush3.bf16.msra.mxu0 %v22909_v25  ;;  %15861 = vmatprep.mubr.f32.mxu0 %v23069_v62 }
 0x6bb   : > { %18402 = vmatprep.subr.bf16.mxu0 %v22917_v46 }
 0x6be   : > { %18404 = vmatpush3.bf16.msra.mxu0 %v22917_v46 }
 0x6bf   : > { %18406 = vmatprep.subr.bf16.mxu0 %v22921_v12 }
 0x6c2   : > { %18408 = vmatpush3.bf16.msra.mxu0 %v22921_v12 }
 0x6c3   : > { %18410 = vmatprep.subr.bf16.mxu0 %v22925_v7 }
 0x6c6   : > { %18412 = vmatpush3.bf16.msra.mxu0 %v22925_v7 }
 0x6c7   : > { %18414 = vmatprep.subr.bf16.mxu0 %v22935_v0 }
 0x6ca   : > { %18416 = vmatpush3.bf16.msra.mxu0 %v22935_v0 }
 0x6cd   : > { %15862 = vmatmul.mubr.f32.vlgmr.msra.gmra.mrb[16].mxu0 %v23062_v49 }
 0x6ce   : > { %15864 = vmatprep.mubr.f32.mxu0 %v23088_v39 }
 0x6d1   : > { %15865 = vmatmul.mubr.f32.gmra.mrb[18].mxu0 %v23085_v14 }
 0x6d2   : > { %15867 = vmatprep.mubr.f32.mxu0 %v23112_v21 }
 0x6d5   : > { %15868 = vmatmul.mubr.f32.gmra.mrb[20].mxu0 %v23106_v43 }
 0x6d6   : > { %15870 = vmatprep.mubr.f32.mxu0 %v23130_v59 }
 0x6d9   : > { %15871 = vmatmul.mubr.f32.gmra.mrb[22].mxu0 %v23127_v50 }
 0x7a0   : > { %v15863_v41 = vpop.f32.mrb[16].mxu0 }
 0x7a1   : > { %v19305_v26 = vadd.f32 %v15863_v41, %v12900_v11  ;;  %v5695_v25 = vpop.f32.mrb[17].mxu0 }
 0x7a2   : > { %v19306_v12 = vadd.f32 %v12900_v11, %v5695_v25 }
 0x7a3   : > { %5745 = vadd.xlane.f32.xlu1 %v19305_v26 }
 0x7a4   : > { %v15866_v46 = vpop.f32.mrb[18].mxu0 }
 0x7a5   : > { %v5707_v7 = vpop.f32.mrb[19].mxu0  ;;  %v19307_v56 = vadd.f32 %v15866_v46, %v12900_v11  ;;  %v23342_v46 = vld [vmem:[%s26054_s10] ss:$0 sm:$0xff] }
 0x7a6   : > { %v19308_v22 = vadd.f32 %v12900_v11, %v5707_v7 }
 0x7a7   : > { %5743 = vadd.xlane.f32.xlu1 %v19306_v12 }
 0x7a8   : > { %v15869_v0 = vpop.f32.mrb[20].mxu0 }
 0x7a9   : > { %v5719_v60 = vpop.f32.mrb[21].mxu0  ;;  %v19309_v43 = vadd.f32 %v15869_v0, %v12900_v11 }
 0x7aa   : > { %v19310_v49 = vadd.f32 %v12900_v11, %v5719_v60 }
 0x7ab   : > { %5749 = vadd.xlane.f32.xlu1 %v19307_v56 }
 0x7ac   : > { %v15872_v39 = vpop.f32.mrb[22].mxu0 }
 0x7ad   : > { %v5731_v14 = vpop.f32.mrb[23].mxu0  ;;  %v19311_v21 = vadd.f32 %v15872_v39, %v12900_v11 }
 0x7ae   : > { %v19312_v62 = vadd.f32 %v12900_v11, %v5731_v14 }
 0x7af   : > { %5747 = vadd.xlane.f32.xlu1 %v19308_v22 }
 0x7b3   : > { %5753 = vadd.xlane.f32.xlu1 %v19309_v43 }
 0x7b7   : > { %5751 = vadd.xlane.f32.xlu1 %v19310_v49 }
 0x7bb   : > { %5755 = vadd.xlane.f32.xlu1 %v19312_v62 }
 0x7bf   : > { %5757 = vadd.xlane.f32.xlu1 %v19311_v21 }
 0x830   : > { %v5746_v50 = vpop.xlane.xlu1 %5745 }
 0x831   : > { %v5761_v59 = vmul.f32 0.0078125, %v5746_v50  ;;  %v20147_v50 = vld [vmem:[%s21526_s29 + $0x8] sm:$0xff] }
 0x833   : > { %v23293_v40 = vsub.f32 %v19305_v26, %v5761_v59 }
 0x834   : > { %v5744_v3 = vpop.xlane.xlu1 %5743 }
 0x835   : > { %v5760_v18 = vmul.f32 0.0078125, %v5744_v3  ;;  %v5777_v16 = vmul.f32 %v23293_v40, %v23293_v40 }
 0x837   : > { %v23297_v33 = vsub.f32 %v19306_v12, %v5760_v18  ;;  %5786 = vadd.xlane.f32.xlu1 %v5777_v16 }
 0x838   : > { %v5750_v2 = vpop.xlane.xlu1 %5749 }
 0x839   : > { %v5763_v48 = vmul.f32 0.0078125, %v5750_v2  ;;  %v5776_v8 = vmul.f32 %v23297_v33, %v23297_v33 }
 0x83b   : > { %v23301_v6 = vsub.f32 %v19307_v56, %v5763_v48  ;;  %5784 = vadd.xlane.f32.xlu1 %v5776_v8  ;;  %v23348_v56 = vld [vmem:[%s26055_s11] ss:$0 sm:$0xff] }
 0x83c   : > { %v5748_v45 = vpop.xlane.xlu1 %5747 }
 0x83d   : > { %v5762_v58 = vmul.f32 0.0078125, %v5748_v45  ;;  %v5779_v47 = vmul.f32 %v23301_v6, %v23301_v6  ;;  %v20148_v45 = vld [vmem:[%s21526_s29] sm:$0xff] }
 0x83f   : > { %v23305_v5 = vsub.f32 %v19308_v22, %v5762_v58  ;;  %5790 = vadd.xlane.f32.xlu1 %v5779_v47 }
 0x840   : > { %v5754_v34 = vpop.xlane.xlu1 %5753 }
 0x841   : > { %v5765_v23 = vmul.f32 0.0078125, %v5754_v34  ;;  %v5778_v38 = vmul.f32 %v23305_v5, %v23305_v5 }
 0x843   : > { %v23309_v27 = vsub.f32 %v19309_v43, %v5765_v23  ;;  %5788 = vadd.xlane.f32.xlu1 %v5778_v38 }
 0x844   : > { %v5752_v29 = vpop.xlane.xlu1 %5751 }
 0x845   : > { %v5764_v20 = vmul.f32 0.0078125, %v5752_v29  ;;  %v5781_v1 = vmul.f32 %v23309_v27, %v23309_v27 }
 0x847   : > { %v23313_v10 = vsub.f32 %v19310_v49, %v5764_v20  ;;  %5794 = vadd.xlane.f32.xlu1 %v5781_v1 }
 0x848   : > { %v5756_v19 = vpop.xlane.xlu1 %5755 }
 0x849   : > { %v5766_v51 = vmul.f32 0.0078125, %v5756_v19  ;;  %v5780_v4 = vmul.f32 %v23313_v10, %v23313_v10 }
 0x84b   : > { %v23317_v9 = vsub.f32 %v19312_v62, %v5766_v51  ;;  %5792 = vadd.xlane.f32.xlu1 %v5780_v4 }
 0x84c   : > { %v5758_v42 = vpop.xlane.xlu1 %5757 }
 0x84d   : > { %v5767_v63 = vmul.f32 0.0078125, %v5758_v42  ;;  %v5782_v53 = vmul.f32 %v23317_v9, %v23317_v9  ;;  %v20149_v42 = vld [vmem:[%s21526_s29 + $0x18] sm:$0xff] }
 0x84f   : > { %v23321_v52 = vsub.f32 %v19311_v21, %v5767_v63  ;;  %5796 = vadd.xlane.f32.xlu1 %v5782_v53 }
 0x851   : > { %v5783_v37 = vmul.f32 %v23321_v52, %v23321_v52 }
 0x853   : > { %5798 = vadd.xlane.f32.xlu1 %v5783_v37 }
 0x8c4   : > { %v5787_v28 = vpop.xlane.xlu1 %5786 }
 0x8c5   : > { %v5801_v17 = vmul.f32 0.0078125, %v5787_v28 }
 0x8c7   : > { %v5809_v31 = vadd.f32 1e-05, %v5801_v17 }
 0x8c8   : > { %v5785_v13 = vpop.xlane.xlu1 %5784 }
 0x8c9   : > { %20098 = vrsqrt.f32 %v5809_v31  ;;  %v5800_v44 = vmul.f32 0.0078125, %v5785_v13  ;;  %v20150_v31 = vld [vmem:[%s21526_s29 + $0x10] sm:$0xff] }
 0x8cb   : > { %v5808_v54 = vadd.f32 1e-05, %v5800_v44 }
 0x8cc   : > { %v5791_v57 = vpop.xlane.xlu1 %5790 }
 0x8cd   : > { %20100 = vrsqrt.f32 %v5808_v54  ;;  %v5803_v32 = vmul.f32 0.0078125, %v5791_v57 }
 0x8cf   : > { %v5811_v11 = vadd.f32 1e-05, %v5803_v32 }
 0x8d0   : > { %v5789_v41 = vpop.xlane.xlu1 %5788 }
 0x8d1   : > { %20102 = vrsqrt.f32 %v5811_v11  ;;  %v5802_v26 = vmul.f32 0.0078125, %v5789_v41 }
 0x8d3   : > { %v20099_v25 = vpop.eup %20098  ;;  %v5810_v12 = vadd.f32 1e-05, %v5802_v26  ;;  %v26875_v26 = vld [vmem:[#allocation33_spill] sm:$0xff] }
 0x8d4   : > { %v5825_v7 = vmul.f32 %v20099_v25, %v23293_v40  ;;  %v5795_v0 = vpop.xlane.xlu1 %5794  ;;  %v23395_v25 = vand.u32 4294901760, %v26875_v26 }
 0x8d5   : > { %20104 = vrsqrt.f32 %v5810_v12  ;;  %v5805_v60 = vmul.f32 0.0078125, %v5795_v0 }
 0x8d6   : > { %v5839_v39 = vmul.f32 %v23342_v46, %v5825_v7  ;;  %v26876_v7 = vld [vmem:[#allocation34_spill] sm:$0xff] }
 0x8d7   : > { %v20101_v22 = vpop.eup %20100  ;;  %v5813_v14 = vadd.f32 1e-05, %v5805_v60  ;;  %v23400_v0 = vand.u32 4294901760, %v26876_v7  ;;  %v20151_v60 = vld [vmem:[%s21526_s29 + $0x28] sm:$0xff] }
 0x8d8   : > { %v5853_v43 = vadd.f32 %v23348_v56, %v5839_v39  ;;  %v5824_v49 = vmul.f32 %v20101_v22, %v23297_v33  ;;  %v5793_v62 = vpop.xlane.xlu1 %5792 }
 0x8d9   : > { %20106 = vrsqrt.f32 %v5813_v14  ;;  %v5804_v21 = vmul.f32 0.0078125, %v5793_v62 }
 0x8da   : > { %v12623_v59 = vadd.f32 %v20147_v50, %v5853_v43  ;;  %v5838_v40 = vmul.f32 %v23342_v46, %v5824_v49  ;;  %v5913_v16 = vand.u32 4294901760, %v5853_v43 }
 0x8db   : > { %v20103_v3 = vpop.eup %20102  ;;  %v5812_v18 = vadd.f32 1e-05, %v5804_v21 }
 0x8dc   : > { %12631 = vst [vmem:[%s23356_s20 + $0x8] sm:$0xff] %v12623_v59  ;;  %v5852_v2 = vadd.f32 %v23348_v56, %v5838_v40  ;;  %v5827_v33 = vmul.f32 %v20103_v3, %v23301_v6  ;;  %v5797_v48 = vpop.xlane.xlu1 %5796  ;;  %v23363_v29 = vsub.f32 %v5853_v43, %v5913_v16  ;;  %v23416_v40 = vsub.f32 %v26875_v26, %v23395_v25 }
 0x8dd   : > { %20108 = vrsqrt.f32 %v5812_v18  ;;  %v5806_v8 = vmul.f32 0.0078125, %v5797_v48 }
 0x8de   : > { %v12622_v58 = vadd.f32 %v20148_v45, %v5852_v2  ;;  %v5841_v47 = vmul.f32 %v23342_v46, %v5827_v33  ;;  %v5910_v34 = vand.u32 4294901760, %v5852_v2  ;;  %v6152_v30 = vand.u32 4294901760, %v23363_v29 }
 0x8df   : > { %v20105_v23 = vpop.eup %20104  ;;  %v5814_v38 = vadd.f32 1e-05, %v5806_v8 }
 0x8e0   : > { %12630 = vst [vmem:[%s23356_s20] sm:$0xff] %v12622_v58  ;;  %v5855_v20 = vadd.f32 %v23348_v56, %v5841_v47  ;;  %v5826_v1 = vmul.f32 %v20105_v23, %v23305_v5  ;;  %v5799_v6 = vpop.xlane.xlu1 %5798  ;;  %v23368_v19 = vpack.c.bf16 %v5913_v16, %v5910_v34  ;;  %v23370_v51 = vsub.f32 %v5852_v2, %v5910_v34  ;;  %v20152_v2 = vld [vmem:[%s21526_s29 + $0x20] sm:$0xff]  ;;  %v26878_v58 = vld [vmem:[#allocation36_spill] sm:$0xff] }
 0x8e1   : > { %20110 = vrsqrt.f32 %v5814_v38  ;;  %v5807_v4 = vmul.f32 0.0078125, %v5799_v6  ;;  %v23424_v16 = vsub.f32 %v26876_v7, %v23400_v0  ;;  %v23433_v47 = vand.u32 4294901760, %v26878_v58  ;;  %v26879_v34 = vld [vmem:[#allocation37_spill] sm:$0xff]  ;;  %v26880_v38 = vld [vmem:[#allocation38_spill] sm:$0xff] }
 0x8e2   : > { %v12625_v63 = vadd.f32 %v20149_v42, %v5855_v20  ;;  %v5840_v53 = vmul.f32 %v23342_v46, %v5826_v1  ;;  %18418 = vmatprep.subr.bf16.mxu1 %v23368_v19  ;;  %v6145_v37 = vand.u32 4294901760, %v23370_v51  ;;  %v5919_v36 = vand.u32 4294901760, %v5855_v20 }
 0x8e3   : > { %v20107_v61 = vpop.eup %20106  ;;  %v5815_v5 = vadd.f32 1e-05, %v5807_v4  ;;  %18420 = vmatpush3.bf16.msra.mxu1 %v23368_v19  ;;  %v23436_v23 = vand.u32 4294901760, %v26879_v34 }
 0x8e4   : > { %12633 = vst [vmem:[%s23356_s20 + $0x18] sm:$0xff] %v12625_v63  ;;  %v5854_v15 = vadd.f32 %v23348_v56, %v5840_v53  ;;  %v5829_v28 = vmul.f32 %v20107_v61, %v23309_v27  ;;  %v23383_v17 = vpack.c.bf16 %v6152_v30, %v6145_v37  ;;  %v23387_v32 = vsub.f32 %v5855_v20, %v5919_v36  ;;  %v26881_v53 = vld [vmem:[#allocation39_spill] sm:$0xff] }
 0x8e5   : > { %20112 = vrsqrt.f32 %v5815_v5  ;;  %v23439_v20 = vand.u32 4294901760, %v26880_v38  ;;  %v26343_v63 = vand.u32 4294901760, %v23416_v40  ;;  %v23450_v61 = vand.u32 4294901760, %v26881_v53 }
 0x8e6   : > { %v12624_v13 = vadd.f32 %v20150_v31, %v5854_v15  ;;  %v5843_v44 = vmul.f32 %v23342_v46, %v5829_v28  ;;  %v5916_v54 = vand.u32 4294901760, %v5854_v15  ;;  %v6166_v21 = vand.u32 4294901760, %v23387_v32 }
 0x8e7   : > { %v20109_v57 = vpop.eup %20108  ;;  %v6146_v5 = vsub.f32 %v23370_v51, %v6145_v37  ;;  %v26342_v37 = vand.u32 4294901760, %v23424_v16 }
 0x8e8   : > { %12632 = vst [vmem:[%s23356_s20 + $0x10] sm:$0xff] %v12624_v13  ;;  %v5857_v11 = vadd.f32 %v23348_v56, %v5843_v44  ;;  %v5828_v27 = vmul.f32 %v20109_v57, %v23313_v10  ;;  %v23392_v41 = vpack.c.bf16 %v5919_v36, %v5916_v54  ;;  %v23397_v12 = vsub.f32 %v5854_v15, %v5916_v54  ;;  %v26877_v10 = vld [vmem:[#allocation35_spill] sm:$0xff] }
 0x8e9   : > { %v23406_v49 = vand.u32 4294901760, %v26877_v10  ;;  %v20153_v15 = vld [vmem:[%s21526_s29 + $0x30] sm:$0xff]  ;;  %v23460_v44 = vsub.f32 %v26878_v58, %v23433_v47  ;;  %v23464_v54 = vsub.f32 %v26879_v34, %v23436_v23  ;;  %v23473_v57 = vsub.f32 %v26880_v38, %v23439_v20 }
 0x8ea   : > { %v12627_v39 = vadd.f32 %v20151_v60, %v5857_v11  ;;  %v5842_v22 = vmul.f32 %v23342_v46, %v5828_v27  ;;  %18422 = vmatprep.subr.bf16.mxu1 %v23392_v41  ;;  %v5925_v14 = vand.u32 4294901760, %v5857_v11  ;;  %v6159_v62 = vand.u32 4294901760, %v23397_v12 }
 0x8eb   : > { %v20111_v43 = vpop.eup %20110  ;;  %18424 = vmatpush3.bf16.msra.mxu1 %v23392_v41  ;;  %v5995_v60 = vsub.f32 %v23416_v40, %v26343_v63 }
 0x8ec   : > { %12635 = vst [vmem:[%s23356_s20 + $0x28] sm:$0xff] %v12627_v39  ;;  %v5856_v50 = vadd.f32 %v23348_v56, %v5842_v22  ;;  %v5830_v59 = vmul.f32 %v20111_v43, %v23317_v9  ;;  %v23418_v3 = vsub.f32 %v5857_v11, %v5925_v14  ;;  %v23420_v18 = vpack.c.bf16 %v6166_v21, %v6159_v62  ;;  %v26882_v11 = vld [vmem:[#allocation40_spill] sm:$0xff] }
 0x8ed   : > { %v23430_v9 = vsub.f32 %v26877_v10, %v23406_v49  ;;  %v23476_v27 = vand.u32 4294901760, %v26882_v11  ;;  %v6147_v39 = vand.u32 4294901760, %v6146_v5  ;;  %v5996_v38 = vand.u32 4294901760, %v5995_v60 }
 0x8ee   : > { %v12626_v33 = vadd.f32 %v20152_v2, %v5856_v50  ;;  %v5844_v48 = vmul.f32 %v23342_v46, %v5830_v59  ;;  %v5922_v8 = vand.u32 4294901760, %v5856_v50  ;;  %v6180_v36 = vand.u32 4294901760, %v23418_v3  ;;  %v26883_v59 = vld [vmem:[#allocation41_spill] sm:$0xff] }
 0x8ef   : > { %v20113_v45 = vpop.eup %20112  ;;  %v26341_v22 = vand.u32 4294901760, %v23430_v9  ;;  %v23495_v2 = vand.u32 4294901760, %v26883_v59 }
 0x8f0   : > { %12634 = vst [vmem:[%s23356_s20 + $0x20] sm:$0xff] %v12626_v33  ;;  %v5858_v1 = vadd.f32 %v23348_v56, %v5844_v48  ;;  %v5831_v6 = vmul.f32 %v20113_v45, %v23321_v52  ;;  %v23444_v4 = vpack.c.bf16 %v5925_v14, %v5922_v8  ;;  %v23446_v42 = vsub.f32 %v5856_v50, %v5922_v8  ;;  %v20154_v14 = vld [vmem:[%s21526_s29 + $0x38] sm:$0xff]  ;;  %s20399_s29 = sshll.u32 %s20521_s5, 4  ;;  %s20400_s29 = int_to_ptr.vmem [resolvable:$false] %s20399_s29 }
 0x8f1   : > { %v6160_v50 = vsub.f32 %v23397_v12, %v6159_v62  ;;  %v6005_v48 = vsub.f32 %v23424_v16, %v26342_v37  ;;  %v26340_v8 = vand.u32 4294901760, %v23460_v44  ;;  %v23503_v45 = vsub.f32 %v26882_v11, %v23476_v27  ;;  %s20401_s2 = scalar_lea.vmem %s20400_s29, 2048  ;;  %p20402_p10 = scmp.lt.s32.totalorder %s25869_s21, %s20400_s29 }
 0x8f2   : > { %v12628_v28 = vadd.f32 %v20153_v15, %v5858_v1  ;;  %v5845_v31 = vmul.f32 %v23342_v46, %v5831_v6  ;;  %18426 = vmatprep.subr.bf16.mxu1 %v23444_v4  ;;  %v5928_v52 = vand.u32 4294901760, %v5858_v1  ;;  %v6173_v13 = vand.u32 4294901760, %v23446_v42  ;;  %p20403_p2 = scmp.lt.s32.totalorder %s20401_s2, %s20395_s27 }
 0x8f3   : > { %18428 = vmatpush3.bf16.msra.mxu1 %v23444_v4  ;;  %v6153_v46 = vsub.f32 %v23363_v29, %v6152_v30  ;;  %v23487_v30 = vsub.f32 %v26881_v53, %v23450_v61  ;;  %v6167_v62 = vsub.f32 %v23387_v32, %v6166_v21  ;;  %v6015_v6 = vsub.f32 %v23430_v9, %v26341_v22  ;;  %v26884_v21 = vld [vmem:[#allocation42_spill] sm:$0xff] }
 0x8f4   : > { %12636 = vst [vmem:[%s23356_s20 + $0x30] sm:$0xff] %v12628_v28  ;;  %v5859_v26 = vadd.f32 %v23348_v56, %v5845_v31  ;;  %v23480_v7 = vpack.c.bf16 %v6180_v36, %v6173_v13  ;;  %v23492_v56 = vsub.f32 %v5858_v1, %v5928_v52  ;;  %v26344_v53 = vand.u32 4294901760, %v23464_v54  ;;  %p20404_p3 = por %p20403_p2, %p20402_p10 }
 0x8f5   : > { %v6154_v33 = vand.u32 4294901760, %v6153_v46  ;;  %v6161_v5 = vand.u32 4294901760, %v6160_v50  ;;  %v6174_v15 = vsub.f32 %v23446_v42, %v6173_v13  ;;  %v6006_v46 = vand.u32 4294901760, %v6005_v48  ;;  %v26886_v50 = vld [vmem:[#allocation44_spill] sm:$0xff] }
 0x8f6   : > { %v12629_v43 = vadd.f32 %v20154_v14, %v5859_v26  ;;  %v5931_v10 = vand.u32 4294901760, %v5859_v26  ;;  %v6187_v28 = vand.u32 4294901760, %v23492_v56  ;;  %v6025_v11 = vsub.f32 %v23460_v44, %v26340_v8  ;;  %p20405_p4 = pnand %p20404_p3, %p20398_p0 }
 0x8f7   : > { %v18433_v1 = vpack.c.bf16 %v6154_v33, %v6147_v39  ;;  %v23529_v60 = vsub.f32 %v26883_v59, %v23495_v2  ;;  %v6168_v13 = vand.u32 4294901760, %v6167_v62  ;;  %v6181_v39 = vsub.f32 %v23418_v3, %v6180_v36 }
 0x8f8   : > { %12637 = vst [vmem:[%s23356_s20 + $0x38] sm:$0xff] %v12629_v43  ;;  %v23506_v58 = vpack.c.bf16 %v5931_v10, %v5928_v52  ;;  %v23509_v34 = vsub.f32 %v5859_v26, %v5931_v10  ;;  %v23520_v52 = vand.u32 4294901760, %v26884_v21  ;;  %v26345_v26 = vand.u32 4294901760, %v23473_v57  ;;  %v26885_v43 = vld [vmem:[#allocation43_spill] sm:$0xff] }
 0x8f9   : > { %v23535_v10 = vand.u32 4294901760, %v26885_v43  ;;  %v23538_v33 = vand.u32 4294901760, %v26886_v50  ;;  %v6016_v48 = vand.u32 4294901760, %v6015_v6  ;;  %v6035_v8 = vsub.f32 %v23464_v54, %v26344_v53 }
 0x8fa   : > { %18430 = vmatprep.subr.bf16.mxu1 %v23506_v58  ;;  %v6194_v31 = vand.u32 4294901760, %v23509_v34  ;;  %v18437_v59 = vpack.c.bf16 %v6168_v13, %v6161_v5  ;;  %v6175_v22 = vand.u32 4294901760, %v6174_v15  ;;  %v26347_v36 = vand.u32 4294901760, %v23487_v30 }
 0x8fb   : > { %18432 = vmatpush3.bf16.msra.mxu1 %v23506_v58  ;;  %v23547_v37 = vsub.f32 %v26884_v21, %v23520_v52  ;;  %v6026_v63 = vand.u32 4294901760, %v6025_v11  ;;  %v6045_v6 = vsub.f32 %v23473_v57, %v26345_v26  ;;  %v26348_v53 = vand.u32 4294901760, %v23503_v45  ;;  %v26888_v26 = vld [vmem:[#allocation46_spill] sm:$0xff] }
 0x8fc   : > { %18434 = vmatprep.subr.bf16.mxu1 %v18433_v1  ;;  %v23532_v14 = vpack.c.bf16 %v6194_v31, %v6187_v28  ;;  %v6195_v62 = vsub.f32 %v23509_v34, %v6194_v31  ;;  %v6188_v5 = vsub.f32 %v23492_v56, %v6187_v28  ;;  %v23556_v15 = vsub.f32 %v26885_v43, %v23535_v10 }
 0x8fd   : > { %v23560_v31 = vsub.f32 %v26886_v50, %v23538_v33  ;;  %v6074_v28 = vand.u32 4294901760, %v23529_v60  ;;  %v23570_v43 = vand.u32 4294901760, %v26888_v26  ;;  %v6046_v50 = vand.u32 4294901760, %v6045_v6 }
 0x8fe   : > { %15890 = vmatmul.mubr.f32.vlgmr.msra.gmra.mrb[8].mxu1 %v5996_v38  ;;  %v6182_v38 = vand.u32 4294901760, %v6181_v39  ;;  %v6196_v13 = vand.u32 4294901760, %v6195_v62  ;;  %v6055_v39 = vsub.f32 %v23487_v30, %v26347_v36  ;;  %v6065_v24 = vsub.f32 %v23503_v45, %v26348_v53  ;;  %v26889_v62 = vld [vmem:[#allocation47_spill] sm:$0xff] }
 0x8ff   : > { %18436 = vmatpush3.bf16.msra.mxu1 %v18433_v1  ;;  %15892 = vmatprep.mubr.f32.mxu1 %v6006_v46  ;;  %v26887_v1 = vld [vmem:[#allocation45_spill] sm:$0xff]  ;;  %v6036_v46 = vand.u32 4294901760, %v6035_v8  ;;  %v6084_v8 = vand.u32 4294901760, %v23547_v37  ;;  %v6094_v6 = vand.u32 4294901760, %v23556_v15  ;;  %v23589_v53 = vsub.f32 %v26888_v26, %v23570_v43 }
 0x900   : > { %18438 = vmatprep.subr.bf16.mxu1 %v18437_v59  ;;  %v23563_v21 = vand.u32 4294901760, %v26887_v1  ;;  %v18441_v11 = vpack.c.bf16 %v6182_v38, %v6175_v22  ;;  %v6189_v22 = vand.u32 4294901760, %v6188_v5  ;;  %v23581_v38 = vand.u32 4294901760, %v26889_v62 }
 0x901   : > { %v6066_v5 = vand.u32 4294901760, %v6065_v24  ;;  %v6095_v24 = vsub.f32 %v23556_v15, %v6094_v6 }
 0x902   : > { %15893 = vmatmul.mubr.f32.gmra.mrb[10].mxu1 %v6016_v48  ;;  %v23578_v48 = vsub.f32 %v26887_v1, %v23563_v21  ;;  %v18445_v36 = vpack.c.bf16 %v6196_v13, %v6189_v22  ;;  %v6085_v1 = vsub.f32 %v23547_v37, %v6084_v8  ;;  %v23597_v13 = vsub.f32 %v26889_v62, %v23581_v38 }
 0x903   : > { %18440 = vmatpush3.bf16.msra.mxu1 %v18437_v59  ;;  %15895 = vmatprep.mubr.f32.mxu1 %v6026_v63  ;;  %v6056_v59 = vand.u32 4294901760, %v6055_v39  ;;  %v6075_v63 = vsub.f32 %v23529_v60, %v6074_v28  ;;  %v18449_v39 = vpack.c.bf16 %v23363_v29, %v23370_v51  ;;  %v6124_v62 = vand.u32 4294901760, %v23589_v53 }
 0x904   : > { %18442 = vmatprep.subr.bf16.mxu1 %v18441_v11  ;;  %v6134_v51 = vand.u32 4294901760, %v23597_v13 }
 0x905   : > { %v6076_v26 = vand.u32 4294901760, %v6075_v63 }
 0x906   : > { %15896 = vmatmul.mubr.f32.gmra.mrb[12].mxu1 %v6036_v46  ;;  %v6104_v46 = vand.u32 4294901760, %v23560_v31 }
 0x907   : > { %18444 = vmatpush3.bf16.msra.mxu1 %v18441_v11  ;;  %15898 = vmatprep.mubr.f32.mxu1 %v6046_v50  ;;  %v6114_v11 = vand.u32 4294901760, %v23578_v48  ;;  %v6086_v50 = vand.u32 4294901760, %v6085_v1  ;;  %v6135_v1 = vsub.f32 %v23597_v13, %v6134_v51 }
 0x908   : > { %18446 = vmatprep.subr.bf16.mxu1 %v18445_v36  ;;  %v6105_v22 = vsub.f32 %v23560_v31, %v6104_v46 }
 0x909   : > { %v6115_v29 = vsub.f32 %v23578_v48, %v6114_v11 }
 0x90a   : > { %15899 = vmatmul.mubr.f32.gmra.mrb[14].mxu1 %v6056_v59  ;;  %v6096_v59 = vand.u32 4294901760, %v6095_v24  ;;  %v6106_v63 = vand.u32 4294901760, %v6105_v22  ;;  %v6136_v24 = vand.u32 4294901760, %v6135_v1  ;;  %v18457_v22 = vpack.c.bf16 %v23418_v3, %v23446_v42 }
 0x90b   : > { %18448 = vmatpush3.bf16.msra.mxu1 %v18445_v36  ;;  %15901 = vmatprep.mubr.f32.mxu1 %v6066_v5  ;;  %v6125_v36 = vsub.f32 %v23589_v53, %v6124_v62  ;;  %v6116_v5 = vand.u32 4294901760, %v6115_v29  ;;  %v26892_v3 = vand.u32 4294901760, %v23424_v16  ;;  %v26893_v42 = vand.u32 4294901760, %v23430_v9 }
 0x90c   : > { %18450 = vmatprep.subr.bf16.mxu1 %v18449_v39 }
 0x90e   : > { %15902 = vmatmul.mubr.f32.gmra.mrb[16].mxu1 %v6076_v26  ;;  %v6126_v26 = vand.u32 4294901760, %v6125_v36  ;;  %v23783_v36 = vld [vmem:[#allocation11 + $0x70] sm:$0xff] }
 0x90f   : > { %15904 = vmatprep.mubr.f32.mxu1 %v6086_v50  ;;  %v18453_v50 = vpack.c.bf16 %v23387_v32, %v23397_v12  ;;  %v26890_v32 = vand.u32 4294901760, %v23330_v35  ;;  %v26891_v12 = vand.u32 4294901760, %v23416_v40 }
 0x912   : > { %15905 = vmatmul.mubr.f32.gmra.mrb[18].mxu1 %v6096_v59  ;;  %v18461_v59 = vpack.c.bf16 %v23509_v34, %v23492_v56  ;;  %v26894_v56 = vand.u32 4294901760, %v23460_v44 }
 0x913   : > { %15907 = vmatprep.mubr.f32.mxu1 %v6106_v63 }
 0x916   : > { %15908 = vmatmul.mubr.f32.gmra.mrb[20].mxu1 %v6116_v5  ;;  %v23785_v5 = vld [vmem:[#allocation11 + $0x78] sm:$0xff] }
 0x917   : > { %15910 = vmatprep.mubr.f32.mxu1 %v6126_v26  ;;  %v7166_v26 = vand.u32 4294901760, %v23783_v36 }
 0x91a   : > { %15911 = vmatmul.mubr.f32.gmra.mrb[22].mxu1 %v6136_v24  ;;  %v7169_v24 = vand.u32 4294901760, %v23785_v5 }
 0x91b   : > { %15929 = vmatprep.mubr.f32.mxu1 %v23327_v55 }
 0x91e   : > { %15930 = vmatmul.mubr.f32.vlgmr.msra.gmra.mrb[8].mxu1 %v23395_v25 }
 0x91f   : > { %18452 = vmatpush3.bf16.msra.mxu1 %v18449_v39  ;;  %15932 = vmatprep.mubr.f32.mxu1 %v23400_v0 }
 0x920   : > { %18454 = vmatprep.subr.bf16.mxu1 %v18453_v50 }
 0x922   : > { %15933 = vmatmul.mubr.f32.gmra.mrb[10].mxu1 %v23406_v49 }
 0x923   : > { %18456 = vmatpush3.bf16.msra.mxu1 %v18453_v50  ;;  %15935 = vmatprep.mubr.f32.mxu1 %v23433_v47 }
 0x924   : > { %18458 = vmatprep.subr.bf16.mxu1 %v18457_v22 }
 0x926   : > { %15936 = vmatmul.mubr.f32.gmra.mrb[12].mxu1 %v23436_v23 }
 0x927   : > { %18460 = vmatpush3.bf16.msra.mxu1 %v18457_v22  ;;  %15938 = vmatprep.mubr.f32.mxu1 %v23439_v20 }
 0x928   : > { %18462 = vmatprep.subr.bf16.mxu1 %v18461_v59 }
 0x92a   : > { %15939 = vmatmul.mubr.f32.gmra.mrb[14].mxu1 %v23450_v61 }
 0x92b   : > { %18464 = vmatpush3.bf16.msra.mxu1 %v18461_v59  ;;  %15941 = vmatprep.mubr.f32.mxu1 %v23476_v27 }
 0x92c   : > { %18466 = vmatprep.subr.bf16.mxu1 %v23368_v19 }
 0x92e   : > { %15942 = vmatmul.mubr.f32.gmra.mrb[16].mxu1 %v23495_v2 }
 0x92f   : > { %15944 = vmatprep.mubr.f32.mxu1 %v23520_v52 }
 0x932   : > { %15945 = vmatmul.mubr.f32.gmra.mrb[18].mxu1 %v23535_v10 }
 0x933   : > { %15947 = vmatprep.mubr.f32.mxu1 %v23538_v33 }
 0x936   : > { %15948 = vmatmul.mubr.f32.gmra.mrb[20].mxu1 %v23563_v21 }
 0x937   : > { %15950 = vmatprep.mubr.f32.mxu1 %v23570_v43 }
 0x93a   : > { %15951 = vmatmul.mubr.f32.gmra.mrb[22].mxu1 %v23581_v38 }
 0x93b   : > { %15969 = vmatprep.mubr.f32.mxu1 %v23330_v35  ;;  %v26895_v35 = vand.u32 4294901760, %v23464_v54 }
 0x93e   : > { %15970 = vmatmul.mubr.f32.vlgmr.msra.gmra.mrb[8].mxu1 %v23416_v40  ;;  %v26897_v40 = vand.u32 4294901760, %v23487_v30 }
 0x93f   : > { %18468 = vmatpush3.bf16.msra.mxu1 %v23368_v19  ;;  %15972 = vmatprep.mubr.f32.mxu1 %v23424_v16  ;;  %v7107_v16 = vld [vmem:[#allocation11] sm:$0xff] }
 0x940   : > { %18470 = vmatprep.subr.bf16.mxu1 %v23392_v41 }
 0x942   : > { %15973 = vmatmul.mubr.f32.gmra.mrb[10].mxu1 %v23430_v9  ;;  %v7108_v9 = vld [vmem:[#allocation11 + $0x8] sm:$0xff] }
 0x943   : > { %18472 = vmatpush3.bf16.msra.mxu1 %v23392_v41  ;;  %15975 = vmatprep.mubr.f32.mxu1 %v23460_v44  ;;  %v7124_v44 = vand.u32 4294901760, %v7107_v16 }
 0x944   : > { %18474 = vmatprep.subr.bf16.mxu1 %v23444_v4 }
 0x946   : > { %15976 = vmatmul.mubr.f32.gmra.mrb[12].mxu1 %v23464_v54  ;;  %v7127_v54 = vand.u32 4294901760, %v7108_v9 }
 0x947   : > { %18476 = vmatpush3.bf16.msra.mxu1 %v23444_v4  ;;  %15978 = vmatprep.mubr.f32.mxu1 %v23473_v57 }
 0x948   : > { %18478 = vmatprep.subr.bf16.mxu1 %v23506_v58 }
 0x94a   : > { %15979 = vmatmul.mubr.f32.gmra.mrb[14].mxu1 %v23487_v30  ;;  %v7112_v30 = vld [vmem:[#allocation11 + $0x28] sm:$0xff] }
 0x94b   : > { %18480 = vmatpush3.bf16.msra.mxu1 %v23506_v58  ;;  %15981 = vmatprep.mubr.f32.mxu1 %v23503_v45  ;;  %v7139_v34 = vand.u32 4294901760, %v7112_v30 }
 0x94c   : > { %18482 = vmatprep.subr.bf16.mxu1 %v23383_v17 }
 0x94e   : > { %15982 = vmatmul.mubr.f32.gmra.mrb[16].mxu1 %v23529_v60  ;;  %v7114_v60 = vld [vmem:[#allocation11 + $0x38] sm:$0xff] }
 0x94f   : > { %15984 = vmatprep.mubr.f32.mxu1 %v23547_v37 }
 0x952   : > { %15985 = vmatmul.mubr.f32.gmra.mrb[18].mxu1 %v23556_v15 }
 0x953   : > { %15987 = vmatprep.mubr.f32.mxu1 %v23560_v31  ;;  %v7145_v31 = vand.u32 4294901760, %v7114_v60 }
 0x956   : > { %15988 = vmatmul.mubr.f32.gmra.mrb[20].mxu1 %v23578_v48  ;;  %v23753_v48 = vld [vmem:[#allocation11 + $0x50] sm:$0xff] }
 0x957   : > { %15990 = vmatprep.mubr.f32.mxu1 %v23589_v53  ;;  %v7113_v53 = vld [vmem:[#allocation11 + $0x30] sm:$0xff] }
 0x958   : > { %v7142_v15 = vand.u32 4294901760, %v7113_v53 }
 0x95a   : > { %15991 = vmatmul.mubr.f32.gmra.mrb[22].mxu1 %v23597_v13  ;;  %v23766_v13 = vsub.f32 %v7108_v9, %v7127_v54 }
 0x95b   : > { %16009 = vmatprep.mubr.f32.mxu1 %v26890_v32 }
 0x95e   : > { %16010 = vmatmul.mubr.f32.vlgmr.msra.gmra.mrb[8].mxu1 %v26891_v12  ;;  %v23816_v12 = vsub.f32 %v7113_v53, %v7142_v15 }
 0x95f   : > { %18484 = vmatpush3.bf16.msra.mxu1 %v23383_v17  ;;  %16012 = vmatprep.mubr.f32.mxu1 %v26892_v3  ;;  %v26896_v17 = vand.u32 4294901760, %v23473_v57  ;;  %v23818_v3 = vsub.f32 %v7114_v60, %v7145_v31 }
 0x960   : > { %18486 = vmatprep.subr.bf16.mxu1 %v23420_v18 }
 0x962   : > { %16013 = vmatmul.mubr.f32.gmra.mrb[10].mxu1 %v26893_v42  ;;  %v23826_v42 = vpack.c.bf16 %v7169_v24, %v7166_v26 }
 0x963   : > { %18488 = vmatpush3.bf16.msra.mxu1 %v23420_v18  ;;  %16015 = vmatprep.mubr.f32.mxu1 %v26894_v56  ;;  %v26898_v18 = vand.u32 4294901760, %v23503_v45 }
 0x964   : > { %18490 = vmatprep.subr.bf16.mxu1 %v23480_v7 }
 0x966   : > { %16016 = vmatmul.mubr.f32.gmra.mrb[12].mxu1 %v26895_v35 }
 0x967   : > { %18492 = vmatpush3.bf16.msra.mxu1 %v23480_v7  ;;  %16018 = vmatprep.mubr.f32.mxu1 %v26896_v17  ;;  %v7111_v7 = vld [vmem:[#allocation11 + $0x20] sm:$0xff] }
 0x968   : > { %18494 = vmatprep.subr.bf16.mxu1 %v23532_v14 }
 0x96a   : > { %16019 = vmatmul.mubr.f32.gmra.mrb[14].mxu1 %v26897_v40 }
 0x96b   : > { %18496 = vmatpush3.bf16.msra.mxu1 %v23532_v14  ;;  %16021 = vmatprep.mubr.f32.mxu1 %v26898_v18  ;;  %v7409_v18 = vand.u32 4294901760, %v23816_v12 }
 0x96c   : > { %18498 = vmatprep.subr.bf16.mxu1 %v23368_v19 }
 0x96e   : > { %16022 = vmatmul.mubr.f32.gmra.mrb[16].mxu1 %v6074_v28  ;;  %v23741_v28 = vld [vmem:[#allocation11 + $0x40] sm:$0xff] }
 0x96f   : > { %16024 = vmatprep.mubr.f32.mxu1 %v6084_v8 }
 0x972   : > { %16025 = vmatmul.mubr.f32.gmra.mrb[18].mxu1 %v6094_v6  ;;  %v23755_v6 = vld [vmem:[#allocation11 + $0x58] sm:$0xff] }
 0x973   : > { %16027 = vmatprep.mubr.f32.mxu1 %v6104_v46  ;;  %v23764_v46 = vsub.f32 %v7107_v16, %v7124_v44  ;;  %v7416_v16 = vand.u32 4294901760, %v23818_v3 }
 0x975   : > { %v7367_v29 = vand.u32 4294901760, %v23764_v46 }
 0x976   : > { %16028 = vmatmul.mubr.f32.gmra.mrb[20].mxu1 %v6114_v11  ;;  %v7154_v11 = vand.u32 4294901760, %v23753_v48 }
 0x977   : > { %16030 = vmatprep.mubr.f32.mxu1 %v6124_v62  ;;  %v7368_v50 = vsub.f32 %v23764_v46, %v7367_v29 }
 0x979   : > { %v7369_v56 = vand.u32 4294901760, %v7368_v50 }
 0x97a   : > { %16031 = vmatmul.mubr.f32.gmra.mrb[22].mxu1 %v6134_v51  ;;  %v7374_v51 = vand.u32 4294901760, %v23766_v13 }
 0x97b   : > { %16049 = vmatprep.mubr.f32.mxu1 %v23327_v55 }
 0x97e   : > { %16050 = vmatmul.mubr.f32.vlgmr.msra.gmra.mrb[8].mxu1 %v23395_v25 }
 0x97f   : > { %18500 = vmatpush3.bf16.msra.mxu1 %v23368_v19  ;;  %16052 = vmatprep.mubr.f32.mxu1 %v23400_v0  ;;  %v23719_v19 = vpack.c.bf16 %v7127_v54, %v7124_v44 }
 0x980   : > { %18502 = vmatprep.subr.bf16.mxu1 %v23392_v41 }
 0x982   : > { %16053 = vmatmul.mubr.f32.gmra.mrb[10].mxu1 %v23406_v49 }
 0x983   : > { %18504 = vmatpush3.bf16.msra.mxu1 %v23392_v41  ;;  %16055 = vmatprep.mubr.f32.mxu1 %v23433_v47  ;;  %v7109_v41 = vld [vmem:[#allocation11 + $0x10] sm:$0xff] }
 0x984   : > { %18506 = vmatprep.subr.bf16.mxu1 %v23444_v4  ;;  %v7130_v37 = vand.u32 4294901760, %v7109_v41 }
 0x986   : > { %16056 = vmatmul.mubr.f32.gmra.mrb[12].mxu1 %v23436_v23 }
 0x987   : > { %18508 = vmatpush3.bf16.msra.mxu1 %v23444_v4  ;;  %16058 = vmatprep.mubr.f32.mxu1 %v23439_v20  ;;  %v7110_v4 = vld [vmem:[#allocation11 + $0x18] sm:$0xff] }
 0x988   : > { %18510 = vmatprep.subr.bf16.mxu1 %v23506_v58  ;;  %v7133_v57 = vand.u32 4294901760, %v7110_v4 }
 0x98a   : > { %16059 = vmatmul.mubr.f32.gmra.mrb[14].mxu1 %v23450_v61  ;;  %v23733_v45 = vpack.c.bf16 %v7133_v57, %v7130_v37  ;;  %v23789_v1 = vsub.f32 %v7110_v4, %v7133_v57  ;;  %v7417_v57 = vsub.f32 %v23818_v3, %v7416_v16 }
 0x98b   : > { %18512 = vmatpush3.bf16.msra.mxu1 %v23506_v58  ;;  %16061 = vmatprep.mubr.f32.mxu1 %v23476_v27  ;;  %v7136_v58 = vand.u32 4294901760, %v7111_v7 }
 0x98c   : > { %18514 = vmatprep.subr.bf16.mxu1 %v23719_v19  ;;  %v7388_v59 = vand.u32 4294901760, %v23789_v1 }
 0x98d   : > { %v23739_v14 = vpack.c.bf16 %v7139_v34, %v7136_v58  ;;  %v23811_v32 = vsub.f32 %v7111_v7, %v7136_v58  ;;  %v26899_v7 = vld [vmem:[#allocation71_spill] sm:$0xff] }
 0x98e   : > { %16062 = vmatmul.mubr.f32.gmra.mrb[16].mxu1 %v23495_v2  ;;  %v7389_v17 = vsub.f32 %v23789_v1, %v7388_v59 }
 0x98f   : > { %16064 = vmatprep.mubr.f32.mxu1 %v23520_v52 }
 0x990   : > { %v7390_v4 = vand.u32 4294901760, %v7389_v17 }
 0x992   : > { %16065 = vmatmul.mubr.f32.gmra.mrb[18].mxu1 %v23535_v10 }
 0x993   : > { %16067 = vmatprep.mubr.f32.mxu1 %v23538_v33 }
 0x996   : > { %16068 = vmatmul.mubr.f32.gmra.mrb[20].mxu1 %v23563_v21 }
 0x997   : > { %16070 = vmatprep.mubr.f32.mxu1 %v23570_v43 }
 0x99a   : > { %16071 = vmatmul.mubr.f32.gmra.mrb[22].mxu1 %v23581_v38 }
 0x99b   : > { %16089 = vmatprep.mubr.f32.mxu1 %v23327_v55  ;;  %v23743_v55 = vld [vmem:[#allocation11 + $0x48] sm:$0xff] }
 0x99c   : > { %v7151_v8 = vand.u32 4294901760, %v23743_v55 }
 0x99e   : > { %16090 = vmatmul.mubr.f32.vlgmr.msra.gmra.mrb[8].mxu1 %v23395_v25  ;;  %v23749_v25 = vpack.c.bf16 %v7145_v31, %v7142_v15  ;;  %v23846_v54 = vsub.f32 %v23743_v55, %v7151_v8  ;;  %v26900_v31 = vld [vmem:[#allocation72_spill] sm:$0xff]  ;;  %v7418_v55 = vand.u32 4294901760, %v7417_v57 }
 0x99f   : > { %18516 = vmatpush3.bf16.msra.mxu1 %v23719_v19  ;;  %16092 = vmatprep.mubr.f32.mxu1 %v23400_v0  ;;  %v7148_v0 = vand.u32 4294901760, %v23741_v28 }
 0x9a0   : > { %18518 = vmatprep.subr.bf16.mxu1 %v23733_v45  ;;  %v7430_v58 = vand.u32 4294901760, %v23846_v54 }
 0x9a1   : > { %v23769_v39 = vpack.c.bf16 %v7151_v8, %v7148_v0  ;;  %v23843_v44 = vsub.f32 %v23741_v28, %v7148_v0  ;;  %v26901_v0 = vld [vmem:[#allocation87_spill] sm:$0xff] }
 0x9a2   : > { %16093 = vmatmul.mubr.f32.gmra.mrb[10].mxu1 %v23406_v49  ;;  %v23760_v49 = vld [vmem:[#allocation11 + $0x60] sm:$0xff] }
 0x9a3   : > { %18520 = vmatpush3.bf16.msra.mxu1 %v23733_v45  ;;  %16095 = vmatprep.mubr.f32.mxu1 %v23433_v47  ;;  %v23762_v47 = vld [vmem:[#allocation11 + $0x68] sm:$0xff] }
 0x9a4   : > { %18522 = vmatprep.subr.bf16.mxu1 %v23739_v14  ;;  %v7163_v62 = vand.u32 4294901760, %v23762_v47 }
 0x9a6   : > { %16096 = vmatmul.mubr.f32.gmra.mrb[12].mxu1 %v23436_v23  ;;  %v7157_v23 = vand.u32 4294901760, %v23755_v6 }
 0x9a7   : > { %18524 = vmatpush3.bf16.msra.mxu1 %v23739_v14  ;;  %16098 = vmatprep.mubr.f32.mxu1 %v23439_v20  ;;  %v7160_v20 = vand.u32 4294901760, %v23760_v49 }
 0x9a8   : > { %18526 = vmatprep.subr.bf16.mxu1 %v23749_v25  ;;  %v23781_v63 = vpack.c.bf16 %v7157_v23, %v7154_v11 }
 0x9a9   : > { %v23885_v50 = vsub.f32 %v23760_v49, %v7160_v20 }
 0x9aa   : > { %16099 = vmatmul.mubr.f32.gmra.mrb[14].mxu1 %v23450_v61  ;;  %v23787_v61 = vsub.f32 %v7109_v41, %v7130_v37 }
 0x9ab   : > { %18528 = vmatpush3.bf16.msra.mxu1 %v23749_v25  ;;  %16101 = vmatprep.mubr.f32.mxu1 %v23476_v27  ;;  %v23796_v27 = vpack.c.bf16 %v7163_v62, %v7160_v20 }
 0x9ac   : > { %18530 = vmatprep.subr.bf16.mxu1 %v23769_v39  ;;  %v7381_v22 = vand.u32 4294901760, %v23787_v61 }
 0x9ae   : > { %16102 = vmatmul.mubr.f32.gmra.mrb[16].mxu1 %v23495_v2  ;;  %v7375_v2 = vsub.f32 %v23766_v13, %v7374_v51 }
 0x9af   : > { %18532 = vmatpush3.bf16.msra.mxu1 %v23769_v39  ;;  %16104 = vmatprep.mubr.f32.mxu1 %v23520_v52  ;;  %v23813_v52 = vsub.f32 %v7112_v30, %v7139_v34  ;;  %v7423_v30 = vand.u32 4294901760, %v23843_v44  ;;  %v23867_v34 = vsub.f32 %v23753_v48, %v7154_v11  ;;  %v7431_v48 = vsub.f32 %v23846_v54, %v7430_v58 }
 0x9b0   : > { %18534 = vmatprep.subr.bf16.mxu1 %v23781_v63  ;;  %v7376_v35 = vand.u32 4294901760, %v7375_v2  ;;  %v23890_v2 = vsub.f32 %v23762_v47, %v7163_v62  ;;  %v7451_v47 = vand.u32 4294901760, %v23885_v50  ;;  %v23905_v62 = vsub.f32 %v23783_v36, %v7166_v26 }
 0x9b1   : > { %v7402_v40 = vand.u32 4294901760, %v23813_v52  ;;  %v7424_v8 = vsub.f32 %v23843_v44, %v7423_v30 }
 0x9b2   : > { %16105 = vmatmul.mubr.f32.gmra.mrb[18].mxu1 %v23535_v10  ;;  %v7382_v10 = vsub.f32 %v23787_v61, %v7381_v22  ;;  %v18545_v9 = vpack.c.bf16 %v7376_v35, %v7369_v56  ;;  %v26902_v56 = vld [vmem:[#allocation91_spill] sm:$0xff]  ;;  %v7458_v20 = vand.u32 4294901760, %v23890_v2 }
 0x9b3   : > { %18536 = vmatpush3.bf16.msra.mxu1 %v23781_v63  ;;  %16107 = vmatprep.mubr.f32.mxu1 %v23538_v33  ;;  %v7395_v33 = vand.u32 4294901760, %v23811_v32  ;;  %v7403_v37 = vsub.f32 %v23813_v52, %v7402_v40  ;;  %v7425_v17 = vand.u32 4294901760, %v7424_v8  ;;  %v26908_v8 = vld [vmem:[#allocation109_spill] sm:$0xff] }
 0x9b4   : > { %18538 = vmatprep.subr.bf16.mxu1 %v23796_v27  ;;  %v7383_v41 = vand.u32 4294901760, %v7382_v10  ;;  %v26903_v10 = vld [vmem:[#allocation93_spill] sm:$0xff]  ;;  %v7459_v36 = vsub.f32 %v23890_v2, %v7458_v20 }
 0x9b5   : > { %v7404_v15 = vand.u32 4294901760, %v7403_v37  ;;  %v26905_v37 = vld [vmem:[#allocation99_spill] sm:$0xff] }
 0x9b6   : > { %16108 = vmatmul.mubr.f32.gmra.mrb[20].mxu1 %v23563_v21  ;;  %v7396_v21 = vsub.f32 %v23811_v32, %v7395_v33  ;;  %v18549_v53 = vpack.c.bf16 %v7390_v4, %v7383_v41  ;;  %v23910_v4 = vsub.f32 %v23785_v5, %v7169_v24  ;;  %v7465_v5 = vand.u32 4294901760, %v23905_v62  ;;  %v26906_v24 = vld [vmem:[#allocation100_spill] sm:$0xff] }
 0x9b7   : > { %18540 = vmatpush3.bf16.msra.mxu1 %v23796_v27  ;;  %16110 = vmatprep.mubr.f32.mxu1 %v23570_v43  ;;  %v7410_v43 = vsub.f32 %v23816_v12, %v7409_v18 }
 0x9b8   : > { %18542 = vmatprep.subr.bf16.mxu1 %v23826_v42  ;;  %v7397_v60 = vand.u32 4294901760, %v7396_v21  ;;  %v26904_v21 = vld [vmem:[#allocation94_spill] sm:$0xff]  ;;  %v7472_v26 = vand.u32 4294901760, %v23910_v4 }
 0x9b9   : > { %v7411_v28 = vand.u32 4294901760, %v7410_v43 }
 0x9ba   : > { %16111 = vmatmul.mubr.f32.gmra.mrb[22].mxu1 %v23581_v38  ;;  %v23870_v38 = vsub.f32 %v23755_v6, %v7157_v23  ;;  %v7437_v6 = vand.u32 4294901760, %v23867_v34  ;;  %v18553_v23 = vpack.c.bf16 %v7404_v15, %v7397_v60  ;;  %v26907_v60 = vld [vmem:[#allocation108_spill] sm:$0xff] }
 0x9bb   : > { %18544 = vmatpush3.bf16.msra.mxu1 %v23826_v42  ;;  %16145 = vmatprep.mubr.f32.mxu1 %v26899_v7  ;;  %v18557_v35 = vpack.c.bf16 %v7418_v55, %v7411_v28  ;;  %v7460_v28 = vand.u32 4294901760, %v7459_v36  ;;  %v7466_v55 = vsub.f32 %v23905_v62, %v7465_v5  ;;  %v18585_v36 = vpack.c.bf16 %v23813_v52, %v23811_v32  ;;  %v26955_v32 = vld [vmem:[#allocation95_spill] sm:$0xff] }
 0x9bc   : > { %18546 = vmatprep.subr.bf16.mxu1 %v18545_v9  ;;  %v7444_v11 = vand.u32 4294901760, %v23870_v38  ;;  %v7438_v41 = vsub.f32 %v23867_v34, %v7437_v6 }
 0x9be   : > { %16146 = vmatmul.mubr.f32.vlgmr.msra.gmra.mrb[24].mxu1 %v26900_v31  ;;  %v7445_v49 = vsub.f32 %v23870_v38, %v7444_v11  ;;  %v7439_v57 = vand.u32 4294901760, %v7438_v41  ;;  %v26912_v41 = vld [vmem:[#allocation119_spill] sm:$0xff]  ;;  %v18661_v52 = vpack.c.bf16 %v7444_v11, %v7437_v6  ;;  %v7095_v6 = vld [vmem:[#allocation10 + $0x20] sm:$0xff]  ;;  %v7096_v11 = vld [vmem:[#allocation10 + $0x28] sm:$0xff] }
 0x9bf   : > { %18548 = vmatpush3.bf16.msra.mxu1 %v18545_v9  ;;  %16148 = vmatprep.mubr.f32.mxu1 %v26901_v0  ;;  %v7432_v9 = vand.u32 4294901760, %v7431_v48  ;;  %v7473_v0 = vsub.f32 %v23910_v4, %v7472_v26  ;;  %v26909_v48 = vld [vmem:[#allocation113_spill] sm:$0xff] }
 0x9c0   : > { %18550 = vmatprep.subr.bf16.mxu1 %v18549_v53  ;;  %v7446_v7 = vand.u32 4294901760, %v7445_v49  ;;  %v26913_v49 = vld [vmem:[#allocation121_spill] sm:$0xff] }
 0x9c1   : > { %v18561_v43 = vpack.c.bf16 %v7432_v9, %v7425_v17  ;;  %v26911_v17 = vld [vmem:[#allocation118_spill] sm:$0xff] }
 0x9c2   : > { %16149 = vmatmul.mubr.f32.gmra.mrb[26].mxu1 %v26902_v56  ;;  %v18565_v15 = vpack.c.bf16 %v7446_v7, %v7439_v57  ;;  %v7467_v56 = vand.u32 4294901760, %v7466_v55  ;;  %v18581_v57 = vpack.c.bf16 %v23789_v1, %v23787_v61  ;;  %v26916_v7 = vld [vmem:[#allocation49_spill] sm:$0xff]  ;;  %v18593_v55 = vpack.c.bf16 %v23846_v54, %v23843_v44  ;;  %v26952_v61 = vld [vmem:[#allocation83_spill] sm:$0xff] }
 0x9c3   : > { %18552 = vmatpush3.bf16.msra.mxu1 %v18549_v53  ;;  %16151 = vmatprep.mubr.f32.mxu1 %v26903_v10  ;;  %v7452_v53 = vsub.f32 %v23885_v50, %v7451_v47  ;;  %v26910_v10 = vld [vmem:[#allocation114_spill] sm:$0xff]  ;;  %v26953_v1 = vld [vmem:[#allocation85_spill] sm:$0xff]  ;;  %v26960_v44 = vld [vmem:[#allocation107_spill] sm:$0xff] }
 0x9c4   : > { %18554 = vmatprep.subr.bf16.mxu1 %v18553_v23  ;;  %v26961_v54 = vld [vmem:[#allocation115_spill] sm:$0xff] }
 0x9c5   : > { %v7453_v31 = vand.u32 4294901760, %v7452_v53  ;;  %v26917_v53 = vld [vmem:[#allocation50_spill] sm:$0xff] }
 0x9c6   : > { %16152 = vmatmul.mubr.f32.gmra.mrb[28].mxu1 %v26904_v21  ;;  %v18577_v21 = vpack.c.bf16 %v23766_v13, %v23764_v46  ;;  %v18649_v46 = vpack.c.bf16 %v7402_v40, %v7395_v33  ;;  %v26950_v13 = vld [vmem:[#allocation79_spill] sm:$0xff]  ;;  %v18665_v33 = vpack.c.bf16 %v7458_v20, %v7451_v47  ;;  %v26958_v40 = vld [vmem:[#allocation104_spill] sm:$0xff] }
 0x9c7   : > { %18556 = vmatpush3.bf16.msra.mxu1 %v18553_v23  ;;  %16154 = vmatprep.mubr.f32.mxu1 %v26905_v37  ;;  %v18569_v23 = vpack.c.bf16 %v7460_v28, %v7453_v31  ;;  %v26914_v37 = vld [vmem:[#allocation122_spill] sm:$0xff]  ;;  %v26921_v28 = vld [vmem:[#allocation57_spill] sm:$0xff]  ;;  %v7097_v47 = vld [vmem:[#allocation10 + $0x30] sm:$0xff] }
 0x9c8   : > { %18558 = vmatprep.subr.bf16.mxu1 %v18557_v35  ;;  %v26920_v31 = vld [vmem:[#allocation54_spill] sm:$0xff]  ;;  %v7098_v20 = vld [vmem:[#allocation10 + $0x38] sm:$0xff] }
 0x9ca   : > { %16155 = vmatmul.mubr.f32.gmra.mrb[30].mxu1 %v26906_v24  ;;  %v26918_v24 = vld [vmem:[#allocation51_spill] sm:$0xff] }
 0x9cb   : > { %18560 = vmatpush3.bf16.msra.mxu1 %v18557_v35  ;;  %16157 = vmatprep.mubr.f32.mxu1 %v26907_v60  ;;  %v7474_v35 = vand.u32 4294901760, %v7473_v0  ;;  %v26919_v60 = vld [vmem:[#allocation53_spill] sm:$0xff]  ;;  %v26922_v0 = vld [vmem:[#allocation58_spill] sm:$0xff] }
 0x9cc   : > { %18562 = vmatprep.subr.bf16.mxu1 %v18561_v43 }
 0x9cd   : > { %v18573_v9 = vpack.c.bf16 %v7474_v35, %v7467_v56  ;;  %v26925_v56 = vld [vmem:[#allocation61_spill] sm:$0xff]  ;;  %v18601_v35 = vpack.c.bf16 %v23890_v2, %v23885_v50  ;;  %v8425_v2 = vand.u32 4294901760, %v7096_v11 }
 0x9ce   : > { %16158 = vmatmul.mubr.f32.gmra.mrb[32].mxu1 %v26908_v8  ;;  %v26923_v8 = vld [vmem:[#allocation59_spill] sm:$0xff] }
 0x9cf   : > { %18564 = vmatpush3.bf16.msra.mxu1 %v18561_v43  ;;  %16160 = vmatprep.mubr.f32.mxu1 %v26909_v48  ;;  %v26915_v43 = vld [vmem:[#allocation48_spill] sm:$0xff]  ;;  %v18597_v48 = vpack.c.bf16 %v23870_v38, %v23867_v34 }
 0x9d0   : > { %18566 = vmatprep.subr.bf16.mxu1 %v18565_v15  ;;  %v7094_v34 = vld [vmem:[#allocation10 + $0x18] sm:$0xff] }
 0x9d2   : > { %16161 = vmatmul.mubr.f32.gmra.mrb[34].mxu1 %v26910_v10  ;;  %v26926_v10 = vld [vmem:[#allocation62_spill] sm:$0xff] }
 0x9d3   : > { %18568 = vmatpush3.bf16.msra.mxu1 %v18565_v15  ;;  %16163 = vmatprep.mubr.f32.mxu1 %v26911_v17  ;;  %v18589_v15 = vpack.c.bf16 %v23818_v3, %v23816_v12  ;;  %v26927_v17 = vld [vmem:[#allocation65_spill] sm:$0xff]  ;;  %v26956_v12 = vld [vmem:[#allocation96_spill] sm:$0xff] }
 0x9d4   : > { %18570 = vmatprep.subr.bf16.mxu1 %v18569_v23  ;;  %v26957_v3 = vld [vmem:[#allocation101_spill] sm:$0xff] }
 0x9d6   : > { %16164 = vmatmul.mubr.f32.gmra.mrb[36].mxu1 %v26912_v41  ;;  %v26928_v41 = vld [vmem:[#allocation66_spill] sm:$0xff] }
 0x9d7   : > { %18572 = vmatpush3.bf16.msra.mxu1 %v18569_v23  ;;  %16166 = vmatprep.mubr.f32.mxu1 %v26913_v49  ;;  %v26924_v23 = vld [vmem:[#allocation60_spill] sm:$0xff]  ;;  %v26929_v49 = vld [vmem:[#allocation69_spill] sm:$0xff] }
 0x9d8   : > { %18574 = vmatprep.subr.bf16.mxu1 %v18573_v9 }
 0x9da   : > { %16167 = vmatmul.mubr.f32.gmra.mrb[38].mxu1 %v26914_v37  ;;  %v26931_v37 = vld [vmem:[#allocation63_spill] sm:$0xff] }
 0x9db   : > { %18576 = vmatpush3.bf16.msra.mxu1 %v18573_v9  ;;  %16201 = vmatprep.mubr.f32.mxu1 %v26915_v43  ;;  %v18605_v9 = vpack.c.bf16 %v23910_v4, %v23905_v62  ;;  %v8431_v4 = vand.u32 4294901760, %v7098_v20 }
 0x9dc   : > { %18578 = vmatprep.subr.bf16.mxu1 %v18577_v21 }
 0x9de   : > { %16202 = vmatmul.mubr.f32.vlgmr.msra.gmra.mrb[24].mxu1 %v26916_v7 }
 0x9df   : > { %18580 = vmatpush3.bf16.msra.mxu1 %v18577_v21  ;;  %16204 = vmatprep.mubr.f32.mxu1 %v26917_v53  ;;  %v26930_v21 = vld [vmem:[#allocation70_spill] sm:$0xff] }
 0x9e0   : > { %18582 = vmatprep.subr.bf16.mxu1 %v18581_v57 }
 0x9e2   : > { %16205 = vmatmul.mubr.f32.gmra.mrb[26].mxu1 %v26918_v24 }
 0x9e3   : > { %18584 = vmatpush3.bf16.msra.mxu1 %v18581_v57  ;;  %16207 = vmatprep.mubr.f32.mxu1 %v26919_v60  ;;  %v26932_v57 = vld [vmem:[#allocation64_spill] sm:$0xff] }
 0x9e4   : > { %18586 = vmatprep.subr.bf16.mxu1 %v18585_v36 }
 0x9e6   : > { %16208 = vmatmul.mubr.f32.gmra.mrb[28].mxu1 %v26920_v31 }
 0x9e7   : > { %18588 = vmatpush3.bf16.msra.mxu1 %v18585_v36  ;;  %16210 = vmatprep.mubr.f32.mxu1 %v26921_v28  ;;  %v26933_v36 = vld [vmem:[#allocation73_spill] sm:$0xff] }
 0x9e8   : > { %18590 = vmatprep.subr.bf16.mxu1 %v18589_v15 }
 0x9ea   : > { %16211 = vmatmul.mubr.f32.gmra.mrb[30].mxu1 %v26922_v0 }
 0x9eb   : > { %18592 = vmatpush3.bf16.msra.mxu1 %v18589_v15  ;;  %16213 = vmatprep.mubr.f32.mxu1 %v26923_v8  ;;  %v26934_v15 = vld [vmem:[#allocation74_spill] sm:$0xff] }
 0x9ec   : > { %18594 = vmatprep.subr.bf16.mxu1 %v18593_v55 }
 0x9ee   : > { %16214 = vmatmul.mubr.f32.gmra.mrb[32].mxu1 %v26924_v23 }
 0x9ef   : > { %18596 = vmatpush3.bf16.msra.mxu1 %v18593_v55  ;;  %16216 = vmatprep.mubr.f32.mxu1 %v26925_v56  ;;  %v26935_v55 = vld [vmem:[#allocation75_spill] sm:$0xff] }
 0x9f0   : > { %18598 = vmatprep.subr.bf16.mxu1 %v18597_v48 }
 0x9f2   : > { %16217 = vmatmul.mubr.f32.gmra.mrb[34].mxu1 %v26926_v10 }
 0x9f3   : > { %18600 = vmatpush3.bf16.msra.mxu1 %v18597_v48  ;;  %16219 = vmatprep.mubr.f32.mxu1 %v26927_v17  ;;  %v26936_v48 = vld [vmem:[#allocation77_spill] sm:$0xff] }
 0x9f4   : > { %18602 = vmatprep.subr.bf16.mxu1 %v18601_v35 }
 0x9f6   : > { %16220 = vmatmul.mubr.f32.gmra.mrb[36].mxu1 %v26928_v41 }
 0x9f7   : > { %18604 = vmatpush3.bf16.msra.mxu1 %v18601_v35  ;;  %16222 = vmatprep.mubr.f32.mxu1 %v26929_v49  ;;  %v26937_v35 = vld [vmem:[#allocation80_spill] sm:$0xff] }
 0x9f8   : > { %18606 = vmatprep.subr.bf16.mxu1 %v18605_v9 }
 0x9fa   : > { %16223 = vmatmul.mubr.f32.gmra.mrb[38].mxu1 %v26930_v21 }
 0x9fb   : > { %18608 = vmatpush3.bf16.msra.mxu1 %v18605_v9  ;;  %16257 = vmatprep.mubr.f32.mxu1 %v26931_v37  ;;  %v26938_v9 = vld [vmem:[#allocation81_spill] sm:$0xff]  ;;  %v26939_v37 = vld [vmem:[#allocation88_spill] sm:$0xff] }
 0x9fc   : > { %18610 = vmatprep.subr.bf16.mxu1 %v23719_v19 }
 0x9fe   : > { %16258 = vmatmul.mubr.f32.vlgmr.msra.gmra.mrb[24].mxu1 %v26932_v57  ;;  %v26940_v57 = vld [vmem:[#allocation89_spill] sm:$0xff] }
 0x9ff   : > { %18612 = vmatpush3.bf16.msra.mxu1 %v23719_v19  ;;  %16260 = vmatprep.mubr.f32.mxu1 %v26933_v36  ;;  %v26941_v36 = vld [vmem:[#allocation92_spill] sm:$0xff] }
 0xa00   : > { %18614 = vmatprep.subr.bf16.mxu1 %v23733_v45 }
 0xa02   : > { %16261 = vmatmul.mubr.f32.gmra.mrb[26].mxu1 %v26934_v15  ;;  %v26942_v15 = vld [vmem:[#allocation97_spill] sm:$0xff] }
 0xa03   : > { %18616 = vmatpush3.bf16.msra.mxu1 %v23733_v45  ;;  %16263 = vmatprep.mubr.f32.mxu1 %v26935_v55  ;;  %v26943_v55 = vld [vmem:[#allocation102_spill] sm:$0xff] }
 0xa04   : > { %18618 = vmatprep.subr.bf16.mxu1 %v23739_v14 }
 0xa06   : > { %16264 = vmatmul.mubr.f32.gmra.mrb[28].mxu1 %v26936_v48  ;;  %v26944_v48 = vld [vmem:[#allocation103_spill] sm:$0xff] }
 0xa07   : > { %18620 = vmatpush3.bf16.msra.mxu1 %v23739_v14  ;;  %16266 = vmatprep.mubr.f32.mxu1 %v26937_v35  ;;  %v26945_v35 = vld [vmem:[#allocation110_spill] sm:$0xff] }
 0xa08   : > { %18622 = vmatprep.subr.bf16.mxu1 %v23749_v25 }
 0xa0a   : > { %16267 = vmatmul.mubr.f32.gmra.mrb[30].mxu1 %v26938_v9  ;;  %v18641_v9 = vpack.c.bf16 %v7374_v51, %v7367_v29  ;;  %v26951_v29 = vld [vmem:[#allocation82_spill] sm:$0xff]  ;;  %v18653_v51 = vpack.c.bf16 %v7416_v16, %v7409_v18  ;;  %v18669_v16 = vpack.c.bf16 %v7472_v26, %v7465_v5  ;;  %v7099_v5 = vld [vmem:[#allocation10 + $0x40] sm:$0xff] }
 0xa0b   : > { %18624 = vmatpush3.bf16.msra.mxu1 %v23749_v25  ;;  %16269 = vmatprep.mubr.f32.mxu1 %v26939_v37  ;;  %v26946_v37 = vld [vmem:[#allocation112_spill] sm:$0xff]  ;;  %v26959_v18 = vld [vmem:[#allocation106_spill] sm:$0xff] }
 0xa0c   : > { %18626 = vmatprep.subr.bf16.mxu1 %v23769_v39  ;;  %v7100_v26 = vld [vmem:[#allocation10 + $0x48] sm:$0xff] }
 0xa0e   : > { %16270 = vmatmul.mubr.f32.gmra.mrb[32].mxu1 %v26940_v57  ;;  %v26947_v57 = vld [vmem:[#allocation67_spill] sm:$0xff] }
 0xa0f   : > { %18628 = vmatpush3.bf16.msra.mxu1 %v23769_v39  ;;  %16272 = vmatprep.mubr.f32.mxu1 %v26941_v36  ;;  %v18645_v36 = vpack.c.bf16 %v7388_v59, %v7381_v22  ;;  %v18657_v22 = vpack.c.bf16 %v7430_v58, %v7423_v30  ;;  %v26954_v59 = vld [vmem:[#allocation86_spill] sm:$0xff]  ;;  %v26962_v30 = vld [vmem:[#allocation117_spill] sm:$0xff]  ;;  %v7093_v58 = vld [vmem:[#allocation10 + $0x10] sm:$0xff] }
 0xa10   : > { %18630 = vmatprep.subr.bf16.mxu1 %v23781_v63  ;;  %v8416_v38 = vand.u32 4294901760, %v7093_v58 }
 0xa12   : > { %16273 = vmatmul.mubr.f32.gmra.mrb[34].mxu1 %v26942_v15  ;;  %v26948_v15 = vld [vmem:[#allocation68_spill] sm:$0xff] }
 0xa13   : > { %18632 = vmatpush3.bf16.msra.mxu1 %v23781_v63  ;;  %16275 = vmatprep.mubr.f32.mxu1 %v26943_v55  ;;  %v26949_v55 = vld [vmem:[#allocation76_spill] sm:$0xff] }
 0xa14   : > { %18634 = vmatprep.subr.bf16.mxu1 %v23796_v27 }
 0xa16   : > { %16276 = vmatmul.mubr.f32.gmra.mrb[36].mxu1 %v26944_v48 }
 0xa17   : > { %18636 = vmatpush3.bf16.msra.mxu1 %v23796_v27  ;;  %16278 = vmatprep.mubr.f32.mxu1 %v26945_v35  ;;  %v24101_v35 = vld [vmem:[#allocation10 + $0x58] sm:$0xff] }
 0xa18   : > { %18638 = vmatprep.subr.bf16.mxu1 %v23826_v42 }
 0xa1a   : > { %16279 = vmatmul.mubr.f32.gmra.mrb[38].mxu1 %v26946_v37 }
 0xa1b   : > { %18640 = vmatpush3.bf16.msra.mxu1 %v23826_v42  ;;  %16313 = vmatprep.mubr.f32.mxu1 %v26947_v57  ;;  %v24114_v57 = vld [vmem:[#allocation10 + $0x68] sm:$0xff] }
 0xa1c   : > { %18642 = vmatprep.subr.bf16.mxu1 %v18641_v9 }
 0xa1e   : > { %16314 = vmatmul.mubr.f32.vlgmr.msra.gmra.mrb[24].mxu1 %v26948_v15 }
 0xa1f   : > { %18644 = vmatpush3.bf16.msra.mxu1 %v18641_v9  ;;  %16316 = vmatprep.mubr.f32.mxu1 %v26949_v55 }
 0xa20   : > { %18646 = vmatprep.subr.bf16.mxu1 %v18645_v36 }
 0xa22   : > { %16317 = vmatmul.mubr.f32.gmra.mrb[26].mxu1 %v26950_v13  ;;  %v24125_v13 = vsub.f32 %v7096_v11, %v8425_v2 }
 0xa23   : > { %18648 = vmatpush3.bf16.msra.mxu1 %v18645_v36  ;;  %16319 = vmatprep.mubr.f32.mxu1 %v26951_v29  ;;  %v24116_v36 = vsub.f32 %v7093_v58, %v8416_v38 }
 0xa24   : > { %18650 = vmatprep.subr.bf16.mxu1 %v18649_v46 }
 0xa26   : > { %16320 = vmatmul.mubr.f32.gmra.mrb[28].mxu1 %v26952_v61  ;;  %v8449_v61 = vand.u32 4294901760, %v24114_v57 }
 0xa27   : > { %18652 = vmatpush3.bf16.msra.mxu1 %v18649_v46  ;;  %16322 = vmatprep.mubr.f32.mxu1 %v26953_v1  ;;  %v26357_v1 = vand.u32 4294901760, %v24116_v36 }
 0xa28   : > { %18654 = vmatprep.subr.bf16.mxu1 %v18653_v51 }
 0xa2a   : > { %16323 = vmatmul.mubr.f32.gmra.mrb[30].mxu1 %v26954_v59 }
 0xa2b   : > { %18656 = vmatpush3.bf16.msra.mxu1 %v18653_v51  ;;  %16325 = vmatprep.mubr.f32.mxu1 %v26955_v32  ;;  %v26352_v32 = vand.u32 4294901760, %v24125_v13 }
 0xa2c   : > { %18658 = vmatprep.subr.bf16.mxu1 %v18657_v22 }
 0xa2e   : > { %16326 = vmatmul.mubr.f32.gmra.mrb[32].mxu1 %v26956_v12  ;;  %v24147_v12 = vld [vmem:[#allocation10 + $0x78] sm:$0xff] }
 0xa2f   : > { %18660 = vmatpush3.bf16.msra.mxu1 %v18657_v22  ;;  %16328 = vmatprep.mubr.f32.mxu1 %v26957_v3 }
 0xa30   : > { %18662 = vmatprep.subr.bf16.mxu1 %v18661_v52 }
 0xa32   : > { %16329 = vmatmul.mubr.f32.gmra.mrb[34].mxu1 %v26958_v40 }
 0xa33   : > { %18664 = vmatpush3.bf16.msra.mxu1 %v18661_v52  ;;  %16331 = vmatprep.mubr.f32.mxu1 %v26959_v18  ;;  %v24145_v52 = vld [vmem:[#allocation10 + $0x70] sm:$0xff]  ;;  %v24164_v18 = vsub.f32 %v7098_v20, %v8431_v4 }
 0xa34   : > { %18666 = vmatprep.subr.bf16.mxu1 %v18665_v33 }
 0xa36   : > { %16332 = vmatmul.mubr.f32.gmra.mrb[36].mxu1 %v26960_v44 }
 0xa37   : > { %18668 = vmatpush3.bf16.msra.mxu1 %v18665_v33  ;;  %16334 = vmatprep.mubr.f32.mxu1 %v26961_v54  ;;  %v8452_v54 = vand.u32 4294901760, %v24145_v52 }
 0xa38   : > { %18670 = vmatprep.subr.bf16.mxu1 %v18669_v16 }
 0xa3a   : > { %16335 = vmatmul.mubr.f32.gmra.mrb[38].mxu1 %v26962_v30  ;;  %v8455_v30 = vand.u32 4294901760, %v24147_v12 }
 0xa3b   : > { %18672 = vmatpush3.bf16.msra.mxu1 %v18669_v16  ;;  %16369 = vmatprep.mubr.f32.mxu1 %v26915_v43  ;;  %v8668_v16 = vsub.f32 %v24116_v36, %v26357_v1 }
 0xa3c   : > { %18674 = vmatprep.subr.bf16.mxu1 %v23719_v19 }
 0xa3e   : > { %16370 = vmatmul.mubr.f32.vlgmr.msra.gmra.mrb[24].mxu1 %v26916_v7 }
 0xa3f   : > { %18676 = vmatpush3.bf16.msra.mxu1 %v23719_v19  ;;  %16372 = vmatprep.mubr.f32.mxu1 %v26917_v53  ;;  %v7091_v19 = vld [vmem:[#allocation10] sm:$0xff] }
 0xa40   : > { %18678 = vmatprep.subr.bf16.mxu1 %v23733_v45 }
 0xa42   : > { %16373 = vmatmul.mubr.f32.gmra.mrb[26].mxu1 %v26918_v24 }
 0xa43   : > { %18680 = vmatpush3.bf16.msra.mxu1 %v23733_v45  ;;  %16375 = vmatprep.mubr.f32.mxu1 %v26919_v60  ;;  %v7092_v45 = vld [vmem:[#allocation10 + $0x8] sm:$0xff] }
 0xa44   : > { %18682 = vmatprep.subr.bf16.mxu1 %v23739_v14 }
 0xa46   : > { %16376 = vmatmul.mubr.f32.gmra.mrb[28].mxu1 %v26920_v31 }
 0xa47   : > { %18684 = vmatpush3.bf16.msra.mxu1 %v23739_v14  ;;  %16378 = vmatprep.mubr.f32.mxu1 %v26921_v28  ;;  %v8410_v14 = vand.u32 4294901760, %v7091_v19 }
 0xa48   : > { %18686 = vmatprep.subr.bf16.mxu1 %v23749_v25 }
 0xa49   : > { %v24103_v9 = vsub.f32 %v7091_v19, %v8410_v14  ;;  %v8689_v19 = vsub.f32 %v24125_v13, %v26352_v32 }
 0xa4a   : > { %16379 = vmatmul.mubr.f32.gmra.mrb[30].mxu1 %v26922_v0 }
 0xa4b   : > { %18688 = vmatpush3.bf16.msra.mxu1 %v23749_v25  ;;  %16381 = vmatprep.mubr.f32.mxu1 %v26923_v8  ;;  %v8413_v25 = vand.u32 4294901760, %v7092_v45 }
 0xa4c   : > { %18690 = vmatprep.subr.bf16.mxu1 %v23769_v39 }
 0xa4d   : > { %v24105_v37 = vsub.f32 %v7092_v45, %v8413_v25 }
 0xa4e   : > { %16382 = vmatmul.mubr.f32.gmra.mrb[32].mxu1 %v26924_v23 }
 0xa4f   : > { %18692 = vmatpush3.bf16.msra.mxu1 %v23769_v39  ;;  %16384 = vmatprep.mubr.f32.mxu1 %v26925_v56  ;;  %v24079_v39 = vpack.c.bf16 %v8413_v25, %v8410_v14  ;;  %v26361_v29 = vand.u32 4294901760, %v24105_v37 }
 0xa50   : > { %18694 = vmatprep.subr.bf16.mxu1 %v23781_v63 }
 0xa51   : > { %v8661_v3 = vsub.f32 %v24105_v37, %v26361_v29 }
 0xa52   : > { %16385 = vmatmul.mubr.f32.gmra.mrb[34].mxu1 %v26926_v10 }
 0xa53   : > { %18696 = vmatpush3.bf16.msra.mxu1 %v23781_v63  ;;  %16387 = vmatprep.mubr.f32.mxu1 %v26927_v17  ;;  %v8419_v63 = vand.u32 4294901760, %v7094_v34  ;;  %v8662_v25 = vand.u32 4294901760, %v8661_v3 }
 0xa54   : > { %18698 = vmatprep.subr.bf16.mxu1 %v23796_v27 }
 0xa55   : > { %v24085_v50 = vpack.c.bf16 %v8419_v63, %v8416_v38  ;;  %v24118_v15 = vsub.f32 %v7094_v34, %v8419_v63 }
 0xa56   : > { %16388 = vmatmul.mubr.f32.gmra.mrb[36].mxu1 %v26928_v41 }
 0xa57   : > { %18700 = vmatpush3.bf16.msra.mxu1 %v23796_v27  ;;  %16390 = vmatprep.mubr.f32.mxu1 %v26929_v49  ;;  %v8422_v27 = vand.u32 4294901760, %v7095_v6  ;;  %v26356_v22 = vand.u32 4294901760, %v24118_v15 }
 0xa58   : > { %18702 = vmatprep.subr.bf16.mxu1 %v23826_v42 }
 0xa59   : > { %v24091_v62 = vpack.c.bf16 %v8425_v2, %v8422_v27  ;;  %v24123_v46 = vsub.f32 %v7095_v6, %v8422_v27  ;;  %v26350_v6 = vand.u32 4294901760, %v24164_v18  ;;  %v8669_v27 = vand.u32 4294901760, %v8668_v16 }
 0xa5a   : > { %16391 = vmatmul.mubr.f32.gmra.mrb[38].mxu1 %v26930_v21 }
 0xa5b   : > { %18704 = vmatpush3.bf16.msra.mxu1 %v23826_v42  ;;  %16425 = vmatprep.mubr.f32.mxu1 %v26915_v43  ;;  %v8428_v42 = vand.u32 4294901760, %v7097_v47  ;;  %v8434_v43 = vand.u32 4294901760, %v7099_v5 }
 0xa5c   : > { %18706 = vmatprep.subr.bf16.mxu1 %v24079_v39 }
 0xa5d   : > { %v24097_v48 = vpack.c.bf16 %v8431_v4, %v8428_v42  ;;  %v24162_v40 = vsub.f32 %v7097_v47, %v8428_v42  ;;  %v24174_v44 = vsub.f32 %v7099_v5, %v8434_v43  ;;  %v8690_v4 = vand.u32 4294901760, %v8689_v19 }
 0xa5e   : > { %16426 = vmatmul.mubr.f32.vlgmr.msra.gmra.mrb[24].mxu1 %v26916_v7  ;;  %v8437_v7 = vand.u32 4294901760, %v7100_v26 }
 0xa5f   : > { %18708 = vmatpush3.bf16.msra.mxu1 %v24079_v39  ;;  %16428 = vmatprep.mubr.f32.mxu1 %v26917_v53  ;;  %26963 = vst [vmem:[#allocation131_spill] sm:$0xff] %v24097_v48  ;;  %v24099_v53 = vld [vmem:[#allocation10 + $0x50] sm:$0xff]  ;;  %v26351_v63 = vand.u32 4294901760, %v24162_v40  ;;  %v26349_v47 = vand.u32 4294901760, %v24174_v44 }
 0xa60   : > { %18710 = vmatprep.subr.bf16.mxu1 %v24085_v50  ;;  %v8440_v55 = vand.u32 4294901760, %v24099_v53  ;;  %v24185_v58 = vsub.f32 %v7100_v26, %v8437_v7 }
 0xa61   : > { %v8696_v16 = vsub.f32 %v24162_v40, %v26351_v63 }
 0xa62   : > { %16429 = vmatmul.mubr.f32.gmra.mrb[26].mxu1 %v26918_v24  ;;  %v24110_v24 = vpack.c.bf16 %v8437_v7, %v8434_v43  ;;  %v26353_v43 = vand.u32 4294901760, %v24185_v58 }
 0xa63   : > { %18712 = vmatpush3.bf16.msra.mxu1 %v24085_v50  ;;  %16431 = vmatprep.mubr.f32.mxu1 %v26919_v60  ;;  %v24112_v60 = vld [vmem:[#allocation10 + $0x60] sm:$0xff] }
 0xa64   : > { %18714 = vmatprep.subr.bf16.mxu1 %v24091_v62  ;;  %26964 = vst [vmem:[#allocation84_spill] sm:$0xff] %v24110_v24  ;;  %v8446_v51 = vand.u32 4294901760, %v24112_v60 }
 0xa66   : > { %16432 = vmatmul.mubr.f32.gmra.mrb[28].mxu1 %v26920_v31  ;;  %v8443_v31 = vand.u32 4294901760, %v24101_v35  ;;  %v24160_v33 = vpack.c.bf16 %v8449_v61, %v8446_v51 }
 0xa67   : > { %18716 = vmatpush3.bf16.msra.mxu1 %v24091_v62  ;;  %16434 = vmatprep.mubr.f32.mxu1 %v26921_v28  ;;  %v26366_v28 = vand.u32 4294901760, %v24103_v9 }
 0xa68   : > { %18718 = vmatprep.subr.bf16.mxu1 %v24097_v48  ;;  %v24141_v59 = vpack.c.bf16 %v8443_v31, %v8440_v55  ;;  %26966 = vst [vmem:[#allocation55_spill] sm:$0xff] %v24160_v33 }
 0xa6a   : > { %16435 = vmatmul.mubr.f32.gmra.mrb[30].mxu1 %v26922_v0  ;;  %26965 = vst [vmem:[#allocation90_spill] sm:$0xff] %v24141_v59  ;;  %v26354_v0 = vand.u32 4294901760, %v24123_v46 }
 0xa6b   : > { %18720 = vmatpush3.bf16.msra.mxu1 %v24097_v48  ;;  %16437 = vmatprep.mubr.f32.mxu1 %v26923_v8  ;;  %v8654_v8 = vsub.f32 %v24103_v9, %v26366_v28 }
 0xa6c   : > { %18722 = vmatprep.subr.bf16.mxu1 %v24110_v24 }
 0xa6d   : > { %v8655_v14 = vand.u32 4294901760, %v8654_v8 }
 0xa6e   : > { %16438 = vmatmul.mubr.f32.gmra.mrb[32].mxu1 %v26924_v23  ;;  %v8675_v23 = vsub.f32 %v24118_v15, %v26356_v22 }
 0xa6f   : > { %18724 = vmatpush3.bf16.msra.mxu1 %v24110_v24  ;;  %16440 = vmatprep.mubr.f32.mxu1 %v26925_v56  ;;  %v8682_v56 = vsub.f32 %v24123_v46, %v26354_v0  ;;  %v18737_v26 = vpack.c.bf16 %v8662_v25, %v8655_v14 }
 0xa70   : > { %18726 = vmatprep.subr.bf16.mxu1 %v24141_v59  ;;  %v8676_v2 = vand.u32 4294901760, %v8675_v23  ;;  %v8703_v23 = vsub.f32 %v24164_v18, %v26350_v6 }
 0xa71   : > { %v16091_v45 = vpop.f32.mrb[8].mxu1  ;;  %v8683_v42 = vand.u32 4294901760, %v8682_v56 }
 0xa72   : > { %v24187_v34 = vand.u32 4294901760, %v16091_v45  ;;  %v6997_v38 = vpop.f32.mrb[9].mxu1  ;;  %16441 = vmatmul.mubr.f32.gmra.mrb[34].mxu1 %v26926_v10  ;;  %v24205_v10 = vpack.c.bf16 %v8455_v30, %v8452_v54  ;;  %v8704_v6 = vand.u32 4294901760, %v8703_v23 }
 0xa73   : > { %v24192_v11 = vand.u32 4294901760, %v6997_v38  ;;  %18728 = vmatpush3.bf16.msra.mxu1 %v24141_v59  ;;  %16443 = vmatprep.mubr.f32.mxu1 %v26927_v17 }
 0xa74   : > { %v24198_v20 = vsub.f32 %v16091_v45, %v24187_v34  ;;  %18730 = vmatprep.subr.bf16.mxu1 %v24160_v33  ;;  %26967 = vst [vmem:[#allocation124_spill] sm:$0xff] %v24205_v10  ;;  %v24226_v45 = vpack.c.bf16 %v8676_v2, %v8669_v27 }
 0xa75   : > { %v24208_v5 = vsub.f32 %v6997_v38, %v24192_v11  ;;  %v16094_v17 = vpop.f32.mrb[10].mxu1  ;;  %v24238_v38 = vpack.c.bf16 %v8690_v4, %v8683_v42  ;;  %v24257_v42 = vsub.f32 %v24101_v35, %v8443_v31 }
 0xa76   : > { %v26355_v7 = vand.u32 4294901760, %v24198_v20  ;;  %v24212_v8 = vand.u32 4294901760, %v16094_v17  ;;  %v7009_v3 = vpop.f32.mrb[11].mxu1  ;;  %16444 = vmatmul.mubr.f32.gmra.mrb[36].mxu1 %v26928_v41  ;;  %v8710_v41 = vsub.f32 %v24174_v44, %v26349_v47 }
 0xa77   : > { %v26360_v56 = vand.u32 4294901760, %v24208_v5  ;;  %v24222_v19 = vand.u32 4294901760, %v7009_v3  ;;  %18732 = vmatpush3.bf16.msra.mxu1 %v24160_v33  ;;  %16446 = vmatprep.mubr.f32.mxu1 %v26929_v49  ;;  %v24243_v49 = vsub.f32 %v24099_v53, %v8440_v55 }
 0xa78   : > { %v8503_v14 = vsub.f32 %v24198_v20, %v26355_v7  ;;  %v24235_v25 = vsub.f32 %v16094_v17, %v24212_v8  ;;  %18734 = vmatprep.subr.bf16.mxu1 %v24205_v10  ;;  %v8717_v17 = vsub.f32 %v24185_v58, %v26353_v43  ;;  %v8711_v0 = vand.u32 4294901760, %v8710_v41 }
 0xa79   : > { %v24246_v27 = vsub.f32 %v7009_v3, %v24222_v19  ;;  %v16097_v2 = vpop.f32.mrb[12].mxu1  ;;  %v8493_v47 = vsub.f32 %v24208_v5, %v26360_v56  ;;  %v8697_v3 = vand.u32 4294901760, %v8696_v16 }
 0xa7a   : > { %v26358_v53 = vand.u32 4294901760, %v24235_v25  ;;  %v24260_v55 = vand.u32 4294901760, %v16097_v2  ;;  %v7021_v4 = vpop.f32.mrb[13].mxu1  ;;  %16447 = vmatmul.mubr.f32.gmra.mrb[38].mxu1 %v26930_v21  ;;  %v8504_v7 = vand.u32 4294901760, %v8503_v14  ;;  %v26362_v21 = vand.u32 4294901760, %v24243_v49 }
 0xa7b   : > { %v26359_v63 = vand.u32 4294901760, %v24246_v27  ;;  %v24264_v32 = vand.u32 4294901760, %v7021_v4  ;;  %18736 = vmatpush3.bf16.msra.mxu1 %v24205_v10  ;;  %v8494_v43 = vand.u32 4294901760, %v8493_v47  ;;  %v8718_v41 = vand.u32 4294901760, %v8717_v17 }
 0xa7c   : > { %v24268_v35 = vsub.f32 %v16097_v2, %v24260_v55  ;;  %18738 = vmatprep.subr.bf16.mxu1 %v18737_v26  ;;  %v8523_v31 = vsub.f32 %v24235_v25, %v26358_v53  ;;  %v26364_v14 = vand.u32 4294901760, %v24257_v42  ;;  %v18749_v56 = vpack.c.bf16 %v8704_v6, %v8697_v3 }
 0xa7d   : > { %v24275_v16 = vsub.f32 %v7021_v4, %v24264_v32  ;;  %v16100_v23 = vpop.f32.mrb[14].mxu1  ;;  %16481 = vmatprep.mubr.f32.mxu1 %v8494_v43  ;;  %v8513_v47 = vsub.f32 %v24246_v27, %v26359_v63  ;;  %v24287_v4 = vsub.f32 %v24112_v60, %v8446_v51  ;;  %v24292_v43 = vsub.f32 %v24114_v57, %v8449_v61 }
 0xa7e   : > { %v26363_v2 = vand.u32 4294901760, %v24268_v35  ;;  %v24282_v22 = vand.u32 4294901760, %v16100_v23  ;;  %v7033_v1 = vpop.f32.mrb[15].mxu1  ;;  %16482 = vmatmul.mubr.f32.vlgmr.msra.gmra.mrb[24].mxu1 %v8504_v7  ;;  %v8524_v7 = vand.u32 4294901760, %v8523_v31  ;;  %v8724_v57 = vsub.f32 %v24243_v49, %v26362_v21 }
 0xa7f   : > { %v26365_v17 = vand.u32 4294901760, %v24275_v16  ;;  %v24295_v53 = vand.u32 4294901760, %v7033_v1  ;;  %18740 = vmatpush3.bf16.msra.mxu1 %v18737_v26  ;;  %v8514_v63 = vand.u32 4294901760, %v8513_v47  ;;  %v24313_v26 = vpack.c.bf16 %v8718_v41, %v8711_v0 }
 0xa80   : > { %v24298_v29 = vsub.f32 %v16100_v23, %v24282_v22  ;;  %18742 = vmatprep.subr.bf16.mxu1 %v24226_v45  ;;  %v8543_v60 = vsub.f32 %v24268_v35, %v26363_v2  ;;  %v8731_v3 = vsub.f32 %v24257_v42, %v26364_v14  ;;  %v24330_v41 = vsub.f32 %v24145_v52, %v8452_v54 }
 0xa81   : > { %v24308_v51 = vsub.f32 %v7033_v1, %v24295_v53  ;;  %v16103_v61 = vpop.f32.mrb[16].mxu1  ;;  %16484 = vmatprep.mubr.f32.mxu1 %v8514_v63  ;;  %v8533_v6 = vsub.f32 %v24275_v16, %v26365_v17  ;;  %v26371_v1 = vand.u32 4294901760, %v24287_v4 }
 0xa82   : > { %26968 = vst [vmem:[#allocation134_spill] sm:$0xff] %v24298_v29  ;;  %v26367_v31 = vand.u32 4294901760, %v24298_v29  ;;  %v24319_v23 = vand.u32 4294901760, %v16103_v61  ;;  %v7045_v47 = vpop.f32.mrb[17].mxu1  ;;  %16485 = vmatmul.mubr.f32.gmra.mrb[26].mxu1 %v8524_v7  ;;  %v8544_v7 = vand.u32 4294901760, %v8543_v60  ;;  %v8725_v60 = vand.u32 4294901760, %v8724_v57 }
 0xa83   : > { %v26370_v21 = vand.u32 4294901760, %v24308_v51  ;;  %v24324_v2 = vand.u32 4294901760, %v7045_v47  ;;  %18744 = vmatpush3.bf16.msra.mxu1 %v24226_v45  ;;  %v8534_v0 = vand.u32 4294901760, %v8533_v6  ;;  %v24342_v45 = vsub.f32 %v24147_v12, %v8455_v30 }
 0xa84   : > { %v24333_v14 = vsub.f32 %v16103_v61, %v24319_v23  ;;  %18746 = vmatprep.subr.bf16.mxu1 %v24238_v38  ;;  %v8563_v17 = vsub.f32 %v24298_v29, %v26367_v31  ;;  %v8732_v61 = vand.u32 4294901760, %v8731_v3  ;;  %v8738_v12 = vsub.f32 %v24287_v4, %v26371_v1 }
 0xa85   : > { %v24345_v6 = vsub.f32 %v7045_v47, %v24324_v2  ;;  %v16106_v52 = vpop.f32.mrb[18].mxu1  ;;  %16487 = vmatprep.mubr.f32.mxu1 %v8534_v0  ;;  %v8553_v54 = vsub.f32 %v24308_v51, %v26370_v21  ;;  %v26971_v30 = vand.u32 4294901760, %v24292_v43 }
 0xa86   : > { %26969 = vst [vmem:[#allocation98_spill] sm:$0xff] %v24333_v14  ;;  %v26378_v28 = vand.u32 4294901760, %v24333_v14  ;;  %v24351_v63 = vand.u32 4294901760, %v16106_v52  ;;  %v7057_v31 = vpop.f32.mrb[19].mxu1  ;;  %16488 = vmatmul.mubr.f32.gmra.mrb[28].mxu1 %v8544_v7  ;;  %v8564_v7 = vand.u32 4294901760, %v8563_v17  ;;  %v18757_v3 = vpack.c.bf16 %v8732_v61, %v8725_v60 }
 0xa87   : > { %26970 = vst [vmem:[#allocation105_spill] sm:$0xff] %v24345_v6  ;;  %v8745_v47 = vsub.f32 %v24292_v43, %v26971_v30  ;;  %v24360_v10 = vand.u32 4294901760, %v7057_v31  ;;  %18748 = vmatpush3.bf16.msra.mxu1 %v24238_v38  ;;  %v8554_v57 = vand.u32 4294901760, %v8553_v54  ;;  %v26974_v38 = vand.u32 4294901760, %v24345_v6 }
 0xa88   : > { %v24365_v21 = vsub.f32 %v16106_v52, %v24351_v63  ;;  %18750 = vmatprep.subr.bf16.mxu1 %v18749_v56  ;;  %v8583_v1 = vsub.f32 %v24333_v14, %v26378_v28  ;;  %v8739_v24 = vand.u32 4294901760, %v8738_v12 }
 0xa89   : > { %v24372_v0 = vsub.f32 %v7057_v31, %v24360_v10  ;;  %v16109_v33 = vpop.f32.mrb[20].mxu1  ;;  %16490 = vmatprep.mubr.f32.mxu1 %v8554_v57  ;;  %v8573_v54 = vsub.f32 %v24345_v6, %v26974_v38  ;;  %v8746_v28 = vand.u32 4294901760, %v8745_v47  ;;  %v26975_v57 = vand.u32 4294901760, %v24330_v41 }
 0xa8a   : > { %26972 = vst [vmem:[#allocation56_spill] sm:$0xff] %v24365_v21  ;;  %v26383_v52 = vand.u32 4294901760, %v24365_v21  ;;  %v24378_v17 = vand.u32 4294901760, %v16109_v33  ;;  %v7069_v59 = vpop.f32.mrb[21].mxu1  ;;  %16491 = vmatmul.mubr.f32.gmra.mrb[30].mxu1 %v8564_v7  ;;  %v8584_v61 = vand.u32 4294901760, %v8583_v1  ;;  %v26976_v47 = vand.u32 4294901760, %v24342_v45 }
 0xa8b   : > { %26973 = vst [vmem:[#allocation125_spill] sm:$0xff] %v24372_v0  ;;  %v26390_v30 = vand.u32 4294901760, %v24372_v0  ;;  %v24381_v14 = vand.u32 4294901760, %v7069_v59  ;;  %18752 = vmatpush3.bf16.msra.mxu1 %v18749_v56  ;;  %v8574_v31 = vand.u32 4294901760, %v8573_v54  ;;  %v8752_v29 = vsub.f32 %v24330_v41, %v26975_v57 }
 0xa8c   : > { %v24387_v60 = vsub.f32 %v16109_v33, %v24378_v17  ;;  %18754 = vmatprep.subr.bf16.mxu1 %v24313_v26  ;;  %v8603_v12 = vsub.f32 %v24365_v21, %v26383_v52  ;;  %v8759_v7 = vsub.f32 %v24342_v45, %v26976_v47  ;;  %v18761_v52 = vpack.c.bf16 %v8746_v28, %v8739_v24 }
 0xa8d   : > { %v24397_v56 = vsub.f32 %v7069_v59, %v24381_v14  ;;  %v16112_v38 = vpop.f32.mrb[22].mxu1  ;;  %16493 = vmatprep.mubr.f32.mxu1 %v8574_v31  ;;  %v8593_v33 = vsub.f32 %v24372_v0, %v26390_v30  ;;  %v8753_v47 = vand.u32 4294901760, %v8752_v29 }
 0xa8e   : > { %v26401_v1 = vand.u32 4294901760, %v24387_v60  ;;  %v24403_v54 = vand.u32 4294901760, %v16112_v38  ;;  %v7081_v57 = vpop.f32.mrb[23].mxu1  ;;  %16494 = vmatmul.mubr.f32.gmra.mrb[32].mxu1 %v8584_v61  ;;  %v8604_v48 = vand.u32 4294901760, %v8603_v12  ;;  %v8760_v0 = vand.u32 4294901760, %v8759_v7 }
 0xa8f   : > { %v26402_v21 = vand.u32 4294901760, %v24397_v56  ;;  %v24406_v6 = vand.u32 4294901760, %v7081_v57  ;;  %18756 = vmatpush3.bf16.msra.mxu1 %v24313_v26  ;;  %v8594_v59 = vand.u32 4294901760, %v8593_v33 }
 0xa90   : > { %v24410_v31 = vsub.f32 %v16112_v38, %v24403_v54  ;;  %18758 = vmatprep.subr.bf16.mxu1 %v18757_v3  ;;  %v8623_v30 = vsub.f32 %v24387_v60, %v26401_v1  ;;  %v18765_v38 = vpack.c.bf16 %v8760_v0, %v8753_v47  ;;  %v18773_v0 = vpack.c.bf16 %v24118_v15, %v24116_v36  ;;  %v26991_v1 = vld [vmem:[#allocation105_spill] sm:$0xff] }
 0xa91   : > { %v24416_v24 = vsub.f32 %v7081_v57, %v24406_v6  ;;  %16496 = vmatprep.mubr.f32.mxu1 %v8594_v59  ;;  %v8613_v28 = vsub.f32 %v24397_v56, %v26402_v21  ;;  %v18785_v59 = vpack.c.bf16 %v24185_v58, %v24174_v44  ;;  %v18789_v47 = vpack.c.bf16 %v24257_v42, %v24243_v49  ;;  %v26992_v21 = vld [vmem:[#allocation84_spill] sm:$0xff] }
 0xa92   : > { %v26393_v29 = vand.u32 4294901760, %v24410_v31  ;;  %16497 = vmatmul.mubr.f32.gmra.mrb[34].mxu1 %v8604_v48  ;;  %v8624_v12 = vand.u32 4294901760, %v8623_v30  ;;  %v18777_v30 = vpack.c.bf16 %v24125_v13, %v24123_v46 }
 0xa93   : > { %v26400_v26 = vand.u32 4294901760, %v24416_v24  ;;  %18760 = vmatpush3.bf16.msra.mxu1 %v18757_v3  ;;  %v8614_v61 = vand.u32 4294901760, %v8613_v28  ;;  %v18769_v3 = vpack.c.bf16 %v24105_v37, %v24103_v9  ;;  %v18793_v28 = vpack.c.bf16 %v24292_v43, %v24287_v4 }
 0xa94   : > { %18762 = vmatprep.subr.bf16.mxu1 %v18761_v52  ;;  %v8643_v7 = vsub.f32 %v24410_v31, %v26393_v29  ;;  %v24496_v29 = vld [vmem:[#allocation13 + $0x30] sm:$0xff] }
 0xa95   : > { %16499 = vmatprep.mubr.f32.mxu1 %v8614_v61  ;;  %v8633_v33 = vsub.f32 %v24416_v24, %v26400_v26  ;;  %v18797_v61 = vpack.c.bf16 %v24342_v45, %v24330_v41  ;;  %26985 = vst [vmem:[#allocation140_spill] sm:$0xff] %v24496_v29  ;;  %v26990_v26 = vld [vmem:[#allocation134_spill] sm:$0xff] }
 0xa96   : > { %16500 = vmatmul.mubr.f32.gmra.mrb[36].mxu1 %v8624_v12  ;;  %v8644_v48 = vand.u32 4294901760, %v8643_v7  ;;  %v24461_v12 = vld [vmem:[#allocation13] sm:$0xff]  ;;  %v24463_v7 = vld [vmem:[#allocation13 + $0x8] sm:$0xff] }
 0xa97   : > { %18764 = vmatpush3.bf16.msra.mxu1 %v18761_v52  ;;  %v8634_v57 = vand.u32 4294901760, %v8633_v33  ;;  %v18781_v52 = vpack.c.bf16 %v24164_v18, %v24162_v40  ;;  %26977 = vst [vmem:[#allocation137_spill] sm:$0xff] %v24461_v12  ;;  %26978 = vst [vmem:[#allocation111_spill] sm:$0xff] %v24463_v7  ;;  %v26397_v33 = vand.u32 4294901760, %v24461_v12  ;;  %v27004_v12 = vand.u32 4294901760, %v24198_v20 }
 0xa98   : > { %18766 = vmatprep.subr.bf16.mxu1 %v18765_v38 }
 0xa99   : > { %16502 = vmatprep.mubr.f32.mxu1 %v8634_v57  ;;  %v26394_v57 = vand.u32 4294901760, %v24463_v7 }
 0xa9a   : > { %16503 = vmatmul.mubr.f32.gmra.mrb[38].mxu1 %v8644_v48  ;;  %v24470_v48 = vld [vmem:[#allocation13 + $0x18] sm:$0xff] }
 0xa9b   : > { %18768 = vmatpush3.bf16.msra.mxu1 %v18765_v38  ;;  %16537 = vmatprep.mubr.f32.mxu1 %v24192_v11  ;;  %v24465_v38 = vld [vmem:[#allocation13 + $0x10] sm:$0xff]  ;;  %26980 = vst [vmem:[#allocation126_spill] sm:$0xff] %v24470_v48 }
 0xa9c   : > { %18770 = vmatprep.subr.bf16.mxu1 %v18769_v3  ;;  %26979 = vst [vmem:[#allocation116_spill] sm:$0xff] %v24465_v38 }
 0xa9e   : > { %16538 = vmatmul.mubr.f32.vlgmr.msra.gmra.mrb[24].mxu1 %v24187_v34 }
 0xa9f   : > { %16540 = vmatprep.mubr.f32.mxu1 %v24222_v19  ;;  %18772 = vmatpush3.bf16.msra.mxu1 %v18769_v3  ;;  %v26396_v3 = vand.u32 4294901760, %v24465_v38  ;;  %v27003_v38 = vand.u32 4294901760, %v24118_v15  ;;  %v27010_v15 = vand.u32 4294901760, %v24162_v40  ;;  %v27017_v40 = vand.u32 4294901760, %v26991_v1 }
 0xaa0   : > { %18774 = vmatprep.subr.bf16.mxu1 %v18773_v0 }
 0xaa2   : > { %16541 = vmatmul.mubr.f32.gmra.mrb[26].mxu1 %v24212_v8 }
 0xaa3   : > { %16543 = vmatprep.mubr.f32.mxu1 %v24264_v32  ;;  %18776 = vmatpush3.bf16.msra.mxu1 %v18773_v0  ;;  %v24473_v0 = vld [vmem:[#allocation13 + $0x20] sm:$0xff] }
 0xaa4   : > { %18778 = vmatprep.subr.bf16.mxu1 %v18777_v30  ;;  %26981 = vst [vmem:[#allocation138_spill] sm:$0xff] %v24473_v0 }
 0xaa6   : > { %16544 = vmatmul.mubr.f32.gmra.mrb[28].mxu1 %v24260_v55 }
 0xaa7   : > { %16546 = vmatprep.mubr.f32.mxu1 %v24295_v53  ;;  %18780 = vmatpush3.bf16.msra.mxu1 %v18777_v30  ;;  %v24475_v30 = vld [vmem:[#allocation13 + $0x28] sm:$0xff] }
 0xaa8   : > { %18782 = vmatprep.subr.bf16.mxu1 %v18781_v52  ;;  %26982 = vst [vmem:[#allocation120_spill] sm:$0xff] %v24475_v30 }
 0xaaa   : > { %16547 = vmatmul.mubr.f32.gmra.mrb[30].mxu1 %v24282_v22 }
 0xaab   : > { %16549 = vmatprep.mubr.f32.mxu1 %v24324_v2  ;;  %18784 = vmatpush3.bf16.msra.mxu1 %v18781_v52  ;;  %v26395_v52 = vand.u32 4294901760, %v24470_v48  ;;  %v27002_v48 = vand.u32 4294901760, %v24116_v36  ;;  %v27009_v36 = vand.u32 4294901760, %v24275_v16 }
 0xaac   : > { %18786 = vmatprep.subr.bf16.mxu1 %v18785_v59 }
 0xaad   : > { %v18837_v7 = vpack.c.bf16 %v27003_v38, %v27002_v48 }
 0xaae   : > { %16550 = vmatmul.mubr.f32.gmra.mrb[32].mxu1 %v24319_v23 }
 0xaaf   : > { %16552 = vmatprep.mubr.f32.mxu1 %v24360_v10  ;;  %18788 = vmatpush3.bf16.msra.mxu1 %v18785_v59  ;;  %v24483_v59 = vpack.c.bf16 %v26394_v57, %v26397_v33  ;;  %v24498_v57 = vld [vmem:[#allocation13 + $0x38] sm:$0xff] }
 0xab0   : > { %18790 = vmatprep.subr.bf16.mxu1 %v18789_v47  ;;  %26986 = vst [vmem:[#allocation128_spill] sm:$0xff] %v24498_v57  ;;  %v26403_v33 = vand.u32 4294901760, %v24498_v57  ;;  %v26999_v57 = vand.u32 4294901760, %v24103_v9  ;;  %v27005_v9 = vand.u32 4294901760, %v24246_v27 }
 0xab1   : > { %26983 = vst [vmem:[#allocation127_spill] sm:$0xff] %v24483_v59  ;;  %18898 = vmatprep.subr.bf16.mxu0 %v24483_v59 }
 0xab2   : > { %16553 = vmatmul.mubr.f32.gmra.mrb[34].mxu1 %v24351_v63  ;;  %18900 = vmatpush3.bf16.msra.mxu0 %v24483_v59  ;;  %v26997_v59 = vld [vmem:[#allocation55_spill] sm:$0xff] }
 0xab3   : > { %16555 = vmatprep.mubr.f32.mxu1 %v24381_v14  ;;  %18792 = vmatpush3.bf16.msra.mxu1 %v18789_v47  ;;  %v24490_v47 = vpack.c.bf16 %v26395_v52, %v26396_v3  ;;  %v26404_v3 = vand.u32 4294901760, %v24496_v29  ;;  %v27000_v29 = vand.u32 4294901760, %v24105_v37  ;;  %v27006_v37 = vand.u32 4294901760, %v24123_v46 }
 0xab4   : > { %18794 = vmatprep.subr.bf16.mxu1 %v18793_v28  ;;  %v27013_v46 = vand.u32 4294901760, %v24308_v51 }
 0xab5   : > { %26984 = vst [vmem:[#allocation139_spill] sm:$0xff] %v24490_v47  ;;  %18902 = vmatprep.subr.bf16.mxu0 %v24490_v47 }
 0xab6   : > { %16556 = vmatmul.mubr.f32.gmra.mrb[36].mxu1 %v24378_v17  ;;  %18904 = vmatpush3.bf16.msra.mxu0 %v24490_v47  ;;  %v26995_v47 = vld [vmem:[#allocation90_spill] sm:$0xff] }
 0xab7   : > { %16558 = vmatprep.mubr.f32.mxu1 %v24406_v6  ;;  %18796 = vmatpush3.bf16.msra.mxu1 %v18793_v28  ;;  %v26399_v28 = vand.u32 4294901760, %v24473_v0  ;;  %v27001_v0 = vand.u32 4294901760, %v24208_v5 }
 0xab8   : > { %18798 = vmatprep.subr.bf16.mxu1 %v18797_v61 }
 0xaba   : > { %16559 = vmatmul.mubr.f32.gmra.mrb[38].mxu1 %v24403_v54 }
 0xabb   : > { %18800 = vmatpush3.bf16.msra.mxu1 %v18797_v61  ;;  %16593 = vmatprep.mubr.f32.mxu1 %v24208_v5  ;;  %v26398_v61 = vand.u32 4294901760, %v24475_v30  ;;  %v18833_v30 = vpack.c.bf16 %v27000_v29, %v26999_v57  ;;  %v27007_v29 = vand.u32 4294901760, %v24125_v13  ;;  %v27008_v57 = vand.u32 4294901760, %v24235_v25 }
 0xabc   : > { %18802 = vmatprep.subr.bf16.mxu1 %v24079_v39  ;;  %v27014_v13 = vand.u32 4294901760, %v24174_v44 }
 0xabd   : > { %v24509_v52 = vpack.c.bf16 %v26398_v61, %v26399_v28  ;;  %v24523_v61 = vpack.c.bf16 %v26403_v33, %v26404_v3  ;;  %v26989_v28 = vld [vmem:[#allocation131_spill] sm:$0xff]  ;;  %v26993_v33 = vld [vmem:[#allocation98_spill] sm:$0xff]  ;;  %v26994_v3 = vld [vmem:[#allocation125_spill] sm:$0xff]  ;;  %v18841_v5 = vpack.c.bf16 %v27007_v29, %v27006_v37 }
 0xabe   : > { %16594 = vmatmul.mubr.f32.vlgmr.msra.gmra.mrb[24].mxu1 %v24198_v20  ;;  %v27011_v20 = vand.u32 4294901760, %v24164_v18  ;;  %v27018_v18 = vand.u32 4294901760, %v24243_v49  ;;  %v27020_v38 = vand.u32 4294901760, %v26993_v33  ;;  %v27021_v44 = vand.u32 4294901760, %v26994_v3 }
 0xabf   : > { %16596 = vmatprep.mubr.f32.mxu1 %v24246_v27  ;;  %18804 = vmatpush3.bf16.msra.mxu1 %v24079_v39  ;;  %26987 = vst [vmem:[#allocation129_spill] sm:$0xff] %v24509_v52  ;;  %26988 = vst [vmem:[#allocation132_spill] sm:$0xff] %v24523_v61  ;;  %v27025_v49 = vand.u32 4294901760, %v24397_v56 }
 0xac0   : > { %18806 = vmatprep.subr.bf16.mxu1 %v24085_v50  ;;  %18906 = vmatprep.subr.bf16.mxu0 %v24509_v52  ;;  %v18845_v27 = vpack.c.bf16 %v27011_v20, %v27010_v15 }
 0xac1   : > { %18908 = vmatpush3.bf16.msra.mxu0 %v24509_v52  ;;  %v26996_v52 = vld [vmem:[#allocation56_spill] sm:$0xff] }
 0xac2   : > { %16597 = vmatmul.mubr.f32.gmra.mrb[26].mxu1 %v24235_v25  ;;  %18910 = vmatprep.subr.bf16.mxu0 %v24523_v61  ;;  %v27015_v25 = vand.u32 4294901760, %v24185_v58  ;;  %v27022_v58 = vand.u32 4294901760, %v24287_v4  ;;  %v27024_v48 = vand.u32 4294901760, %v26996_v52  ;;  %v27029_v4 = vand.u32 4294901760, %v24416_v24 }
 0xac3   : > { %16599 = vmatprep.mubr.f32.mxu1 %v24275_v16  ;;  %18808 = vmatpush3.bf16.msra.mxu1 %v24085_v50 }
 0xac4   : > { %18810 = vmatprep.subr.bf16.mxu1 %v24091_v62  ;;  %v18849_v16 = vpack.c.bf16 %v27015_v25, %v27014_v13 }
 0xac5   : > { %18912 = vmatpush3.bf16.msra.mxu0 %v24523_v61  ;;  %v26998_v61 = vld [vmem:[#allocation124_spill] sm:$0xff] }
 0xac6   : > { %16600 = vmatmul.mubr.f32.gmra.mrb[28].mxu1 %v24268_v35 }
 0xac7   : > { %16602 = vmatprep.mubr.f32.mxu1 %v24308_v51  ;;  %18812 = vmatpush3.bf16.msra.mxu1 %v24091_v62 }
 0xac8   : > { %18814 = vmatprep.subr.bf16.mxu1 %v26989_v28 }
 0xaca   : > { %16603 = vmatmul.mubr.f32.gmra.mrb[30].mxu1 %v26990_v26 }
 0xacb   : > { %16605 = vmatprep.mubr.f32.mxu1 %v26991_v1  ;;  %18816 = vmatpush3.bf16.msra.mxu1 %v26989_v28  ;;  %v27023_v1 = vand.u32 4294901760, %v24292_v43  ;;  %v27030_v43 = vand.u32 4294901760, %v24410_v31 }
 0xacc   : > { %18818 = vmatprep.subr.bf16.mxu1 %v26992_v21 }
 0xace   : > { %16606 = vmatmul.mubr.f32.gmra.mrb[32].mxu1 %v26993_v33  ;;  %v27027_v33 = vand.u32 4294901760, %v24342_v45  ;;  %v27033_v45 = vld [vmem:[#allocation111_spill] sm:$0xff] }
 0xacf   : > { %16608 = vmatprep.mubr.f32.mxu1 %v26994_v3  ;;  %18820 = vmatpush3.bf16.msra.mxu1 %v26992_v21 }
 0xad0   : > { %18822 = vmatprep.subr.bf16.mxu1 %v26995_v47 }
 0xad2   : > { %16609 = vmatmul.mubr.f32.gmra.mrb[34].mxu1 %v26996_v52 }
 0xad3   : > { %16611 = vmatprep.mubr.f32.mxu1 %v24397_v56  ;;  %18824 = vmatpush3.bf16.msra.mxu1 %v26995_v47  ;;  %v9749_v56 = vld [vmem:[#allocation13 + $0x78] sm:$0xff] }
 0xad4   : > { %18826 = vmatprep.subr.bf16.mxu1 %v26997_v59 }
 0xad6   : > { %16612 = vmatmul.mubr.f32.gmra.mrb[36].mxu1 %v24387_v60 }
 0xad7   : > { %16614 = vmatprep.mubr.f32.mxu1 %v24416_v24  ;;  %18828 = vmatpush3.bf16.msra.mxu1 %v26997_v59 }
 0xad8   : > { %18830 = vmatprep.subr.bf16.mxu1 %v26998_v61 }
 0xada   : > { %16615 = vmatmul.mubr.f32.gmra.mrb[38].mxu1 %v24410_v31  ;;  %v9803_v31 = vand.u32 4294901760, %v9749_v56 }
 0xadb   : > { %18832 = vmatpush3.bf16.msra.mxu1 %v26998_v61  ;;  %16649 = vmatprep.mubr.f32.mxu1 %v27001_v0  ;;  %v27028_v0 = vand.u32 4294901760, %v24387_v60  ;;  %v9748_v60 = vld [vmem:[#allocation13 + $0x70] sm:$0xff] }
 0xadc   : > { %18834 = vmatprep.subr.bf16.mxu1 %v18833_v30 }
 0xade   : > { %16650 = vmatmul.mubr.f32.vlgmr.msra.gmra.mrb[24].mxu1 %v27004_v12  ;;  %v27012_v12 = vand.u32 4294901760, %v24268_v35  ;;  %v27019_v35 = vand.u32 4294901760, %v24257_v42  ;;  %v27026_v42 = vand.u32 4294901760, %v24330_v41 }
 0xadf   : > { %16652 = vmatprep.mubr.f32.mxu1 %v27005_v9  ;;  %18836 = vmatpush3.bf16.msra.mxu1 %v18833_v30 }
 0xae0   : > { %18838 = vmatprep.subr.bf16.mxu1 %v18837_v7  ;;  %v18853_v51 = vpack.c.bf16 %v27019_v35, %v27018_v18  ;;  %v18861_v3 = vpack.c.bf16 %v27027_v33, %v27026_v42  ;;  %v24740_v42 = vsub.f32 %v9749_v56, %v9803_v31 }
 0xae2   : > { %16653 = vmatmul.mubr.f32.gmra.mrb[26].mxu1 %v27008_v57  ;;  %27043 = vst [vmem:[#allocation123_spill] sm:$0xff] %v24740_v42 }
 0xae3   : > { %16655 = vmatprep.mubr.f32.mxu1 %v27009_v36  ;;  %18840 = vmatpush3.bf16.msra.mxu1 %v18837_v7  ;;  %v27016_v7 = vand.u32 4294901760, %v26990_v26  ;;  %v18857_v26 = vpack.c.bf16 %v27023_v1, %v27022_v58 }
 0xae4   : > { %18842 = vmatprep.subr.bf16.mxu1 %v18841_v5 }
 0xae6   : > { %16656 = vmatmul.mubr.f32.gmra.mrb[28].mxu1 %v27012_v12 }
 0xae7   : > { %16658 = vmatprep.mubr.f32.mxu1 %v27013_v46  ;;  %18844 = vmatpush3.bf16.msra.mxu1 %v18841_v5 }
 0xae8   : > { %18846 = vmatprep.subr.bf16.mxu1 %v18845_v27 }
 0xaea   : > { %16659 = vmatmul.mubr.f32.gmra.mrb[30].mxu1 %v27016_v7 }
 0xaeb   : > { %16661 = vmatprep.mubr.f32.mxu1 %v27017_v40  ;;  %18848 = vmatpush3.bf16.msra.mxu1 %v18845_v27 }
 0xaec   : > { %18850 = vmatprep.subr.bf16.mxu1 %v18849_v16 }
 0xaee   : > { %16662 = vmatmul.mubr.f32.gmra.mrb[32].mxu1 %v27020_v38 }
 0xaef   : > { %16664 = vmatprep.mubr.f32.mxu1 %v27021_v44  ;;  %18852 = vmatpush3.bf16.msra.mxu1 %v18849_v16 }
 0xaf0   : > { %18854 = vmatprep.subr.bf16.mxu1 %v18853_v51 }
 0xaf2   : > { %16665 = vmatmul.mubr.f32.gmra.mrb[34].mxu1 %v27024_v48 }
 0xaf3   : > { %16667 = vmatprep.mubr.f32.mxu1 %v27025_v49  ;;  %18856 = vmatpush3.bf16.msra.mxu1 %v18853_v51 }
 0xaf4   : > { %18858 = vmatprep.subr.bf16.mxu1 %v18857_v26 }
 0xaf6   : > { %16668 = vmatmul.mubr.f32.gmra.mrb[36].mxu1 %v27028_v0 }
 0xaf7   : > { %16670 = vmatprep.mubr.f32.mxu1 %v27029_v4  ;;  %18860 = vmatpush3.bf16.msra.mxu1 %v18857_v26  ;;  %v26429_v4 = vand.u32 4294901760, %v24740_v42 }
 0xaf8   : > { %18862 = vmatprep.subr.bf16.mxu1 %v18861_v3 }
 0xafa   : > { %16671 = vmatmul.mubr.f32.gmra.mrb[38].mxu1 %v27030_v43 }
 0xafb   : > { %18864 = vmatpush3.bf16.msra.mxu1 %v18861_v3  ;;  %16705 = vmatprep.mubr.f32.mxu1 %v24192_v11 }
 0xafc   : > { %18866 = vmatprep.subr.bf16.mxu1 %v24079_v39 }
 0xafe   : > { %16706 = vmatmul.mubr.f32.vlgmr.msra.gmra.mrb[24].mxu1 %v24187_v34 }
 0xaff   : > { %16708 = vmatprep.mubr.f32.mxu1 %v24222_v19  ;;  %18868 = vmatpush3.bf16.msra.mxu1 %v24079_v39  ;;  %v9742_v39 = vld [vmem:[#allocation13 + $0x40] sm:$0xff] }
 0xb00   : > { %18870 = vmatprep.subr.bf16.mxu1 %v24085_v50 }
 0xb02   : > { %16709 = vmatmul.mubr.f32.gmra.mrb[26].mxu1 %v24212_v8 }
 0xb03   : > { %16711 = vmatprep.mubr.f32.mxu1 %v24264_v32  ;;  %18872 = vmatpush3.bf16.msra.mxu1 %v24085_v50  ;;  %v9743_v50 = vld [vmem:[#allocation13 + $0x48] sm:$0xff] }
 0xb04   : > { %18874 = vmatprep.subr.bf16.mxu1 %v24091_v62 }
 0xb06   : > { %16712 = vmatmul.mubr.f32.gmra.mrb[28].mxu1 %v24260_v55 }
 0xb07   : > { %16714 = vmatprep.mubr.f32.mxu1 %v24295_v53  ;;  %18876 = vmatpush3.bf16.msra.mxu1 %v24091_v62  ;;  %v9782_v62 = vand.u32 4294901760, %v9742_v39 }
 0xb08   : > { %18878 = vmatprep.subr.bf16.mxu1 %v26989_v28 }
 0xb09   : > { %v24698_v37 = vsub.f32 %v9742_v39, %v9782_v62 }
 0xb0a   : > { %16715 = vmatmul.mubr.f32.gmra.mrb[30].mxu1 %v24282_v22 }
 0xb0b   : > { %16717 = vmatprep.mubr.f32.mxu1 %v24324_v2  ;;  %18880 = vmatpush3.bf16.msra.mxu1 %v26989_v28  ;;  %27036 = vst [vmem:[#allocation142_spill] sm:$0xff] %v24698_v37  ;;  %v26436_v5 = vand.u32 4294901760, %v24698_v37 }
 0xb0c   : > { %18882 = vmatprep.subr.bf16.mxu1 %v26992_v21 }
 0xb0d   : > { %v10058_v36 = vsub.f32 %v24698_v37, %v26436_v5 }
 0xb0e   : > { %16718 = vmatmul.mubr.f32.gmra.mrb[32].mxu1 %v24319_v23 }
 0xb0f   : > { %16720 = vmatprep.mubr.f32.mxu1 %v24360_v10  ;;  %18884 = vmatpush3.bf16.msra.mxu1 %v26992_v21  ;;  %v10059_v12 = vand.u32 4294901760, %v10058_v36 }
 0xb10   : > { %18886 = vmatprep.subr.bf16.mxu1 %v26995_v47 }
 0xb12   : > { %16721 = vmatmul.mubr.f32.gmra.mrb[34].mxu1 %v24351_v63 }
 0xb13   : > { %16723 = vmatprep.mubr.f32.mxu1 %v24381_v14  ;;  %18888 = vmatpush3.bf16.msra.mxu1 %v26995_v47 }
 0xb14   : > { %18890 = vmatprep.subr.bf16.mxu1 %v26997_v59 }
 0xb16   : > { %16724 = vmatmul.mubr.f32.gmra.mrb[36].mxu1 %v24378_v17 }
 0xb17   : > { %16726 = vmatprep.mubr.f32.mxu1 %v24406_v6  ;;  %18892 = vmatpush3.bf16.msra.mxu1 %v26997_v59 }
 0xb18   : > { %18894 = vmatprep.subr.bf16.mxu1 %v26998_v61 }
 0xb1a   : > { %16727 = vmatmul.mubr.f32.gmra.mrb[38].mxu1 %v24403_v54 }
 0xb1b   : > { %18896 = vmatpush3.bf16.msra.mxu1 %v26998_v61  ;;  %16761 = vmatprep.mubr.f32.mxu1 %v24192_v11  ;;  %v9745_v11 = vld [vmem:[#allocation13 + $0x58] sm:$0xff] }
 0xb1e   : > { %16762 = vmatmul.mubr.f32.vlgmr.msra.gmra.mrb[24].mxu1 %v24187_v34  ;;  %v9744_v34 = vld [vmem:[#allocation13 + $0x50] sm:$0xff] }
 0xb1f   : > { %16764 = vmatprep.mubr.f32.mxu1 %v24222_v19 }
 0xb22   : > { %16765 = vmatmul.mubr.f32.gmra.mrb[26].mxu1 %v24212_v8  ;;  %v9791_v8 = vand.u32 4294901760, %v9745_v11 }
 0xb23   : > { %16767 = vmatprep.mubr.f32.mxu1 %v24264_v32 }
 0xb24   : > { %v24709_v20 = vsub.f32 %v9745_v11, %v9791_v8 }
 0xb26   : > { %16768 = vmatmul.mubr.f32.gmra.mrb[28].mxu1 %v24260_v55  ;;  %v9747_v55 = vld [vmem:[#allocation13 + $0x68] sm:$0xff]  ;;  %27039 = vst [vmem:[#allocation135_spill] sm:$0xff] %v24709_v20  ;;  %v26433_v13 = vand.u32 4294901760, %v24709_v20 }
 0xb27   : > { %16770 = vmatprep.mubr.f32.mxu1 %v24295_v53  ;;  %v9746_v53 = vld [vmem:[#allocation13 + $0x60] sm:$0xff] }
 0xb28   : > { %v9794_v21 = vand.u32 4294901760, %v9746_v53  ;;  %v10079_v7 = vsub.f32 %v24709_v20, %v26433_v13 }
 0xb2a   : > { %16771 = vmatmul.mubr.f32.gmra.mrb[30].mxu1 %v24282_v22  ;;  %v9785_v22 = vand.u32 4294901760, %v9743_v50  ;;  %v24722_v40 = vsub.f32 %v9746_v53, %v9794_v21  ;;  %v10080_v38 = vand.u32 4294901760, %v10079_v7 }
 0xb2b   : > { %16773 = vmatprep.mubr.f32.mxu1 %v24324_v2 }
 0xb2c   : > { %v24661_v32 = vpack.c.bf16 %v9785_v22, %v9782_v62  ;;  %v24700_v29 = vsub.f32 %v9743_v50, %v9785_v22  ;;  %27040 = vst [vmem:[#allocation136_spill] sm:$0xff] %v24722_v40  ;;  %v26432_v44 = vand.u32 4294901760, %v24722_v40  ;;  %v10107_v50 = vsub.f32 %v24740_v42, %v26429_v4 }
 0xb2e   : > { %16774 = vmatmul.mubr.f32.gmra.mrb[32].mxu1 %v24319_v23  ;;  %18914 = vmatprep.subr.bf16.mxu0 %v24661_v32  ;;  %v27031_v23 = vld [vmem:[#allocation137_spill] sm:$0xff]  ;;  %27037 = vst [vmem:[#allocation143_spill] sm:$0xff] %v24700_v29  ;;  %v26435_v57 = vand.u32 4294901760, %v24700_v29  ;;  %v10086_v26 = vsub.f32 %v24722_v40, %v26432_v44  ;;  %v10108_v22 = vand.u32 4294901760, %v10107_v50 }
 0xb2f   : > { %16776 = vmatprep.mubr.f32.mxu1 %v24360_v10  ;;  %v9788_v10 = vand.u32 4294901760, %v9744_v34  ;;  %18916 = vmatpush3.bf16.msra.mxu0 %v24661_v32 }
 0xb30   : > { %v10065_v27 = vsub.f32 %v24700_v29, %v26435_v57  ;;  %v10087_v33 = vand.u32 4294901760, %v10086_v26 }
 0xb31   : > { %v24665_v19 = vpack.c.bf16 %v9791_v8, %v9788_v10  ;;  %v24707_v15 = vsub.f32 %v9744_v34, %v9788_v10  ;;  %v24760_v10 = vpack.c.bf16 %v24700_v29, %v24698_v37 }
 0xb32   : > { %16777 = vmatmul.mubr.f32.gmra.mrb[34].mxu1 %v24351_v63  ;;  %v27032_v63 = vand.u32 4294901760, %v27031_v23  ;;  %v10066_v25 = vand.u32 4294901760, %v10065_v27 }
 0xb33   : > { %16779 = vmatprep.mubr.f32.mxu1 %v24381_v14  ;;  %18918 = vmatprep.subr.bf16.mxu0 %v24665_v19  ;;  %v9797_v14 = vand.u32 4294901760, %v9747_v55  ;;  %27038 = vst [vmem:[#allocation133_spill] sm:$0xff] %v24707_v15  ;;  %v26434_v46 = vand.u32 4294901760, %v24707_v15  ;;  %v24764_v8 = vpack.c.bf16 %v24709_v20, %v24707_v15 }
 0xb34   : > { %18920 = vmatpush3.bf16.msra.mxu0 %v24665_v19  ;;  %v24674_v41 = vsub.f32 %v27031_v23, %v27032_v63  ;;  %v24726_v35 = vpack.c.bf16 %v10066_v25, %v10059_v12  ;;  %v27046_v63 = vld [vmem:[#allocation126_spill] sm:$0xff] }
 0xb35   : > { %v24669_v2 = vpack.c.bf16 %v9797_v14, %v9794_v21  ;;  %v10072_v16 = vsub.f32 %v24707_v15, %v26434_v46  ;;  %v24724_v18 = vsub.f32 %v9747_v55, %v9797_v14  ;;  %v27044_v21 = vld [vmem:[#allocation116_spill] sm:$0xff] }
 0xb36   : > { %16780 = vmatmul.mubr.f32.gmra.mrb[36].mxu1 %v24378_v17  ;;  %v26447_v24 = vand.u32 4294901760, %v24674_v41  ;;  %v27045_v14 = vand.u32 4294901760, %v27044_v21 }
 0xb37   : > { %16782 = vmatprep.mubr.f32.mxu1 %v24406_v6  ;;  %v27034_v6 = vand.u32 4294901760, %v27033_v45  ;;  %18922 = vmatprep.subr.bf16.mxu0 %v24669_v2  ;;  %27041 = vst [vmem:[#allocation78_spill] sm:$0xff] %v24724_v18  ;;  %v10073_v51 = vand.u32 4294901760, %v10072_v16  ;;  %v26431_v58 = vand.u32 4294901760, %v24724_v18  ;;  %v24768_v53 = vpack.c.bf16 %v24724_v18, %v24722_v40 }
 0xb38   : > { %18924 = vmatpush3.bf16.msra.mxu0 %v24669_v2  ;;  %v10002_v59 = vsub.f32 %v24674_v41, %v26447_v24  ;;  %v24777_v23 = vsub.f32 %v27044_v21, %v27045_v14 }
 0xb39   : > { %v24679_v17 = vsub.f32 %v27033_v45, %v27034_v6  ;;  %v24730_v1 = vpack.c.bf16 %v10080_v38, %v10073_v51  ;;  %v10093_v48 = vsub.f32 %v24724_v18, %v26431_v58  ;;  %v27047_v45 = vand.u32 4294901760, %v27046_v63 }
 0xb3a   : > { %16783 = vmatmul.mubr.f32.gmra.mrb[38].mxu1 %v24403_v54  ;;  %v9800_v54 = vand.u32 4294901760, %v9748_v60  ;;  %v10003_v28 = vand.u32 4294901760, %v10002_v59 }
 0xb3b   : > { %27035 = vst [vmem:[#allocation141_spill] sm:$0xff] %v24679_v17  ;;  %v26445_v30 = vand.u32 4294901760, %v24679_v17  ;;  %v10094_v3 = vand.u32 4294901760, %v10093_v48  ;;  %v24756_v11 = vpack.c.bf16 %v24679_v17, %v24674_v41  ;;  %v24782_v6 = vsub.f32 %v27046_v63, %v27047_v45 }
 0xb3c   : > { %v24685_v52 = vpack.c.bf16 %v9803_v31, %v9800_v54  ;;  %v24738_v49 = vsub.f32 %v9748_v60, %v9800_v54  ;;  %v27048_v60 = vld [vmem:[#allocation138_spill] sm:$0xff]  ;;  %v27050_v31 = vld [vmem:[#allocation120_spill] sm:$0xff] }
 0xb3d   : > { %v10009_v47 = vsub.f32 %v24679_v17, %v26445_v30  ;;  %v24744_v43 = vpack.c.bf16 %v10094_v3, %v10087_v33  ;;  %v27049_v56 = vand.u32 4294901760, %v27048_v60  ;;  %v27051_v59 = vand.u32 4294901760, %v27050_v31 }
 0xb3e   : > { %18926 = vmatprep.subr.bf16.mxu0 %v24685_v52  ;;  %27042 = vst [vmem:[#allocation130_spill] sm:$0xff] %v24738_v49  ;;  %v26430_v0 = vand.u32 4294901760, %v24738_v49  ;;  %v24772_v55 = vpack.c.bf16 %v24740_v42, %v24738_v49  ;;  %v26441_v36 = vand.u32 4294901760, %v24782_v6 }
 0xb3f   : > { %v10010_v61 = vand.u32 4294901760, %v10009_v47  ;;  %18928 = vmatpush3.bf16.msra.mxu0 %v24685_v52  ;;  %v24787_v54 = vsub.f32 %v27048_v60, %v27049_v56  ;;  %v24792_v47 = vsub.f32 %v27050_v31, %v27051_v59  ;;  %v27054_v60 = vld [vmem:[#allocation128_spill] sm:$0xff] }
 0xb40   : > { %v10100_v39 = vsub.f32 %v24738_v49, %v26430_v0  ;;  %v10023_v26 = vsub.f32 %v24782_v6, %v26441_v36  ;;  %v27055_v56 = vand.u32 4294901760, %v27054_v60 }
 0xb41   : > { %v24695_v9 = vpack.c.bf16 %v10010_v61, %v10003_v28  ;;  %v24797_v28 = vld [vmem:[%s26058_s14] ss:$0 sm:$0xff]  ;;  %v26442_v61 = vand.u32 4294901760, %v24777_v23  ;;  %v26438_v27 = vand.u32 4294901760, %v24787_v54  ;;  %v26437_v12 = vand.u32 4294901760, %v24792_v47 }
 0xb42   : > { %v10101_v62 = vand.u32 4294901760, %v10100_v39  ;;  %v24828_v31 = vsub.f32 %v27054_v60, %v27055_v56 }
 0xb43   : > { %18930 = vmatprep.subr.bf16.mxu0 %v24695_v9  ;;  %v10016_v38 = vsub.f32 %v24777_v23, %v26442_v61  ;;  %v10030_v33 = vsub.f32 %v24787_v54, %v26438_v27  ;;  %v10037_v3 = vsub.f32 %v24792_v47, %v26437_v12 }
 0xb44   : > { %v24752_v34 = vpack.c.bf16 %v10108_v22, %v10101_v62  ;;  %v27052_v62 = vld [vmem:[#allocation140_spill] sm:$0xff] }
 0xb45   : > { %v27053_v22 = vand.u32 4294901760, %v27052_v62  ;;  %v10038_v4 = vand.u32 4294901760, %v10037_v3 }
 0xb47   : > { %v24820_v21 = vsub.f32 %v27052_v62, %v27053_v22  ;;  %v10031_v22 = vand.u32 4294901760, %v10030_v33 }
 0xb49   : > { %v26440_v60 = vand.u32 4294901760, %v24820_v21  ;;  %v24855_v46 = vpack.c.bf16 %v10038_v4, %v10031_v22 }
 0xbf1   : > { %v16763_v25 = vpop.f32.mrb[24].mxu1 }
 0xbf2   : > { %v9703_v16 = vadd.f32 %v16763_v25, %v24797_v28  ;;  %v9601_v7 = vpop.f32.mrb[25].mxu1 }
 0xbf3   : > { %v9702_v51 = vadd.f32 %v24797_v28, %v9601_v7  ;;  %v10024_v7 = vand.u32 4294901760, %v10023_v26 }
 0xbf4   : > { %v9719_v48 = vmax.f32 %v9703_v16, 0.0  ;;  %v10017_v16 = vand.u32 4294901760, %v10016_v38 }
 0xbf5   : > { %v9718_v39 = vmax.f32 %v9702_v51, 0.0  ;;  %v16766_v50 = vpop.f32.mrb[26].mxu1 }
 0xbf6   : > { %v24822_v14 = vand.u32 4294901760, %v9719_v48  ;;  %v9705_v63 = vadd.f32 %v16766_v50, %v24797_v28  ;;  %v9613_v45 = vpop.f32.mrb[27].mxu1 }
 0xbf7   : > { %v24830_v59 = vand.u32 4294901760, %v9718_v39  ;;  %v9704_v25 = vadd.f32 %v24797_v28, %v9613_v45 }
 0xbf8   : > { %v24834_v51 = vsub.f32 %v9719_v48, %v24822_v14  ;;  %v9721_v62 = vmax.f32 %v9705_v63, 0.0  ;;  %v26443_v48 = vand.u32 4294901760, %v24828_v31 }
 0xbf9   : > { %v24837_v50 = vsub.f32 %v9718_v39, %v24830_v59  ;;  %v9720_v0 = vmax.f32 %v9704_v25, 0.0  ;;  %v16769_v58 = vpop.f32.mrb[28].mxu1  ;;  %v18933_v39 = vpack.c.bf16 %v10024_v7, %v10017_v16  ;;  %v10044_v16 = vsub.f32 %v24820_v21, %v26440_v60 }
 0xbfa   : > { %v26439_v56 = vand.u32 4294901760, %v24834_v51  ;;  %v24841_v44 = vand.u32 4294901760, %v9721_v62  ;;  %v9707_v38 = vadd.f32 %v16769_v58, %v24797_v28  ;;  %v9625_v26 = vpop.f32.mrb[29].mxu1 }
 0xbfb   : > { %v24845_v45 = vand.u32 4294901760, %v9720_v0  ;;  %v9706_v33 = vadd.f32 %v24797_v28, %v9625_v26  ;;  %v26444_v3 = vand.u32 4294901760, %v24837_v50 }
 0xbfc   : > { %v9851_v63 = vsub.f32 %v24834_v51, %v26439_v56  ;;  %v24853_v25 = vsub.f32 %v9721_v62, %v24841_v44  ;;  %v9723_v13 = vmax.f32 %v9707_v38, 0.0 }
 0xbfd   : > { %v24858_v58 = vsub.f32 %v9720_v0, %v24845_v45  ;;  %v9722_v57 = vmax.f32 %v9706_v33, 0.0  ;;  %v16772_v5 = vpop.f32.mrb[30].mxu1  ;;  %v9841_v26 = vsub.f32 %v24837_v50, %v26444_v3  ;;  %v10051_v0 = vsub.f32 %v24828_v31, %v26443_v48 }
 0xbfe   : > { %v24866_v7 = vand.u32 4294901760, %v9723_v13  ;;  %v9709_v62 = vadd.f32 %v16772_v5, %v24797_v28  ;;  %v9637_v38 = vpop.f32.mrb[31].mxu1  ;;  %v26446_v4 = vand.u32 4294901760, %v24853_v25  ;;  %v9852_v56 = vand.u32 4294901760, %v9851_v63 }
 0xbff   : > { %v24873_v22 = vand.u32 4294901760, %v9722_v57  ;;  %v9708_v33 = vadd.f32 %v24797_v28, %v9637_v38  ;;  %v9842_v12 = vand.u32 4294901760, %v9841_v26  ;;  %v26448_v27 = vand.u32 4294901760, %v24858_v58 }
 0xc00   : > { %v24878_v60 = vsub.f32 %v9723_v13, %v24866_v7  ;;  %v9725_v36 = vmax.f32 %v9709_v62, 0.0  ;;  %v9871_v5 = vsub.f32 %v24853_v25, %v26446_v4  ;;  %v10045_v38 = vand.u32 4294901760, %v10044_v16 }
 0xc01   : > { %v24884_v61 = vsub.f32 %v9722_v57, %v24873_v22  ;;  %v9724_v48 = vmax.f32 %v9708_v33, 0.0  ;;  %v16775_v3 = vpop.f32.mrb[32].mxu1  ;;  %16817 = vmatprep.mubr.f32.mxu0 %v9842_v12  ;;  %v9861_v26 = vsub.f32 %v24858_v58, %v26448_v27  ;;  %v10052_v4 = vand.u32 4294901760, %v10051_v0 }
 0xc02   : > { %v24889_v63 = vand.u32 4294901760, %v9725_v36  ;;  %v9711_v13 = vadd.f32 %v16775_v3, %v24797_v28  ;;  %v9649_v62 = vpop.f32.mrb[33].mxu1  ;;  %16818 = vmatmul.mubr.f32.vlgmr.msra.gmra.mrb[24].mxu0 %v9852_v56  ;;  %v26451_v30 = vand.u32 4294901760, %v24878_v60  ;;  %v9872_v42 = vand.u32 4294901760, %v9871_v5 }
 0xc03   : > { %v24893_v24 = vand.u32 4294901760, %v9724_v48  ;;  %v9710_v57 = vadd.f32 %v24797_v28, %v9649_v62  ;;  %18932 = vmatpush3.bf16.msra.mxu0 %v24695_v9  ;;  %v9862_v12 = vand.u32 4294901760, %v9861_v26  ;;  %v26453_v33 = vand.u32 4294901760, %v24884_v61 }
 0xc04   : > { %v24899_v16 = vsub.f32 %v9725_v36, %v24889_v63  ;;  %v9727_v27 = vmax.f32 %v9711_v13, 0.0  ;;  %18934 = vmatprep.subr.bf16.mxu0 %v18933_v39  ;;  %v9891_v56 = vsub.f32 %v24878_v60, %v26451_v30  ;;  %v18941_v49 = vpack.c.bf16 %v10052_v4, %v10045_v38 }
 0xc05   : > { %v24905_v3 = vsub.f32 %v9724_v48, %v24893_v24  ;;  %v9726_v0 = vmax.f32 %v9710_v57, 0.0  ;;  %v16778_v62 = vpop.f32.mrb[34].mxu1  ;;  %16820 = vmatprep.mubr.f32.mxu0 %v9862_v12  ;;  %v9881_v9 = vsub.f32 %v24884_v61, %v26453_v33 }
 0xc06   : > { %v24910_v26 = vand.u32 4294901760, %v9727_v27  ;;  %v9713_v36 = vadd.f32 %v16778_v62, %v24797_v28  ;;  %v9661_v5 = vpop.f32.mrb[35].mxu1  ;;  %16821 = vmatmul.mubr.f32.gmra.mrb[26].mxu0 %v9872_v42  ;;  %v26455_v13 = vand.u32 4294901760, %v24899_v16  ;;  %v9892_v40 = vand.u32 4294901760, %v9891_v56 }
 0xc07   : > { %v24914_v30 = vand.u32 4294901760, %v9726_v0  ;;  %v9712_v48 = vadd.f32 %v24797_v28, %v9661_v5  ;;  %18936 = vmatpush3.bf16.msra.mxu0 %v18933_v39  ;;  %v9882_v57 = vand.u32 4294901760, %v9881_v9  ;;  %v26456_v12 = vand.u32 4294901760, %v24905_v3 }
 0xc08   : > { %v24919_v18 = vsub.f32 %v9727_v27, %v24910_v26  ;;  %v9729_v33 = vmax.f32 %v9713_v36, 0.0  ;;  %18938 = vmatprep.subr.bf16.mxu0 %v24855_v46  ;;  %v9911_v42 = vsub.f32 %v24899_v16, %v26455_v13 }
 0xc09   : > { %v24926_v4 = vsub.f32 %v9726_v0, %v24914_v30  ;;  %v9728_v38 = vmax.f32 %v9712_v48, 0.0  ;;  %v16781_v62 = vpop.f32.mrb[36].mxu1  ;;  %16823 = vmatprep.mubr.f32.mxu0 %v9882_v57  ;;  %v9901_v39 = vsub.f32 %v24905_v3, %v26456_v12 }
 0xc0a   : > { %v24931_v27 = vand.u32 4294901760, %v9729_v33  ;;  %v9715_v56 = vadd.f32 %v16781_v62, %v24797_v28  ;;  %v9673_v9 = vpop.f32.mrb[37].mxu1  ;;  %16824 = vmatmul.mubr.f32.gmra.mrb[28].mxu0 %v9892_v40  ;;  %v26460_v36 = vand.u32 4294901760, %v24919_v18  ;;  %v9912_v20 = vand.u32 4294901760, %v9911_v42 }
 0xc0b   : > { %v24935_v5 = vand.u32 4294901760, %v9728_v38  ;;  %v9714_v0 = vadd.f32 %v24797_v28, %v9673_v9  ;;  %18940 = vmatpush3.bf16.msra.mxu0 %v24855_v46  ;;  %v9902_v48 = vand.u32 4294901760, %v9901_v39  ;;  %v26461_v57 = vand.u32 4294901760, %v24926_v4 }
 0xc0c   : > { %v24941_v13 = vsub.f32 %v9729_v33, %v24931_v27  ;;  %v9731_v12 = vmax.f32 %v9715_v56, 0.0  ;;  %18942 = vmatprep.subr.bf16.mxu0 %v18941_v49  ;;  %v9931_v40 = vsub.f32 %v24919_v18, %v26460_v36 }
 0xc0d   : > { %v24947_v62 = vsub.f32 %v9728_v38, %v24935_v5  ;;  %v9730_v15 = vmax.f32 %v9714_v0, 0.0  ;;  %v16784_v9 = vpop.f32.mrb[38].mxu1  ;;  %16826 = vmatprep.mubr.f32.mxu0 %v9902_v48  ;;  %v9921_v46 = vsub.f32 %v24926_v4, %v26461_v57 }
 0xc0e   : > { %v24952_v39 = vand.u32 4294901760, %v9731_v12  ;;  %v9717_v33 = vadd.f32 %v16784_v9, %v24797_v28  ;;  %v9685_v42 = vpop.f32.mrb[39].mxu1  ;;  %16827 = vmatmul.mubr.f32.gmra.mrb[30].mxu0 %v9912_v20  ;;  %v26476_v56 = vand.u32 4294901760, %v24941_v13  ;;  %v9932_v37 = vand.u32 4294901760, %v9931_v40 }
 0xc0f   : > { %v24956_v29 = vand.u32 4294901760, %v9730_v15  ;;  %v9716_v38 = vadd.f32 %v24797_v28, %v9685_v42  ;;  %18944 = vmatpush3.bf16.msra.mxu0 %v18941_v49  ;;  %v9922_v0 = vand.u32 4294901760, %v9921_v46  ;;  %v26477_v48 = vand.u32 4294901760, %v24947_v62 }
 0xc10   : > { %v24961_v36 = vsub.f32 %v9731_v12, %v24952_v39  ;;  %v9733_v57 = vmax.f32 %v9717_v33, 0.0  ;;  %18946 = vmatprep.subr.bf16.mxu0 %v24726_v35  ;;  %v9951_v20 = vsub.f32 %v24941_v13, %v26476_v56 }
 0xc11   : > { %v24968_v9 = vsub.f32 %v9730_v15, %v24956_v29  ;;  %v9732_v17 = vmax.f32 %v9716_v38, 0.0  ;;  %16829 = vmatprep.mubr.f32.mxu0 %v9922_v0  ;;  %v9941_v49 = vsub.f32 %v24947_v62, %v26477_v48  ;;  %v27067_v48 = vand.u32 4294901760, %v24837_v50 }
 0xc12   : > { %v24973_v28 = vand.u32 4294901760, %v9733_v57  ;;  %16830 = vmatmul.mubr.f32.gmra.mrb[32].mxu0 %v9932_v37  ;;  %v26470_v12 = vand.u32 4294901760, %v24961_v36  ;;  %v9952_v42 = vand.u32 4294901760, %v9951_v20 }
 0xc13   : > { %v24976_v40 = vand.u32 4294901760, %v9732_v17  ;;  %18948 = vmatpush3.bf16.msra.mxu0 %v24726_v35  ;;  %v9942_v46 = vand.u32 4294901760, %v9941_v49  ;;  %v26471_v33 = vand.u32 4294901760, %v24968_v9 }
 0xc14   : > { %v24981_v15 = vsub.f32 %v9733_v57, %v24973_v28  ;;  %18950 = vmatprep.subr.bf16.mxu0 %v24730_v1  ;;  %v9971_v38 = vsub.f32 %v24961_v36, %v26470_v12 }
 0xc15   : > { %v24988_v37 = vsub.f32 %v9732_v17, %v24976_v40  ;;  %16832 = vmatprep.mubr.f32.mxu0 %v9942_v46  ;;  %v9961_v35 = vsub.f32 %v24968_v9, %v26471_v33  ;;  %v27063_v33 = vld [vmem:[#allocation132_spill] sm:$0xff] }
 0xc16   : > { %16833 = vmatmul.mubr.f32.gmra.mrb[34].mxu0 %v9952_v42  ;;  %v26464_v0 = vand.u32 4294901760, %v24981_v15  ;;  %v9972_v49 = vand.u32 4294901760, %v9971_v38  ;;  %v18965_v38 = vpack.c.bf16 %v24782_v6, %v24777_v23 }
 0xc17   : > { %18952 = vmatpush3.bf16.msra.mxu0 %v24730_v1  ;;  %v9962_v57 = vand.u32 4294901760, %v9961_v35  ;;  %v26469_v20 = vand.u32 4294901760, %v24988_v37  ;;  %v25041_v35 = vld [vmem:[#allocation14 + $0x10] sm:$0xff] }
 0xc18   : > { %18954 = vmatprep.subr.bf16.mxu0 %v24744_v43  ;;  %v9991_v17 = vsub.f32 %v24981_v15, %v26464_v0 }
 0xc19   : > { %16835 = vmatprep.mubr.f32.mxu0 %v9962_v57  ;;  %v9981_v46 = vsub.f32 %v24988_v37, %v26469_v20 }
 0xc1a   : > { %16836 = vmatmul.mubr.f32.gmra.mrb[36].mxu0 %v9972_v49  ;;  %v9992_v1 = vand.u32 4294901760, %v9991_v17  ;;  %v25047_v49 = vld [vmem:[#allocation14 + $0x18] sm:$0xff]  ;;  %v26468_v17 = vand.u32 4294901760, %v25041_v35 }
 0xc1b   : > { %18956 = vmatpush3.bf16.msra.mxu0 %v24744_v43  ;;  %v9982_v42 = vand.u32 4294901760, %v9981_v46  ;;  %v18969_v43 = vpack.c.bf16 %v24792_v47, %v24787_v54  ;;  %v26467_v46 = vand.u32 4294901760, %v25047_v49 }
 0xc1c   : > { %18958 = vmatprep.subr.bf16.mxu0 %v24752_v34 }
 0xc1d   : > { %16838 = vmatprep.mubr.f32.mxu0 %v9982_v42  ;;  %v25052_v42 = vld [vmem:[#allocation14 + $0x20] sm:$0xff] }
 0xc1e   : > { %16839 = vmatmul.mubr.f32.gmra.mrb[38].mxu0 %v9992_v1  ;;  %27057 = vst [vmem:[#allocation52_spill] sm:$0xff] %v25052_v42  ;;  %v25054_v1 = vld [vmem:[#allocation14 + $0x28] sm:$0xff] }
 0xc1f   : > { %18960 = vmatpush3.bf16.msra.mxu0 %v24752_v34  ;;  %16873 = vmatprep.mubr.f32.mxu0 %v24830_v59  ;;  %v18973_v34 = vpack.c.bf16 %v24828_v31, %v24820_v21  ;;  %27058 = vst [vmem:[#allocation33_spill] sm:$0xff] %v25054_v1  ;;  %v26472_v0 = vand.u32 4294901760, %v25054_v1 }
 0xc20   : > { %18962 = vmatprep.subr.bf16.mxu0 %v24756_v11 }
 0xc22   : > { %16874 = vmatmul.mubr.f32.vlgmr.msra.gmra.mrb[24].mxu0 %v24822_v14 }
 0xc23   : > { %16876 = vmatprep.mubr.f32.mxu0 %v24845_v45  ;;  %18964 = vmatpush3.bf16.msra.mxu0 %v24756_v11  ;;  %v25037_v11 = vld [vmem:[#allocation14] sm:$0xff] }
 0xc24   : > { %18966 = vmatprep.subr.bf16.mxu0 %v18965_v38 }
 0xc26   : > { %16877 = vmatmul.mubr.f32.gmra.mrb[26].mxu0 %v24841_v44 }
 0xc27   : > { %16879 = vmatprep.mubr.f32.mxu0 %v24873_v22  ;;  %18968 = vmatpush3.bf16.msra.mxu0 %v18965_v38  ;;  %v27059_v38 = vld [vmem:[#allocation139_spill] sm:$0xff] }
 0xc28   : > { %18970 = vmatprep.subr.bf16.mxu0 %v18969_v43 }
 0xc2a   : > { %16880 = vmatmul.mubr.f32.gmra.mrb[28].mxu0 %v24866_v7 }
 0xc2b   : > { %16882 = vmatprep.mubr.f32.mxu0 %v24893_v24  ;;  %18972 = vmatpush3.bf16.msra.mxu0 %v18969_v43  ;;  %v25070_v43 = vpack.c.bf16 %v26467_v46, %v26468_v17  ;;  %v27062_v46 = vld [vmem:[#allocation129_spill] sm:$0xff] }
 0xc2c   : > { %18974 = vmatprep.subr.bf16.mxu0 %v18973_v34 }
 0xc2e   : > { %16883 = vmatmul.mubr.f32.gmra.mrb[30].mxu0 %v24889_v63 }
 0xc2f   : > { %16885 = vmatprep.mubr.f32.mxu0 %v24914_v30  ;;  %18976 = vmatpush3.bf16.msra.mxu0 %v18973_v34  ;;  %v26475_v34 = vand.u32 4294901760, %v25052_v42  ;;  %v27070_v42 = vand.u32 4294901760, %v24834_v51 }
 0xc30   : > { %18978 = vmatprep.subr.bf16.mxu0 %v24760_v10 }
 0xc31   : > { %v25089_v17 = vpack.c.bf16 %v26472_v0, %v26475_v34 }
 0xc32   : > { %16886 = vmatmul.mubr.f32.gmra.mrb[32].mxu0 %v24910_v26 }
 0xc33   : > { %16888 = vmatprep.mubr.f32.mxu0 %v24935_v5  ;;  %18980 = vmatpush3.bf16.msra.mxu0 %v24760_v10  ;;  %v25039_v10 = vld [vmem:[#allocation14 + $0x8] sm:$0xff] }
 0xc34   : > { %18982 = vmatprep.subr.bf16.mxu0 %v24764_v8  ;;  %v26465_v57 = vand.u32 4294901760, %v25039_v10 }
 0xc36   : > { %16889 = vmatmul.mubr.f32.gmra.mrb[34].mxu0 %v24931_v27 }
 0xc37   : > { %16891 = vmatprep.mubr.f32.mxu0 %v24956_v29  ;;  %18984 = vmatpush3.bf16.msra.mxu0 %v24764_v8  ;;  %v26466_v8 = vand.u32 4294901760, %v25037_v11 }
 0xc38   : > { %18986 = vmatprep.subr.bf16.mxu0 %v24768_v53 }
 0xc3a   : > { %16892 = vmatmul.mubr.f32.gmra.mrb[36].mxu0 %v24952_v39 }
 0xc3b   : > { %16894 = vmatprep.mubr.f32.mxu0 %v24976_v40  ;;  %18988 = vmatpush3.bf16.msra.mxu0 %v24768_v53  ;;  %v27056_v53 = vld [vmem:[#allocation127_spill] sm:$0xff] }
 0xc3c   : > { %18990 = vmatprep.subr.bf16.mxu0 %v24772_v55 }
 0xc3e   : > { %16895 = vmatmul.mubr.f32.gmra.mrb[38].mxu0 %v24973_v28 }
 0xc3f   : > { %18992 = vmatpush3.bf16.msra.mxu0 %v24772_v55  ;;  %16929 = vmatprep.mubr.f32.mxu0 %v24837_v50  ;;  %v25061_v55 = vpack.c.bf16 %v26465_v57, %v26466_v8  ;;  %v25075_v57 = vld [vmem:[#allocation14 + $0x30] sm:$0xff]  ;;  %v25077_v8 = vld [vmem:[#allocation14 + $0x38] sm:$0xff] }
 0xc40   : > { %18994 = vmatprep.subr.bf16.mxu0 %v27056_v53  ;;  %27060 = vst [vmem:[#allocation34_spill] sm:$0xff] %v25075_v57  ;;  %27061 = vst [vmem:[#allocation35_spill] sm:$0xff] %v25077_v8  ;;  %v26474_v20 = vand.u32 4294901760, %v25075_v57  ;;  %v26473_v12 = vand.u32 4294901760, %v25077_v8  ;;  %v27068_v8 = vand.u32 4294901760, %v24777_v23  ;;  %v27069_v57 = vand.u32 4294901760, %v24782_v6 }
 0xc41   : > { %19281 = vmatprep.subr.bf16.mxu1 %v25061_v55  ;;  %v27075_v23 = vand.u32 4294901760, %v24884_v61  ;;  %v27076_v6 = vand.u32 4294901760, %v24820_v21  ;;  %v27085_v21 = vand.u32 4294901760, %v24926_v4 }
 0xc42   : > { %16930 = vmatmul.mubr.f32.vlgmr.msra.gmra.mrb[24].mxu0 %v24834_v51  ;;  %19289 = vmatpush3.bf16.msra.mxu1 %v25061_v55  ;;  %v25103_v0 = vpack.c.bf16 %v26473_v12, %v26474_v20  ;;  %v27064_v12 = vand.u32 4294901760, %v24674_v41  ;;  %v27065_v20 = vld [vmem:[#allocation141_spill] sm:$0xff]  ;;  %v19029_v1 = vpack.c.bf16 %v27069_v57, %v27068_v8  ;;  %v27071_v41 = vand.u32 4294901760, %v24858_v58  ;;  %v27082_v8 = vld [vmem:[#allocation143_spill] sm:$0xff] }
 0xc43   : > { %16932 = vmatprep.mubr.f32.mxu0 %v24858_v58  ;;  %18996 = vmatpush3.bf16.msra.mxu0 %v27056_v53  ;;  %v27066_v34 = vand.u32 4294901760, %v27065_v20  ;;  %v27073_v20 = vand.u32 4294901760, %v24792_v47  ;;  %v27077_v51 = vand.u32 4294901760, %v24828_v31  ;;  %v27080_v47 = vld [vmem:[#allocation142_spill] sm:$0xff]  ;;  %v27086_v31 = vld [vmem:[#allocation133_spill] sm:$0xff] }
 0xc44   : > { %18998 = vmatprep.subr.bf16.mxu0 %v27059_v38  ;;  %19282 = vmatprep.subr.bf16.mxu1 %v25070_v43 }
 0xc45   : > { %v19025_v56 = vpack.c.bf16 %v27066_v34, %v27064_v12  ;;  %v27072_v12 = vand.u32 4294901760, %v24787_v54  ;;  %v19037_v58 = vpack.c.bf16 %v27077_v51, %v27076_v6  ;;  %v27079_v54 = vand.u32 4294901760, %v24905_v3 }
 0xc46   : > { %16933 = vmatmul.mubr.f32.gmra.mrb[26].mxu0 %v24853_v25  ;;  %19290 = vmatpush3.bf16.msra.mxu1 %v25070_v43  ;;  %v27097_v6 = vand.u32 4294901760, %v24968_v9 }
 0xc47   : > { %16935 = vmatprep.mubr.f32.mxu0 %v24884_v61  ;;  %19000 = vmatpush3.bf16.msra.mxu0 %v27059_v38  ;;  %v19033_v50 = vpack.c.bf16 %v27073_v20, %v27072_v12  ;;  %v27083_v61 = vand.u32 4294901760, %v27082_v8  ;;  %v27091_v12 = vand.u32 4294901760, %v24947_v62 }
 0xc48   : > { %19002 = vmatprep.subr.bf16.mxu0 %v27062_v46  ;;  %19283 = vmatprep.subr.bf16.mxu1 %v25089_v17 }
 0xc4a   : > { %16936 = vmatmul.mubr.f32.gmra.mrb[28].mxu0 %v24878_v60  ;;  %19291 = vmatpush3.bf16.msra.mxu1 %v25089_v17 }
 0xc4b   : > { %16938 = vmatprep.mubr.f32.mxu0 %v24905_v3  ;;  %19004 = vmatpush3.bf16.msra.mxu0 %v27062_v46 }
 0xc4c   : > { %19006 = vmatprep.subr.bf16.mxu0 %v27063_v33  ;;  %19284 = vmatprep.subr.bf16.mxu1 %v25103_v0 }
 0xc4e   : > { %16939 = vmatmul.mubr.f32.gmra.mrb[30].mxu0 %v24899_v16  ;;  %19292 = vmatpush3.bf16.msra.mxu1 %v25103_v0 }
 0xc4f   : > { %16941 = vmatprep.mubr.f32.mxu0 %v24926_v4  ;;  %19008 = vmatpush3.bf16.msra.mxu0 %v27063_v33 }
 0xc50   : > { %19010 = vmatprep.subr.bf16.mxu0 %v24661_v32 }
 0xc52   : > { %16942 = vmatmul.mubr.f32.gmra.mrb[32].mxu0 %v24919_v18 }
 0xc53   : > { %16944 = vmatprep.mubr.f32.mxu0 %v24947_v62  ;;  %19012 = vmatpush3.bf16.msra.mxu0 %v24661_v32 }
 0xc54   : > { %19014 = vmatprep.subr.bf16.mxu0 %v24665_v19 }
 0xc56   : > { %16945 = vmatmul.mubr.f32.gmra.mrb[34].mxu0 %v24941_v13 }
 0xc57   : > { %16947 = vmatprep.mubr.f32.mxu0 %v24968_v9  ;;  %19016 = vmatpush3.bf16.msra.mxu0 %v24665_v19  ;;  %v11073_v9 = vld [vmem:[#allocation14 + $0x70] sm:$0xff] }
 0xc58   : > { %19018 = vmatprep.subr.bf16.mxu0 %v24669_v2 }
 0xc5a   : > { %16948 = vmatmul.mubr.f32.gmra.mrb[36].mxu0 %v24961_v36 }
 0xc5b   : > { %16950 = vmatprep.mubr.f32.mxu0 %v24988_v37  ;;  %19020 = vmatpush3.bf16.msra.mxu0 %v24669_v2 }
 0xc5c   : > { %19022 = vmatprep.subr.bf16.mxu0 %v24685_v52 }
 0xc5e   : > { %16951 = vmatmul.mubr.f32.gmra.mrb[38].mxu0 %v24981_v15 }
 0xc5f   : > { %19024 = vmatpush3.bf16.msra.mxu0 %v24685_v52  ;;  %16985 = vmatprep.mubr.f32.mxu0 %v27067_v48  ;;  %v27074_v48 = vand.u32 4294901760, %v24853_v25  ;;  %v27081_v25 = vand.u32 4294901760, %v27080_v47  ;;  %v27103_v47 = vand.u32 4294901760, %v24988_v37 }
 0xc60   : > { %19026 = vmatprep.subr.bf16.mxu0 %v19025_v56 }
 0xc61   : > { %v19041_v57 = vpack.c.bf16 %v27083_v61, %v27081_v25 }
 0xc62   : > { %16986 = vmatmul.mubr.f32.vlgmr.msra.gmra.mrb[24].mxu0 %v27070_v42  ;;  %v27084_v42 = vand.u32 4294901760, %v24899_v16  ;;  %v27092_v16 = vld [vmem:[#allocation136_spill] sm:$0xff] }
 0xc63   : > { %16988 = vmatprep.mubr.f32.mxu0 %v27071_v41  ;;  %19028 = vmatpush3.bf16.msra.mxu0 %v19025_v56  ;;  %v27078_v56 = vand.u32 4294901760, %v24878_v60  ;;  %v27087_v60 = vand.u32 4294901760, %v27086_v31  ;;  %v27090_v41 = vand.u32 4294901760, %v24919_v18  ;;  %v27093_v20 = vand.u32 4294901760, %v27092_v16  ;;  %v27098_v18 = vld [vmem:[#allocation130_spill] sm:$0xff] }
 0xc64   : > { %19030 = vmatprep.subr.bf16.mxu0 %v19029_v1  ;;  %v27099_v51 = vand.u32 4294901760, %v27098_v18 }
 0xc66   : > { %16989 = vmatmul.mubr.f32.gmra.mrb[26].mxu0 %v27074_v48 }
 0xc67   : > { %16991 = vmatprep.mubr.f32.mxu0 %v27075_v23  ;;  %19032 = vmatpush3.bf16.msra.mxu0 %v19029_v1  ;;  %v27088_v1 = vld [vmem:[#allocation135_spill] sm:$0xff]  ;;  %v27096_v23 = vand.u32 4294901760, %v24941_v13  ;;  %v27104_v13 = vand.u32 4294901760, %v24981_v15 }
 0xc68   : > { %19034 = vmatprep.subr.bf16.mxu0 %v19033_v50  ;;  %v27089_v3 = vand.u32 4294901760, %v27088_v1 }
 0xc6a   : > { %16992 = vmatmul.mubr.f32.gmra.mrb[28].mxu0 %v27078_v56  ;;  %v19045_v34 = vpack.c.bf16 %v27089_v3, %v27087_v60 }
 0xc6b   : > { %16994 = vmatprep.mubr.f32.mxu0 %v27079_v54  ;;  %19036 = vmatpush3.bf16.msra.mxu0 %v19033_v50  ;;  %v27094_v50 = vld [vmem:[#allocation78_spill] sm:$0xff]  ;;  %v27102_v54 = vand.u32 4294901760, %v24961_v36 }
 0xc6c   : > { %19038 = vmatprep.subr.bf16.mxu0 %v19037_v58  ;;  %v27095_v4 = vand.u32 4294901760, %v27094_v50 }
 0xc6e   : > { %16995 = vmatmul.mubr.f32.gmra.mrb[30].mxu0 %v27084_v42  ;;  %v19049_v48 = vpack.c.bf16 %v27095_v4, %v27093_v20 }
 0xc6f   : > { %16997 = vmatprep.mubr.f32.mxu0 %v27085_v21  ;;  %19040 = vmatpush3.bf16.msra.mxu0 %v19037_v58  ;;  %v27100_v58 = vld [vmem:[#allocation123_spill] sm:$0xff] }
 0xc70   : > { %19042 = vmatprep.subr.bf16.mxu0 %v19041_v57  ;;  %v27101_v62 = vand.u32 4294901760, %v27100_v58 }
 0xc72   : > { %16998 = vmatmul.mubr.f32.gmra.mrb[32].mxu0 %v27090_v41  ;;  %v19053_v56 = vpack.c.bf16 %v27101_v62, %v27099_v51 }
 0xc73   : > { %17000 = vmatprep.mubr.f32.mxu0 %v27091_v12  ;;  %19044 = vmatpush3.bf16.msra.mxu0 %v19041_v57 }
 0xc74   : > { %19046 = vmatprep.subr.bf16.mxu0 %v19045_v34 }
 0xc76   : > { %17001 = vmatmul.mubr.f32.gmra.mrb[34].mxu0 %v27096_v23 }
 0xc77   : > { %17003 = vmatprep.mubr.f32.mxu0 %v27097_v6  ;;  %19048 = vmatpush3.bf16.msra.mxu0 %v19045_v34 }
 0xc78   : > { %19050 = vmatprep.subr.bf16.mxu0 %v19049_v48 }
 0xc7a   : > { %17004 = vmatmul.mubr.f32.gmra.mrb[36].mxu0 %v27102_v54 }
 0xc7b   : > { %17006 = vmatprep.mubr.f32.mxu0 %v27103_v47  ;;  %19052 = vmatpush3.bf16.msra.mxu0 %v19049_v48 }
 0xc7c   : > { %19054 = vmatprep.subr.bf16.mxu0 %v19053_v56 }
 0xc7e   : > { %17007 = vmatmul.mubr.f32.gmra.mrb[38].mxu0 %v27104_v13 }
 0xc7f   : > { %19056 = vmatpush3.bf16.msra.mxu0 %v19053_v56  ;;  %17041 = vmatprep.mubr.f32.mxu0 %v24830_v59 }
 0xc80   : > { %19058 = vmatprep.subr.bf16.mxu0 %v27056_v53 }
 0xc82   : > { %17042 = vmatmul.mubr.f32.vlgmr.msra.gmra.mrb[24].mxu0 %v24822_v14 }
 0xc83   : > { %17044 = vmatprep.mubr.f32.mxu0 %v24845_v45  ;;  %19060 = vmatpush3.bf16.msra.mxu0 %v27056_v53 }
 0xc84   : > { %19062 = vmatprep.subr.bf16.mxu0 %v27059_v38 }
 0xc86   : > { %17045 = vmatmul.mubr.f32.gmra.mrb[26].mxu0 %v24841_v44 }
 0xc87   : > { %17047 = vmatprep.mubr.f32.mxu0 %v24873_v22  ;;  %19064 = vmatpush3.bf16.msra.mxu0 %v27059_v38 }
 0xc88   : > { %19066 = vmatprep.subr.bf16.mxu0 %v27062_v46 }
 0xc8a   : > { %17048 = vmatmul.mubr.f32.gmra.mrb[28].mxu0 %v24866_v7 }
 0xc8b   : > { %17050 = vmatprep.mubr.f32.mxu0 %v24893_v24  ;;  %19068 = vmatpush3.bf16.msra.mxu0 %v27062_v46 }
 0xc8c   : > { %19070 = vmatprep.subr.bf16.mxu0 %v27063_v33 }
 0xc8e   : > { %17051 = vmatmul.mubr.f32.gmra.mrb[30].mxu0 %v24889_v63 }
 0xc8f   : > { %17053 = vmatprep.mubr.f32.mxu0 %v24914_v30  ;;  %19072 = vmatpush3.bf16.msra.mxu0 %v27063_v33 }
 0xc90   : > { %19074 = vmatprep.subr.bf16.mxu0 %v24661_v32 }
 0xc92   : > { %17054 = vmatmul.mubr.f32.gmra.mrb[32].mxu0 %v24910_v26 }
 0xc93   : > { %17056 = vmatprep.mubr.f32.mxu0 %v24935_v5  ;;  %19076 = vmatpush3.bf16.msra.mxu0 %v24661_v32  ;;  %v11067_v32 = vld [vmem:[#allocation14 + $0x40] sm:$0xff] }
 0xc94   : > { %19078 = vmatprep.subr.bf16.mxu0 %v24665_v19 }
 0xc96   : > { %17057 = vmatmul.mubr.f32.gmra.mrb[34].mxu0 %v24931_v27 }
 0xc97   : > { %17059 = vmatprep.mubr.f32.mxu0 %v24956_v29  ;;  %19080 = vmatpush3.bf16.msra.mxu0 %v24665_v19  ;;  %v11068_v19 = vld [vmem:[#allocation14 + $0x48] sm:$0xff] }
 0xc98   : > { %19082 = vmatprep.subr.bf16.mxu0 %v24669_v2 }
 0xc9a   : > { %17060 = vmatmul.mubr.f32.gmra.mrb[36].mxu0 %v24952_v39 }
 0xc9b   : > { %17062 = vmatprep.mubr.f32.mxu0 %v24976_v40  ;;  %19084 = vmatpush3.bf16.msra.mxu0 %v24669_v2  ;;  %v11107_v2 = vand.u32 4294901760, %v11067_v32 }
 0xc9c   : > { %19086 = vmatprep.subr.bf16.mxu0 %v24685_v52 }
 0xc9d   : > { %v25291_v8 = vsub.f32 %v11067_v32, %v11107_v2 }
 0xc9e   : > { %17063 = vmatmul.mubr.f32.gmra.mrb[38].mxu0 %v24973_v28 }
 0xc9f   : > { %19088 = vmatpush3.bf16.msra.mxu0 %v24685_v52  ;;  %17097 = vmatprep.mubr.f32.mxu0 %v24830_v59  ;;  %v11069_v52 = vld [vmem:[#allocation14 + $0x50] sm:$0xff]  ;;  %27112 = vst [vmem:[#allocation41_spill] sm:$0xff] %v25291_v8  ;;  %v26493_v57 = vand.u32 4294901760, %v25291_v8 }
 0xca0   : > { %19090 = vmatprep.subr.bf16.mxu0 %v25061_v55 }
 0xca1   : > { %v11383_v21 = vsub.f32 %v25291_v8, %v26493_v57 }
 0xca2   : > { %17098 = vmatmul.mubr.f32.vlgmr.msra.gmra.mrb[24].mxu0 %v24822_v14  ;;  %v11113_v14 = vand.u32 4294901760, %v11069_v52 }
 0xca3   : > { %17100 = vmatprep.mubr.f32.mxu0 %v24845_v45  ;;  %19092 = vmatpush3.bf16.msra.mxu0 %v25061_v55  ;;  %v11071_v45 = vld [vmem:[#allocation14 + $0x60] sm:$0xff]  ;;  %v11384_v3 = vand.u32 4294901760, %v11383_v21 }
 0xca4   : > { %19094 = vmatprep.subr.bf16.mxu0 %v25070_v43  ;;  %v25300_v31 = vsub.f32 %v11069_v52, %v11113_v14 }
 0xca6   : > { %17101 = vmatmul.mubr.f32.gmra.mrb[26].mxu0 %v24841_v44  ;;  %v11070_v44 = vld [vmem:[#allocation14 + $0x58] sm:$0xff]  ;;  %27114 = vst [vmem:[#allocation43_spill] sm:$0xff] %v25300_v31  ;;  %v26491_v34 = vand.u32 4294901760, %v25300_v31 }
 0xca7   : > { %17103 = vmatprep.mubr.f32.mxu0 %v24873_v22  ;;  %19096 = vmatpush3.bf16.msra.mxu0 %v25070_v43  ;;  %v11116_v59 = vand.u32 4294901760, %v11070_v44  ;;  %v11119_v22 = vand.u32 4294901760, %v11071_v45 }
 0xca8   : > { %19098 = vmatprep.subr.bf16.mxu0 %v25089_v17  ;;  %v11397_v16 = vsub.f32 %v25300_v31, %v26491_v34 }
 0xca9   : > { %v25302_v60 = vsub.f32 %v11070_v44, %v11116_v59  ;;  %v25315_v50 = vsub.f32 %v11071_v45, %v11119_v22 }
 0xcaa   : > { %17104 = vmatmul.mubr.f32.gmra.mrb[28].mxu0 %v24866_v7  ;;  %v11072_v7 = vld [vmem:[#allocation14 + $0x68] sm:$0xff]  ;;  %v11398_v23 = vand.u32 4294901760, %v11397_v16 }
 0xcab   : > { %17106 = vmatprep.mubr.f32.mxu0 %v24893_v24  ;;  %19100 = vmatpush3.bf16.msra.mxu0 %v25089_v17  ;;  %v11110_v24 = vand.u32 4294901760, %v11068_v19  ;;  %27115 = vst [vmem:[#allocation44_spill] sm:$0xff] %v25302_v60  ;;  %v26490_v41 = vand.u32 4294901760, %v25302_v60  ;;  %27116 = vst [vmem:[#allocation45_spill] sm:$0xff] %v25315_v50  ;;  %v26489_v18 = vand.u32 4294901760, %v25315_v50 }
 0xcac   : > { %19102 = vmatprep.subr.bf16.mxu0 %v25103_v0 }
 0xcad   : > { %v25293_v61 = vsub.f32 %v11068_v19, %v11110_v24  ;;  %v11404_v20 = vsub.f32 %v25302_v60, %v26490_v41  ;;  %v11411_v62 = vsub.f32 %v25315_v50, %v26489_v18 }
 0xcae   : > { %17107 = vmatmul.mubr.f32.gmra.mrb[30].mxu0 %v24889_v63  ;;  %v11122_v63 = vand.u32 4294901760, %v11072_v7 }
 0xcaf   : > { %17109 = vmatprep.mubr.f32.mxu0 %v24914_v30  ;;  %19104 = vmatpush3.bf16.msra.mxu0 %v25103_v0  ;;  %v25246_v30 = vpack.c.bf16 %v11110_v24, %v11107_v2  ;;  %27113 = vst [vmem:[#allocation42_spill] sm:$0xff] %v25293_v61  ;;  %v26492_v42 = vand.u32 4294901760, %v25293_v61  ;;  %v11405_v6 = vand.u32 4294901760, %v11404_v20  ;;  %v11412_v13 = vand.u32 4294901760, %v11411_v62 }
 0xcb0   : > { %v25317_v4 = vsub.f32 %v11072_v7, %v11122_v63 }
 0xcb1   : > { %19106 = vmatprep.subr.bf16.mxu0 %v25246_v30  ;;  %19285 = vmatprep.subr.bf16.mxu1 %v25246_v30  ;;  %v11390_v1 = vsub.f32 %v25293_v61, %v26492_v42  ;;  %v25323_v58 = vpack.c.bf16 %v11405_v6, %v11398_v23 }
 0xcb2   : > { %17110 = vmatmul.mubr.f32.gmra.mrb[32].mxu0 %v24910_v26  ;;  %19293 = vmatpush3.bf16.msra.mxu1 %v25246_v30  ;;  %v25258_v26 = vpack.c.bf16 %v11122_v63, %v11119_v22  ;;  %27117 = vst [vmem:[#allocation46_spill] sm:$0xff] %v25317_v4  ;;  %v26488_v51 = vand.u32 4294901760, %v25317_v4  ;;  %v25353_v22 = vpack.c.bf16 %v25293_v61, %v25291_v8 }
 0xcb3   : > { %17112 = vmatprep.mubr.f32.mxu0 %v24935_v5  ;;  %19108 = vmatpush3.bf16.msra.mxu0 %v25246_v30  ;;  %v27109_v5 = vand.u32 4294901760, %v25039_v10  ;;  %v11391_v12 = vand.u32 4294901760, %v11390_v1  ;;  %v25357_v63 = vpack.c.bf16 %v25302_v60, %v25300_v31 }
 0xcb4   : > { %27106 = vst [vmem:[#allocation37_spill] sm:$0xff] %v25258_v26  ;;  %v11418_v56 = vsub.f32 %v25317_v4, %v26488_v51 }
 0xcb5   : > { %v25319_v48 = vpack.c.bf16 %v11391_v12, %v11384_v3 }
 0xcb6   : > { %17113 = vmatmul.mubr.f32.gmra.mrb[34].mxu0 %v24931_v27  ;;  %v27107_v27 = vand.u32 4294901760, %v25037_v11  ;;  %v11419_v32 = vand.u32 4294901760, %v11418_v56 }
 0xcb7   : > { %17115 = vmatprep.mubr.f32.mxu0 %v24956_v29  ;;  %v25252_v29 = vpack.c.bf16 %v11116_v59, %v11113_v14 }
 0xcb8   : > { %v25263_v36 = vsub.f32 %v25037_v11, %v27107_v27  ;;  %v25337_v24 = vpack.c.bf16 %v11419_v32, %v11412_v13  ;;  %v25361_v27 = vpack.c.bf16 %v25317_v4, %v25315_v50 }
 0xcb9   : > { %27105 = vst [vmem:[#allocation36_spill] sm:$0xff] %v25252_v29  ;;  %19110 = vmatprep.subr.bf16.mxu0 %v25252_v29  ;;  %19286 = vmatprep.subr.bf16.mxu1 %v25252_v29 }
 0xcba   : > { %17116 = vmatmul.mubr.f32.gmra.mrb[36].mxu0 %v24952_v39  ;;  %19294 = vmatpush3.bf16.msra.mxu1 %v25252_v29  ;;  %27108 = vst [vmem:[#allocation38_spill] sm:$0xff] %v25263_v36  ;;  %v25268_v39 = vsub.f32 %v25039_v10, %v27109_v5  ;;  %v26502_v15 = vand.u32 4294901760, %v25263_v36 }
 0xcbb   : > { %17118 = vmatprep.mubr.f32.mxu0 %v24976_v40  ;;  %19112 = vmatpush3.bf16.msra.mxu0 %v25252_v29  ;;  %v11125_v40 = vand.u32 4294901760, %v11073_v9 }
 0xcbc   : > { %27110 = vst [vmem:[#allocation39_spill] sm:$0xff] %v25268_v39  ;;  %19114 = vmatprep.subr.bf16.mxu0 %v25258_v26  ;;  %v26500_v37 = vand.u32 4294901760, %v25268_v39  ;;  %19287 = vmatprep.subr.bf16.mxu1 %v25258_v26  ;;  %v11327_v10 = vsub.f32 %v25263_v36, %v26502_v15  ;;  %v25349_v7 = vpack.c.bf16 %v25268_v39, %v25263_v36 }
 0xcbd   : > { %v25331_v54 = vsub.f32 %v11073_v9, %v11125_v40  ;;  %v27120_v9 = vand.u32 4294901760, %v25041_v35 }
 0xcbe   : > { %17119 = vmatmul.mubr.f32.gmra.mrb[38].mxu0 %v24973_v28  ;;  %v11074_v28 = vld [vmem:[#allocation14 + $0x78] sm:$0xff]  ;;  %19295 = vmatpush3.bf16.msra.mxu1 %v25258_v26  ;;  %v11334_v53 = vsub.f32 %v25268_v39, %v26500_v37  ;;  %v11328_v46 = vand.u32 4294901760, %v11327_v10 }
 0xcbf   : > { %v11128_v33 = vand.u32 4294901760, %v11074_v28  ;;  %19116 = vmatpush3.bf16.msra.mxu0 %v25258_v26  ;;  %27118 = vst [vmem:[#allocation47_spill] sm:$0xff] %v25331_v54  ;;  %v26487_v19 = vand.u32 4294901760, %v25331_v54  ;;  %v27122_v10 = vld [vmem:[#allocation52_spill] sm:$0xff] }
 0xcc0   : > { %v11335_v38 = vand.u32 4294901760, %v11334_v53  ;;  %v27123_v53 = vand.u32 4294901760, %v27122_v10 }
 0xcc1   : > { %v25276_v11 = vpack.c.bf16 %v11128_v33, %v11125_v40  ;;  %v25333_v47 = vsub.f32 %v11074_v28, %v11128_v33  ;;  %v11425_v52 = vsub.f32 %v25331_v54, %v26487_v19  ;;  %v25370_v28 = vsub.f32 %v25041_v35, %v27120_v9  ;;  %v25390_v35 = vld [vmem:[%s26060_s16] ss:$0 sm:$0xff]  ;;  %v27126_v9 = vld [vmem:[#allocation34_spill] sm:$0xff] }
 0xcc2   : > { %v25288_v25 = vpack.c.bf16 %v11335_v38, %v11328_v46  ;;  %v27121_v40 = vand.u32 4294901760, %v25047_v49  ;;  %v25380_v46 = vsub.f32 %v27122_v10, %v27123_v53  ;;  %v27124_v38 = vld [vmem:[#allocation33_spill] sm:$0xff] }
 0xcc3   : > { %27111 = vst [vmem:[#allocation40_spill] sm:$0xff] %v25276_v11  ;;  %19118 = vmatprep.subr.bf16.mxu0 %v25276_v11  ;;  %19288 = vmatprep.subr.bf16.mxu1 %v25276_v11  ;;  %27119 = vst [vmem:[#allocation71_spill] sm:$0xff] %v25333_v47  ;;  %v26486_v2 = vand.u32 4294901760, %v25333_v47  ;;  %v11426_v14 = vand.u32 4294901760, %v11425_v52  ;;  %v25365_v5 = vpack.c.bf16 %v25333_v47, %v25331_v54  ;;  %v27125_v21 = vand.u32 4294901760, %v27124_v38 }
 0xcc4   : > { %19120 = vmatpush3.bf16.msra.mxu0 %v25276_v11  ;;  %19296 = vmatpush3.bf16.msra.mxu1 %v25276_v11  ;;  %v25375_v33 = vsub.f32 %v25047_v49, %v27121_v40  ;;  %v26497_v3 = vand.u32 4294901760, %v25370_v28  ;;  %v26495_v12 = vand.u32 4294901760, %v25380_v46  ;;  %v27127_v40 = vand.u32 4294901760, %v27126_v9 }
 0xcc5   : > { %19122 = vmatprep.subr.bf16.mxu0 %v25288_v25  ;;  %v11432_v44 = vsub.f32 %v25333_v47, %v26486_v2  ;;  %v25385_v1 = vsub.f32 %v27124_v38, %v27125_v21 }
 0xcc6   : > { %v26496_v49 = vand.u32 4294901760, %v25375_v33  ;;  %v11341_v56 = vsub.f32 %v25370_v28, %v26497_v3  ;;  %v11355_v52 = vsub.f32 %v25380_v46, %v26495_v12  ;;  %v25413_v10 = vsub.f32 %v27126_v9, %v27127_v40 }
 0xcc7   : > { %v11433_v59 = vand.u32 4294901760, %v11432_v44  ;;  %v26494_v16 = vand.u32 4294901760, %v25385_v1 }
 0xcc8   : > { %v11348_v13 = vsub.f32 %v25375_v33, %v26496_v49  ;;  %v11342_v19 = vand.u32 4294901760, %v11341_v56  ;;  %v11356_v40 = vand.u32 4294901760, %v11355_v52 }
 0xcc9   : > { %v25345_v45 = vpack.c.bf16 %v11433_v59, %v11426_v14  ;;  %v11362_v44 = vsub.f32 %v25385_v1, %v26494_v16 }
 0xcca   : > { %v11349_v51 = vand.u32 4294901760, %v11348_v13 }
 0xccb   : > { %v11363_v41 = vand.u32 4294901760, %v11362_v44 }
 0xccd   : > { %v25448_v12 = vpack.c.bf16 %v11363_v41, %v11356_v40 }
 0xd75   : > { %v17099_v20 = vpop.f32.mrb[24].mxu0 }
 0xd76   : > { %v19313_v23 = vadd.f32 %v17099_v20, %v25390_v35  ;;  %v10949_v6 = vpop.f32.mrb[25].mxu0  ;;  %v27128_v20 = vld [vmem:[#allocation35_spill] sm:$0xff] }
 0xd77   : > { %v19314_v62 = vadd.f32 %v25390_v35, %v10949_v6 }
 0xd78   : > { %v11044_v32 = vmax.f32 %v19313_v23, 0.0  ;;  %v27129_v23 = vand.u32 4294901760, %v27128_v20 }
 0xd79   : > { %v11043_v14 = vmax.f32 %v19314_v62, 0.0  ;;  %v17102_v59 = vpop.f32.mrb[26].mxu0 }
 0xd7a   : > { %v25415_v53 = vand.u32 4294901760, %v11044_v32  ;;  %v19315_v38 = vadd.f32 %v17102_v59, %v25390_v35  ;;  %v10961_v21 = vpop.f32.mrb[27].mxu0  ;;  %v25421_v6 = vsub.f32 %v27128_v20, %v27129_v23  ;;  %v26501_v20 = vand.u32 4294901760, %v25413_v10 }
 0xd7b   : > { %v25423_v2 = vand.u32 4294901760, %v11043_v14  ;;  %v19316_v62 = vadd.f32 %v25390_v35, %v10961_v21 }
 0xd7c   : > { %v25427_v18 = vsub.f32 %v11044_v32, %v25415_v53  ;;  %v11046_v9 = vmax.f32 %v19315_v38, 0.0  ;;  %v26504_v32 = vand.u32 4294901760, %v25421_v6 }
 0xd7d   : > { %v25430_v59 = vsub.f32 %v11043_v14, %v25423_v2  ;;  %v11045_v34 = vmax.f32 %v19316_v62, 0.0  ;;  %v17105_v42 = vpop.f32.mrb[28].mxu0  ;;  %v19125_v14 = vpack.c.bf16 %v11349_v51, %v11342_v19  ;;  %v11369_v51 = vsub.f32 %v25413_v10, %v26501_v20 }
 0xd7e   : > { %v26498_v23 = vand.u32 4294901760, %v25427_v18  ;;  %v25434_v57 = vand.u32 4294901760, %v11046_v9  ;;  %v19317_v56 = vadd.f32 %v17105_v42, %v25390_v35  ;;  %v10973_v13 = vpop.f32.mrb[29].mxu0 }
 0xd7f   : > { %v25438_v21 = vand.u32 4294901760, %v11045_v34  ;;  %v19318_v52 = vadd.f32 %v25390_v35, %v10973_v13  ;;  %v26499_v44 = vand.u32 4294901760, %v25430_v59 }
 0xd80   : > { %v11176_v38 = vsub.f32 %v25427_v18, %v26498_v23  ;;  %v25446_v62 = vsub.f32 %v11046_v9, %v25434_v57  ;;  %v11048_v16 = vmax.f32 %v19317_v56, 0.0 }
 0xd81   : > { %v25451_v42 = vsub.f32 %v11045_v34, %v25438_v21  ;;  %v11047_v49 = vmax.f32 %v19318_v52, 0.0  ;;  %v17108_v3 = vpop.f32.mrb[30].mxu0  ;;  %v11166_v13 = vsub.f32 %v25430_v59, %v26499_v44  ;;  %v11376_v34 = vsub.f32 %v25421_v6, %v26504_v32 }
 0xd82   : > { %v25459_v19 = vand.u32 4294901760, %v11048_v16  ;;  %v19319_v9 = vadd.f32 %v17108_v3, %v25390_v35  ;;  %v10985_v56 = vpop.f32.mrb[31].mxu0  ;;  %v26507_v41 = vand.u32 4294901760, %v25446_v62  ;;  %v11177_v37 = vand.u32 4294901760, %v11176_v38 }
 0xd83   : > { %v25466_v40 = vand.u32 4294901760, %v11047_v49  ;;  %v19320_v52 = vadd.f32 %v25390_v35, %v10985_v56  ;;  %v11167_v23 = vand.u32 4294901760, %v11166_v13  ;;  %v26509_v44 = vand.u32 4294901760, %v25451_v42 }
 0xd84   : > { %v25471_v20 = vsub.f32 %v11048_v16, %v25459_v19  ;;  %v11050_v15 = vmax.f32 %v19319_v9, 0.0  ;;  %v11196_v3 = vsub.f32 %v25446_v62, %v26507_v41  ;;  %v11370_v56 = vand.u32 4294901760, %v11369_v51 }
 0xd85   : > { %v25477_v47 = vsub.f32 %v11047_v49, %v25466_v40  ;;  %v11049_v32 = vmax.f32 %v19320_v52, 0.0  ;;  %v17111_v54 = vpop.f32.mrb[32].mxu0  ;;  %17153 = vmatprep.mubr.f32.mxu0 %v11167_v23  ;;  %v11186_v13 = vsub.f32 %v25451_v42, %v26509_v44  ;;  %v11377_v41 = vand.u32 4294901760, %v11376_v34 }
 0xd86   : > { %v25482_v38 = vand.u32 4294901760, %v11050_v15  ;;  %v19321_v16 = vadd.f32 %v17111_v54, %v25390_v35  ;;  %v10997_v9 = vpop.f32.mrb[33].mxu0  ;;  %17154 = vmatmul.mubr.f32.vlgmr.msra.gmra.mrb[40].mxu0 %v11177_v37  ;;  %v26512_v4 = vand.u32 4294901760, %v25471_v20  ;;  %v11197_v60 = vand.u32 4294901760, %v11196_v3 }
 0xd87   : > { %v25486_v50 = vand.u32 4294901760, %v11049_v32  ;;  %v19322_v49 = vadd.f32 %v25390_v35, %v10997_v9  ;;  %19124 = vmatpush3.bf16.msra.mxu0 %v25288_v25  ;;  %v11187_v23 = vand.u32 4294901760, %v11186_v13  ;;  %v26514_v52 = vand.u32 4294901760, %v25477_v47 }
 0xd88   : > { %v25492_v51 = vsub.f32 %v11050_v15, %v25482_v38  ;;  %v11052_v44 = vmax.f32 %v19321_v16, 0.0  ;;  %19126 = vmatprep.subr.bf16.mxu0 %v19125_v14  ;;  %v11216_v37 = vsub.f32 %v25471_v20, %v26512_v4  ;;  %v19133_v31 = vpack.c.bf16 %v11377_v41, %v11370_v56 }
 0xd89   : > { %v25498_v54 = vsub.f32 %v11049_v32, %v25486_v50  ;;  %v11051_v34 = vmax.f32 %v19322_v49, 0.0  ;;  %v17114_v9 = vpop.f32.mrb[34].mxu0  ;;  %17156 = vmatprep.mubr.f32.mxu0 %v11187_v23  ;;  %v11206_v25 = vsub.f32 %v25477_v47, %v26514_v52 }
 0xd8a   : > { %v25503_v13 = vand.u32 4294901760, %v11052_v44  ;;  %v19323_v15 = vadd.f32 %v17114_v9, %v25390_v35  ;;  %v11009_v3 = vpop.f32.mrb[35].mxu0  ;;  %17157 = vmatmul.mubr.f32.gmra.mrb[42].mxu0 %v11197_v60  ;;  %v26516_v16 = vand.u32 4294901760, %v25492_v51  ;;  %v11217_v8 = vand.u32 4294901760, %v11216_v37 }
 0xd8b   : > { %v25507_v4 = vand.u32 4294901760, %v11051_v34  ;;  %v19324_v32 = vadd.f32 %v25390_v35, %v11009_v3  ;;  %19128 = vmatpush3.bf16.msra.mxu0 %v19125_v14  ;;  %v11207_v49 = vand.u32 4294901760, %v11206_v25  ;;  %v26517_v23 = vand.u32 4294901760, %v25498_v54 }
 0xd8c   : > { %v25512_v61 = vsub.f32 %v11052_v44, %v25503_v13  ;;  %v11054_v52 = vmax.f32 %v19323_v15, 0.0  ;;  %19130 = vmatprep.subr.bf16.mxu0 %v25448_v12  ;;  %v11236_v60 = vsub.f32 %v25492_v51, %v26516_v16 }
 0xd8d   : > { %v25519_v41 = vsub.f32 %v11051_v34, %v25507_v4  ;;  %v11053_v56 = vmax.f32 %v19324_v32, 0.0  ;;  %v17117_v9 = vpop.f32.mrb[36].mxu0  ;;  %17159 = vmatprep.mubr.f32.mxu0 %v11207_v49  ;;  %v11226_v14 = vsub.f32 %v25498_v54, %v26517_v23 }
 0xd8e   : > { %v25524_v44 = vand.u32 4294901760, %v11054_v52  ;;  %v19325_v37 = vadd.f32 %v17117_v9, %v25390_v35  ;;  %v11021_v25 = vpop.f32.mrb[37].mxu0  ;;  %17160 = vmatmul.mubr.f32.gmra.mrb[44].mxu0 %v11217_v8  ;;  %v26522_v15 = vand.u32 4294901760, %v25512_v61  ;;  %v11237_v39 = vand.u32 4294901760, %v11236_v60 }
 0xd8f   : > { %v25528_v3 = vand.u32 4294901760, %v11053_v56  ;;  %v19326_v34 = vadd.f32 %v25390_v35, %v11021_v25  ;;  %19132 = vmatpush3.bf16.msra.mxu0 %v25448_v12  ;;  %v11227_v32 = vand.u32 4294901760, %v11226_v14  ;;  %v26523_v49 = vand.u32 4294901760, %v25519_v41 }
 0xd90   : > { %v25534_v16 = vsub.f32 %v11054_v52, %v25524_v44  ;;  %v11056_v23 = vmax.f32 %v19325_v37, 0.0  ;;  %19134 = vmatprep.subr.bf16.mxu0 %v19133_v31  ;;  %v11256_v8 = vsub.f32 %v25512_v61, %v26522_v15 }
 0xd91   : > { %v25540_v9 = vsub.f32 %v11053_v56, %v25528_v3  ;;  %v11055_v36 = vmax.f32 %v19326_v34, 0.0  ;;  %v17120_v25 = vpop.f32.mrb[38].mxu0  ;;  %17162 = vmatprep.mubr.f32.mxu0 %v11227_v32  ;;  %v11246_v12 = vsub.f32 %v25519_v41, %v26523_v49 }
 0xd92   : > { %v25545_v14 = vand.u32 4294901760, %v11056_v23  ;;  %v19327_v52 = vadd.f32 %v17120_v25, %v25390_v35  ;;  %v11033_v60 = vpop.f32.mrb[39].mxu0  ;;  %17163 = vmatmul.mubr.f32.gmra.mrb[46].mxu0 %v11237_v39  ;;  %v11275_v37 = vand.u32 4294901760, %v25534_v16  ;;  %v11257_v26 = vand.u32 4294901760, %v11256_v8 }
 0xd93   : > { %v25549_v11 = vand.u32 4294901760, %v11055_v36  ;;  %v19328_v56 = vadd.f32 %v25390_v35, %v11033_v60  ;;  %19136 = vmatpush3.bf16.msra.mxu0 %v19133_v31  ;;  %v11247_v34 = vand.u32 4294901760, %v11246_v12  ;;  %v11265_v32 = vand.u32 4294901760, %v25540_v9 }
 0xd94   : > { %v25554_v15 = vsub.f32 %v11056_v23, %v25545_v14  ;;  %v11058_v49 = vmax.f32 %v19327_v52, 0.0  ;;  %19138 = vmatprep.subr.bf16.mxu0 %v25319_v48  ;;  %v11276_v39 = vsub.f32 %v25534_v16, %v11275_v37 }
 0xd95   : > { %v25561_v25 = vsub.f32 %v11055_v36, %v25549_v11  ;;  %v11057_v29 = vmax.f32 %v19328_v56, 0.0  ;;  %17165 = vmatprep.mubr.f32.mxu0 %v11247_v34  ;;  %17451 = vmatprep.mubr.f32.mxu1 %v25549_v11  ;;  %v11266_v31 = vsub.f32 %v25540_v9, %v11265_v32 }
 0xd96   : > { %v25567_v35 = vand.u32 4294901760, %v11058_v49  ;;  %17166 = vmatmul.mubr.f32.gmra.mrb[48].mxu0 %v11257_v26  ;;  %17452 = vmatmul.mubr.f32.vlgmr.msra.gmra.mrb[40].mxu1 %v25545_v14  ;;  %v11295_v23 = vand.u32 4294901760, %v25554_v15  ;;  %v11277_v60 = vand.u32 4294901760, %v11276_v39 }
 0xd97   : > { %v25571_v8 = vand.u32 4294901760, %v11057_v29  ;;  %19140 = vmatpush3.bf16.msra.mxu0 %v25319_v48  ;;  %v11267_v36 = vand.u32 4294901760, %v11266_v31  ;;  %v11285_v12 = vand.u32 4294901760, %v25561_v25 }
 0xd98   : > { %v25576_v52 = vsub.f32 %v11058_v49, %v25567_v35  ;;  %19142 = vmatprep.subr.bf16.mxu0 %v25323_v58  ;;  %v11296_v26 = vsub.f32 %v25554_v15, %v11295_v23 }
 0xd99   : > { %v25583_v56 = vsub.f32 %v11057_v29, %v25571_v8  ;;  %17168 = vmatprep.mubr.f32.mxu0 %v11267_v36  ;;  %17454 = vmatprep.mubr.f32.mxu1 %v25571_v8  ;;  %v11286_v48 = vsub.f32 %v25561_v25, %v11285_v12 }
 0xd9a   : > { %17169 = vmatmul.mubr.f32.gmra.mrb[50].mxu0 %v11277_v60  ;;  %17455 = vmatmul.mubr.f32.gmra.mrb[42].mxu1 %v25567_v35  ;;  %v11315_v49 = vand.u32 4294901760, %v25576_v52  ;;  %v11297_v31 = vand.u32 4294901760, %v11296_v26  ;;  %v19157_v26 = vpack.c.bf16 %v25375_v33, %v25370_v28 }
 0xd9b   : > { %19144 = vmatpush3.bf16.msra.mxu0 %v25323_v58  ;;  %v11287_v34 = vand.u32 4294901760, %v11286_v48  ;;  %v11305_v39 = vand.u32 4294901760, %v25583_v56  ;;  %v27135_v48 = vld [vmem:[#allocation39_spill] sm:$0xff] }
 0xd9c   : > { %19146 = vmatprep.subr.bf16.mxu0 %v25337_v24  ;;  %v11316_v29 = vsub.f32 %v25576_v52, %v11315_v49 }
 0xd9d   : > { %17171 = vmatprep.mubr.f32.mxu0 %v11287_v34  ;;  %v11306_v36 = vsub.f32 %v25583_v56, %v11305_v39  ;;  %v27136_v34 = vand.u32 4294901760, %v27135_v48  ;;  %v27148_v48 = vand.u32 4294901760, %v25471_v20 }
 0xd9e   : > { %17172 = vmatmul.mubr.f32.gmra.mrb[52].mxu0 %v11297_v31  ;;  %v11317_v58 = vand.u32 4294901760, %v11316_v29  ;;  %v27137_v29 = vand.u32 4294901760, %v25430_v59 }
 0xd9f   : > { %19148 = vmatpush3.bf16.msra.mxu0 %v25337_v24  ;;  %v11307_v60 = vand.u32 4294901760, %v11306_v36  ;;  %v19161_v24 = vpack.c.bf16 %v25385_v1, %v25380_v46  ;;  %v27138_v36 = vand.u32 4294901760, %v25370_v28  ;;  %v27145_v28 = vand.u32 4294901760, %v25477_v47 }
 0xda0   : > { %19150 = vmatprep.subr.bf16.mxu0 %v25345_v45 }
 0xda1   : > { %17174 = vmatprep.mubr.f32.mxu0 %v11307_v60  ;;  %v27139_v60 = vand.u32 4294901760, %v25375_v33  ;;  %v27147_v33 = vand.u32 4294901760, %v25421_v6 }
 0xda2   : > { %17175 = vmatmul.mubr.f32.gmra.mrb[54].mxu0 %v11317_v58 }
 0xda3   : > { %19152 = vmatpush3.bf16.msra.mxu0 %v25345_v45  ;;  %17209 = vmatprep.mubr.f32.mxu0 %v25423_v2  ;;  %v19165_v45 = vpack.c.bf16 %v25421_v6, %v25413_v10  ;;  %v19221_v58 = vpack.c.bf16 %v27139_v60, %v27138_v36  ;;  %v27156_v6 = vld [vmem:[#allocation43_spill] sm:$0xff]  ;;  %v27158_v36 = vld [vmem:[#allocation44_spill] sm:$0xff] }
 0xda4   : > { %19154 = vmatprep.subr.bf16.mxu0 %v25349_v7 }
 0xda6   : > { %17210 = vmatmul.mubr.f32.vlgmr.msra.gmra.mrb[40].mxu0 %v25415_v53 }
 0xda7   : > { %17212 = vmatprep.mubr.f32.mxu0 %v25438_v21  ;;  %19156 = vmatpush3.bf16.msra.mxu0 %v25349_v7  ;;  %v27130_v7 = vld [vmem:[#allocation36_spill] sm:$0xff] }
 0xda8   : > { %19158 = vmatprep.subr.bf16.mxu0 %v19157_v26 }
 0xdaa   : > { %17213 = vmatmul.mubr.f32.gmra.mrb[42].mxu0 %v25434_v57 }
 0xdab   : > { %17215 = vmatprep.mubr.f32.mxu0 %v25466_v40  ;;  %19160 = vmatpush3.bf16.msra.mxu0 %v19157_v26  ;;  %v27140_v26 = vand.u32 4294901760, %v25427_v18 }
 0xdac   : > { %19162 = vmatprep.subr.bf16.mxu0 %v19161_v24 }
 0xdae   : > { %17216 = vmatmul.mubr.f32.gmra.mrb[44].mxu0 %v25459_v19 }
 0xdaf   : > { %17218 = vmatprep.mubr.f32.mxu0 %v25486_v50  ;;  %19164 = vmatpush3.bf16.msra.mxu0 %v19161_v24  ;;  %v27141_v24 = vand.u32 4294901760, %v25451_v42 }
 0xdb0   : > { %19166 = vmatprep.subr.bf16.mxu0 %v19165_v45 }
 0xdb2   : > { %17219 = vmatmul.mubr.f32.gmra.mrb[46].mxu0 %v25482_v38 }
 0xdb3   : > { %17221 = vmatprep.mubr.f32.mxu0 %v25507_v4  ;;  %19168 = vmatpush3.bf16.msra.mxu0 %v19165_v45  ;;  %v27142_v45 = vand.u32 4294901760, %v25380_v46  ;;  %v27149_v46 = vand.u32 4294901760, %v25498_v54 }
 0xdb4   : > { %19170 = vmatprep.subr.bf16.mxu0 %v25353_v22 }
 0xdb6   : > { %17222 = vmatmul.mubr.f32.gmra.mrb[48].mxu0 %v25503_v13 }
 0xdb7   : > { %17224 = vmatprep.mubr.f32.mxu0 %v25528_v3  ;;  %19172 = vmatpush3.bf16.msra.mxu0 %v25353_v22  ;;  %v27131_v22 = vld [vmem:[#allocation37_spill] sm:$0xff] }
 0xdb8   : > { %19174 = vmatprep.subr.bf16.mxu0 %v25357_v63 }
 0xdba   : > { %17225 = vmatmul.mubr.f32.gmra.mrb[50].mxu0 %v25524_v44 }
 0xdbb   : > { %17227 = vmatprep.mubr.f32.mxu0 %v25549_v11  ;;  %19176 = vmatpush3.bf16.msra.mxu0 %v25357_v63  ;;  %v27132_v63 = vld [vmem:[#allocation40_spill] sm:$0xff] }
 0xdbc   : > { %19178 = vmatprep.subr.bf16.mxu0 %v25361_v27 }
 0xdbe   : > { %17228 = vmatmul.mubr.f32.gmra.mrb[52].mxu0 %v25545_v14 }
 0xdbf   : > { %17230 = vmatprep.mubr.f32.mxu0 %v25571_v8  ;;  %19180 = vmatpush3.bf16.msra.mxu0 %v25361_v27  ;;  %v27133_v27 = vld [vmem:[#allocation38_spill] sm:$0xff] }
 0xdc0   : > { %19182 = vmatprep.subr.bf16.mxu0 %v25365_v5 }
 0xdc2   : > { %17231 = vmatmul.mubr.f32.gmra.mrb[54].mxu0 %v25567_v35 }
 0xdc3   : > { %19184 = vmatpush3.bf16.msra.mxu0 %v25365_v5  ;;  %17265 = vmatprep.mubr.f32.mxu0 %v25430_v59  ;;  %v27134_v5 = vand.u32 4294901760, %v27133_v27  ;;  %v27143_v27 = vand.u32 4294901760, %v25385_v1  ;;  %v27150_v1 = vld [vmem:[#allocation41_spill] sm:$0xff] }
 0xdc4   : > { %19186 = vmatprep.subr.bf16.mxu0 %v25061_v55 }
 0xdc5   : > { %v19217_v31 = vpack.c.bf16 %v27136_v34, %v27134_v5  ;;  %v19225_v59 = vpack.c.bf16 %v27143_v27, %v27142_v45  ;;  %v27144_v5 = vand.u32 4294901760, %v25446_v62  ;;  %v27152_v34 = vld [vmem:[#allocation42_spill] sm:$0xff] }
 0xdc6   : > { %17266 = vmatmul.mubr.f32.vlgmr.msra.gmra.mrb[40].mxu0 %v25427_v18  ;;  %v27146_v18 = vand.u32 4294901760, %v25413_v10  ;;  %v27155_v10 = vand.u32 4294901760, %v25519_v41 }
 0xdc7   : > { %17268 = vmatprep.mubr.f32.mxu0 %v25451_v42  ;;  %19188 = vmatpush3.bf16.msra.mxu0 %v25061_v55 }
 0xdc8   : > { %19190 = vmatprep.subr.bf16.mxu0 %v25070_v43  ;;  %v19229_v42 = vpack.c.bf16 %v27147_v33, %v27146_v18 }
 0xdca   : > { %17269 = vmatmul.mubr.f32.gmra.mrb[42].mxu0 %v25446_v62  ;;  %v27151_v62 = vand.u32 4294901760, %v27150_v1 }
 0xdcb   : > { %17271 = vmatprep.mubr.f32.mxu0 %v25477_v47  ;;  %19192 = vmatpush3.bf16.msra.mxu0 %v25070_v43  ;;  %v27153_v47 = vand.u32 4294901760, %v27152_v34 }
 0xdcc   : > { %19194 = vmatprep.subr.bf16.mxu0 %v25089_v17 }
 0xdce   : > { %17272 = vmatmul.mubr.f32.gmra.mrb[44].mxu0 %v25471_v20  ;;  %v27157_v20 = vand.u32 4294901760, %v27156_v6 }
 0xdcf   : > { %17274 = vmatprep.mubr.f32.mxu0 %v25498_v54  ;;  %19196 = vmatpush3.bf16.msra.mxu0 %v25089_v17  ;;  %v27159_v54 = vand.u32 4294901760, %v27158_v36 }
 0xdd0   : > { %19198 = vmatprep.subr.bf16.mxu0 %v25103_v0 }
 0xdd1   : > { %v19237_v60 = vpack.c.bf16 %v27159_v54, %v27157_v20 }
 0xdd2   : > { %17275 = vmatmul.mubr.f32.gmra.mrb[46].mxu0 %v25492_v51 }
 0xdd3   : > { %17277 = vmatprep.mubr.f32.mxu0 %v25519_v41  ;;  %19200 = vmatpush3.bf16.msra.mxu0 %v25103_v0 }
 0xdd4   : > { %19202 = vmatprep.subr.bf16.mxu0 %v25246_v30 }
 0xdd6   : > { %17278 = vmatmul.mubr.f32.gmra.mrb[48].mxu0 %v25512_v61 }
 0xdd7   : > { %17280 = vmatprep.mubr.f32.mxu0 %v25540_v9  ;;  %19204 = vmatpush3.bf16.msra.mxu0 %v25246_v30 }
 0xdd8   : > { %19206 = vmatprep.subr.bf16.mxu0 %v27130_v7 }
 0xdda   : > { %17281 = vmatmul.mubr.f32.gmra.mrb[50].mxu0 %v25534_v16 }
 0xddb   : > { %17283 = vmatprep.mubr.f32.mxu0 %v25561_v25  ;;  %19208 = vmatpush3.bf16.msra.mxu0 %v27130_v7 }
 0xddc   : > { %19210 = vmatprep.subr.bf16.mxu0 %v27131_v22 }
 0xdde   : > { %17284 = vmatmul.mubr.f32.gmra.mrb[52].mxu0 %v25554_v15 }
 0xddf   : > { %17286 = vmatprep.mubr.f32.mxu0 %v25583_v56  ;;  %19212 = vmatpush3.bf16.msra.mxu0 %v27131_v22 }
 0xde0   : > { %19214 = vmatprep.subr.bf16.mxu0 %v27132_v63 }
 0xde2   : > { %17287 = vmatmul.mubr.f32.gmra.mrb[54].mxu0 %v25576_v52 }
 0xde3   : > { %19216 = vmatpush3.bf16.msra.mxu0 %v27132_v63  ;;  %17321 = vmatprep.mubr.f32.mxu0 %v27137_v29  ;;  %v27154_v29 = vand.u32 4294901760, %v25492_v51  ;;  %v27161_v51 = vld [vmem:[#allocation45_spill] sm:$0xff] }
 0xde4   : > { %19218 = vmatprep.subr.bf16.mxu0 %v19217_v31 }
 0xde6   : > { %17322 = vmatmul.mubr.f32.vlgmr.msra.gmra.mrb[40].mxu0 %v27140_v26  ;;  %v27162_v26 = vand.u32 4294901760, %v27161_v51 }
 0xde7   : > { %17324 = vmatprep.mubr.f32.mxu0 %v27141_v24  ;;  %19220 = vmatpush3.bf16.msra.mxu0 %v19217_v31  ;;  %v19233_v31 = vpack.c.bf16 %v27153_v47, %v27151_v62  ;;  %v27163_v24 = vld [vmem:[#allocation46_spill] sm:$0xff] }
 0xde8   : > { %19222 = vmatprep.subr.bf16.mxu0 %v19221_v58  ;;  %v27164_v41 = vand.u32 4294901760, %v27163_v24 }
 0xdea   : > { %17325 = vmatmul.mubr.f32.gmra.mrb[42].mxu0 %v27144_v5  ;;  %v19241_v45 = vpack.c.bf16 %v27164_v41, %v27162_v26 }
 0xdeb   : > { %17327 = vmatprep.mubr.f32.mxu0 %v27145_v28  ;;  %19224 = vmatpush3.bf16.msra.mxu0 %v19221_v58  ;;  %v27160_v58 = vand.u32 4294901760, %v25512_v61  ;;  %v27165_v61 = vld [vmem:[#allocation47_spill] sm:$0xff] }
 0xdec   : > { %19226 = vmatprep.subr.bf16.mxu0 %v19225_v59  ;;  %v27166_v27 = vand.u32 4294901760, %v27165_v61 }
 0xdee   : > { %17328 = vmatmul.mubr.f32.gmra.mrb[44].mxu0 %v27148_v48 }
 0xdef   : > { %17330 = vmatprep.mubr.f32.mxu0 %v27149_v46  ;;  %19228 = vmatpush3.bf16.msra.mxu0 %v19225_v59  ;;  %v27167_v59 = vld [vmem:[#allocation71_spill] sm:$0xff] }
 0xdf0   : > { %19230 = vmatprep.subr.bf16.mxu0 %v19229_v42  ;;  %v27168_v9 = vand.u32 4294901760, %v27167_v59 }
 0xdf2   : > { %17331 = vmatmul.mubr.f32.gmra.mrb[46].mxu0 %v27154_v29 }
 0xdf3   : > { %17333 = vmatprep.mubr.f32.mxu0 %v27155_v10  ;;  %19232 = vmatpush3.bf16.msra.mxu0 %v19229_v42 }
 0xdf4   : > { %19234 = vmatprep.subr.bf16.mxu0 %v19233_v31 }
 0xdf6   : > { %17334 = vmatmul.mubr.f32.gmra.mrb[48].mxu0 %v27160_v58 }
 0xdf7   : > { %17336 = vmatprep.mubr.f32.mxu0 %v11265_v32  ;;  %19236 = vmatpush3.bf16.msra.mxu0 %v19233_v31  ;;  %v19245_v32 = vpack.c.bf16 %v27168_v9, %v27166_v27 }
 0xdf8   : > { %19238 = vmatprep.subr.bf16.mxu0 %v19237_v60 }
 0xdfa   : > { %17337 = vmatmul.mubr.f32.gmra.mrb[50].mxu0 %v11275_v37 }
 0xdfb   : > { %17339 = vmatprep.mubr.f32.mxu0 %v11285_v12  ;;  %19240 = vmatpush3.bf16.msra.mxu0 %v19237_v60 }
 0xdfc   : > { %19242 = vmatprep.subr.bf16.mxu0 %v19241_v45 }
 0xdfe   : > { %17340 = vmatmul.mubr.f32.gmra.mrb[52].mxu0 %v11295_v23 }
 0xdff   : > { %17342 = vmatprep.mubr.f32.mxu0 %v11305_v39  ;;  %19244 = vmatpush3.bf16.msra.mxu0 %v19241_v45 }
 0xe00   : > { %19246 = vmatprep.subr.bf16.mxu0 %v19245_v32 }
 0xe02   : > { %17343 = vmatmul.mubr.f32.gmra.mrb[54].mxu0 %v11315_v49 }
 0xe03   : > { %19248 = vmatpush3.bf16.msra.mxu0 %v19245_v32  ;;  %17377 = vmatprep.mubr.f32.mxu0 %v25423_v2 }
 0xe04   : > { %19250 = vmatprep.subr.bf16.mxu0 %v25061_v55 }
 0xe06   : > { %17378 = vmatmul.mubr.f32.vlgmr.msra.gmra.mrb[40].mxu0 %v25415_v53 }
 0xe07   : > { %17380 = vmatprep.mubr.f32.mxu0 %v25438_v21  ;;  %19252 = vmatpush3.bf16.msra.mxu0 %v25061_v55 }
 0xe08   : > { %19254 = vmatprep.subr.bf16.mxu0 %v25070_v43 }
 0xe0a   : > { %17381 = vmatmul.mubr.f32.gmra.mrb[42].mxu0 %v25434_v57 }
 0xe0b   : > { %17383 = vmatprep.mubr.f32.mxu0 %v25466_v40  ;;  %19256 = vmatpush3.bf16.msra.mxu0 %v25070_v43 }
 0xe0c   : > { %19258 = vmatprep.subr.bf16.mxu0 %v25089_v17 }
 0xe0e   : > { %17384 = vmatmul.mubr.f32.gmra.mrb[44].mxu0 %v25459_v19 }
 0xe0f   : > { %17386 = vmatprep.mubr.f32.mxu0 %v25486_v50  ;;  %19260 = vmatpush3.bf16.msra.mxu0 %v25089_v17 }
 0xe10   : > { %19262 = vmatprep.subr.bf16.mxu0 %v25103_v0 }
 0xe12   : > { %17387 = vmatmul.mubr.f32.gmra.mrb[46].mxu0 %v25482_v38 }
 0xe13   : > { %17389 = vmatprep.mubr.f32.mxu0 %v25507_v4  ;;  %19264 = vmatpush3.bf16.msra.mxu0 %v25103_v0 }
 0xe14   : > { %19266 = vmatprep.subr.bf16.mxu0 %v25246_v30 }
 0xe16   : > { %17390 = vmatmul.mubr.f32.gmra.mrb[48].mxu0 %v25503_v13 }
 0xe17   : > { %17392 = vmatprep.mubr.f32.mxu0 %v25528_v3  ;;  %19268 = vmatpush3.bf16.msra.mxu0 %v25246_v30  ;;  %v12905_v30 = vld [vmem:[%s27169_s19] ss:$0 sm:$0xff] }
 0xe18   : > { %19270 = vmatprep.subr.bf16.mxu0 %v27130_v7 }
 0xe1a   : > { %17393 = vmatmul.mubr.f32.gmra.mrb[50].mxu0 %v25524_v44 }
 0xe1b   : > { %17395 = vmatprep.mubr.f32.mxu0 %v25549_v11  ;;  %19272 = vmatpush3.bf16.msra.mxu0 %v27130_v7 }
 0xe1c   : > { %19274 = vmatprep.subr.bf16.mxu0 %v27131_v22 }
 0xe1e   : > { %17396 = vmatmul.mubr.f32.gmra.mrb[52].mxu0 %v25545_v14 }
 0xe1f   : > { %17398 = vmatprep.mubr.f32.mxu0 %v25571_v8  ;;  %19276 = vmatpush3.bf16.msra.mxu0 %v27131_v22 }
 0xe20   : > { %19278 = vmatprep.subr.bf16.mxu0 %v27132_v63 }
 0xe22   : > { %17399 = vmatmul.mubr.f32.gmra.mrb[54].mxu0 %v25567_v35 }
 0xe23   : > { %19280 = vmatpush3.bf16.msra.mxu0 %v27132_v63  ;;  %17433 = vmatprep.mubr.f32.mxu0 %v25423_v2 }
 0xe26   : > { %17434 = vmatmul.mubr.f32.vlgmr.msra.gmra.mrb[40].mxu0 %v25415_v53 }
 0xe27   : > { %17436 = vmatprep.mubr.f32.mxu0 %v25438_v21 }
 0xe2a   : > { %17437 = vmatmul.mubr.f32.gmra.mrb[42].mxu0 %v25434_v57 }
 0xe2b   : > { %17439 = vmatprep.mubr.f32.mxu0 %v25466_v40 }
 0xe2e   : > { %17440 = vmatmul.mubr.f32.gmra.mrb[44].mxu0 %v25459_v19 }
 0xe2f   : > { %17442 = vmatprep.mubr.f32.mxu0 %v25486_v50 }
 0xe32   : > { %17443 = vmatmul.mubr.f32.gmra.mrb[46].mxu0 %v25482_v38 }
 0xe33   : > { %17445 = vmatprep.mubr.f32.mxu0 %v25507_v4 }
 0xe36   : > { %17446 = vmatmul.mubr.f32.gmra.mrb[48].mxu0 %v25503_v13 }
 0xe37   : > { %17448 = vmatprep.mubr.f32.mxu0 %v25528_v3 }
 0xe3a   : > { %17449 = vmatmul.mubr.f32.gmra.mrb[50].mxu0 %v25524_v44 }
 0xe69   : > { %v17453_v0 = vpop.f32.mrb[40].mxu1 }
 0xe6a   : > { %v12346_v17 = vpop.f32.mrb[41].mxu1 }
 0xe6d   : > { %v17456_v55 = vpop.f32.mrb[42].mxu1 }
 0xe6e   : > { %v12358_v43 = vpop.f32.mrb[43].mxu1 }
 0xef1   : > { %v17397_v11 = vpop.f32.mrb[52].mxu0 }
 0xef2   : > { %v19341_v57 = vadd.f32 %v17397_v11, %v12905_v30  ;;  %v12169_v50 = vpop.f32.mrb[53].mxu0 }
 0xef3   : > { %v19343_v2 = vadd.f32 %v12905_v30, %v12169_v50 }
 0xef4   : > { %v19342_v53 = vadd.f32 %v19341_v57, %v17453_v0 }
 0xef5   : > { %v17400_v4 = vpop.f32.mrb[54].mxu0  ;;  %v19344_v21 = vadd.f32 %v19343_v2, %v12346_v17 }
 0xef6   : > { %v19345_v19 = vadd.f32 %v17400_v4, %v12905_v30  ;;  %12396 = vadd.xlane.f32.xlu0 %v19342_v53  ;;  %v12181_v40 = vpop.f32.mrb[55].mxu0 }
 0xef7   : > { %v19347_v38 = vadd.f32 %v12905_v30, %v12181_v40  ;;  %12394 = vadd.xlane.f32.xlu1 %v19344_v21 }
 0xef8   : > { %v25778_v13 = vadd.f32 %v19345_v19, %v17456_v55 }
 0xef9   : > { %v17435_v16 = vpop.f32.mrb[40].mxu0  ;;  %v25780_v44 = vadd.f32 %v19347_v38, %v12358_v43 }
 0xefa   : > { %v19329_v15 = vadd.f32 %v17435_v16, %v12905_v30  ;;  %v12274_v3 = vpop.f32.mrb[41].mxu0 }
 0xefb   : > { %v19330_v14 = vadd.f32 %v12905_v30, %v12274_v3 }
 0xefc   : > { %12372 = vadd.xlane.f32.xlu1 %v19329_v15 }
 0xefd   : > { %v17438_v37 = vpop.f32.mrb[42].mxu0  ;;  %12370 = vadd.xlane.f32.xlu0 %v19330_v14 }
 0xefe   : > { %v19331_v25 = vadd.f32 %v17438_v37, %v12905_v30  ;;  %v12286_v35 = vpop.f32.mrb[43].mxu0 }
 0xeff   : > { %v19332_v8 = vadd.f32 %v12905_v30, %v12286_v35 }
 0xf00   : > { %12376 = vadd.xlane.f32.xlu1 %v19331_v25 }
 0xf01   : > { %v17441_v23 = vpop.f32.mrb[44].mxu0  ;;  %12400 = vadd.xlane.f32.xlu0 %v25778_v13 }
 0xf02   : > { %v12298_v12 = vpop.f32.mrb[45].mxu0  ;;  %v19333_v56 = vadd.f32 %v17441_v23, %v12905_v30 }
 0xf03   : > { %v19334_v7 = vadd.f32 %v12905_v30, %v12298_v12 }
 0xf04   : > { %12374 = vadd.xlane.f32.xlu1 %v19332_v8 }
 0xf05   : > { %v17444_v52 = vpop.f32.mrb[46].mxu0 }
 0xf06   : > { %v12310_v49 = vpop.f32.mrb[47].mxu0  ;;  %v19335_v5 = vadd.f32 %v17444_v52, %v12905_v30 }
 0xf07   : > { %v19336_v18 = vadd.f32 %v12905_v30, %v12310_v49 }
 0xf08   : > { %12380 = vadd.xlane.f32.xlu1 %v19333_v56 }
 0xf09   : > { %v17447_v39 = vpop.f32.mrb[48].mxu0 }
 0xf0a   : > { %v12322_v22 = vpop.f32.mrb[49].mxu0  ;;  %v19337_v33 = vadd.f32 %v17447_v39, %v12905_v30 }
 0xf0b   : > { %v25783_v42 = vadd.f32 %v12905_v30, %v12322_v22 }
 0xf0c   : > { %12378 = vadd.xlane.f32.xlu1 %v19334_v7 }
 0xf0d   : > { %v17450_v63 = vpop.f32.mrb[50].mxu0 }
 0xf0e   : > { %v12334_v28 = vpop.f32.mrb[51].mxu0  ;;  %v25786_v48 = vadd.f32 %v17450_v63, %v12905_v30 }
 0xf0f   : > { %v25789_v46 = vadd.f32 %v12905_v30, %v12334_v28 }
 0xf10   : > { %12384 = vadd.xlane.f32.xlu1 %v19335_v5 }
 0xf14   : > { %12382 = vadd.xlane.f32.xlu1 %v19336_v18 }
 0xf18   : > { %12388 = vadd.xlane.f32.xlu1 %v19337_v33 }
 0xf1c   : > { %12386 = vadd.xlane.f32.xlu1 %v25783_v42 }
 0xf20   : > { %12392 = vadd.xlane.f32.xlu1 %v25786_v48 }
 0xf24   : > { %12390 = vadd.xlane.f32.xlu1 %v25789_v46 }
 0xf28   : > { %12398 = vadd.xlane.f32.xlu1 %v25780_v44 }
 0xf83   : > { %v12397_v1 = vpop.xlane.xlu0 %12396 }
 0xf84   : > { %v12415_v62 = vmul.f32 0.0078125, %v12397_v1  ;;  %v12395_v34 = vpop.xlane.xlu1 %12394 }
 0xf85   : > { %v12414_v47 = vmul.f32 0.0078125, %v12395_v34 }
 0xf86   : > { %v25793_v31 = vsub.f32 %v19342_v53, %v12415_v62 }
 0xf87   : > { %v25795_v29 = vsub.f32 %v19344_v21, %v12414_v47 }
 0xf88   : > { %v12447_v10 = vmul.f32 %v25793_v31, %v25793_v31 }
 0xf89   : > { %v12373_v6 = vpop.xlane.xlu1 %12372  ;;  %v12446_v20 = vmul.f32 %v25795_v29, %v25795_v29 }
 0xf8a   : > { %v12403_v36 = vmul.f32 0.0078125, %v12373_v6  ;;  %12476 = vadd.xlane.f32.xlu0 %v12447_v10  ;;  %v12371_v54 = vpop.xlane.xlu0 %12370 }
 0xf8b   : > { %v12402_v60 = vmul.f32 0.0078125, %v12371_v54  ;;  %12474 = vadd.xlane.f32.xlu1 %v12446_v20 }
 0xf8c   : > { %v25801_v58 = vsub.f32 %v19329_v15, %v12403_v36 }
 0xf8d   : > { %v25803_v51 = vsub.f32 %v19330_v14, %v12402_v60  ;;  %v12377_v26 = vpop.xlane.xlu1 %12376 }
 0xf8e   : > { %v12405_v24 = vmul.f32 0.0078125, %v12377_v26  ;;  %v12435_v41 = vmul.f32 %v25801_v58, %v25801_v58 }
 0xf8f   : > { %v12434_v45 = vmul.f32 %v25803_v51, %v25803_v51 }
 0xf90   : > { %v25809_v61 = vsub.f32 %v19331_v25, %v12405_v24  ;;  %12452 = vadd.xlane.f32.xlu0 %v12435_v41 }
 0xf91   : > { %v12375_v27 = vpop.xlane.xlu1 %12374  ;;  %12450 = vadd.xlane.f32.xlu1 %v12434_v45 }
 0xf92   : > { %v12404_v59 = vmul.f32 0.0078125, %v12375_v27  ;;  %v12437_v9 = vmul.f32 %v25809_v61, %v25809_v61 }
 0xf94   : > { %v25813_v32 = vsub.f32 %v19332_v8, %v12404_v59  ;;  %12456 = vadd.xlane.f32.xlu0 %v12437_v9  ;;  %v12401_v8 = vpop.xlane.xlu0 %12400 }
 0xf95   : > { %v12381_v0 = vpop.xlane.xlu1 %12380 }
 0xf96   : > { %v12407_v17 = vmul.f32 0.0078125, %v12381_v0  ;;  %v12436_v55 = vmul.f32 %v25813_v32, %v25813_v32 }
 0xf98   : > { %v25817_v43 = vsub.f32 %v19333_v56, %v12407_v17  ;;  %12454 = vadd.xlane.f32.xlu1 %v12436_v55  ;;  %v12417_v56 = vmul.f32 0.0078125, %v12401_v8 }
 0xf99   : > { %v12379_v30 = vpop.xlane.xlu1 %12378 }
 0xf9a   : > { %v12406_v11 = vmul.f32 0.0078125, %v12379_v30  ;;  %v12439_v57 = vmul.f32 %v25817_v43, %v25817_v43  ;;  %v25846_v63 = vsub.f32 %v25778_v13, %v12417_v56 }
 0xf9c   : > { %v25821_v50 = vsub.f32 %v19334_v7, %v12406_v11  ;;  %12460 = vadd.xlane.f32.xlu0 %v12439_v57  ;;  %v12449_v13 = vmul.f32 %v25846_v63, %v25846_v63 }
 0xf9d   : > { %v12385_v2 = vpop.xlane.xlu1 %12384 }
 0xf9e   : > { %v12409_v53 = vmul.f32 0.0078125, %v12385_v2  ;;  %v12438_v4 = vmul.f32 %v25821_v50, %v25821_v50 }
 0xfa0   : > { %v25825_v21 = vsub.f32 %v19335_v5, %v12409_v53  ;;  %12458 = vadd.xlane.f32.xlu1 %v12438_v4 }
 0xfa1   : > { %v12383_v19 = vpop.xlane.xlu1 %12382 }
 0xfa2   : > { %v12408_v40 = vmul.f32 0.0078125, %v12383_v19  ;;  %v12441_v38 = vmul.f32 %v25825_v21, %v25825_v21 }
 0xfa4   : > { %v25829_v16 = vsub.f32 %v19336_v18, %v12408_v40  ;;  %12464 = vadd.xlane.f32.xlu0 %v12441_v38 }
 0xfa5   : > { %v12389_v15 = vpop.xlane.xlu1 %12388 }
 0xfa6   : > { %v12411_v3 = vmul.f32 0.0078125, %v12389_v15  ;;  %v12440_v14 = vmul.f32 %v25829_v16, %v25829_v16 }
 0xfa8   : > { %v25833_v37 = vsub.f32 %v19337_v33, %v12411_v3  ;;  %12462 = vadd.xlane.f32.xlu1 %v12440_v14 }
 0xfa9   : > { %v12387_v25 = vpop.xlane.xlu1 %12386 }
 0xfaa   : > { %v12410_v35 = vmul.f32 0.0078125, %v12387_v25  ;;  %v12443_v23 = vmul.f32 %v25833_v37, %v25833_v37 }
 0xfac   : > { %v25838_v12 = vsub.f32 %v25783_v42, %v12410_v35  ;;  %12468 = vadd.xlane.f32.xlu0 %v12443_v23 }
 0xfad   : > { %v12393_v52 = vpop.xlane.xlu1 %12392 }
 0xfae   : > { %v12413_v49 = vmul.f32 0.0078125, %v12393_v52  ;;  %v12442_v39 = vmul.f32 %v25838_v12, %v25838_v12 }
 0xfb0   : > { %v25843_v7 = vsub.f32 %v25786_v48, %v12413_v49  ;;  %12466 = vadd.xlane.f32.xlu1 %v12442_v39 }
 0xfb1   : > { %v12391_v22 = vpop.xlane.xlu1 %12390 }
 0xfb2   : > { %v12412_v5 = vmul.f32 0.0078125, %v12391_v22  ;;  %v12445_v28 = vmul.f32 %v25843_v7, %v25843_v7 }
 0xfb4   : > { %v25851_v18 = vsub.f32 %v25789_v46, %v12412_v5  ;;  %12472 = vadd.xlane.f32.xlu0 %v12445_v28 }
 0xfb5   : > { %v12399_v33 = vpop.xlane.xlu1 %12398 }
 0xfb6   : > { %v12416_v42 = vmul.f32 0.0078125, %v12399_v33  ;;  %v12444_v48 = vmul.f32 %v25851_v18, %v25851_v18 }
 0xfb8   : > { %v25858_v1 = vsub.f32 %v25780_v44, %v12416_v42  ;;  %12470 = vadd.xlane.f32.xlu1 %v12444_v48  ;;  %12480 = vadd.xlane.f32.xlu0 %v12449_v13 }
 0xfba   : > { %v12448_v62 = vmul.f32 %v25858_v1, %v25858_v1 }
 0xfbc   : > { %12478 = vadd.xlane.f32.xlu1 %v12448_v62 }
 0xfbd   : > { %20408 = shalt.err (!%p20405_p4)
}
 0xfbe   : > { %s20409_s20 = scalar_lea.hbm %s25866_s8, 1024  ;;  %s20413_s19 = scalar_lea.hbm %s27171_s13, 4096 }
 0xfbf   : > { %p20410_p12 = scmp.ne.s32.totalorder %s25866_s8, %s20409_s20  ;;  %p20414_p11 = scmp.lt.u32.totalorder %s25866_s8, %s27171_s13 }
 0xfc0   : > { %p20415_p13 = scmp.lt.u32.totalorder %s20413_s19, %s20409_s20  ;;  %p20417_p6 = scmp.lt.u32.totalorder %s20409_s20, %s25866_s8 }
 0xfc1   : > { %p20411_p7 = pnand %p20410_p12, %p27172_p9 }
 0xfc2   : > { %p20416_p1 = por %p20415_p13, %p20414_p11 }
 0xfc3   : > { %p20412_p8 = pneg %p20411_p7 }
 0xfc4   : > { %p20418_p5 = por %p20417_p6, %p20416_p1 }
 0xfc6   : > { %p20419_p0 = pnand %p20418_p5, %p20412_p8 }
 0xfc8   : > { %20422 = shalt.err (!%p20419_p0)
}
 0xfc9   : > { %s20522_s25 = smov 128   ;;  %s20523_s27 = smov 8   ;;  %v20155_v25 = vld [vmem:[%s20969_s22 + $0x68] sm:$0xff]  ;;  %v20156_v8 = vld [vmem:[%s20969_s22 + $0x60] sm:$0xff] }
 0xfca   : > { %20002 = dma.vmem_to_hbm [thread:$0]  (%p27172_p9), %s25869_s21, 1024, %s25866_s8, %s12644_s1, %s20522_s25, %s20522_s25, %s20523_s27  }
 0xfcb   : > { %s27173_s1 = sld [smem:[#allocation154_spill]]  ;;  %s27174_s2 = sld [smem:[#allocation155_spill]]  ;;  %v20157_v13 = vld [vmem:[%s20969_s22 + $0x8] sm:$0xff] }
 0xfcc   : > { %s12890_s20 = sshll.u32 %s23337_s30, 7  ;;  %s12919_s18 = sshll.u32 %s20661_s4, 11 }
 0xfcd   : > { %s25919_s6 = scalar_lea.vmem [#allocation16], %s12890_s20  ;;  %s27175_s8 = sld [smem:[#allocation156_spill]] }
 0xfce   : > { %s12657_s19 = sshll.u32 %s25919_s6, 4  ;;  %s20524_s5 = smov [#allocation16]   ;;  %s25997_s19 = int_to_ptr.vmem [resolvable:$true] %s12657_s19 }
 0xfcf   : > { %s20423_s4 = scalar_lea.vmem %s25997_s19, 2048 }
 0xfd0   : > { %p20424_p10 = scmp.ne.s32.totalorder %s25997_s19, %s20423_s4 }
 0xfd1   : > { %v25901_v0 = vld [vmem:[%s27173_s1] ss:$0 sm:$0xff]  ;;  %s12639_s1 = scalar_lea.sflag [#allocation4], %s23337_s30 }
 0xfd2   : > { %v25907_v11 = vld [vmem:[%s27174_s2] ss:$0 sm:$0xff]  ;;  %p20425_p2 = pnand %p20424_p10, %p27172_p9 }
 0xfd3   : > { %s25995_s21 = scalar_lea.hbm %s27175_s8, %s12919_s18 }
 0xfd4   : > { %p20426_p3 = pneg %p20425_p2 }
0x1017   : > { %v12477_v44 = vpop.xlane.xlu0 %12476 }
0x1018   : > { %v12495_v46 = vmul.f32 0.0078125, %v12477_v44  ;;  %v12475_v34 = vpop.xlane.xlu1 %12474 }
0x1019   : > { %v12494_v47 = vmul.f32 0.0078125, %v12475_v34  ;;  %v20158_v34 = vld [vmem:[%s20969_s22] sm:$0xff] }
0x101a   : > { %v12511_v10 = vadd.f32 1e-05, %v12495_v46 }
0x101b   : > { %v12510_v6 = vadd.f32 1e-05, %v12494_v47 }
0x101c   : > { %20114 = vrsqrt.f32 %v12511_v10 }
0x101d   : > { %20116 = vrsqrt.f32 %v12510_v6  ;;  %v12453_v20 = vpop.xlane.xlu0 %12452 }
0x101e   : > { %v12483_v36 = vmul.f32 0.0078125, %v12453_v20  ;;  %v12451_v54 = vpop.xlane.xlu1 %12450 }
0x101f   : > { %v12482_v60 = vmul.f32 0.0078125, %v12451_v54  ;;  %v20159_v54 = vld [vmem:[%s20969_s22 + $0x18] sm:$0xff] }
0x1020   : > { %v12499_v26 = vadd.f32 1e-05, %v12483_v36 }
0x1021   : > { %v12498_v24 = vadd.f32 1e-05, %v12482_v60  ;;  %v12457_v41 = vpop.xlane.xlu0 %12456 }
0x1022   : > { %20118 = vrsqrt.f32 %v12499_v26  ;;  %v12485_v45 = vmul.f32 0.0078125, %v12457_v41 }
0x1023   : > { %20120 = vrsqrt.f32 %v12498_v24 }
0x1024   : > { %v12501_v27 = vadd.f32 1e-05, %v12485_v45 }
0x1025   : > { %v12455_v59 = vpop.xlane.xlu1 %12454 }
0x1026   : > { %v20115_v9 = vpop.eup %20114  ;;  %20122 = vrsqrt.f32 %v12501_v27  ;;  %v12484_v17 = vmul.f32 0.0078125, %v12455_v59 }
0x1027   : > { %v20117_v55 = vpop.eup %20116  ;;  %v12543_v30 = vmul.f32 %v20115_v9, %v25793_v31  ;;  %v20160_v9 = vld [vmem:[%s20969_s22 + $0x10] sm:$0xff] }
0x1028   : > { %v12542_v57 = vmul.f32 %v20117_v55, %v25795_v29  ;;  %v12500_v2 = vadd.f32 1e-05, %v12484_v17 }
0x1029   : > { %v12565_v53 = vmul.f32 %v25901_v0, %v12543_v30  ;;  %v12461_v4 = vpop.xlane.xlu0 %12460 }
0x102a   : > { %v12564_v19 = vmul.f32 %v25901_v0, %v12542_v57  ;;  %20124 = vrsqrt.f32 %v12500_v2  ;;  %v12487_v40 = vmul.f32 0.0078125, %v12461_v4 }
0x102b   : > { %v12587_v38 = vadd.f32 %v25907_v11, %v12565_v53 }
0x102c   : > { %v20119_v31 = vpop.eup %20118  ;;  %v12586_v15 = vadd.f32 %v25907_v11, %v12564_v19  ;;  %v12503_v3 = vadd.f32 1e-05, %v12487_v40 }
0x102d   : > { %v20121_v14 = vpop.eup %20120  ;;  %v12603_v35 = vadd.f32 %v20155_v25, %v12587_v38  ;;  %v12531_v29 = vmul.f32 %v20119_v31, %v25801_v58  ;;  %v12459_v23 = vpop.xlane.xlu1 %12458 }
0x102e   : > { %v12602_v52 = vadd.f32 %v20156_v8, %v12586_v15  ;;  %v12530_v56 = vmul.f32 %v20121_v14, %v25803_v51  ;;  %20126 = vrsqrt.f32 %v12503_v3  ;;  %v12486_v49 = vmul.f32 0.0078125, %v12459_v23 }
0x102f   : > { %12619 = vst [vmem:[%s25919_s6 + $0x68] sm:$0xff] %v12603_v35  ;;  %v12553_v39 = vmul.f32 %v25901_v0, %v12531_v29 }
0x1030   : > { %v20123_v22 = vpop.eup %20122  ;;  %12618 = vst [vmem:[%s25919_s6 + $0x60] sm:$0xff] %v12602_v52  ;;  %v12552_v58 = vmul.f32 %v25901_v0, %v12530_v56  ;;  %v12502_v5 = vadd.f32 1e-05, %v12486_v49 }
0x1031   : > { %v12575_v28 = vadd.f32 %v25907_v11, %v12553_v39  ;;  %v12533_v51 = vmul.f32 %v20123_v22, %v25809_v61  ;;  %v12465_v33 = vpop.xlane.xlu0 %12464 }
0x1032   : > { %v12574_v42 = vadd.f32 %v25907_v11, %v12552_v58  ;;  %20128 = vrsqrt.f32 %v12502_v5  ;;  %v12489_v48 = vmul.f32 0.0078125, %v12465_v33  ;;  %v20163_v5 = vld [vmem:[%s20969_s22 + $0x38] sm:$0xff] }
0x1033   : > { %v12591_v62 = vadd.f32 %v20157_v13, %v12575_v28  ;;  %v12555_v44 = vmul.f32 %v25901_v0, %v12533_v51 }
0x1034   : > { %v20125_v46 = vpop.eup %20124  ;;  %v12590_v47 = vadd.f32 %v20158_v34, %v12574_v42  ;;  %v12505_v10 = vadd.f32 1e-05, %v12489_v48 }
0x1035   : > { %12607 = vst [vmem:[%s25919_s6 + $0x8] sm:$0xff] %v12591_v62  ;;  %v12577_v6 = vadd.f32 %v25907_v11, %v12555_v44  ;;  %v12532_v61 = vmul.f32 %v20125_v46, %v25813_v32  ;;  %v12463_v20 = vpop.xlane.xlu1 %12462  ;;  %v20164_v46 = vld [vmem:[%s20969_s22 + $0x30] sm:$0xff] }
0x1036   : > { %12606 = vst [vmem:[%s25919_s6] sm:$0xff] %v12590_v47  ;;  %20130 = vrsqrt.f32 %v12505_v10  ;;  %v12488_v36 = vmul.f32 0.0078125, %v12463_v20 }
0x1037   : > { %v12593_v60 = vadd.f32 %v20159_v54, %v12577_v6  ;;  %v12554_v26 = vmul.f32 %v25901_v0, %v12532_v61 }
0x1038   : > { %v20127_v24 = vpop.eup %20126  ;;  %v12504_v41 = vadd.f32 1e-05, %v12488_v36 }
0x1039   : > { %12609 = vst [vmem:[%s25919_s6 + $0x18] sm:$0xff] %v12593_v60  ;;  %v12576_v45 = vadd.f32 %v25907_v11, %v12554_v26  ;;  %v12535_v27 = vmul.f32 %v20127_v24, %v25817_v43  ;;  %v12469_v59 = vpop.xlane.xlu0 %12468  ;;  %v20161_v43 = vld [vmem:[%s20969_s22 + $0x28] sm:$0xff] }
0x103a   : > { %20132 = vrsqrt.f32 %v12504_v41  ;;  %v12491_v32 = vmul.f32 0.0078125, %v12469_v59  ;;  %v20166_v41 = vld [vmem:[%s20969_s22 + $0x40] sm:$0xff] }
0x103b   : > { %v12592_v17 = vadd.f32 %v20160_v9, %v12576_v45  ;;  %v12557_v55 = vmul.f32 %v25901_v0, %v12535_v27 }
0x103c   : > { %v20129_v30 = vpop.eup %20128  ;;  %v12507_v57 = vadd.f32 1e-05, %v12491_v32 }
0x103d   : > { %12608 = vst [vmem:[%s25919_s6 + $0x10] sm:$0xff] %v12592_v17  ;;  %v12579_v2 = vadd.f32 %v25907_v11, %v12557_v55  ;;  %v12534_v53 = vmul.f32 %v20129_v30, %v25821_v50  ;;  %v12467_v4 = vpop.xlane.xlu1 %12466  ;;  %v20162_v50 = vld [vmem:[%s20969_s22 + $0x20] sm:$0xff]  ;;  %v20167_v55 = vld [vmem:[%s20969_s22 + $0x58] sm:$0xff] }
0x103e   : > { %20134 = vrsqrt.f32 %v12507_v57  ;;  %v12490_v19 = vmul.f32 0.0078125, %v12467_v4 }
0x103f   : > { %v12595_v40 = vadd.f32 %v20161_v43, %v12579_v2  ;;  %v12556_v38 = vmul.f32 %v25901_v0, %v12534_v53 }
0x1040   : > { %v20131_v31 = vpop.eup %20130  ;;  %v12506_v15 = vadd.f32 1e-05, %v12490_v19 }
0x1041   : > { %12611 = vst [vmem:[%s25919_s6 + $0x28] sm:$0xff] %v12595_v40  ;;  %v12578_v3 = vadd.f32 %v25907_v11, %v12556_v38  ;;  %v12537_v14 = vmul.f32 %v20131_v31, %v25825_v21  ;;  %v12473_v25 = vpop.xlane.xlu0 %12472  ;;  %v20169_v40 = vld [vmem:[%s20969_s22 + $0x78] sm:$0xff] }
0x1042   : > { %20136 = vrsqrt.f32 %v12506_v15  ;;  %v12493_v35 = vmul.f32 0.0078125, %v12473_v25  ;;  %v20170_v15 = vld [vmem:[%s20969_s22 + $0x70] sm:$0xff] }
0x1043   : > { %v12594_v29 = vadd.f32 %v20162_v50, %v12578_v3  ;;  %v12559_v23 = vmul.f32 %v25901_v0, %v12537_v14 }
0x1044   : > { %v20133_v8 = vpop.eup %20132  ;;  %v12509_v52 = vadd.f32 1e-05, %v12493_v35 }
0x1045   : > { %12610 = vst [vmem:[%s25919_s6 + $0x20] sm:$0xff] %v12594_v29  ;;  %v12581_v56 = vadd.f32 %v25907_v11, %v12559_v23  ;;  %v12536_v49 = vmul.f32 %v20133_v8, %v25829_v16  ;;  %v12471_v39 = vpop.xlane.xlu1 %12470  ;;  %v12481_v22 = vpop.xlane.xlu0 %12480 }
0x1046   : > { %20138 = vrsqrt.f32 %v12509_v52  ;;  %v12492_v21 = vmul.f32 0.0078125, %v12471_v39  ;;  %v12497_v58 = vmul.f32 0.0078125, %v12481_v22 }
0x1047   : > { %v12597_v28 = vadd.f32 %v20163_v5, %v12581_v56  ;;  %v12558_v51 = vmul.f32 %v25901_v0, %v12536_v49 }
0x1048   : > { %v20135_v33 = vpop.eup %20134  ;;  %v12508_v42 = vadd.f32 1e-05, %v12492_v21  ;;  %v12513_v48 = vadd.f32 1e-05, %v12497_v58 }
0x1049   : > { %12613 = vst [vmem:[%s25919_s6 + $0x38] sm:$0xff] %v12597_v28  ;;  %v12580_v13 = vadd.f32 %v25907_v11, %v12558_v51  ;;  %v12539_v16 = vmul.f32 %v20135_v33, %v25833_v37  ;;  %v12479_v62 = vpop.xlane.xlu1 %12478  ;;  %v20165_v37 = vld [vmem:[%s20969_s22 + $0x48] sm:$0xff] }
0x104a   : > { %20140 = vrsqrt.f32 %v12508_v42  ;;  %v12496_v44 = vmul.f32 0.0078125, %v12479_v62 }
0x104b   : > { %v12596_v34 = vadd.f32 %v20164_v46, %v12580_v13  ;;  %v12561_v47 = vmul.f32 %v25901_v0, %v12539_v16  ;;  %20142 = vrsqrt.f32 %v12513_v48 }
0x104c   : > { %v20137_v10 = vpop.eup %20136  ;;  %v12512_v6 = vadd.f32 1e-05, %v12496_v44 }
0x104d   : > { %12612 = vst [vmem:[%s25919_s6 + $0x30] sm:$0xff] %v12596_v34  ;;  %v12583_v61 = vadd.f32 %v25907_v11, %v12561_v47  ;;  %v12538_v20 = vmul.f32 %v20137_v10, %v25838_v12 }
0x104e   : > { %20144 = vrsqrt.f32 %v12512_v6 }
0x104f   : > { %v12599_v36 = vadd.f32 %v20165_v37, %v12583_v61  ;;  %v12560_v54 = vmul.f32 %v25901_v0, %v12538_v20 }
0x1050   : > { %v20139_v60 = vpop.eup %20138 }
0x1051   : > { %12615 = vst [vmem:[%s25919_s6 + $0x48] sm:$0xff] %v12599_v36  ;;  %v12582_v26 = vadd.f32 %v25907_v11, %v12560_v54  ;;  %v12541_v24 = vmul.f32 %v20139_v60, %v25843_v7 }
0x1053   : > { %v12598_v45 = vadd.f32 %v20166_v41, %v12582_v26  ;;  %v12563_v27 = vmul.f32 %v25901_v0, %v12541_v24 }
0x1054   : > { %v20141_v59 = vpop.eup %20140 }
0x1055   : > { %v20143_v12 = vpop.eup %20142  ;;  %12614 = vst [vmem:[%s25919_s6 + $0x40] sm:$0xff] %v12598_v45  ;;  %v12585_v32 = vadd.f32 %v25907_v11, %v12563_v27  ;;  %v12540_v9 = vmul.f32 %v20141_v59, %v25851_v18 }
0x1056   : > { %v12545_v17 = vmul.f32 %v20143_v12, %v25846_v63  ;;  %v20168_v63 = vld [vmem:[%s20969_s22 + $0x50] sm:$0xff]  ;;  %s20427_s22 = sshll.u32 %s20524_s5, 4  ;;  %s20428_s22 = int_to_ptr.vmem [resolvable:$false] %s20427_s22 }
0x1057   : > { %v12601_v7 = vadd.f32 %v20167_v55, %v12585_v32  ;;  %v12562_v30 = vmul.f32 %v25901_v0, %v12540_v9  ;;  %s20429_s29 = scalar_lea.vmem %s20428_s22, 4096  ;;  %p20430_p4 = scmp.lt.s32.totalorder %s25997_s19, %s20428_s22 }
0x1058   : > { %v20145_v57 = vpop.eup %20144  ;;  %v12567_v2 = vmul.f32 %v25901_v0, %v12545_v17  ;;  %p20431_p12 = scmp.lt.s32.totalorder %s20429_s29, %s20423_s4 }
0x1059   : > { %12617 = vst [vmem:[%s25919_s6 + $0x58] sm:$0xff] %v12601_v7  ;;  %v12584_v53 = vadd.f32 %v25907_v11, %v12562_v30  ;;  %v12544_v4 = vmul.f32 %v20145_v57, %v25858_v1 }
0x105a   : > { %v12589_v18 = vadd.f32 %v25907_v11, %v12567_v2  ;;  %p20432_p7 = por %p20431_p12, %p20430_p4 }
0x105b   : > { %v12600_v19 = vadd.f32 %v20168_v63, %v12584_v53  ;;  %v12566_v43 = vmul.f32 %v25901_v0, %v12544_v4 }
0x105c   : > { %v12605_v38 = vadd.f32 %v20169_v40, %v12589_v18  ;;  %p20433_p8 = pnand %p20432_p7, %p20426_p3 }
0x105d   : > { %12616 = vst [vmem:[%s25919_s6 + $0x50] sm:$0xff] %v12600_v19  ;;  %v12588_v31 = vadd.f32 %v25907_v11, %v12566_v43 }
0x105e   : > { %12621 = vst [vmem:[%s25919_s6 + $0x78] sm:$0xff] %v12605_v38 }
0x105f   : > { %v12604_v3 = vadd.f32 %v20170_v15, %v12588_v31 }
0x1061   : > { %12620 = vst [vmem:[%s25919_s6 + $0x70] sm:$0xff] %v12604_v3 }
0x1062   : > { %20436 = shalt.err (!%p20433_p8)
}
0x1063   : > { %s20437_s2 = scalar_lea.hbm %s25995_s21, 2048  ;;  %s20441_s18 = scalar_lea.hbm %s27175_s8, 8192 }
0x1064   : > { %p20438_p11 = scmp.ne.s32.totalorder %s25995_s21, %s20437_s2  ;;  %p20442_p6 = scmp.lt.u32.totalorder %s25995_s21, %s27175_s8 }
0x1065   : > { %p20443_p5 = scmp.lt.u32.totalorder %s20441_s18, %s20437_s2  ;;  %p20445_p10 = scmp.lt.u32.totalorder %s20437_s2, %s25995_s21 }
0x1066   : > { %p20439_p13 = pnand %p20438_p11, %p27172_p9 }
0x1067   : > { %p20444_p0 = por %p20443_p5, %p20442_p6 }
0x1068   : > { %p20440_p1 = pneg %p20439_p13 }
0x1069   : > { %p20446_p2 = por %p20445_p10, %p20444_p0 }
0x106b   : > { %p20447_p3 = pnand %p20446_p2, %p20440_p1 }
0x106d   : > { %20450 = shalt.err (!%p20447_p3)
}
0x106e   : > { %20001 = dma.vmem_to_hbm [thread:$0]  (%p27172_p9), %s25997_s19, 2048, %s25995_s21, %s12639_s1, %s20522_s25, %s20522_s25, %s20523_s27  }
0x106f PF: > { %s27176_s4 = sld [smem:[#allocation28_spill]]  ;;  %s27177_s5 = sld [smem:[#allocation26_spill]] }
0x1070   : > { %s27178_s22 = sld [smem:[#allocation32_spill]] }
0x1075   : > { %p20053_p4 = scmp.ge.s32.totalorder %s27176_s4, 2  ;;  %s12688_s29 = sand.u32 1, %s27177_s5  }
0x1076   : > { %p27179_p12 = scmp.ne.s32.totalorder %s27178_s22, 0  ;;  %s12689_s2 = scalar_lea.sflag [#allocation4], %s12688_s29 }
0x1078   : > { %p20031_p7 = pnand %p20053_p4, %p27179_p12 }
0x107a   : > { %20488 = dma.done.wait (!%p20031_p7), %s12689_s2, 2048  }
0x107b   : > { %20490 = vsyncadd (!%p20031_p7), %s12689_s2, 4294965248  ;;  %s12698_s26 = scalar_lea.sflag [#allocation18], %s12688_s29 }
0x107c   : > { %20492 = dma.done.wait (!%p20031_p7), %s12698_s26, 1024  }
0x107d   : > { %20494 = vsyncadd (!%p20031_p7), %s12698_s26, 4294966272  ;;  %s27180_s30 = sld [smem:[#allocation29_spill]]  ;;  %s27181_s20 = sld [smem:[#allocation27_spill]] }
0x107e   : > { %s27182_s29 = sld [smem:[#allocation30_spill]]  ;;  %s27183_s3 = smov %s20501_s28 }
0x1083   : > { %p41_p9 = scmp.ge.s32.totalorder %s27180_s30, 6   ;;  %s27184_s28 = smov %s27181_s20 }
0x1085   :  { %43 = sbr.rel (!%p41_p9) target bundleno = 25 (0x19), region = 195 }
0x108c   :  { %12703 = vsyncpa [#allocation3], 1 }
0x108d   :  { %12705 = vsyncpa [#allocation3 + $0x1], 1 }
0x108e   :  { %12706 = vsyncpa [#allocation6], 1 }
0x108f   :  { %12707 = vsyncpa [#allocation9], 1 }
0x1090   :  { %12708 = vsyncpa [#allocation12], 1 }
0x1091   :  { %12709 = vsyncpa [#allocation15], 1 }
0x1092   :  { %12710 = vsyncpa [#allocation4], 1 }
0x1093   :  { %12712 = vsyncpa [#allocation4 + $0x1], 1 }
0x1094   :  { %12713 = vsyncpa [#allocation18], 1 }
0x1095   :  { %12715 = vsyncpa [#allocation18 + $0x1], 1 }

</bundles_post_ra>
